<compile_context>
chip_gen: v6e
topology: v6e:2x2x1
jax: 0.10.0
libtpu: 0.0.40
codegen_flags: <defaults>
</compile_context>

<pallas_src>
import numpy as np
import jax
import jax.numpy as jnp
from jax import lax
from jax.experimental import pallas as pl
from jax.experimental.pallas import tpu as pltpu

B = 2                  # batch
H_IN = 28              # 28 -> conv 26 -> pool 13 -> conv 11 -> conv 9 -> pool 4
LATENT = 512

ROW = 28               # canvas row stride (lanes between vertically adjacent pixels)
CANVAS = ROW * H_IN    # 784 lanes per image; constant through the whole trunk
N_ACT = B * CANVAS     # 1568 active lanes (both batch images side by side)
W_BUF = 1792           # buffer lane width >= N_ACT + max tap shift (116); 14*128
TAIL = W_BUF - N_ACT   # 224 pad lanes per slab (zeroed at kernel entry)


def _encoder_kernel(x_ref, w1_ref, b1_ref, w2_ref, b2_ref, w3_ref, b3_ref,
                    wfc_ref, bfc_ref, wsc_ref, bsc_ref,
                    out_ref,
                    c1_ref, m1_ref, c2_ref, c3_ref, m2_ref):
    """Activations are (C, lane-canvas) slabs; valid pixel (b,h,w) of a layer with
    dilation d sits at lane b*784 + d*(28*h + w)."""

    # --- zero the never-written tail lanes of every slab (robustness; ~free) ---
    for ref in (c1_ref, m1_ref, c2_ref, c3_ref, m2_ref):
        ref[:, pl.ds(N_ACT, TAIL)] = jnp.zeros((ref.shape[0], TAIL), jnp.float32)

    def conv_taps(src_ref, w_ref, b_ref, dil, cin):
        # 9 shifted whole-slab slices, one matmul (or broadcast-mul) each.
        acc = None
        for ky in range(3):
            for kx in range(3):
                s = dil * (ky * ROW + kx)
                xs = src_ref[:, pl.ds(s, N_ACT)]                  # (Cin, N_ACT)
                if cin == 1:
                    term = w_ref[ky, kx] * xs                     # (Cout,1)*(1,N)
                else:
                    term = jnp.dot(w_ref[ky, kx], xs,             # (Cout,Cin)@(Cin,N)
                                   preferred_element_type=jnp.float32)
                acc = term if acc is None else acc + term
        return jnp.maximum(acc + b_ref[...], 0.0)

    def pool_taps(src_ref, dil):
        # 2x2 max pool = elementwise max of 4 shifted whole-slab slices.
        m = None
        for dy in (0, 1):
            for dx in (0, 1):
                s = dil * (dy * ROW + dx)
                v = src_ref[:, pl.ds(s, N_ACT)]
                m = v if m is None else jnp.maximum(m, v)
        return m

    # --- features (each layer: one wide store) ---
    c1_ref[:, pl.ds(0, N_ACT)] = conv_taps(x_ref, w1_ref, b1_ref, dil=1, cin=1)    # 1->6
    m1_ref[:, pl.ds(0, N_ACT)] = pool_taps(c1_ref, dil=1)                          # pool1
    c2_ref[:, pl.ds(0, N_ACT)] = conv_taps(m1_ref, w2_ref, b2_ref, dil=2, cin=6)   # 6->16
    c3_ref[:, pl.ds(0, N_ACT)] = conv_taps(c2_ref, w3_ref, b3_ref, dil=2, cin=16)  # 16->16
    m2_ref[:, pl.ds(0, N_ACT)] = pool_taps(c3_ref, dil=2)                          # pool2

    # --- flatten: valid pooled pixel (b, h, w) lives at lane b*784 + 4*(28*h + w) ---
    # Feature order produced here is (h*4+w)*16 + c; the wrapper permutes Wfc to match.
    cols = []
    for b in range(B):
        chunks = [m2_ref[:, pl.ds(b * CANVAS + 4 * (h * ROW + w), 1)]   # (16, 1)
                  for h in range(4) for w in range(4)]
        cols.append(jnp.concatenate(chunks, axis=0))                    # (256, 1)
    feat_t = jnp.concatenate(cols, axis=1)                              # (256, B)
    feat_t = jnp.concatenate(
        [feat_t, jnp.zeros((256, 128 - B), jnp.float32)], axis=1)       # (256, 128)
    feat = jnp.transpose(feat_t)[:B, :]                                 # (B, 256) lane-dense

    # --- fc -> relu -> fc_pt_sc, lane-dense outputs (B,256) / (B,512) ---
    y = jnp.maximum(
        jnp.dot(feat, wfc_ref[...], preferred_element_type=jnp.float32) + bfc_ref[...],
        0.0)
    out_ref[...] = (jnp.dot(y, wsc_ref[...], preferred_element_type=jnp.float32)
                    + bsc_ref[...])


def simple_encoder_forward(x_nchw, params):
    (W1, b1, W2, b2, W3, b3, Wfc, bfc, Wsc, bsc) = params

    # input -> (1, B*784) wide canvas, zero-padded to W_BUF lanes
    x = x_nchw.astype(jnp.float32).reshape(B, CANVAS).reshape(1, N_ACT)
    x = jnp.pad(x, ((0, 0), (0, W_BUF - N_ACT)))

    # conv weights (Cout, Cin, 3, 3) -> (ky, kx, Cout, Cin)
    w1k = jnp.transpose(W1, (2, 3, 0, 1))
    w2k = jnp.transpose(W2, (2, 3, 0, 1))
    w3k = jnp.transpose(W3, (2, 3, 0, 1))
    # fc weight: torch flatten index = c*16 + h*4 + w ; kernel order = (h*4+w)*16 + c
    wfck = jnp.transpose(Wfc.reshape(256, 16, 4, 4), (2, 3, 1, 0)).reshape(256, 256)
    wsck = Wsc.T                                                        # (256, 512)

    args = (x, w1k, b1.reshape(6, 1), w2k, b2.reshape(16, 1),
            w3k, b3.reshape(16, 1), wfck, bfc.reshape(1, 256),
            wsck, bsc.reshape(1, LATENT))

    def full_spec(a):
        nd = a.ndim
        return pl.BlockSpec(a.shape, lambda i, _nd=nd: (0,) * _nd)

    out = pl.pallas_call(
        _encoder_kernel,
        grid=(1,),
        in_specs=[full_spec(a) for a in args],
        out_specs=pl.BlockSpec((B, LATENT), lambda i: (0, 0)),
        out_shape=jax.ShapeDtypeStruct((B, LATENT), jnp.float32),
        scratch_shapes=[
            pltpu.VMEM((6, W_BUF), jnp.float32),     # conv1+relu
            pltpu.VMEM((6, W_BUF), jnp.float32),     # pool1 (un-compacted)
            pltpu.VMEM((16, W_BUF), jnp.float32),    # conv2+relu
            pltpu.VMEM((16, W_BUF), jnp.float32),    # conv3+relu
            pltpu.VMEM((16, W_BUF), jnp.float32),    # pool2 (un-compacted)
        ],
        compiler_params=pltpu.CompilerParams(dimension_semantics=("arbitrary",)),
    )(*args)
    return out                                                          # (B, 512)


def reference_forward(x_nchw, params):
    (W1, b1, W2, b2, W3, b3, Wfc, bfc, Wsc, bsc) = params

    def conv(x, w, b):
        y = lax.conv_general_dilated(x, w, window_strides=(1, 1), padding="VALID",
                                     dimension_numbers=("NCHW", "OIHW", "NCHW"))
        return jax.nn.relu(y + b[None, :, None, None])

    def pool(x):
        return lax.reduce_window(x, -jnp.inf, lax.max,
                                 (1, 1, 2, 2), (1, 1, 2, 2), "VALID")

    h = pool(conv(x_nchw, W1, b1))
    h = conv(h, W2, b2)
    h = pool(conv(h, W3, b3))
    feat = h.reshape(h.shape[0], -1)                 # torch C-major flatten
    y = jax.nn.relu(feat @ Wfc.T + bfc)
    return y @ Wsc.T + bsc


def make_params(key):
    ks = jax.random.split(key, 10)

    def init(k, shape, fan_in):
        return jax.random.normal(k, shape, jnp.float32) / jnp.sqrt(fan_in)

    W1 = init(ks[0], (6, 1, 3, 3), 9.0);      b1 = init(ks[1], (6,), 9.0)
    W2 = init(ks[2], (16, 6, 3, 3), 54.0);    b2 = init(ks[3], (16,), 54.0)
    W3 = init(ks[4], (16, 16, 3, 3), 144.0);  b3 = init(ks[5], (16,), 144.0)
    Wfc = init(ks[6], (256, 256), 256.0);     bfc = init(ks[7], (256,), 256.0)
    Wsc = init(ks[8], (LATENT, 256), 256.0);  bsc = init(ks[9], (LATENT,), 256.0)
    return (W1, b1, W2, b2, W3, b3, Wfc, bfc, Wsc, bsc)


if __name__ == "__main__":
    root = jax.random.PRNGKey(0)
    pkey, xkey = jax.random.split(root)
    params = make_params(pkey)
    x = jax.random.normal(xkey, (B, 1, H_IN, H_IN), jnp.float32)   # NCHW, like torch

    out = jax.block_until_ready(jax.jit(simple_encoder_forward)(x, params))
    assert out.shape == (B, LATENT), out.shape

    ref = jax.block_until_ready(jax.jit(reference_forward)(x, params))
    if not np.allclose(np.asarray(out), np.asarray(ref), rtol=5e-2, atol=5e-2):
        diff = float(np.max(np.abs(np.asarray(out) - np.asarray(ref))))
        raise AssertionError(f"Pallas kernel mismatch vs reference, max|diff|={diff}")

    print("KERNEL_OK")
</pallas_src>

<mosaic_0001>
module attributes {stable_mosaic.version = 11 : i64} {
  func.func @_encoder_kernel(%arg0: i32, %arg1: memref<1x1792xf32, #tpu.memory_space<vmem>>, %arg2: memref<3x3x6x1xf32, #tpu.memory_space<vmem>>, %arg3: memref<6x1xf32, #tpu.memory_space<vmem>>, %arg4: memref<3x3x16x6xf32, #tpu.memory_space<vmem>>, %arg5: memref<16x1xf32, #tpu.memory_space<vmem>>, %arg6: memref<3x3x16x16xf32, #tpu.memory_space<vmem>>, %arg7: memref<16x1xf32, #tpu.memory_space<vmem>>, %arg8: memref<256x256xf32, #tpu.memory_space<vmem>>, %arg9: memref<1x256xf32, #tpu.memory_space<vmem>>, %arg10: memref<256x512xf32, #tpu.memory_space<vmem>>, %arg11: memref<1x512xf32, #tpu.memory_space<vmem>>, %arg12: memref<2x512xf32, #tpu.memory_space<vmem>>, %arg13: memref<6x1792xf32, #tpu.memory_space<vmem>>, %arg14: memref<6x1792xf32, #tpu.memory_space<vmem>>, %arg15: memref<16x1792xf32, #tpu.memory_space<vmem>>, %arg16: memref<16x1792xf32, #tpu.memory_space<vmem>>, %arg17: memref<16x1792xf32, #tpu.memory_space<vmem>>) attributes {dimension_semantics = [#tpu.dimension_semantics<arbitrary>], iteration_bounds = array<i64: 1>, scalar_prefetch = 0 : i64, scratch_operands = 5 : i64, tpu.core_type = #tpu.core_type<tc>, window_params = [{pipeline_mode = #tpu.pipeline_mode<synchronous>, transform_indices = @transform_0, window_bounds = array<i64: 1, 1792>}, {pipeline_mode = #tpu.pipeline_mode<synchronous>, transform_indices = @transform_1, window_bounds = array<i64: 3, 3, 6, 1>}, {pipeline_mode = #tpu.pipeline_mode<synchronous>, transform_indices = @transform_2, window_bounds = array<i64: 6, 1>}, {pipeline_mode = #tpu.pipeline_mode<synchronous>, transform_indices = @transform_3, window_bounds = array<i64: 3, 3, 16, 6>}, {pipeline_mode = #tpu.pipeline_mode<synchronous>, transform_indices = @transform_4, window_bounds = array<i64: 16, 1>}, {pipeline_mode = #tpu.pipeline_mode<synchronous>, transform_indices = @transform_5, window_bounds = array<i64: 3, 3, 16, 16>}, {pipeline_mode = #tpu.pipeline_mode<synchronous>, transform_indices = @transform_6, window_bounds = array<i64: 16, 1>}, {pipeline_mode = #tpu.pipeline_mode<synchronous>, transform_indices = @transform_7, window_bounds = array<i64: 256, 256>}, {pipeline_mode = #tpu.pipeline_mode<synchronous>, transform_indices = @transform_8, window_bounds = array<i64: 1, 256>}, {pipeline_mode = #tpu.pipeline_mode<synchronous>, transform_indices = @transform_9, window_bounds = array<i64: 256, 512>}, {pipeline_mode = #tpu.pipeline_mode<synchronous>, transform_indices = @transform_10, window_bounds = array<i64: 1, 512>}, {pipeline_mode = #tpu.pipeline_mode<synchronous>, transform_indices = @transform_11, window_bounds = array<i64: 2, 512>}]} {
    %cst = arith.constant 0.000000e+00 : f32
    %0 = vector.broadcast %cst : f32 to vector<6x224xf32>
    %c0 = arith.constant 0 : index
    %c1568 = arith.constant 1568 : index
    %1 = vector.load %arg13[%c0, %c1568] : memref<6x1792xf32, #tpu.memory_space<vmem>>, vector<6x224xf32>
    tpu.vector_store %arg13[%c0, %c1568], %0 {strides = array<i32>} : memref<6x1792xf32, #tpu.memory_space<vmem>>, vector<6x224xf32>,
    %cst_0 = arith.constant 0.000000e+00 : f32
    %2 = vector.broadcast %cst_0 : f32 to vector<6x224xf32>
    %c0_1 = arith.constant 0 : index
    %c1568_2 = arith.constant 1568 : index
    %3 = vector.load %arg14[%c0_1, %c1568_2] : memref<6x1792xf32, #tpu.memory_space<vmem>>, vector<6x224xf32>
    tpu.vector_store %arg14[%c0_1, %c1568_2], %2 {strides = array<i32>} : memref<6x1792xf32, #tpu.memory_space<vmem>>, vector<6x224xf32>,
    %cst_3 = arith.constant 0.000000e+00 : f32
    %4 = vector.broadcast %cst_3 : f32 to vector<16x224xf32>
    %c0_4 = arith.constant 0 : index
    %c1568_5 = arith.constant 1568 : index
    %5 = vector.load %arg15[%c0_4, %c1568_5] : memref<16x1792xf32, #tpu.memory_space<vmem>>, vector<16x224xf32>
    tpu.vector_store %arg15[%c0_4, %c1568_5], %4 {strides = array<i32>} : memref<16x1792xf32, #tpu.memory_space<vmem>>, vector<16x224xf32>,
    %cst_6 = arith.constant 0.000000e+00 : f32
    %6 = vector.broadcast %cst_6 : f32 to vector<16x224xf32>
    %c0_7 = arith.constant 0 : index
    %c1568_8 = arith.constant 1568 : index
    %7 = vector.load %arg16[%c0_7, %c1568_8] : memref<16x1792xf32, #tpu.memory_space<vmem>>, vector<16x224xf32>
    tpu.vector_store %arg16[%c0_7, %c1568_8], %6 {strides = array<i32>} : memref<16x1792xf32, #tpu.memory_space<vmem>>, vector<16x224xf32>,
    %cst_9 = arith.constant 0.000000e+00 : f32
    %8 = vector.broadcast %cst_9 : f32 to vector<16x224xf32>
    %c0_10 = arith.constant 0 : index
    %c1568_11 = arith.constant 1568 : index
    %9 = vector.load %arg17[%c0_10, %c1568_11] : memref<16x1792xf32, #tpu.memory_space<vmem>>, vector<16x224xf32>
    tpu.vector_store %arg17[%c0_10, %c1568_11], %8 {strides = array<i32>} : memref<16x1792xf32, #tpu.memory_space<vmem>>, vector<16x224xf32>,
    %c0_12 = arith.constant 0 : index
    %c0_13 = arith.constant 0 : index
    %10 = vector.load %arg1[%c0_12, %c0_13] : memref<1x1792xf32, #tpu.memory_space<vmem>>, vector<1x1568xf32>
    %c0_14 = arith.constant 0 : index
    %c0_15 = arith.constant 0 : index
    %c0_16 = arith.constant 0 : index
    %c0_17 = arith.constant 0 : index
    %11 = vector.load %arg2[%c0_14, %c0_15, %c0_16, %c0_17] : memref<3x3x6x1xf32, #tpu.memory_space<vmem>>, vector<1x1x6x1xf32>
    %12 = vector.shape_cast %11 : vector<1x1x6x1xf32> to vector<6x1xf32>
    %13 = vector.broadcast %12 : vector<6x1xf32> to vector<6x1568xf32>
    %14 = vector.broadcast %10 : vector<1x1568xf32> to vector<6x1568xf32>
    %15 = arith.mulf %13, %14 : vector<6x1568xf32>
    %c0_18 = arith.constant 0 : index
    %c1 = arith.constant 1 : index
    %16 = vector.load %arg1[%c0_18, %c1] : memref<1x1792xf32, #tpu.memory_space<vmem>>, vector<1x1568xf32>
    %c0_19 = arith.constant 0 : index
    %c1_20 = arith.constant 1 : index
    %c0_21 = arith.constant 0 : index
    %c0_22 = arith.constant 0 : index
    %17 = vector.load %arg2[%c0_19, %c1_20, %c0_21, %c0_22] : memref<3x3x6x1xf32, #tpu.memory_space<vmem>>, vector<1x1x6x1xf32>
    %18 = vector.shape_cast %17 : vector<1x1x6x1xf32> to vector<6x1xf32>
    %19 = vector.broadcast %18 : vector<6x1xf32> to vector<6x1568xf32>
    %20 = vector.broadcast %16 : vector<1x1568xf32> to vector<6x1568xf32>
    %21 = arith.mulf %19, %20 : vector<6x1568xf32>
    %22 = arith.addf %15, %21 : vector<6x1568xf32>
    %c0_23 = arith.constant 0 : index
    %c2 = arith.constant 2 : index
    %23 = vector.load %arg1[%c0_23, %c2] : memref<1x1792xf32, #tpu.memory_space<vmem>>, vector<1x1568xf32>
    %c0_24 = arith.constant 0 : index
    %c2_25 = arith.constant 2 : index
    %c0_26 = arith.constant 0 : index
    %c0_27 = arith.constant 0 : index
    %24 = vector.load %arg2[%c0_24, %c2_25, %c0_26, %c0_27] : memref<3x3x6x1xf32, #tpu.memory_space<vmem>>, vector<1x1x6x1xf32>
    %25 = vector.shape_cast %24 : vector<1x1x6x1xf32> to vector<6x1xf32>
    %26 = vector.broadcast %25 : vector<6x1xf32> to vector<6x1568xf32>
    %27 = vector.broadcast %23 : vector<1x1568xf32> to vector<6x1568xf32>
    %28 = arith.mulf %26, %27 : vector<6x1568xf32>
    %29 = arith.addf %22, %28 : vector<6x1568xf32>
    %c0_28 = arith.constant 0 : index
    %c28 = arith.constant 28 : index
    %30 = vector.load %arg1[%c0_28, %c28] : memref<1x1792xf32, #tpu.memory_space<vmem>>, vector<1x1568xf32>
    %c1_29 = arith.constant 1 : index
    %c0_30 = arith.constant 0 : index
    %c0_31 = arith.constant 0 : index
    %c0_32 = arith.constant 0 : index
    %31 = vector.load %arg2[%c1_29, %c0_30, %c0_31, %c0_32] : memref<3x3x6x1xf32, #tpu.memory_space<vmem>>, vector<1x1x6x1xf32>
    %32 = vector.shape_cast %31 : vector<1x1x6x1xf32> to vector<6x1xf32>
    %33 = vector.broadcast %32 : vector<6x1xf32> to vector<6x1568xf32>
    %34 = vector.broadcast %30 : vector<1x1568xf32> to vector<6x1568xf32>
    %35 = arith.mulf %33, %34 : vector<6x1568xf32>
    %36 = arith.addf %29, %35 : vector<6x1568xf32>
    %c0_33 = arith.constant 0 : index
    %c29 = arith.constant 29 : index
    %37 = vector.load %arg1[%c0_33, %c29] : memref<1x1792xf32, #tpu.memory_space<vmem>>, vector<1x1568xf32>
    %c1_34 = arith.constant 1 : index
    %c1_35 = arith.constant 1 : index
    %c0_36 = arith.constant 0 : index
    %c0_37 = arith.constant 0 : index
    %38 = vector.load %arg2[%c1_34, %c1_35, %c0_36, %c0_37] : memref<3x3x6x1xf32, #tpu.memory_space<vmem>>, vector<1x1x6x1xf32>
    %39 = vector.shape_cast %38 : vector<1x1x6x1xf32> to vector<6x1xf32>
    %40 = vector.broadcast %39 : vector<6x1xf32> to vector<6x1568xf32>
    %41 = vector.broadcast %37 : vector<1x1568xf32> to vector<6x1568xf32>
    %42 = arith.mulf %40, %41 : vector<6x1568xf32>
    %43 = arith.addf %36, %42 : vector<6x1568xf32>
    %c0_38 = arith.constant 0 : index
    %c30 = arith.constant 30 : index
    %44 = vector.load %arg1[%c0_38, %c30] : memref<1x1792xf32, #tpu.memory_space<vmem>>, vector<1x1568xf32>
    %c1_39 = arith.constant 1 : index
    %c2_40 = arith.constant 2 : index
    %c0_41 = arith.constant 0 : index
    %c0_42 = arith.constant 0 : index
    %45 = vector.load %arg2[%c1_39, %c2_40, %c0_41, %c0_42] : memref<3x3x6x1xf32, #tpu.memory_space<vmem>>, vector<1x1x6x1xf32>
    %46 = vector.shape_cast %45 : vector<1x1x6x1xf32> to vector<6x1xf32>
    %47 = vector.broadcast %46 : vector<6x1xf32> to vector<6x1568xf32>
    %48 = vector.broadcast %44 : vector<1x1568xf32> to vector<6x1568xf32>
    %49 = arith.mulf %47, %48 : vector<6x1568xf32>
    %50 = arith.addf %43, %49 : vector<6x1568xf32>
    %c0_43 = arith.constant 0 : index
    %c56 = arith.constant 56 : index
    %51 = vector.load %arg1[%c0_43, %c56] : memref<1x1792xf32, #tpu.memory_space<vmem>>, vector<1x1568xf32>
    %c2_44 = arith.constant 2 : index
    %c0_45 = arith.constant 0 : index
    %c0_46 = arith.constant 0 : index
    %c0_47 = arith.constant 0 : index
    %52 = vector.load %arg2[%c2_44, %c0_45, %c0_46, %c0_47] : memref<3x3x6x1xf32, #tpu.memory_space<vmem>>, vector<1x1x6x1xf32>
    %53 = vector.shape_cast %52 : vector<1x1x6x1xf32> to vector<6x1xf32>
    %54 = vector.broadcast %53 : vector<6x1xf32> to vector<6x1568xf32>
    %55 = vector.broadcast %51 : vector<1x1568xf32> to vector<6x1568xf32>
    %56 = arith.mulf %54, %55 : vector<6x1568xf32>
    %57 = arith.addf %50, %56 : vector<6x1568xf32>
    %c0_48 = arith.constant 0 : index
    %c57 = arith.constant 57 : index
    %58 = vector.load %arg1[%c0_48, %c57] : memref<1x1792xf32, #tpu.memory_space<vmem>>, vector<1x1568xf32>
    %c2_49 = arith.constant 2 : index
    %c1_50 = arith.constant 1 : index
    %c0_51 = arith.constant 0 : index
    %c0_52 = arith.constant 0 : index
    %59 = vector.load %arg2[%c2_49, %c1_50, %c0_51, %c0_52] : memref<3x3x6x1xf32, #tpu.memory_space<vmem>>, vector<1x1x6x1xf32>
    %60 = vector.shape_cast %59 : vector<1x1x6x1xf32> to vector<6x1xf32>
    %61 = vector.broadcast %60 : vector<6x1xf32> to vector<6x1568xf32>
    %62 = vector.broadcast %58 : vector<1x1568xf32> to vector<6x1568xf32>
    %63 = arith.mulf %61, %62 : vector<6x1568xf32>
    %64 = arith.addf %57, %63 : vector<6x1568xf32>
    %c0_53 = arith.constant 0 : index
    %c58 = arith.constant 58 : index
    %65 = vector.load %arg1[%c0_53, %c58] : memref<1x1792xf32, #tpu.memory_space<vmem>>, vector<1x1568xf32>
    %c2_54 = arith.constant 2 : index
    %c2_55 = arith.constant 2 : index
    %c0_56 = arith.constant 0 : index
    %c0_57 = arith.constant 0 : index
    %66 = vector.load %arg2[%c2_54, %c2_55, %c0_56, %c0_57] : memref<3x3x6x1xf32, #tpu.memory_space<vmem>>, vector<1x1x6x1xf32>
    %67 = vector.shape_cast %66 : vector<1x1x6x1xf32> to vector<6x1xf32>
    %68 = vector.broadcast %67 : vector<6x1xf32> to vector<6x1568xf32>
    %69 = vector.broadcast %65 : vector<1x1568xf32> to vector<6x1568xf32>
    %70 = arith.mulf %68, %69 : vector<6x1568xf32>
    %71 = arith.addf %64, %70 : vector<6x1568xf32>
    %c0_58 = arith.constant 0 : index
    %c0_59 = arith.constant 0 : index
    %72 = vector.load %arg3[%c0_58, %c0_59] : memref<6x1xf32, #tpu.memory_space<vmem>>, vector<6x1xf32>
    %73 = vector.broadcast %72 : vector<6x1xf32> to vector<6x1568xf32>
    %74 = arith.addf %71, %73 : vector<6x1568xf32>
    %cst_60 = arith.constant 0.000000e+00 : f32
    %75 = vector.broadcast %cst_60 : f32 to vector<6x1568xf32>
    %76 = arith.maximumf %74, %75 : vector<6x1568xf32>
    %c0_61 = arith.constant 0 : index
    %c0_62 = arith.constant 0 : index
    %77 = vector.load %arg13[%c0_61, %c0_62] : memref<6x1792xf32, #tpu.memory_space<vmem>>, vector<6x1568xf32>
    tpu.vector_store %arg13[%c0_61, %c0_62], %76 {strides = array<i32>} : memref<6x1792xf32, #tpu.memory_space<vmem>>, vector<6x1568xf32>,
    %c0_63 = arith.constant 0 : index
    %c0_64 = arith.constant 0 : index
    %78 = vector.load %arg13[%c0_63, %c0_64] : memref<6x1792xf32, #tpu.memory_space<vmem>>, vector<6x1568xf32>
    %c0_65 = arith.constant 0 : index
    %c1_66 = arith.constant 1 : index
    %79 = vector.load %arg13[%c0_65, %c1_66] : memref<6x1792xf32, #tpu.memory_space<vmem>>, vector<6x1568xf32>
    %80 = arith.maximumf %78, %79 : vector<6x1568xf32>
    %c0_67 = arith.constant 0 : index
    %c28_68 = arith.constant 28 : index
    %81 = vector.load %arg13[%c0_67, %c28_68] : memref<6x1792xf32, #tpu.memory_space<vmem>>, vector<6x1568xf32>
    %82 = arith.maximumf %80, %81 : vector<6x1568xf32>
    %c0_69 = arith.constant 0 : index
    %c29_70 = arith.constant 29 : index
    %83 = vector.load %arg13[%c0_69, %c29_70] : memref<6x1792xf32, #tpu.memory_space<vmem>>, vector<6x1568xf32>
    %84 = arith.maximumf %82, %83 : vector<6x1568xf32>
    %c0_71 = arith.constant 0 : index
    %c0_72 = arith.constant 0 : index
    %85 = vector.load %arg14[%c0_71, %c0_72] : memref<6x1792xf32, #tpu.memory_space<vmem>>, vector<6x1568xf32>
    tpu.vector_store %arg14[%c0_71, %c0_72], %84 {strides = array<i32>} : memref<6x1792xf32, #tpu.memory_space<vmem>>, vector<6x1568xf32>,
    %c0_73 = arith.constant 0 : index
    %c0_74 = arith.constant 0 : index
    %86 = vector.load %arg14[%c0_73, %c0_74] : memref<6x1792xf32, #tpu.memory_space<vmem>>, vector<6x1568xf32>
    %c0_75 = arith.constant 0 : index
    %c0_76 = arith.constant 0 : index
    %c0_77 = arith.constant 0 : index
    %c0_78 = arith.constant 0 : index
    %87 = vector.load %arg4[%c0_75, %c0_76, %c0_77, %c0_78] : memref<3x3x16x6xf32, #tpu.memory_space<vmem>>, vector<1x1x16x6xf32>
    %88 = vector.shape_cast %87 : vector<1x1x16x6xf32> to vector<16x6xf32>
    %cst_79 = arith.constant dense<0.000000e+00> : vector<16x1568xf32>
    %89 = tpu.matmul %88, %86, %cst_79 {dimension_numbers = #tpu.dot_dimension_numbers<[1], [0], [0], [1], [0, 0, 1, 1], [], []>} : vector<16x6xf32>, vector<6x1568xf32>, vector<16x1568xf32> -> vector<16x1568xf32>
    %c0_80 = arith.constant 0 : index
    %c2_81 = arith.constant 2 : index
    %90 = vector.load %arg14[%c0_80, %c2_81] : memref<6x1792xf32, #tpu.memory_space<vmem>>, vector<6x1568xf32>
    %c0_82 = arith.constant 0 : index
    %c1_83 = arith.constant 1 : index
    %c0_84 = arith.constant 0 : index
    %c0_85 = arith.constant 0 : index
    %91 = vector.load %arg4[%c0_82, %c1_83, %c0_84, %c0_85] : memref<3x3x16x6xf32, #tpu.memory_space<vmem>>, vector<1x1x16x6xf32>
    %92 = vector.shape_cast %91 : vector<1x1x16x6xf32> to vector<16x6xf32>
    %cst_86 = arith.constant dense<0.000000e+00> : vector<16x1568xf32>
    %93 = tpu.matmul %92, %90, %cst_86 {dimension_numbers = #tpu.dot_dimension_numbers<[1], [0], [0], [1], [0, 0, 1, 1], [], []>} : vector<16x6xf32>, vector<6x1568xf32>, vector<16x1568xf32> -> vector<16x1568xf32>
    %94 = arith.addf %89, %93 : vector<16x1568xf32>
    %c0_87 = arith.constant 0 : index
    %c4 = arith.constant 4 : index
    %95 = vector.load %arg14[%c0_87, %c4] : memref<6x1792xf32, #tpu.memory_space<vmem>>, vector<6x1568xf32>
    %c0_88 = arith.constant 0 : index
    %c2_89 = arith.constant 2 : index
    %c0_90 = arith.constant 0 : index
    %c0_91 = arith.constant 0 : index
    %96 = vector.load %arg4[%c0_88, %c2_89, %c0_90, %c0_91] : memref<3x3x16x6xf32, #tpu.memory_space<vmem>>, vector<1x1x16x6xf32>
    %97 = vector.shape_cast %96 : vector<1x1x16x6xf32> to vector<16x6xf32>
    %cst_92 = arith.constant dense<0.000000e+00> : vector<16x1568xf32>
    %98 = tpu.matmul %97, %95, %cst_92 {dimension_numbers = #tpu.dot_dimension_numbers<[1], [0], [0], [1], [0, 0, 1, 1], [], []>} : vector<16x6xf32>, vector<6x1568xf32>, vector<16x1568xf32> -> vector<16x1568xf32>
    %99 = arith.addf %94, %98 : vector<16x1568xf32>
    %c0_93 = arith.constant 0 : index
    %c56_94 = arith.constant 56 : index
    %100 = vector.load %arg14[%c0_93, %c56_94] : memref<6x1792xf32, #tpu.memory_space<vmem>>, vector<6x1568xf32>
    %c1_95 = arith.constant 1 : index
    %c0_96 = arith.constant 0 : index
    %c0_97 = arith.constant 0 : index
    %c0_98 = arith.constant 0 : index
    %101 = vector.load %arg4[%c1_95, %c0_96, %c0_97, %c0_98] : memref<3x3x16x6xf32, #tpu.memory_space<vmem>>, vector<1x1x16x6xf32>
    %102 = vector.shape_cast %101 : vector<1x1x16x6xf32> to vector<16x6xf32>
    %cst_99 = arith.constant dense<0.000000e+00> : vector<16x1568xf32>
    %103 = tpu.matmul %102, %100, %cst_99 {dimension_numbers = #tpu.dot_dimension_numbers<[1], [0], [0], [1], [0, 0, 1, 1], [], []>} : vector<16x6xf32>, vector<6x1568xf32>, vector<16x1568xf32> -> vector<16x1568xf32>
    %104 = arith.addf %99, %103 : vector<16x1568xf32>
    %c0_100 = arith.constant 0 : index
    %c58_101 = arith.constant 58 : index
    %105 = vector.load %arg14[%c0_100, %c58_101] : memref<6x1792xf32, #tpu.memory_space<vmem>>, vector<6x1568xf32>
    %c1_102 = arith.constant 1 : index
    %c1_103 = arith.constant 1 : index
    %c0_104 = arith.constant 0 : index
    %c0_105 = arith.constant 0 : index
    %106 = vector.load %arg4[%c1_102, %c1_103, %c0_104, %c0_105] : memref<3x3x16x6xf32, #tpu.memory_space<vmem>>, vector<1x1x16x6xf32>
    %107 = vector.shape_cast %106 : vector<1x1x16x6xf32> to vector<16x6xf32>
    %cst_106 = arith.constant dense<0.000000e+00> : vector<16x1568xf32>
    %108 = tpu.matmul %107, %105, %cst_106 {dimension_numbers = #tpu.dot_dimension_numbers<[1], [0], [0], [1], [0, 0, 1, 1], [], []>} : vector<16x6xf32>, vector<6x1568xf32>, vector<16x1568xf32> -> vector<16x1568xf32>
    %109 = arith.addf %104, %108 : vector<16x1568xf32>
    %c0_107 = arith.constant 0 : index
    %c60 = arith.constant 60 : index
    %110 = vector.load %arg14[%c0_107, %c60] : memref<6x1792xf32, #tpu.memory_space<vmem>>, vector<6x1568xf32>
    %c1_108 = arith.constant 1 : index
    %c2_109 = arith.constant 2 : index
    %c0_110 = arith.constant 0 : index
    %c0_111 = arith.constant 0 : index
    %111 = vector.load %arg4[%c1_108, %c2_109, %c0_110, %c0_111] : memref<3x3x16x6xf32, #tpu.memory_space<vmem>>, vector<1x1x16x6xf32>
    %112 = vector.shape_cast %111 : vector<1x1x16x6xf32> to vector<16x6xf32>
    %cst_112 = arith.constant dense<0.000000e+00> : vector<16x1568xf32>
    %113 = tpu.matmul %112, %110, %cst_112 {dimension_numbers = #tpu.dot_dimension_numbers<[1], [0], [0], [1], [0, 0, 1, 1], [], []>} : vector<16x6xf32>, vector<6x1568xf32>, vector<16x1568xf32> -> vector<16x1568xf32>
    %114 = arith.addf %109, %113 : vector<16x1568xf32>
    %c0_113 = arith.constant 0 : index
    %c112 = arith.constant 112 : index
    %115 = vector.load %arg14[%c0_113, %c112] : memref<6x1792xf32, #tpu.memory_space<vmem>>, vector<6x1568xf32>
    %c2_114 = arith.constant 2 : index
    %c0_115 = arith.constant 0 : index
    %c0_116 = arith.constant 0 : index
    %c0_117 = arith.constant 0 : index
    %116 = vector.load %arg4[%c2_114, %c0_115, %c0_116, %c0_117] : memref<3x3x16x6xf32, #tpu.memory_space<vmem>>, vector<1x1x16x6xf32>
    %117 = vector.shape_cast %116 : vector<1x1x16x6xf32> to vector<16x6xf32>
    %cst_118 = arith.constant dense<0.000000e+00> : vector<16x1568xf32>
    %118 = tpu.matmul %117, %115, %cst_118 {dimension_numbers = #tpu.dot_dimension_numbers<[1], [0], [0], [1], [0, 0, 1, 1], [], []>} : vector<16x6xf32>, vector<6x1568xf32>, vector<16x1568xf32> -> vector<16x1568xf32>
    %119 = arith.addf %114, %118 : vector<16x1568xf32>
    %c0_119 = arith.constant 0 : index
    %c114 = arith.constant 114 : index
    %120 = vector.load %arg14[%c0_119, %c114] : memref<6x1792xf32, #tpu.memory_space<vmem>>, vector<6x1568xf32>
    %c2_120 = arith.constant 2 : index
    %c1_121 = arith.constant 1 : index
    %c0_122 = arith.constant 0 : index
    %c0_123 = arith.constant 0 : index
    %121 = vector.load %arg4[%c2_120, %c1_121, %c0_122, %c0_123] : memref<3x3x16x6xf32, #tpu.memory_space<vmem>>, vector<1x1x16x6xf32>
    %122 = vector.shape_cast %121 : vector<1x1x16x6xf32> to vector<16x6xf32>
    %cst_124 = arith.constant dense<0.000000e+00> : vector<16x1568xf32>
    %123 = tpu.matmul %122, %120, %cst_124 {dimension_numbers = #tpu.dot_dimension_numbers<[1], [0], [0], [1], [0, 0, 1, 1], [], []>} : vector<16x6xf32>, vector<6x1568xf32>, vector<16x1568xf32> -> vector<16x1568xf32>
    %124 = arith.addf %119, %123 : vector<16x1568xf32>
    %c0_125 = arith.constant 0 : index
    %c116 = arith.constant 116 : index
    %125 = vector.load %arg14[%c0_125, %c116] : memref<6x1792xf32, #tpu.memory_space<vmem>>, vector<6x1568xf32>
    %c2_126 = arith.constant 2 : index
    %c2_127 = arith.constant 2 : index
    %c0_128 = arith.constant 0 : index
    %c0_129 = arith.constant 0 : index
    %126 = vector.load %arg4[%c2_126, %c2_127, %c0_128, %c0_129] : memref<3x3x16x6xf32, #tpu.memory_space<vmem>>, vector<1x1x16x6xf32>
    %127 = vector.shape_cast %126 : vector<1x1x16x6xf32> to vector<16x6xf32>
    %cst_130 = arith.constant dense<0.000000e+00> : vector<16x1568xf32>
    %128 = tpu.matmul %127, %125, %cst_130 {dimension_numbers = #tpu.dot_dimension_numbers<[1], [0], [0], [1], [0, 0, 1, 1], [], []>} : vector<16x6xf32>, vector<6x1568xf32>, vector<16x1568xf32> -> vector<16x1568xf32>
    %129 = arith.addf %124, %128 : vector<16x1568xf32>
    %c0_131 = arith.constant 0 : index
    %c0_132 = arith.constant 0 : index
    %130 = vector.load %arg5[%c0_131, %c0_132] : memref<16x1xf32, #tpu.memory_space<vmem>>, vector<16x1xf32>
    %131 = vector.broadcast %130 : vector<16x1xf32> to vector<16x1568xf32>
    %132 = arith.addf %129, %131 : vector<16x1568xf32>
    %cst_133 = arith.constant 0.000000e+00 : f32
    %133 = vector.broadcast %cst_133 : f32 to vector<16x1568xf32>
    %134 = arith.maximumf %132, %133 : vector<16x1568xf32>
    %c0_134 = arith.constant 0 : index
    %c0_135 = arith.constant 0 : index
    %135 = vector.load %arg15[%c0_134, %c0_135] : memref<16x1792xf32, #tpu.memory_space<vmem>>, vector<16x1568xf32>
    tpu.vector_store %arg15[%c0_134, %c0_135], %134 {strides = array<i32>} : memref<16x1792xf32, #tpu.memory_space<vmem>>, vector<16x1568xf32>,
    %c0_136 = arith.constant 0 : index
    %c0_137 = arith.constant 0 : index
    %136 = vector.load %arg15[%c0_136, %c0_137] : memref<16x1792xf32, #tpu.memory_space<vmem>>, vector<16x1568xf32>
    %c0_138 = arith.constant 0 : index
    %c0_139 = arith.constant 0 : index
    %c0_140 = arith.constant 0 : index
    %c0_141 = arith.constant 0 : index
    %137 = vector.load %arg6[%c0_138, %c0_139, %c0_140, %c0_141] : memref<3x3x16x16xf32, #tpu.memory_space<vmem>>, vector<1x1x16x16xf32>
    %138 = vector.shape_cast %137 : vector<1x1x16x16xf32> to vector<16x16xf32>
    %cst_142 = arith.constant dense<0.000000e+00> : vector<16x1568xf32>
    %139 = tpu.matmul %138, %136, %cst_142 {dimension_numbers = #tpu.dot_dimension_numbers<[1], [0], [0], [1], [0, 0, 1, 1], [], []>} : vector<16x16xf32>, vector<16x1568xf32>, vector<16x1568xf32> -> vector<16x1568xf32>
    %c0_143 = arith.constant 0 : index
    %c2_144 = arith.constant 2 : index
    %140 = vector.load %arg15[%c0_143, %c2_144] : memref<16x1792xf32, #tpu.memory_space<vmem>>, vector<16x1568xf32>
    %c0_145 = arith.constant 0 : index
    %c1_146 = arith.constant 1 : index
    %c0_147 = arith.constant 0 : index
    %c0_148 = arith.constant 0 : index
    %141 = vector.load %arg6[%c0_145, %c1_146, %c0_147, %c0_148] : memref<3x3x16x16xf32, #tpu.memory_space<vmem>>, vector<1x1x16x16xf32>
    %142 = vector.shape_cast %141 : vector<1x1x16x16xf32> to vector<16x16xf32>
    %cst_149 = arith.constant dense<0.000000e+00> : vector<16x1568xf32>
    %143 = tpu.matmul %142, %140, %cst_149 {dimension_numbers = #tpu.dot_dimension_numbers<[1], [0], [0], [1], [0, 0, 1, 1], [], []>} : vector<16x16xf32>, vector<16x1568xf32>, vector<16x1568xf32> -> vector<16x1568xf32>
    %144 = arith.addf %139, %143 : vector<16x1568xf32>
    %c0_150 = arith.constant 0 : index
    %c4_151 = arith.constant 4 : index
    %145 = vector.load %arg15[%c0_150, %c4_151] : memref<16x1792xf32, #tpu.memory_space<vmem>>, vector<16x1568xf32>
    %c0_152 = arith.constant 0 : index
    %c2_153 = arith.constant 2 : index
    %c0_154 = arith.constant 0 : index
    %c0_155 = arith.constant 0 : index
    %146 = vector.load %arg6[%c0_152, %c2_153, %c0_154, %c0_155] : memref<3x3x16x16xf32, #tpu.memory_space<vmem>>, vector<1x1x16x16xf32>
    %147 = vector.shape_cast %146 : vector<1x1x16x16xf32> to vector<16x16xf32>
    %cst_156 = arith.constant dense<0.000000e+00> : vector<16x1568xf32>
    %148 = tpu.matmul %147, %145, %cst_156 {dimension_numbers = #tpu.dot_dimension_numbers<[1], [0], [0], [1], [0, 0, 1, 1], [], []>} : vector<16x16xf32>, vector<16x1568xf32>, vector<16x1568xf32> -> vector<16x1568xf32>
    %149 = arith.addf %144, %148 : vector<16x1568xf32>
    %c0_157 = arith.constant 0 : index
    %c56_158 = arith.constant 56 : index
    %150 = vector.load %arg15[%c0_157, %c56_158] : memref<16x1792xf32, #tpu.memory_space<vmem>>, vector<16x1568xf32>
    %c1_159 = arith.constant 1 : index
    %c0_160 = arith.constant 0 : index
    %c0_161 = arith.constant 0 : index
    %c0_162 = arith.constant 0 : index
    %151 = vector.load %arg6[%c1_159, %c0_160, %c0_161, %c0_162] : memref<3x3x16x16xf32, #tpu.memory_space<vmem>>, vector<1x1x16x16xf32>
    %152 = vector.shape_cast %151 : vector<1x1x16x16xf32> to vector<16x16xf32>
    %cst_163 = arith.constant dense<0.000000e+00> : vector<16x1568xf32>
    %153 = tpu.matmul %152, %150, %cst_163 {dimension_numbers = #tpu.dot_dimension_numbers<[1], [0], [0], [1], [0, 0, 1, 1], [], []>} : vector<16x16xf32>, vector<16x1568xf32>, vector<16x1568xf32> -> vector<16x1568xf32>
    %154 = arith.addf %149, %153 : vector<16x1568xf32>
    %c0_164 = arith.constant 0 : index
    %c58_165 = arith.constant 58 : index
    %155 = vector.load %arg15[%c0_164, %c58_165] : memref<16x1792xf32, #tpu.memory_space<vmem>>, vector<16x1568xf32>
    %c1_166 = arith.constant 1 : index
    %c1_167 = arith.constant 1 : index
    %c0_168 = arith.constant 0 : index
    %c0_169 = arith.constant 0 : index
    %156 = vector.load %arg6[%c1_166, %c1_167, %c0_168, %c0_169] : memref<3x3x16x16xf32, #tpu.memory_space<vmem>>, vector<1x1x16x16xf32>
    %157 = vector.shape_cast %156 : vector<1x1x16x16xf32> to vector<16x16xf32>
    %cst_170 = arith.constant dense<0.000000e+00> : vector<16x1568xf32>
    %158 = tpu.matmul %157, %155, %cst_170 {dimension_numbers = #tpu.dot_dimension_numbers<[1], [0], [0], [1], [0, 0, 1, 1], [], []>} : vector<16x16xf32>, vector<16x1568xf32>, vector<16x1568xf32> -> vector<16x1568xf32>
    %159 = arith.addf %154, %158 : vector<16x1568xf32>
    %c0_171 = arith.constant 0 : index
    %c60_172 = arith.constant 60 : index
    %160 = vector.load %arg15[%c0_171, %c60_172] : memref<16x1792xf32, #tpu.memory_space<vmem>>, vector<16x1568xf32>
    %c1_173 = arith.constant 1 : index
    %c2_174 = arith.constant 2 : index
    %c0_175 = arith.constant 0 : index
    %c0_176 = arith.constant 0 : index
    %161 = vector.load %arg6[%c1_173, %c2_174, %c0_175, %c0_176] : memref<3x3x16x16xf32, #tpu.memory_space<vmem>>, vector<1x1x16x16xf32>
    %162 = vector.shape_cast %161 : vector<1x1x16x16xf32> to vector<16x16xf32>
    %cst_177 = arith.constant dense<0.000000e+00> : vector<16x1568xf32>
    %163 = tpu.matmul %162, %160, %cst_177 {dimension_numbers = #tpu.dot_dimension_numbers<[1], [0], [0], [1], [0, 0, 1, 1], [], []>} : vector<16x16xf32>, vector<16x1568xf32>, vector<16x1568xf32> -> vector<16x1568xf32>
    %164 = arith.addf %159, %163 : vector<16x1568xf32>
    %c0_178 = arith.constant 0 : index
    %c112_179 = arith.constant 112 : index
    %165 = vector.load %arg15[%c0_178, %c112_179] : memref<16x1792xf32, #tpu.memory_space<vmem>>, vector<16x1568xf32>
    %c2_180 = arith.constant 2 : index
    %c0_181 = arith.constant 0 : index
    %c0_182 = arith.constant 0 : index
    %c0_183 = arith.constant 0 : index
    %166 = vector.load %arg6[%c2_180, %c0_181, %c0_182, %c0_183] : memref<3x3x16x16xf32, #tpu.memory_space<vmem>>, vector<1x1x16x16xf32>
    %167 = vector.shape_cast %166 : vector<1x1x16x16xf32> to vector<16x16xf32>
    %cst_184 = arith.constant dense<0.000000e+00> : vector<16x1568xf32>
    %168 = tpu.matmul %167, %165, %cst_184 {dimension_numbers = #tpu.dot_dimension_numbers<[1], [0], [0], [1], [0, 0, 1, 1], [], []>} : vector<16x16xf32>, vector<16x1568xf32>, vector<16x1568xf32> -> vector<16x1568xf32>
    %169 = arith.addf %164, %168 : vector<16x1568xf32>
    %c0_185 = arith.constant 0 : index
    %c114_186 = arith.constant 114 : index
    %170 = vector.load %arg15[%c0_185, %c114_186] : memref<16x1792xf32, #tpu.memory_space<vmem>>, vector<16x1568xf32>
    %c2_187 = arith.constant 2 : index
    %c1_188 = arith.constant 1 : index
    %c0_189 = arith.constant 0 : index
    %c0_190 = arith.constant 0 : index
    %171 = vector.load %arg6[%c2_187, %c1_188, %c0_189, %c0_190] : memref<3x3x16x16xf32, #tpu.memory_space<vmem>>, vector<1x1x16x16xf32>
    %172 = vector.shape_cast %171 : vector<1x1x16x16xf32> to vector<16x16xf32>
    %cst_191 = arith.constant dense<0.000000e+00> : vector<16x1568xf32>
    %173 = tpu.matmul %172, %170, %cst_191 {dimension_numbers = #tpu.dot_dimension_numbers<[1], [0], [0], [1], [0, 0, 1, 1], [], []>} : vector<16x16xf32>, vector<16x1568xf32>, vector<16x1568xf32> -> vector<16x1568xf32>
    %174 = arith.addf %169, %173 : vector<16x1568xf32>
    %c0_192 = arith.constant 0 : index
    %c116_193 = arith.constant 116 : index
    %175 = vector.load %arg15[%c0_192, %c116_193] : memref<16x1792xf32, #tpu.memory_space<vmem>>, vector<16x1568xf32>
    %c2_194 = arith.constant 2 : index
    %c2_195 = arith.constant 2 : index
    %c0_196 = arith.constant 0 : index
    %c0_197 = arith.constant 0 : index
    %176 = vector.load %arg6[%c2_194, %c2_195, %c0_196, %c0_197] : memref<3x3x16x16xf32, #tpu.memory_space<vmem>>, vector<1x1x16x16xf32>
    %177 = vector.shape_cast %176 : vector<1x1x16x16xf32> to vector<16x16xf32>
    %cst_198 = arith.constant dense<0.000000e+00> : vector<16x1568xf32>
    %178 = tpu.matmul %177, %175, %cst_198 {dimension_numbers = #tpu.dot_dimension_numbers<[1], [0], [0], [1], [0, 0, 1, 1], [], []>} : vector<16x16xf32>, vector<16x1568xf32>, vector<16x1568xf32> -> vector<16x1568xf32>
    %179 = arith.addf %174, %178 : vector<16x1568xf32>
    %c0_199 = arith.constant 0 : index
    %c0_200 = arith.constant 0 : index
    %180 = vector.load %arg7[%c0_199, %c0_200] : memref<16x1xf32, #tpu.memory_space<vmem>>, vector<16x1xf32>
    %181 = vector.broadcast %180 : vector<16x1xf32> to vector<16x1568xf32>
    %182 = arith.addf %179, %181 : vector<16x1568xf32>
    %cst_201 = arith.constant 0.000000e+00 : f32
    %183 = vector.broadcast %cst_201 : f32 to vector<16x1568xf32>
    %184 = arith.maximumf %182, %183 : vector<16x1568xf32>
    %c0_202 = arith.constant 0 : index
    %c0_203 = arith.constant 0 : index
    %185 = vector.load %arg16[%c0_202, %c0_203] : memref<16x1792xf32, #tpu.memory_space<vmem>>, vector<16x1568xf32>
    tpu.vector_store %arg16[%c0_202, %c0_203], %184 {strides = array<i32>} : memref<16x1792xf32, #tpu.memory_space<vmem>>, vector<16x1568xf32>,
    %c0_204 = arith.constant 0 : index
    %c0_205 = arith.constant 0 : index
    %186 = vector.load %arg16[%c0_204, %c0_205] : memref<16x1792xf32, #tpu.memory_space<vmem>>, vector<16x1568xf32>
    %c0_206 = arith.constant 0 : index
    %c2_207 = arith.constant 2 : index
    %187 = vector.load %arg16[%c0_206, %c2_207] : memref<16x1792xf32, #tpu.memory_space<vmem>>, vector<16x1568xf32>
    %188 = arith.maximumf %186, %187 : vector<16x1568xf32>
    %c0_208 = arith.constant 0 : index
    %c56_209 = arith.constant 56 : index
    %189 = vector.load %arg16[%c0_208, %c56_209] : memref<16x1792xf32, #tpu.memory_space<vmem>>, vector<16x1568xf32>
    %190 = arith.maximumf %188, %189 : vector<16x1568xf32>
    %c0_210 = arith.constant 0 : index
    %c58_211 = arith.constant 58 : index
    %191 = vector.load %arg16[%c0_210, %c58_211] : memref<16x1792xf32, #tpu.memory_space<vmem>>, vector<16x1568xf32>
    %192 = arith.maximumf %190, %191 : vector<16x1568xf32>
    %c0_212 = arith.constant 0 : index
    %c0_213 = arith.constant 0 : index
    %193 = vector.load %arg17[%c0_212, %c0_213] : memref<16x1792xf32, #tpu.memory_space<vmem>>, vector<16x1568xf32>
    tpu.vector_store %arg17[%c0_212, %c0_213], %192 {strides = array<i32>} : memref<16x1792xf32, #tpu.memory_space<vmem>>, vector<16x1568xf32>,
    %c0_214 = arith.constant 0 : index
    %c0_215 = arith.constant 0 : index
    %194 = vector.load %arg17[%c0_214, %c0_215] : memref<16x1792xf32, #tpu.memory_space<vmem>>, vector<16x1xf32>
    %c0_216 = arith.constant 0 : index
    %c4_217 = arith.constant 4 : index
    %195 = vector.load %arg17[%c0_216, %c4_217] : memref<16x1792xf32, #tpu.memory_space<vmem>>, vector<16x1xf32>
    %c0_218 = arith.constant 0 : index
    %c8 = arith.constant 8 : index
    %196 = vector.load %arg17[%c0_218, %c8] : memref<16x1792xf32, #tpu.memory_space<vmem>>, vector<16x1xf32>
    %c0_219 = arith.constant 0 : index
    %c12 = arith.constant 12 : index
    %197 = vector.load %arg17[%c0_219, %c12] : memref<16x1792xf32, #tpu.memory_space<vmem>>, vector<16x1xf32>
    %c0_220 = arith.constant 0 : index
    %c112_221 = arith.constant 112 : index
    %198 = vector.load %arg17[%c0_220, %c112_221] : memref<16x1792xf32, #tpu.memory_space<vmem>>, vector<16x1xf32>
    %c0_222 = arith.constant 0 : index
    %c116_223 = arith.constant 116 : index
    %199 = vector.load %arg17[%c0_222, %c116_223] : memref<16x1792xf32, #tpu.memory_space<vmem>>, vector<16x1xf32>
    %c0_224 = arith.constant 0 : index
    %c120 = arith.constant 120 : index
    %200 = vector.load %arg17[%c0_224, %c120] : memref<16x1792xf32, #tpu.memory_space<vmem>>, vector<16x1xf32>
    %c0_225 = arith.constant 0 : index
    %c124 = arith.constant 124 : index
    %201 = vector.load %arg17[%c0_225, %c124] : memref<16x1792xf32, #tpu.memory_space<vmem>>, vector<16x1xf32>
    %c0_226 = arith.constant 0 : index
    %c224 = arith.constant 224 : index
    %202 = vector.load %arg17[%c0_226, %c224] : memref<16x1792xf32, #tpu.memory_space<vmem>>, vector<16x1xf32>
    %c0_227 = arith.constant 0 : index
    %c228 = arith.constant 228 : index
    %203 = vector.load %arg17[%c0_227, %c228] : memref<16x1792xf32, #tpu.memory_space<vmem>>, vector<16x1xf32>
    %c0_228 = arith.constant 0 : index
    %c232 = arith.constant 232 : index
    %204 = vector.load %arg17[%c0_228, %c232] : memref<16x1792xf32, #tpu.memory_space<vmem>>, vector<16x1xf32>
    %c0_229 = arith.constant 0 : index
    %c236 = arith.constant 236 : index
    %205 = vector.load %arg17[%c0_229, %c236] : memref<16x1792xf32, #tpu.memory_space<vmem>>, vector<16x1xf32>
    %c0_230 = arith.constant 0 : index
    %c336 = arith.constant 336 : index
    %206 = vector.load %arg17[%c0_230, %c336] : memref<16x1792xf32, #tpu.memory_space<vmem>>, vector<16x1xf32>
    %c0_231 = arith.constant 0 : index
    %c340 = arith.constant 340 : index
    %207 = vector.load %arg17[%c0_231, %c340] : memref<16x1792xf32, #tpu.memory_space<vmem>>, vector<16x1xf32>
    %c0_232 = arith.constant 0 : index
    %c344 = arith.constant 344 : index
    %208 = vector.load %arg17[%c0_232, %c344] : memref<16x1792xf32, #tpu.memory_space<vmem>>, vector<16x1xf32>
    %c0_233 = arith.constant 0 : index
    %c348 = arith.constant 348 : index
    %209 = vector.load %arg17[%c0_233, %c348] : memref<16x1792xf32, #tpu.memory_space<vmem>>, vector<16x1xf32>
    %210 = tpu.concatenate %194, %195, %196, %197, %198, %199, %200, %201, %202, %203, %204, %205, %206, %207, %208, %209 in 0 : vector<16x1xf32>, vector<16x1xf32>, vector<16x1xf32>, vector<16x1xf32>, vector<16x1xf32>, vector<16x1xf32>, vector<16x1xf32>, vector<16x1xf32>, vector<16x1xf32>, vector<16x1xf32>, vector<16x1xf32>, vector<16x1xf32>, vector<16x1xf32>, vector<16x1xf32>, vector<16x1xf32>, vector<16x1xf32> -> vector<256x1xf32>
    %c0_234 = arith.constant 0 : index
    %c784 = arith.constant 784 : index
    %211 = vector.load %arg17[%c0_234, %c784] : memref<16x1792xf32, #tpu.memory_space<vmem>>, vector<16x1xf32>
    %c0_235 = arith.constant 0 : index
    %c788 = arith.constant 788 : index
    %212 = vector.load %arg17[%c0_235, %c788] : memref<16x1792xf32, #tpu.memory_space<vmem>>, vector<16x1xf32>
    %c0_236 = arith.constant 0 : index
    %c792 = arith.constant 792 : index
    %213 = vector.load %arg17[%c0_236, %c792] : memref<16x1792xf32, #tpu.memory_space<vmem>>, vector<16x1xf32>
    %c0_237 = arith.constant 0 : index
    %c796 = arith.constant 796 : index
    %214 = vector.load %arg17[%c0_237, %c796] : memref<16x1792xf32, #tpu.memory_space<vmem>>, vector<16x1xf32>
    %c0_238 = arith.constant 0 : index
    %c896 = arith.constant 896 : index
    %215 = vector.load %arg17[%c0_238, %c896] : memref<16x1792xf32, #tpu.memory_space<vmem>>, vector<16x1xf32>
    %c0_239 = arith.constant 0 : index
    %c900 = arith.constant 900 : index
    %216 = vector.load %arg17[%c0_239, %c900] : memref<16x1792xf32, #tpu.memory_space<vmem>>, vector<16x1xf32>
    %c0_240 = arith.constant 0 : index
    %c904 = arith.constant 904 : index
    %217 = vector.load %arg17[%c0_240, %c904] : memref<16x1792xf32, #tpu.memory_space<vmem>>, vector<16x1xf32>
    %c0_241 = arith.constant 0 : index
    %c908 = arith.constant 908 : index
    %218 = vector.load %arg17[%c0_241, %c908] : memref<16x1792xf32, #tpu.memory_space<vmem>>, vector<16x1xf32>
    %c0_242 = arith.constant 0 : index
    %c1008 = arith.constant 1008 : index
    %219 = vector.load %arg17[%c0_242, %c1008] : memref<16x1792xf32, #tpu.memory_space<vmem>>, vector<16x1xf32>
    %c0_243 = arith.constant 0 : index
    %c1012 = arith.constant 1012 : index
    %220 = vector.load %arg17[%c0_243, %c1012] : memref<16x1792xf32, #tpu.memory_space<vmem>>, vector<16x1xf32>
    %c0_244 = arith.constant 0 : index
    %c1016 = arith.constant 1016 : index
    %221 = vector.load %arg17[%c0_244, %c1016] : memref<16x1792xf32, #tpu.memory_space<vmem>>, vector<16x1xf32>
    %c0_245 = arith.constant 0 : index
    %c1020 = arith.constant 1020 : index
    %222 = vector.load %arg17[%c0_245, %c1020] : memref<16x1792xf32, #tpu.memory_space<vmem>>, vector<16x1xf32>
    %c0_246 = arith.constant 0 : index
    %c1120 = arith.constant 1120 : index
    %223 = vector.load %arg17[%c0_246, %c1120] : memref<16x1792xf32, #tpu.memory_space<vmem>>, vector<16x1xf32>
    %c0_247 = arith.constant 0 : index
    %c1124 = arith.constant 1124 : index
    %224 = vector.load %arg17[%c0_247, %c1124] : memref<16x1792xf32, #tpu.memory_space<vmem>>, vector<16x1xf32>
    %c0_248 = arith.constant 0 : index
    %c1128 = arith.constant 1128 : index
    %225 = vector.load %arg17[%c0_248, %c1128] : memref<16x1792xf32, #tpu.memory_space<vmem>>, vector<16x1xf32>
    %c0_249 = arith.constant 0 : index
    %c1132 = arith.constant 1132 : index
    %226 = vector.load %arg17[%c0_249, %c1132] : memref<16x1792xf32, #tpu.memory_space<vmem>>, vector<16x1xf32>
    %227 = tpu.concatenate %211, %212, %213, %214, %215, %216, %217, %218, %219, %220, %221, %222, %223, %224, %225, %226 in 0 : vector<16x1xf32>, vector<16x1xf32>, vector<16x1xf32>, vector<16x1xf32>, vector<16x1xf32>, vector<16x1xf32>, vector<16x1xf32>, vector<16x1xf32>, vector<16x1xf32>, vector<16x1xf32>, vector<16x1xf32>, vector<16x1xf32>, vector<16x1xf32>, vector<16x1xf32>, vector<16x1xf32>, vector<16x1xf32> -> vector<256x1xf32>
    %228 = tpu.concatenate %210, %227 in 1 : vector<256x1xf32>, vector<256x1xf32> -> vector<256x2xf32>
    %cst_250 = arith.constant 0.000000e+00 : f32
    %229 = vector.broadcast %cst_250 : f32 to vector<256x126xf32>
    %230 = tpu.concatenate %228, %229 in 1 : vector<256x2xf32>, vector<256x126xf32> -> vector<256x128xf32>
    %231 = tpu.transpose %230, [1, 0] : vector<256x128xf32> -> vector<128x256xf32>
    %232 = vector.extract_strided_slice %231 {offsets = [0, 0], sizes = [2, 256], strides = [1, 1]} : vector<128x256xf32> to vector<2x256xf32>
    %c0_251 = arith.constant 0 : index
    %c0_252 = arith.constant 0 : index
    %233 = vector.load %arg8[%c0_251, %c0_252] : memref<256x256xf32, #tpu.memory_space<vmem>>, vector<256x256xf32>
    %cst_253 = arith.constant dense<0.000000e+00> : vector<2x256xf32>
    %234 = tpu.matmul %232, %233, %cst_253 {dimension_numbers = #tpu.dot_dimension_numbers<[1], [0], [0], [1], [0, 0, 1, 1], [], []>} : vector<2x256xf32>, vector<256x256xf32>, vector<2x256xf32> -> vector<2x256xf32>
    %c0_254 = arith.constant 0 : index
    %c0_255 = arith.constant 0 : index
    %235 = vector.load %arg9[%c0_254, %c0_255] : memref<1x256xf32, #tpu.memory_space<vmem>>, vector<1x256xf32>
    %236 = vector.broadcast %235 : vector<1x256xf32> to vector<2x256xf32>
    %237 = arith.addf %234, %236 : vector<2x256xf32>
    %cst_256 = arith.constant 0.000000e+00 : f32
    %238 = vector.broadcast %cst_256 : f32 to vector<2x256xf32>
    %239 = arith.maximumf %237, %238 : vector<2x256xf32>
    %c0_257 = arith.constant 0 : index
    %c0_258 = arith.constant 0 : index
    %240 = vector.load %arg10[%c0_257, %c0_258] : memref<256x512xf32, #tpu.memory_space<vmem>>, vector<256x512xf32>
    %cst_259 = arith.constant dense<0.000000e+00> : vector<2x512xf32>
    %241 = tpu.matmul %239, %240, %cst_259 {dimension_numbers = #tpu.dot_dimension_numbers<[1], [0], [0], [1], [0, 0, 1, 1], [], []>} : vector<2x256xf32>, vector<256x512xf32>, vector<2x512xf32> -> vector<2x512xf32>
    %c0_260 = arith.constant 0 : index
    %c0_261 = arith.constant 0 : index
    %242 = vector.load %arg11[%c0_260, %c0_261] : memref<1x512xf32, #tpu.memory_space<vmem>>, vector<1x512xf32>
    %243 = vector.broadcast %242 : vector<1x512xf32> to vector<2x512xf32>
    %244 = arith.addf %241, %243 : vector<2x512xf32>
    %c0_262 = arith.constant 0 : index
    %c0_263 = arith.constant 0 : index
    %245 = vector.load %arg12[%c0_262, %c0_263] : memref<2x512xf32, #tpu.memory_space<vmem>>, vector<2x512xf32>
    tpu.vector_store %arg12[%c0_262, %c0_263], %244 {strides = array<i32>} : memref<2x512xf32, #tpu.memory_space<vmem>>, vector<2x512xf32>,
    return
  }
  func.func @transform_0(%arg0: i32) -> (i32, i32) {
    %c0_i32 = arith.constant 0 : i32
    %c0_i32_0 = arith.constant 0 : i32
    %c0_i32_1 = arith.constant 0 : i32
    return %c0_i32, %c0_i32_0 : i32, i32
  }
  func.func @transform_1(%arg0: i32) -> (i32, i32, i32, i32) {
    %c0_i32 = arith.constant 0 : i32
    %c0_i32_0 = arith.constant 0 : i32
    %c0_i32_1 = arith.constant 0 : i32
    %c0_i32_2 = arith.constant 0 : i32
    %c0_i32_3 = arith.constant 0 : i32
    return %c0_i32, %c0_i32_0, %c0_i32_1, %c0_i32_2 : i32, i32, i32, i32
  }
  func.func @transform_2(%arg0: i32) -> (i32, i32) {
    %c0_i32 = arith.constant 0 : i32
    %c0_i32_0 = arith.constant 0 : i32
    %c0_i32_1 = arith.constant 0 : i32
    return %c0_i32, %c0_i32_0 : i32, i32
  }
  func.func @transform_3(%arg0: i32) -> (i32, i32, i32, i32) {
    %c0_i32 = arith.constant 0 : i32
    %c0_i32_0 = arith.constant 0 : i32
    %c0_i32_1 = arith.constant 0 : i32
    %c0_i32_2 = arith.constant 0 : i32
    %c0_i32_3 = arith.constant 0 : i32
    return %c0_i32, %c0_i32_0, %c0_i32_1, %c0_i32_2 : i32, i32, i32, i32
  }
  func.func @transform_4(%arg0: i32) -> (i32, i32) {
    %c0_i32 = arith.constant 0 : i32
    %c0_i32_0 = arith.constant 0 : i32
    %c0_i32_1 = arith.constant 0 : i32
    return %c0_i32, %c0_i32_0 : i32, i32
  }
  func.func @transform_5(%arg0: i32) -> (i32, i32, i32, i32) {
    %c0_i32 = arith.constant 0 : i32
    %c0_i32_0 = arith.constant 0 : i32
    %c0_i32_1 = arith.constant 0 : i32
    %c0_i32_2 = arith.constant 0 : i32
    %c0_i32_3 = arith.constant 0 : i32
    return %c0_i32, %c0_i32_0, %c0_i32_1, %c0_i32_2 : i32, i32, i32, i32
  }
  func.func @transform_6(%arg0: i32) -> (i32, i32) {
    %c0_i32 = arith.constant 0 : i32
    %c0_i32_0 = arith.constant 0 : i32
    %c0_i32_1 = arith.constant 0 : i32
    return %c0_i32, %c0_i32_0 : i32, i32
  }
  func.func @transform_7(%arg0: i32) -> (i32, i32) {
    %c0_i32 = arith.constant 0 : i32
    %c0_i32_0 = arith.constant 0 : i32
    %c0_i32_1 = arith.constant 0 : i32
    return %c0_i32, %c0_i32_0 : i32, i32
  }
  func.func @transform_8(%arg0: i32) -> (i32, i32) {
    %c0_i32 = arith.constant 0 : i32
    %c0_i32_0 = arith.constant 0 : i32
    %c0_i32_1 = arith.constant 0 : i32
    return %c0_i32, %c0_i32_0 : i32, i32
  }
  func.func @transform_9(%arg0: i32) -> (i32, i32) {
    %c0_i32 = arith.constant 0 : i32
    %c0_i32_0 = arith.constant 0 : i32
    %c0_i32_1 = arith.constant 0 : i32
    return %c0_i32, %c0_i32_0 : i32, i32
  }
  func.func @transform_10(%arg0: i32) -> (i32, i32) {
    %c0_i32 = arith.constant 0 : i32
    %c0_i32_0 = arith.constant 0 : i32
    %c0_i32_1 = arith.constant 0 : i32
    return %c0_i32, %c0_i32_0 : i32, i32
  }
  func.func @transform_11(%arg0: i32) -> (i32, i32) {
    %c0_i32 = arith.constant 0 : i32
    %c0_i32_0 = arith.constant 0 : i32
    %c0_i32_1 = arith.constant 0 : i32
    return %c0_i32, %c0_i32_0 : i32, i32
  }
}

</mosaic_0001>

<bundles_post_ra>
// kernel: simple_encoder_forward.1
= control target key start
LH: loop header
LB: loop body
LE: loop exit
PB: predicated region body
PF: predicated region fallthrough
CT: control target
= control target key end

     0   :  { %v15421_v2 = vmov 0   ;;  %s21758_s0 = inlined_call_operand.vmem [shape: f32[1,1792], index: 0, kind: input, shape index: {}]   ;;  %s21759_s1 = inlined_call_operand.vmem [shape: f32[3,3,6,1], index: 1, kind: input, shape index: {}]   ;;  %s21760_s2 = inlined_call_operand.vmem [shape: f32[6,1], index: 2, kind: input, shape index: {}]   ;;  %s21761_s3 = inlined_call_operand.vmem [shape: f32[3,3,16,6], index: 3, kind: input, shape index: {}]   ;;  %s21762_s4 = inlined_call_operand.vmem [shape: f32[16,1], index: 4, kind: input, shape index: {}]   ;;  %s21763_s5 = inlined_call_operand.vmem [shape: f32[3,3,16,16], index: 5, kind: input, shape index: {}]   ;;  %s21764_s6 = inlined_call_operand.vmem [shape: f32[16,1], index: 6, kind: input, shape index: {}]   ;;  %s21765_s7 = inlined_call_operand.vmem [shape: f32[256,256], index: 7, kind: input, shape index: {}]   ;;  %s21766_s8 = inlined_call_operand.vmem [shape: f32[1,256], index: 8, kind: input, shape index: {}]   ;;  %s21767_s9 = inlined_call_operand.vmem [shape: f32[256,512], index: 9, kind: input, shape index: {}]   ;;  %s21768_s10 = inlined_call_operand.vmem [shape: f32[1,512], index: 10, kind: input, shape index: {}]   ;;  %s21769_s11 = inlined_call_operand.hbm [shape: f32[2,512], index: 11, kind: output, shape index: {}]  }
   0x1   :  { %v14467_v0 = vld [vmem:[%s21759_s1 + $0x8] sm:$0x3f]  ;;  %v14469_v1 = vld [vmem:[%s21759_s1 + $0x18] sm:$0x3f]  ;;  %15077 = vset.pattern.permute.xlu0 %v15421_v2  ;;  %15078 = vset.pattern.permute.xlu1 %v15421_v2  ;;  %v14468_v3 = vld [vmem:[%s21759_s1 + $0x10] sm:$0x3f] }
   0x2   :  { %149 = vperm.xlu0 %15077, %v14467_v0   ;;  %345 = vperm.xlu1 %15078, %v14469_v1   ;;  %v14470_v4 = vld [vmem:[%s21759_s1 + $0x20] sm:$0x3f] }
   0x3   :  { %16 = vsyncpa [#allocation8], 0  ;;  %v14471_v5 = vld [vmem:[%s21759_s1 + $0x28] sm:$0x3f]  ;;  %v14472_v6 = vld [vmem:[%s21759_s1 + $0x30] sm:$0x3f]  ;;  %v67_v7 = vlaneseq }
   0x4   :  { %v14473_v8 = vld [vmem:[%s21759_s1 + $0x38] sm:$0x3f]  ;;  %v14474_v9 = vld [vmem:[%s21759_s1 + $0x40] sm:$0x3f]  ;;  %v15547_v14 = vld [vmem:[%s21758_s0 + $0x8] sm:$0x1f] }
   0x5   :  { %v15535_v10 = vshrl.u32 %v67_v7, 7  ;;  %v59_v11 = vld [vmem:[%s21759_s1] sm:$0x3f]  ;;  %s15423_s20 = smov 126   ;;  %s15424_s21 = smov 100   ;;  %vm204_vm0 = vcmask 1039360  }
   0x6   :  { %247 = vperm.xlu0 %15077, %v14468_v3   ;;  %443 = vperm.xlu1 %15078, %v14470_v4   ;;  %v929_v12 = vld [vmem:[%s21760_s2] sm:$0x3f]  ;;  %s15425_s22 = smov 99   ;;  %s15426_s23 = smov 98   ;;  %vm302_vm1 = vcmask 1031168   ;;  %vm400_vm2 = vcmask 818176  }
   0x7   :  { %21838 = vst [vmem:[#allocation10_spill] sm:$0xff] %v15535_v10  ;;  %v85_v13 = vsub.s32 4, %v15535_v10  ;;  %v15553_v16 = vsub.s32 2, %v15535_v10  ;;  %v15556_v17 = vsub.s32 1, %v15535_v10  ;;  %v15561_v18 = vld [vmem:[%s21758_s0] sm:$0xff]  ;;  %v15572_v21 = vsub.s32 3, %v15535_v10 }
   0x8   :  { %v15577_v23 = vsub.s32 0, %v15535_v10  ;;  %s15422_s0 = smov 127   ;;  %v93_v48 = vsub.s32 6, %v15535_v10  ;;  %v89_v49 = vsub.s32 5, %v15535_v10  ;;  %s15427_s24 = smov 72   ;;  %vm498_vm3 = vcmask 809984  }
   0x9   :  { %v15550_v15 = vrot.slane %v15547_v14, %v85_v13  ;;  %21839 = vst [vmem:[#allocation11_spill] sm:$0xff] %v15553_v16  ;;  %21840 = vst [vmem:[#allocation12_spill] sm:$0xff] %v15556_v17  ;;  %v15565_v19 = vrot.slane %v15561_v18, %v15553_v16  ;;  %v15569_v20 = vrot.slane %v15561_v18, %v15556_v17  ;;  %s15428_s25 = smov 71   ;;  %s15429_s26 = smov 70   ;;  %vm596_vm4 = vcmask 801792  }
   0xa   :  { %541 = vperm.xlu0 %15077, %v14471_v5   ;;  %639 = vperm.xlu1 %15078, %v14472_v6   ;;  %21841 = vst [vmem:[#allocation13_spill] sm:$0xff] %v15572_v21  ;;  %21842 = vst [vmem:[#allocation14_spill] sm:$0xff] %v15577_v23  ;;  %v15584_v26 = vrot.slane %v15561_v18, %v85_v13  ;;  %v15588_v27 = vrot.slane %v15561_v18, %v15572_v21  ;;  %vm694_vm5 = vcmask 588800   ;;  %vm792_vm6 = vcmask 580608   ;;  %s15431_s12 = smov 124   ;;  %s15432_s17 = smov 68  }
   0xb   :  { %v15598_v30 = vrot.slane %v15561_v18, %v15577_v23  ;;  %v15657_v52 = vrot.slane %v15561_v18, %v93_v48  ;;  %v15660_v53 = vrot.slane %v15561_v18, %v89_v49  ;;  %vm39_vm7 = vcmask 1045760   ;;  %s15433_s18 = smov 16   ;;  %s15435_s28 = smov 12  }
   0xc   :  { %vm890_vm8 = vcmask 572416   ;;  %vm973_vm9 = vcmask 259072   ;;  %vm1282_vm10 = vcmask 1045504   ;;  %vm1275_vm11 = vcmask 48128   ;;  %s15440_s27 = smov 48   ;;  %s15442_s29 = smov 120  }
   0xd   :  { %vm2444_vm12 = vcmask 1014784   ;;  %vm4353_vm13 = vcmask 556032   ;;  %vm5020_vm14 = vcmask 130048   ;;  %vm5660_vm15 = vcmask 113664   ;;  %s15444_s30 = smov 36   ;;  %s15445_s15 = smov 116  }
   0xe   :  { %737 = vperm.xlu0 %15077, %v14473_v8   ;;  %835 = vperm.xlu1 %15078, %v14474_v9   ;;  %s15447_s19 = smov 4  }
  0x12   :  { %62 = vperm.xlu0 %15077, %v59_v11   ;;  %932 = vperm.xlu1 %15078, %v929_v12  }
  0x7d   :  { %v15574_v22 = vpop.permute.xlu0 %149  ;;  %v15620_v38 = vpop.permute.xlu1 %345 }
  0x7e   :  { %v154_v24 = vmul.f32 %v15574_v22, %v15565_v19  ;;  %v153_v25 = vmul.f32 %v15574_v22, %v15569_v20  ;;  %v156_v28 = vmul.f32 %v15574_v22, %v15584_v26  ;;  %v155_v29 = vmul.f32 %v15574_v22, %v15588_v27 }
  0x7f   :  { %v152_v33 = vmul.f32 %v15574_v22, %v15598_v30  ;;  %v350_v39 = vmul.f32 %v15620_v38, %v15565_v19  ;;  %v349_v40 = vmul.f32 %v15620_v38, %v15569_v20  ;;  %v352_v41 = vmul.f32 %v15620_v38, %v15584_v26 }
  0x80   :  { %182 = vrot.lane.b32.xlu0 %v154_v24, %s15422_s0  ;;  %180 = vrot.lane.b32.xlu1 %v153_v25, %s15422_s0  ;;  %v351_v42 = vmul.f32 %v15620_v38, %v15588_v27  ;;  %v348_v45 = vmul.f32 %v15620_v38, %v15598_v30  ;;  %v158_v54 = vmul.f32 %v15574_v22, %v15657_v52 }
  0x81   :  { %v15600_v31 = vpop.permute.xlu0 %247  ;;  %v15636_v43 = vpop.permute.xlu1 %443  ;;  %v157_v55 = vmul.f32 %v15574_v22, %v15660_v53  ;;  %v354_v6 = vmul.f32 %v15620_v38, %v15657_v52  ;;  %v353_v7 = vmul.f32 %v15620_v38, %v15660_v53 }
  0x82   :  { %v251_v32 = vmul.f32 %v15600_v31, %v15569_v20  ;;  %v253_v34 = vmul.f32 %v15600_v31, %v15588_v27  ;;  %v252_v35 = vmul.f32 %v15600_v31, %v15565_v19  ;;  %v250_v36 = vmul.f32 %v15600_v31, %v15598_v30 }
  0x83   :  { %v254_v37 = vmul.f32 %v15600_v31, %v15584_v26  ;;  %v447_v44 = vmul.f32 %v15636_v43, %v15569_v20  ;;  %v449_v46 = vmul.f32 %v15636_v43, %v15588_v27  ;;  %v448_v47 = vmul.f32 %v15636_v43, %v15565_v19 }
  0x84   :  { %186 = vrot.lane.b32.xlu0 %v156_v28, %s15422_s0  ;;  %184 = vrot.lane.b32.xlu1 %v155_v29, %s15422_s0  ;;  %v446_v50 = vmul.f32 %v15636_v43, %v15598_v30  ;;  %v450_v51 = vmul.f32 %v15636_v43, %v15584_v26  ;;  %v255_v61 = vmul.f32 %v15600_v31, %v15660_v53 }
  0x85   :  { %v15668_v56 = vpop.permute.xlu0 %541  ;;  %v15690_v63 = vpop.permute.xlu1 %639  ;;  %v256_v1 = vmul.f32 %v15600_v31, %v15657_v52  ;;  %v451_v25 = vmul.f32 %v15636_v43, %v15660_v53  ;;  %v452_v29 = vmul.f32 %v15636_v43, %v15657_v52 }
  0x86   :  { %v546_v57 = vmul.f32 %v15668_v56, %v15565_v19  ;;  %v545_v58 = vmul.f32 %v15668_v56, %v15569_v20  ;;  %v548_v59 = vmul.f32 %v15668_v56, %v15584_v26  ;;  %v547_v60 = vmul.f32 %v15668_v56, %v15588_v27 }
  0x87   :  { %v544_v62 = vmul.f32 %v15668_v56, %v15598_v30  ;;  %v643_v0 = vmul.f32 %v15690_v63, %v15569_v20  ;;  %v645_v2 = vmul.f32 %v15690_v63, %v15588_v27  ;;  %v644_v3 = vmul.f32 %v15690_v63, %v15565_v19 }
  0x88   :  { %278 = vrot.lane.b32.xlu0 %v251_v32, %s15423_s20  ;;  %178 = vrot.lane.b32.xlu1 %v152_v33, %s15422_s0  ;;  %v642_v4 = vmul.f32 %v15690_v63, %v15598_v30  ;;  %v646_v5 = vmul.f32 %v15690_v63, %v15584_v26  ;;  %v648_v48 = vmul.f32 %v15690_v63, %v15657_v52 }
  0x89   :  { %v15714_v8 = vpop.permute.xlu0 %737  ;;  %v15736_v28 = vpop.permute.xlu1 %835 }
  0x8a   :  { %v742_v9 = vmul.f32 %v15714_v8, %v15565_v19  ;;  %v741_v11 = vmul.f32 %v15714_v8, %v15569_v20  ;;  %v744_v12 = vmul.f32 %v15714_v8, %v15584_v26  ;;  %v743_v13 = vmul.f32 %v15714_v8, %v15588_v27 }
  0x8b   :  { %v740_v24 = vmul.f32 %v15714_v8, %v15598_v30  ;;  %v839_v32 = vmul.f32 %v15736_v28, %v15569_v20  ;;  %v840_v33 = vmul.f32 %v15736_v28, %v15565_v19 }
  0x8c   :  { %282 = vrot.lane.b32.xlu0 %v253_v34, %s15423_s20  ;;  %280 = vrot.lane.b32.xlu1 %v252_v35, %s15423_s20  ;;  %v841_v34 = vmul.f32 %v15736_v28, %v15588_v27  ;;  %v97_v35 = vsub.s32 7, %v15535_v10  ;;  %v458_v10 = vmul.f32 %v15636_v43, %v15550_v15 }
  0x8d   :  { %v15788_v49 = vpop.permute.xlu0 %62 }
  0x90   :  { %276 = vrot.lane.b32.xlu0 %v250_v36, %s15423_s20  ;;  %284 = vrot.lane.b32.xlu1 %v254_v37, %s15423_s20  ;;  %v842_v36 = vmul.f32 %v15736_v28, %v15584_v26  ;;  %v838_v37 = vmul.f32 %v15736_v28, %v15598_v30 }
  0x94   :  { %378 = vrot.lane.b32.xlu0 %v350_v39, %s15424_s21  ;;  %376 = vrot.lane.b32.xlu1 %v349_v40, %s15424_s21  ;;  %v15756_v39 = vrot.slane %v15561_v18, %v97_v35  ;;  %v15760_v40 = vrot.slane %v15547_v14, %v15577_v23  ;;  %v549_v18 = vmul.f32 %v15668_v56, %v15660_v53 }
  0x96   :  { %21843 = vst [vmem:[#allocation15_spill] sm:$0xff] %v15756_v39  ;;  %21844 = vst [vmem:[#allocation16_spill] sm:$0xff] %v15760_v40 }
  0x98   :  { %382 = vrot.lane.b32.xlu0 %v352_v41, %s15424_s21  ;;  %380 = vrot.lane.b32.xlu1 %v351_v42, %s15424_s21  ;;  %v159_v41 = vmul.f32 %v15574_v22, %v15756_v39  ;;  %v160_v42 = vmul.f32 %v15574_v22, %v15760_v40 }
  0x9c   :  { %474 = vrot.lane.b32.xlu0 %v447_v44, %s15425_s22  ;;  %374 = vrot.lane.b32.xlu1 %v348_v45, %s15424_s21  ;;  %v550_v44 = vmul.f32 %v15668_v56, %v15657_v52  ;;  %v257_v45 = vmul.f32 %v15600_v31, %v15756_v39 }
  0xa0   :  { %478 = vrot.lane.b32.xlu0 %v449_v46, %s15425_s22  ;;  %476 = vrot.lane.b32.xlu1 %v448_v47, %s15425_s22  ;;  %v258_v46 = vmul.f32 %v15600_v31, %v15760_v40  ;;  %v647_v47 = vmul.f32 %v15690_v63, %v15660_v53 }
  0xa4   :  { %472 = vrot.lane.b32.xlu0 %v446_v50, %s15425_s22  ;;  %480 = vrot.lane.b32.xlu1 %v450_v51, %s15425_s22  ;;  %v15790_v50 = vpop.permute.xlu1 %932  ;;  %v355_v51 = vmul.f32 %v15620_v38, %v15756_v39 }
  0xa8   :  { %190 = vrot.lane.b32.xlu0 %v158_v54, %s15422_s0  ;;  %188 = vrot.lane.b32.xlu1 %v157_v55, %s15422_s0  ;;  %v356_v54 = vmul.f32 %v15620_v38, %v15760_v40 }
  0xac   :  { %574 = vrot.lane.b32.xlu0 %v546_v57, %s15426_s23  ;;  %572 = vrot.lane.b32.xlu1 %v545_v58, %s15426_s23  ;;  %v745_v58 = vmul.f32 %v15714_v8, %v15660_v53 }
  0xb0   :  { %578 = vrot.lane.b32.xlu0 %v548_v59, %s15426_s23  ;;  %576 = vrot.lane.b32.xlu1 %v547_v60, %s15426_s23  ;;  %v746_v59 = vmul.f32 %v15714_v8, %v15657_v52 }
  0xb4   :  { %286 = vrot.lane.b32.xlu0 %v255_v61, %s15423_s20  ;;  %570 = vrot.lane.b32.xlu1 %v544_v62, %s15426_s23  ;;  %v453_v62 = vmul.f32 %v15636_v43, %v15756_v39 }
  0xb8   :  { %670 = vrot.lane.b32.xlu0 %v643_v0, %s15427_s24  ;;  %288 = vrot.lane.b32.xlu1 %v256_v1, %s15423_s20  ;;  %v454_v0 = vmul.f32 %v15636_v43, %v15760_v40 }
  0xbc   :  { %674 = vrot.lane.b32.xlu0 %v645_v2, %s15427_s24  ;;  %672 = vrot.lane.b32.xlu1 %v644_v3, %s15427_s24  ;;  %v843_v3 = vmul.f32 %v15736_v28, %v15660_v53 }
  0xc0   :  { %668 = vrot.lane.b32.xlu0 %v642_v4, %s15427_s24  ;;  %676 = vrot.lane.b32.xlu1 %v646_v5, %s15427_s24  ;;  %v844_v4 = vmul.f32 %v15736_v28, %v15657_v52  ;;  %v15828_v5 = vrot.slane %v15547_v14, %v15556_v17 }
  0xc2   :  { %21845 = vst [vmem:[#allocation17_spill] sm:$0xff] %v15828_v5 }
  0xc4   :  { %386 = vrot.lane.b32.xlu0 %v354_v6, %s15424_s21  ;;  %384 = vrot.lane.b32.xlu1 %v353_v7, %s15424_s21  ;;  %v15832_v6 = vrot.slane %v15547_v14, %v15553_v16  ;;  %v134_v16 = vmul.f32 %v15565_v19, %v15788_v49 }
  0xc6   :  { %21846 = vst [vmem:[#allocation18_spill] sm:$0xff] %v15832_v6  ;;  %v260_v35 = vmul.f32 %v15600_v31, %v15832_v6  ;;  %v848_v17 = vmul.f32 %v15736_v28, %v15832_v6 }
  0xc8   :  { %770 = vrot.lane.b32.xlu0 %v742_v9, %s15428_s25  ;;  %768 = vrot.lane.b32.xlu1 %v741_v11, %s15428_s25  ;;  %v161_v11 = vmul.f32 %v15574_v22, %v15828_v5 }
  0xcc   :  { %774 = vrot.lane.b32.xlu0 %v744_v12, %s15428_s25  ;;  %772 = vrot.lane.b32.xlu1 %v743_v13, %s15428_s25  ;;  %v162_v12 = vmul.f32 %v15574_v22, %v15832_v6 }
  0xd0   :  { %766 = vrot.lane.b32.xlu0 %v740_v24, %s15428_s25  ;;  %482 = vrot.lane.b32.xlu1 %v451_v25, %s15425_s22  ;;  %v551_v25 = vmul.f32 %v15668_v56, %v15756_v39 }
  0xd4   :  { %484 = vrot.lane.b32.xlu0 %v452_v29, %s15425_s22  ;;  %866 = vrot.lane.b32.xlu1 %v839_v32, %s15429_s26  ;;  %v552_v29 = vmul.f32 %v15668_v56, %v15760_v40 }
  0xd8   :  { %868 = vrot.lane.b32.xlu0 %v840_v33, %s15429_s26  ;;  %870 = vrot.lane.b32.xlu1 %v841_v34, %s15429_s26  ;;  %v259_v34 = vmul.f32 %v15600_v31, %v15828_v5 }
  0xdc   :  { %872 = vrot.lane.b32.xlu0 %v842_v36, %s15429_s26  ;;  %864 = vrot.lane.b32.xlu1 %v838_v37, %s15429_s26 }
  0xe0   :  { %192 = vrot.lane.b32.xlu0 %v159_v41, %s15422_s0  ;;  %194 = vrot.lane.b32.xlu1 %v160_v42, %s15422_s0  ;;  %v649_v41 = vmul.f32 %v15690_v63, %v15756_v39  ;;  %v650_v42 = vmul.f32 %v15690_v63, %v15760_v40 }
  0xe4   :  { %580 = vrot.lane.b32.xlu0 %v549_v18, %s15426_s23  ;;  %582 = vrot.lane.b32.xlu1 %v550_v44, %s15426_s23 }
  0xe8   :  { %290 = vrot.lane.b32.xlu0 %v257_v45, %s15423_s20  ;;  %292 = vrot.lane.b32.xlu1 %v258_v46, %s15423_s20  ;;  %v357_v45 = vmul.f32 %v15620_v38, %v15828_v5  ;;  %v358_v46 = vmul.f32 %v15620_v38, %v15832_v6 }
  0xec   :  { %678 = vrot.lane.b32.xlu0 %v647_v47, %s15427_s24  ;;  %680 = vrot.lane.b32.xlu1 %v648_v48, %s15427_s24 }
  0xf0   :  { %388 = vrot.lane.b32.xlu0 %v355_v51, %s15424_s21  ;;  %390 = vrot.lane.b32.xlu1 %v356_v54, %s15424_s21  ;;  %v747_v51 = vmul.f32 %v15714_v8, %v15756_v39  ;;  %v748_v54 = vmul.f32 %v15714_v8, %v15760_v40 }
  0xf2   :  { %v15798_v55 = vpop.permute.xlu0 %182  ;;  %v15800_v57 = vpop.permute.xlu1 %180 }
  0xf4   :  { %776 = vrot.lane.b32.xlu0 %v745_v58, %s15428_s25  ;;  %778 = vrot.lane.b32.xlu1 %v746_v59, %s15428_s25 }
  0xf6   :  { %v15808_v60 = vpop.permute.xlu0 %186  ;;  %v15810_v61 = vpop.permute.xlu1 %184 }
  0xf7   :  { %v207_v19 = vsel %vm204_vm0, %v15798_v55, %v15810_v61  ;;  %v208_v23 = vsel %vm204_vm0, %v15810_v61, %v15808_v60 }
  0xf8   :  { %486 = vrot.lane.b32.xlu0 %v453_v62, %s15425_s22  ;;  %488 = vrot.lane.b32.xlu1 %v454_v0, %s15425_s22  ;;  %v455_v62 = vmul.f32 %v15636_v43, %v15828_v5  ;;  %v456_v0 = vmul.f32 %v15636_v43, %v15832_v6  ;;  %v232_v61 = vadd.f32 %v207_v19, %v134_v16 }
  0xfa   :  { %v15818_v1 = vpop.permute.xlu0 %278  ;;  %v15820_v2 = vpop.permute.xlu1 %178 }
  0xfc   :  { %874 = vrot.lane.b32.xlu0 %v843_v3, %s15429_s26  ;;  %876 = vrot.lane.b32.xlu1 %v844_v4, %s15429_s26 }
  0xfe   :  { %v15836_v7 = vpop.permute.xlu0 %282  ;;  %v15838_v9 = vpop.permute.xlu1 %280 }
 0x100   :  { %196 = vrot.lane.b32.xlu0 %v161_v11, %s15422_s0  ;;  %198 = vrot.lane.b32.xlu1 %v162_v12, %s15422_s0  ;;  %v845_v11 = vmul.f32 %v15736_v28, %v15756_v39  ;;  %v846_v12 = vmul.f32 %v15736_v28, %v15760_v40 }
 0x102   :  { %v15846_v13 = vpop.permute.xlu0 %276  ;;  %v15848_v24 = vpop.permute.xlu1 %284 }
 0x104   :  { %584 = vrot.lane.b32.xlu0 %v551_v25, %s15426_s23  ;;  %586 = vrot.lane.b32.xlu1 %v552_v29, %s15426_s23  ;;  %v15916_v25 = vrot.slane %v15547_v14, %v15572_v21  ;;  %v133_v21 = vmul.f32 %v15569_v20, %v15788_v49  ;;  %v847_v20 = vmul.f32 %v15736_v28, %v15828_v5 }
 0x106   :  { %v15856_v32 = vpop.permute.xlu0 %378  ;;  %v15858_v33 = vpop.permute.xlu1 %376 }
 0x108   :  { %294 = vrot.lane.b32.xlu0 %v259_v34, %s15423_s20  ;;  %296 = vrot.lane.b32.xlu1 %v260_v35, %s15423_s20  ;;  %v163_v35 = vmul.f32 %v15574_v22, %v15916_v25 }
 0x10a   :  { %v15866_v36 = vpop.permute.xlu0 %382  ;;  %v15868_v37 = vpop.permute.xlu1 %380 }
 0x10c   :  { %682 = vrot.lane.b32.xlu0 %v649_v41, %s15427_s24  ;;  %684 = vrot.lane.b32.xlu1 %v650_v42, %s15427_s24  ;;  %v164_v41 = vmul.f32 %v15574_v22, %v15550_v15 }
 0x10e   :  { %v15876_v18 = vpop.permute.xlu0 %474  ;;  %v15878_v44 = vpop.permute.xlu1 %374 }
 0x110   :  { %392 = vrot.lane.b32.xlu0 %v357_v45, %s15424_s21  ;;  %394 = vrot.lane.b32.xlu1 %v358_v46, %s15424_s21  ;;  %v553_v45 = vmul.f32 %v15668_v56, %v15828_v5  ;;  %v554_v46 = vmul.f32 %v15668_v56, %v15832_v6 }
 0x112   :  { %v15886_v47 = vpop.permute.xlu0 %478  ;;  %v15888_v48 = vpop.permute.xlu1 %476 }
 0x114   :  { %780 = vrot.lane.b32.xlu0 %v747_v51, %s15428_s25  ;;  %782 = vrot.lane.b32.xlu1 %v748_v54, %s15428_s25  ;;  %v261_v54 = vmul.f32 %v15600_v31, %v15916_v25 }
 0x116   :  { %v15896_v58 = vpop.permute.xlu0 %472  ;;  %v15898_v59 = vpop.permute.xlu1 %480 }
 0x118   :  { %490 = vrot.lane.b32.xlu0 %v455_v62, %s15425_s22  ;;  %492 = vrot.lane.b32.xlu1 %v456_v0, %s15425_s22  ;;  %v262_v62 = vmul.f32 %v15600_v31, %v15550_v15 }
 0x11a   :  { %v15906_v3 = vpop.permute.xlu0 %190  ;;  %v15908_v4 = vpop.permute.xlu1 %188 }
 0x11c   :  { %878 = vrot.lane.b32.xlu0 %v845_v11, %s15429_s26  ;;  %880 = vrot.lane.b32.xlu1 %v846_v12, %s15429_s26  ;;  %v651_v12 = vmul.f32 %v15690_v63, %v15828_v5 }
 0x11e   :  { %v15920_v29 = vpop.permute.xlu0 %574  ;;  %v15922_v34 = vpop.permute.xlu1 %572 }
 0x120   :  { %200 = vrot.lane.b32.xlu0 %v163_v35, %s15422_s0  ;;  %202 = vrot.lane.b32.xlu1 %v164_v41, %s15422_s0  ;;  %v652_v35 = vmul.f32 %v15690_v63, %v15832_v6 }
 0x122   :  { %v15930_v14 = vpop.permute.xlu0 %578  ;;  %v15932_v42 = vpop.permute.xlu1 %576 }
 0x124   :  { %588 = vrot.lane.b32.xlu0 %v553_v45, %s15426_s23  ;;  %590 = vrot.lane.b32.xlu1 %v554_v46, %s15426_s23  ;;  %v359_v45 = vmul.f32 %v15620_v38, %v15916_v25  ;;  %v360_v46 = vmul.f32 %v15620_v38, %v15550_v15 }
 0x126   :  { %v15940_v51 = vpop.permute.xlu0 %286  ;;  %v15942_v22 = vpop.permute.xlu1 %570 }
 0x128   :  { %298 = vrot.lane.b32.xlu0 %v261_v54, %s15423_s20  ;;  %300 = vrot.lane.b32.xlu1 %v262_v62, %s15423_s20 }
 0x12a   :  { %v15950_v0 = vpop.permute.xlu0 %670  ;;  %v15952_v11 = vpop.permute.xlu1 %288 }
 0x12c   :  { %686 = vrot.lane.b32.xlu0 %v651_v12, %s15427_s24  ;;  %688 = vrot.lane.b32.xlu1 %v652_v35, %s15427_s24  ;;  %v749_v12 = vmul.f32 %v15714_v8, %v15828_v5  ;;  %v750_v35 = vmul.f32 %v15714_v8, %v15832_v6  ;;  %v304_v5 = vsel %vm302_vm1, %v15818_v1, %v15838_v9 }
 0x12d   :  { %v653_v6 = vmul.f32 %v15690_v63, %v15916_v25 }
 0x12e   :  { %v15960_v41 = vpop.permute.xlu0 %674  ;;  %v15962_v31 = vpop.permute.xlu1 %672 }
 0x130   :  { %396 = vrot.lane.b32.xlu0 %v359_v45, %s15424_s21  ;;  %398 = vrot.lane.b32.xlu1 %v360_v46, %s15424_s21  ;;  %v457_v46 = vmul.f32 %v15636_v43, %v15916_v25  ;;  %v132_v43 = vmul.f32 %v15598_v30, %v15788_v49  ;;  %v556_v30 = vmul.f32 %v15668_v56, %v15550_v15 }
 0x132   :  { %v15970_v54 = vpop.permute.xlu0 %668  ;;  %v15972_v62 = vpop.permute.xlu1 %676 }
 0x134   :  { %784 = vrot.lane.b32.xlu0 %v749_v12, %s15428_s25  ;;  %786 = vrot.lane.b32.xlu1 %v750_v35, %s15428_s25  ;;  %v206_v12 = vsel %vm204_vm0, %v15800_v57, %v15798_v55  ;;  %v135_v35 = vmul.f32 %v15588_v27, %v15788_v49  ;;  %v555_v27 = vmul.f32 %v15668_v56, %v15916_v25 }
 0x135   :  { %v205_v55 = vsel %vm204_vm0, %v15820_v2, %v15800_v57  ;;  %v231_v40 = vadd.f32 %v206_v12, %v133_v21  ;;  %v305_v56 = vsel %vm302_vm1, %v15838_v9, %v15836_v7  ;;  %v654_v57 = vmul.f32 %v15690_v63, %v15550_v15 }
 0x136   :  { %v15980_v38 = vpop.permute.xlu0 %386  ;;  %v15982_v45 = vpop.permute.xlu1 %384  ;;  %v303_v2 = vsel %vm302_vm1, %v15846_v13, %v15818_v1  ;;  %v306_v21 = vsel %vm302_vm1, %v15836_v7, %v15848_v24  ;;  %v233_v12 = vadd.f32 %v208_v23, %v135_v35  ;;  %v230_v9 = vadd.f32 %v205_v55, %v132_v43 }
 0x137   :  { %v329_v39 = vadd.f32 %v304_v5, %v231_v40  ;;  %v330_v16 = vadd.f32 %v305_v56, %v232_v61  ;;  %v403_v1 = vsel %vm400_vm2, %v15856_v32, %v15868_v37  ;;  %v404_v7 = vsel %vm400_vm2, %v15868_v37, %v15866_v36 }
 0x138   :  { %494 = vrot.lane.b32.xlu0 %v457_v46, %s15425_s22  ;;  %496 = vrot.lane.b32.xlu1 %v458_v10, %s15425_s22  ;;  %v401_v23 = vsel %vm400_vm2, %v15878_v44, %v15858_v33  ;;  %v328_v40 = vadd.f32 %v303_v2, %v230_v9  ;;  %v331_v5 = vadd.f32 %v306_v21, %v233_v12 }
 0x139   :  { %v500_v13 = vsel %vm498_vm3, %v15876_v18, %v15888_v48  ;;  %v501_v37 = vsel %vm498_vm3, %v15888_v48, %v15886_v47  ;;  %v502_v44 = vsel %vm498_vm3, %v15886_v47, %v15898_v59  ;;  %v428_v35 = vadd.f32 %v403_v1, %v330_v16 }
 0x13a   :  { %v16006_v46 = vpop.permute.xlu0 %770  ;;  %v16008_v10 = vpop.permute.xlu1 %768  ;;  %v429_v43 = vadd.f32 %v404_v7, %v331_v5  ;;  %v426_v19 = vadd.f32 %v401_v23, %v328_v40  ;;  %v599_v48 = vsel %vm596_vm4, %v15920_v29, %v15932_v42  ;;  %v752_v47 = vmul.f32 %v15714_v8, %v15550_v15 }
 0x13b   :  { %v597_v21 = vsel %vm596_vm4, %v15942_v22, %v15922_v34  ;;  %v600_v12 = vsel %vm596_vm4, %v15932_v42, %v15930_v14  ;;  %v794_v22 = vsel %vm792_vm6, %v16008_v10, %v16006_v46  ;;  %v849_v16 = vmul.f32 %v15736_v28, %v15916_v25 }
 0x13c   :  { %882 = vrot.lane.b32.xlu0 %v847_v20, %s15429_s26  ;;  %884 = vrot.lane.b32.xlu1 %v848_v17, %s15429_s26  ;;  %v402_v17 = vsel %vm400_vm2, %v15858_v33, %v15856_v32  ;;  %v499_v33 = vsel %vm498_vm3, %v15896_v58, %v15876_v18  ;;  %v751_v18 = vmul.f32 %v15714_v8, %v15916_v25 }
 0x13d   :  { %v427_v32 = vadd.f32 %v402_v17, %v329_v39  ;;  %v526_v58 = vadd.f32 %v501_v37, %v428_v35  ;;  %v524_v56 = vadd.f32 %v499_v33, %v426_v19  ;;  %v527_v61 = vadd.f32 %v502_v44, %v429_v43 }
 0x13e   :  { %v16043_v20 = vpop.permute.xlu0 %774  ;;  %v16045_v63 = vpop.permute.xlu1 %772  ;;  %v697_v8 = vsel %vm694_vm5, %v15962_v31, %v15960_v41  ;;  %v15430_v17 = vmov 0.0   ;;  %v850_v1 = vmul.f32 %v15736_v28, %v15550_v15 }
 0x13f   :  { %v525_v55 = vadd.f32 %v500_v13, %v427_v32  ;;  %40 = vst.msk [vmem:[#allocation2 + $0x60] sm:$0x3f] %vm39_vm7, %v15430_v17  ;;  %42 = vst.msk [vmem:[#allocation3 + $0x60] sm:$0x3f] %vm39_vm7, %v15430_v17  ;;  %2019 = vmatprep.mubr.f32.mxu0 %v15430_v17  ;;  %1373 = vmatprep.mubr.f32.mxu1 %v15430_v17  ;;  %v622_v42 = vadd.f32 %v597_v21, %v524_v56 }
 0x140   :  { %592 = vrot.lane.b32.xlu0 %v555_v27, %s15426_s23  ;;  %594 = vrot.lane.b32.xlu1 %v556_v30, %s15426_s23  ;;  %v598_v27 = vsel %vm596_vm4, %v15922_v34, %v15920_v29  ;;  %v696_v29 = vsel %vm694_vm5, %v15950_v0, %v15962_v31  ;;  %v695_v34 = vsel %vm694_vm5, %v15970_v54, %v15950_v0  ;;  %s15437_s23 = smov 32  }
 0x141   :  { %v623_v2 = vadd.f32 %v598_v27, %v525_v55  ;;  %v795_v31 = vsel %vm792_vm6, %v16006_v46, %v16045_v63  ;;  %43 = vst [vmem:[#allocation3 + $0x68] sm:$0x3f] %v15430_v17  ;;  %46 = vst [vmem:[#allocation4 + $0x68] sm:$0xff] %v15430_v17  ;;  %v698_v46 = vsel %vm694_vm5, %v15960_v41, %v15972_v62 }
 0x142   :  { %v767_v39 = vpop.permute.xlu0 %766  ;;  %v16073_v30 = vpop.permute.xlu1 %482  ;;  %v625_v7 = vadd.f32 %v600_v12, %v527_v61  ;;  %v720_v23 = vadd.f32 %v695_v34, %v622_v42  ;;  %v796_v37 = vsel %vm792_vm6, %v16045_v63, %v16043_v20 }
 0x143   :  { %v721_v0 = vadd.f32 %v696_v29, %v623_v2  ;;  %v793_v33 = vsel %vm792_vm6, %v767_v39, %v16008_v10 }
 0x144   :  { %690 = vrot.lane.b32.xlu0 %v653_v6, %s15427_s24  ;;  %692 = vrot.lane.b32.xlu1 %v654_v57, %s15427_s24  ;;  %v624_v6 = vadd.f32 %v599_v48, %v526_v58  ;;  %v723_v35 = vadd.f32 %v698_v46, %v625_v7  ;;  %v818_v27 = vadd.f32 %v793_v33, %v720_v23 }
 0x145   :  { %v819_v40 = vadd.f32 %v794_v22, %v721_v0  ;;  %v209_v7 = vsel %vm204_vm0, %v15808_v60, %v15908_v4  ;;  %v210_v23 = vsel %vm204_vm0, %v15908_v4, %v15906_v3 }
 0x146   :  { %v16096_v9 = vpop.permute.xlu0 %484  ;;  %v867_v57 = vpop.permute.xlu1 %866  ;;  %v722_v54 = vadd.f32 %v697_v8, %v624_v6  ;;  %v821_v19 = vadd.f32 %v796_v37, %v723_v35 }
 0x148   :  { %788 = vrot.lane.b32.xlu0 %v751_v18, %s15428_s25  ;;  %790 = vrot.lane.b32.xlu1 %v752_v47, %s15428_s25  ;;  %v820_v5 = vadd.f32 %v795_v31, %v722_v54  ;;  %s15438_s25 = smov 24  }
 0x14a   :  { %v869_v13 = vpop.permute.xlu0 %868  ;;  %v871_v32 = vpop.permute.xlu1 %870 }
 0x14b   :  { %v892_v41 = vsel %vm890_vm8, %v867_v57, %v869_v13  ;;  %v893_v44 = vsel %vm890_vm8, %v869_v13, %v871_v32  ;;  %v307_v13 = vsel %vm302_vm1, %v15848_v24, %v15940_v51 }
 0x14c   :  { %v917_v43 = vadd.f32 %v892_v41, %v819_v40  ;;  %v918_v28 = vadd.f32 %v893_v44, %v820_v5  ;;  %886 = vrot.lane.b32.xlu0 %v849_v16, %s15429_s26  ;;  %888 = vrot.lane.b32.xlu1 %v850_v1, %s15429_s26  ;;  %v136_v40 = vmul.f32 %v15584_v26, %v15788_v49 }
 0x14d   :  { %v137_v5 = vmul.f32 %v15660_v53, %v15788_v49  ;;  %v405_v26 = vsel %vm400_vm2, %v15866_v36, %v15982_v45  ;;  %v406_v53 = vsel %vm400_vm2, %v15982_v45, %v15980_v38  ;;  %v503_v41 = vsel %vm498_vm3, %v15898_v59, %v16073_v30 }
 0x14e   :  { %v936_v55 = vadd.f32 %v15790_v50, %v917_v43  ;;  %v937_v63 = vadd.f32 %v15790_v50, %v918_v28  ;;  %v16133_v48 = vpop.permute.xlu0 %872  ;;  %v865_v10 = vpop.permute.xlu1 %864  ;;  %v234_v37 = vadd.f32 %v209_v7, %v136_v40  ;;  %v504_v44 = vsel %vm498_vm3, %v16073_v30, %v16096_v9 }
 0x14f   :  { %v894_v39 = vsel %vm890_vm8, %v871_v32, %v16133_v48  ;;  %v891_v18 = vsel %vm890_vm8, %v865_v10, %v867_v57  ;;  %v308_v32 = vsel %vm302_vm1, %v15940_v51, %v15952_v11  ;;  %v235_v60 = vadd.f32 %v210_v23, %v137_v5 }
 0x150   :  { %v949_v47 = vmax.f32 %v936_v55, 0.0  ;;  %v950_v58 = vmax.f32 %v937_v63, 0.0  ;;  %v919_v56 = vadd.f32 %v894_v39, %v821_v19  ;;  %v916_v61 = vadd.f32 %v891_v18, %v818_v27 }
 0x151   :  { %v332_v24 = vadd.f32 %v307_v13, %v234_v37  ;;  %v333_v51 = vadd.f32 %v308_v32, %v235_v60 }
 0x152   :  { %962 = vst [vmem:[#allocation2 + $0x8] sm:$0x3f] %v949_v47  ;;  %963 = vst [vmem:[#allocation2 + $0x10] sm:$0x3f] %v950_v58  ;;  %v938_v2 = vadd.f32 %v15790_v50, %v919_v56  ;;  %v935_v21 = vadd.f32 %v15790_v50, %v916_v61  ;;  %v16140_v29 = vpop.permute.xlu0 %192  ;;  %v16142_v8 = vpop.permute.xlu1 %194 }
 0x153   :  { %v430_v35 = vadd.f32 %v405_v26, %v332_v24  ;;  %v431_v43 = vadd.f32 %v406_v53, %v333_v51 }
 0x154   :  { %v951_v12 = vmax.f32 %v938_v2, 0.0  ;;  %v948_v6 = vmax.f32 %v935_v21, 0.0 }
 0x155   :  { %v528_v19 = vadd.f32 %v503_v41, %v430_v35  ;;  %v529_v27 = vadd.f32 %v504_v44, %v431_v43  ;;  %v211_v41 = vsel %vm204_vm0, %v15906_v3, %v16140_v29  ;;  %v212_v44 = vsel %vm204_vm0, %v16140_v29, %v16142_v8  ;;  %v21847_v43 = vld [vmem:[#allocation15_spill] sm:$0xff] }
 0x156   :  { %964 = vst [vmem:[#allocation2 + $0x18] sm:$0x3f] %v951_v12  ;;  %961 = vst [vmem:[#allocation2] sm:$0x3f] %v948_v6  ;;  %v581_v34 = vpop.permute.xlu0 %580  ;;  %v16144_v57 = vpop.permute.xlu1 %582  ;;  %v138_v35 = vmul.f32 %v15657_v52, %v15788_v49 }
 0x157   :  { %v601_v45 = vsel %vm596_vm4, %v15930_v14, %v581_v34  ;;  %v602_v59 = vsel %vm596_vm4, %v581_v34, %v16144_v57 }
 0x158   :  { %v626_v63 = vadd.f32 %v601_v45, %v528_v19  ;;  %v627_v10 = vadd.f32 %v602_v59, %v529_v27  ;;  %v236_v19 = vadd.f32 %v211_v41, %v138_v35 }
 0x159   :  { %v16146_v22 = vld [vmem:[#allocation2 + $0x8] sm:$0x3f]  ;;  %v16148_v31 = vld [vmem:[#allocation2 + $0x10] sm:$0x3f] }
 0x15a   :  { %v16150_v42 = vpop.permute.xlu0 %290  ;;  %1003 = vrot.lane.b32.xlu0 %v16146_v22, %s15422_s0  ;;  %1005 = vrot.lane.b32.xlu1 %v16148_v31, %s15422_s0  ;;  %v16156_v0 = vpop.permute.xlu1 %292 }
 0x15b   :  { %v309_v45 = vsel %vm302_vm1, %v15952_v11, %v16150_v42  ;;  %v310_v59 = vsel %vm302_vm1, %v16150_v42, %v16156_v0 }
 0x15c   :  { %v334_v42 = vadd.f32 %v309_v45, %v236_v19 }
 0x15d   :  { %v16158_v54 = vld [vmem:[#allocation2 + $0x18] sm:$0x3f]  ;;  %v16160_v46 = vld [vmem:[#allocation2] sm:$0x3f] }
 0x15e   :  { %v679_v16 = vpop.permute.xlu0 %678  ;;  %1007 = vrot.lane.b32.xlu0 %v16158_v54, %s15422_s0  ;;  %v16164_v1 = vpop.permute.xlu1 %680  ;;  %1001 = vrot.lane.b32.xlu1 %v16160_v46, %s15422_s0 }
 0x15f   :  { %v699_v30 = vsel %vm694_vm5, %v15972_v62, %v679_v16  ;;  %v700_v55 = vsel %vm694_vm5, %v679_v16, %v16164_v1 }
 0x160   :  { %v724_v47 = vadd.f32 %v699_v30, %v626_v63  ;;  %v725_v58 = vadd.f32 %v700_v55, %v627_v10 }
 0x162   :  { %v16184_v33 = vpop.permute.xlu0 %388  ;;  %1067 = vrot.lane.b32.xlu0 %v16146_v22, %s15424_s21  ;;  %v16188_v4 = vpop.permute.xlu1 %390  ;;  %1069 = vrot.lane.b32.xlu1 %v16148_v31, %s15424_s21 }
 0x163   :  { %v407_v52 = vsel %vm400_vm2, %v15980_v38, %v16184_v33  ;;  %v408_v11 = vsel %vm400_vm2, %v16184_v33, %v16188_v4 }
 0x164   :  { %v432_v10 = vadd.f32 %v407_v52, %v334_v42 }
 0x166   :  { %v777_v28 = vpop.permute.xlu0 %776  ;;  %1071 = vrot.lane.b32.xlu0 %v16158_v54, %s15424_s21  ;;  %v16206_v36 = vpop.permute.xlu1 %778  ;;  %1065 = vrot.lane.b32.xlu1 %v16160_v46, %s15424_s21 }
 0x167   :  { %v797_v14 = vsel %vm792_vm6, %v16043_v20, %v777_v28  ;;  %v798_v62 = vsel %vm792_vm6, %v777_v28, %v16206_v36  ;;  %v139_v28 = vmul.f32 %v21847_v43, %v15788_v49 }
 0x168   :  { %v822_v56 = vadd.f32 %v797_v14, %v724_v47  ;;  %v823_v61 = vadd.f32 %v798_v62, %v725_v58 }
 0x169   :  { %v237_v3 = vadd.f32 %v212_v44, %v139_v28 }
 0x16a   :  { %v487_v39 = vpop.permute.xlu0 %486  ;;  %1131 = vrot.lane.b32.xlu0 %v16146_v22, %s15425_s22  ;;  %v16220_v18 = vpop.permute.xlu1 %488  ;;  %1133 = vrot.lane.b32.xlu1 %v16148_v31, %s15425_s22 }
 0x16b   :  { %v335_v30 = vadd.f32 %v310_v59, %v237_v3  ;;  %v505_v55 = vsel %vm498_vm3, %v16096_v9, %v487_v39  ;;  %v506_v63 = vsel %vm498_vm3, %v487_v39, %v16220_v18 }
 0x16c   :  { %v530_v33 = vadd.f32 %v505_v55, %v432_v10 }
 0x16d   :  { %v433_v14 = vadd.f32 %v408_v11, %v335_v30 }
 0x16e   :  { %v875_v2 = vpop.permute.xlu0 %874  ;;  %1135 = vrot.lane.b32.xlu0 %v16158_v54, %s15425_s22  ;;  %v16230_v21 = vpop.permute.xlu1 %876  ;;  %1129 = vrot.lane.b32.xlu1 %v16160_v46, %s15425_s22 }
 0x16f   :  { %v895_v12 = vsel %vm890_vm8, %v16133_v48, %v875_v2  ;;  %v896_v20 = vsel %vm890_vm8, %v875_v2, %v16230_v21  ;;  %v531_v58 = vadd.f32 %v506_v63, %v433_v14  ;;  %v21848_v14 = vld [vmem:[#allocation16_spill] sm:$0xff] }
 0x170   :  { %v920_v6 = vadd.f32 %v895_v12, %v822_v56  ;;  %v921_v34 = vadd.f32 %v896_v20, %v823_v61 }
 0x172   :  { %v939_v16 = vadd.f32 %v15790_v50, %v920_v6  ;;  %v940_v7 = vadd.f32 %v15790_v50, %v921_v34  ;;  %v16240_v23 = vpop.permute.xlu0 %196  ;;  %v16242_v40 = vpop.permute.xlu1 %198 }
 0x173   :  { %v213_v63 = vsel %vm204_vm0, %v16142_v8, %v16240_v23  ;;  %v214_v10 = vsel %vm204_vm0, %v16240_v23, %v16242_v40 }
 0x174   :  { %v952_v5 = vmax.f32 %v939_v16, 0.0  ;;  %v953_v13 = vmax.f32 %v940_v7, 0.0 }
 0x176   :  { %965 = vst [vmem:[#allocation2 + $0x20] sm:$0x3f] %v952_v5  ;;  %966 = vst [vmem:[#allocation2 + $0x28] sm:$0x3f] %v953_v13  ;;  %v585_v32 = vpop.permute.xlu0 %584  ;;  %v16244_v37 = vpop.permute.xlu1 %586 }
 0x177   :  { %v603_v38 = vsel %vm596_vm4, %v16144_v57, %v585_v32  ;;  %v604_v9 = vsel %vm596_vm4, %v585_v32, %v16244_v37 }
 0x178   :  { %v628_v61 = vadd.f32 %v603_v38, %v530_v33  ;;  %v629_v2 = vadd.f32 %v604_v9, %v531_v58  ;;  %v21849_v38 = vld [vmem:[#allocation17_spill] sm:$0xff] }
 0x179   :  { %v141_v9 = vmul.f32 %v21849_v38, %v15788_v49 }
 0x17a   :  { %v16246_v48 = vpop.permute.xlu0 %294  ;;  %v16248_v60 = vpop.permute.xlu1 %296 }
 0x17b   :  { %v311_v33 = vsel %vm302_vm1, %v16156_v0, %v16246_v48  ;;  %v312_v58 = vsel %vm302_vm1, %v16246_v48, %v16248_v60  ;;  %v239_v8 = vadd.f32 %v214_v10, %v141_v9  ;;  %v21850_v9 = vld [vmem:[#allocation18_spill] sm:$0xff] }
 0x17d   :  { %v16250_v26 = vld [vmem:[#allocation2 + $0x20] sm:$0x3f]  ;;  %v16252_v53 = vld [vmem:[#allocation2 + $0x28] sm:$0x3f]  ;;  %v337_v48 = vadd.f32 %v312_v58, %v239_v8 }
 0x17e   :  { %v683_v24 = vpop.permute.xlu0 %682  ;;  %1009 = vrot.lane.b32.xlu0 %v16250_v26, %s15422_s0  ;;  %v16256_v51 = vpop.permute.xlu1 %684  ;;  %1011 = vrot.lane.b32.xlu1 %v16252_v53, %s15422_s0 }
 0x17f   :  { %v701_v39 = vsel %vm694_vm5, %v16164_v1, %v683_v24  ;;  %v702_v56 = vsel %vm694_vm5, %v683_v24, %v16256_v51 }
 0x180   :  { %v726_v34 = vadd.f32 %v701_v39, %v628_v61  ;;  %v727_v16 = vadd.f32 %v702_v56, %v629_v2 }
 0x182   :  { %v16276_v27 = vpop.permute.xlu0 %392  ;;  %1073 = vrot.lane.b32.xlu0 %v16250_v26, %s15424_s21  ;;  %v16280_v29 = vpop.permute.xlu1 %394  ;;  %1075 = vrot.lane.b32.xlu1 %v16252_v53, %s15424_s21 }
 0x183   :  { %v409_v61 = vsel %vm400_vm2, %v16188_v4, %v16276_v27  ;;  %v410_v0 = vsel %vm400_vm2, %v16276_v27, %v16280_v29 }
 0x186   :  { %v781_v62 = vpop.permute.xlu0 %780  ;;  %1137 = vrot.lane.b32.xlu0 %v16250_v26, %s15425_s22  ;;  %v16296_v47 = vpop.permute.xlu1 %782  ;;  %1139 = vrot.lane.b32.xlu1 %v16252_v53, %s15425_s22 }
 0x187   :  { %v799_v6 = vsel %vm792_vm6, %v16206_v36, %v781_v62  ;;  %v800_v57 = vsel %vm792_vm6, %v781_v62, %v16296_v47  ;;  %v140_v62 = vmul.f32 %v21848_v14, %v15788_v49 }
 0x188   :  { %v824_v7 = vadd.f32 %v799_v6, %v726_v34  ;;  %v825_v5 = vadd.f32 %v800_v57, %v727_v16  ;;  %v435_v16 = vadd.f32 %v410_v0, %v337_v48 }
 0x189   :  { %v238_v39 = vadd.f32 %v213_v63, %v140_v62 }
 0x18a   :  { %v491_v12 = vpop.permute.xlu0 %490  ;;  %v16308_v20 = vpop.permute.xlu1 %492 }
 0x18b   :  { %v336_v2 = vadd.f32 %v311_v33, %v238_v39  ;;  %v507_v6 = vsel %vm498_vm3, %v16220_v18, %v491_v12  ;;  %v508_v57 = vsel %vm498_vm3, %v491_v12, %v16308_v20  ;;  %v142_v33 = vmul.f32 %v21850_v9, %v15788_v49 }
 0x18d   :  { %v434_v34 = vadd.f32 %v409_v61, %v336_v2 }
 0x18e   :  { %v879_v13 = vpop.permute.xlu0 %878  ;;  %v16314_v1 = vpop.permute.xlu1 %880 }
 0x18f   :  { %v897_v32 = vsel %vm890_vm8, %v16230_v21, %v879_v13  ;;  %v898_v24 = vsel %vm890_vm8, %v879_v13, %v16314_v1  ;;  %v532_v27 = vadd.f32 %v507_v6, %v434_v34  ;;  %v533_v13 = vadd.f32 %v508_v57, %v435_v16 }
 0x190   :  { %v922_v41 = vadd.f32 %v897_v32, %v824_v7  ;;  %v923_v44 = vadd.f32 %v898_v24, %v825_v5 }
 0x192   :  { %v941_v36 = vadd.f32 %v15790_v50, %v922_v41  ;;  %v942_v35 = vadd.f32 %v15790_v50, %v923_v44  ;;  %v201_v43 = vpop.permute.xlu0 %200  ;;  %v16322_v28 = vpop.permute.xlu1 %202 }
 0x193   :  { %v216_v62 = vsel %vm204_vm0, %v201_v43, %v16322_v28 }
 0x194   :  { %v954_v45 = vmax.f32 %v941_v36, 0.0  ;;  %v955_v59 = vmax.f32 %v942_v35, 0.0 }
 0x196   :  { %967 = vst [vmem:[#allocation2 + $0x30] sm:$0x3f] %v954_v45  ;;  %968 = vst [vmem:[#allocation2 + $0x38] sm:$0x3f] %v955_v59  ;;  %v589_v19 = vpop.permute.xlu0 %588  ;;  %v16324_v3 = vpop.permute.xlu1 %590 }
 0x197   :  { %v605_v4 = vsel %vm596_vm4, %v16244_v37, %v589_v19  ;;  %v606_v18 = vsel %vm596_vm4, %v589_v19, %v16324_v3  ;;  %v144_v19 = vmul.f32 %v15550_v15, %v15788_v49  ;;  %v143_v15 = vmul.f32 %v15916_v25, %v15788_v49 }
 0x198   :  { %v630_v24 = vadd.f32 %v605_v4, %v532_v27  ;;  %v631_v41 = vadd.f32 %v606_v18, %v533_v13 }
 0x199   :  { %v242_v8 = vadd.f32 %v16322_v28, %v144_v19 }
 0x19a   :  { %v299_v21 = vpop.permute.xlu0 %298  ;;  %v16326_v52 = vpop.permute.xlu1 %300 }
 0x19b   :  { %v340_v49 = vadd.f32 %v16326_v52, %v242_v8 }
 0x19d   :  { %v16328_v11 = vld [vmem:[#allocation2 + $0x30] sm:$0x3f]  ;;  %v16330_v42 = vld [vmem:[#allocation2 + $0x38] sm:$0x3f] }
 0x19e   :  { %v687_v30 = vpop.permute.xlu0 %686  ;;  %1013 = vrot.lane.b32.xlu0 %v16328_v11, %s15422_s0  ;;  %v16334_v55 = vpop.permute.xlu1 %688  ;;  %1015 = vrot.lane.b32.xlu1 %v16330_v42, %s15422_s0 }
 0x19f   :  { %v703_v12 = vsel %vm694_vm5, %v16256_v51, %v687_v30  ;;  %v704_v32 = vsel %vm694_vm5, %v687_v30, %v16334_v55  ;;  %v215_v30 = vsel %vm204_vm0, %v16242_v40, %v201_v43  ;;  %v313_v40 = vsel %vm302_vm1, %v16248_v60, %v299_v21 }
 0x1a0   :  { %v728_v45 = vadd.f32 %v703_v12, %v630_v24  ;;  %v729_v59 = vadd.f32 %v704_v32, %v631_v41  ;;  %v314_v43 = vsel %vm302_vm1, %v299_v21, %v16326_v52  ;;  %v240_v61 = vadd.f32 %v215_v30, %v142_v33 }
 0x1a2   :  { %v397_v56 = vpop.permute.xlu0 %396  ;;  %1077 = vrot.lane.b32.xlu0 %v16328_v11, %s15424_s21  ;;  %v399_v23 = vpop.permute.xlu1 %398  ;;  %1079 = vrot.lane.b32.xlu1 %v16330_v42, %s15424_s21  ;;  %v338_v57 = vadd.f32 %v313_v40, %v240_v61 }
 0x1a3   :  { %v411_v25 = vsel %vm400_vm2, %v16280_v29, %v397_v56  ;;  %v412_v28 = vsel %vm400_vm2, %v397_v56, %v399_v23  ;;  %v438_v21 = vadd.f32 %v399_v23, %v340_v49 }
 0x1a4   :  { %v436_v18 = vadd.f32 %v411_v25, %v338_v57 }
 0x1a6   :  { %v785_v7 = vpop.permute.xlu0 %784  ;;  %1141 = vrot.lane.b32.xlu0 %v16328_v11, %s15425_s22  ;;  %v16370_v5 = vpop.permute.xlu1 %786  ;;  %1143 = vrot.lane.b32.xlu1 %v16330_v42, %s15425_s22 }
 0x1a7   :  { %v801_v35 = vsel %vm792_vm6, %v16296_v47, %v785_v7  ;;  %v802_v37 = vsel %vm792_vm6, %v785_v7, %v16370_v5 }
 0x1a8   :  { %v826_v63 = vadd.f32 %v801_v35, %v728_v45  ;;  %v827_v51 = vadd.f32 %v802_v37, %v729_v59 }
 0x1aa   :  { %v495_v44 = vpop.permute.xlu0 %494  ;;  %v497_v36 = vpop.permute.xlu1 %496 }
 0x1ab   :  { %v509_v7 = vsel %vm498_vm3, %v16308_v20, %v495_v44  ;;  %v510_v4 = vsel %vm498_vm3, %v495_v44, %v497_v36  ;;  %v536_v12 = vadd.f32 %v497_v36, %v438_v21 }
 0x1ac   :  { %v534_v32 = vadd.f32 %v509_v7, %v436_v18 }
 0x1ae   :  { %v883_v10 = vpop.permute.xlu0 %882  ;;  %v885_v14 = vpop.permute.xlu1 %884 }
 0x1af   :  { %v899_v47 = vsel %vm890_vm8, %v16314_v1, %v883_v10  ;;  %v900_v38 = vsel %vm890_vm8, %v883_v10, %v885_v14  ;;  %v241_v1 = vadd.f32 %v216_v62, %v143_v15 }
 0x1b0   :  { %v924_v58 = vadd.f32 %v899_v47, %v826_v63  ;;  %v925_v39 = vadd.f32 %v900_v38, %v827_v51 }
 0x1b1   :  { %v339_v60 = vadd.f32 %v314_v43, %v241_v1 }
 0x1b2   :  { %v943_v0 = vadd.f32 %v15790_v50, %v924_v58  ;;  %v944_v2 = vadd.f32 %v15790_v50, %v925_v39  ;;  %v593_v48 = vpop.permute.xlu0 %592  ;;  %v595_v6 = vpop.permute.xlu1 %594 }
 0x1b3   :  { %v437_v27 = vadd.f32 %v412_v28, %v339_v60  ;;  %v607_v29 = vsel %vm596_vm4, %v16324_v3, %v593_v48  ;;  %v608_v56 = vsel %vm596_vm4, %v593_v48, %v595_v6  ;;  %v634_v23 = vadd.f32 %v595_v6, %v536_v12 }
 0x1b4   :  { %v956_v34 = vmax.f32 %v943_v0, 0.0  ;;  %v957_v16 = vmax.f32 %v944_v2, 0.0  ;;  %v632_v44 = vadd.f32 %v607_v29, %v534_v32  ;;  %vm13892_vm4 = vcmask 15360  }
 0x1b5   :  { %v535_v24 = vadd.f32 %v510_v4, %v437_v27 }
 0x1b6   :  { %969 = vst [vmem:[#allocation2 + $0x40] sm:$0x3f] %v956_v34  ;;  %970 = vst [vmem:[#allocation2 + $0x48] sm:$0x3f] %v957_v16  ;;  %v691_v52 = vpop.permute.xlu0 %690  ;;  %v693_v13 = vpop.permute.xlu1 %692 }
 0x1b7   :  { %v705_v20 = vsel %vm694_vm5, %v16334_v55, %v691_v52  ;;  %v706_v41 = vsel %vm694_vm5, %v691_v52, %v693_v13  ;;  %v633_v35 = vadd.f32 %v608_v56, %v535_v24  ;;  %v732_v59 = vadd.f32 %v693_v13, %v634_v23 }
 0x1b8   :  { %v730_v19 = vadd.f32 %v705_v20, %v632_v44 }
 0x1b9   :  { %v731_v63 = vadd.f32 %v706_v41, %v633_v35 }
 0x1ba   :  { %v789_v37 = vpop.permute.xlu0 %788  ;;  %v791_v45 = vpop.permute.xlu1 %790 }
 0x1bb   :  { %v803_v36 = vsel %vm792_vm6, %v16370_v5, %v789_v37  ;;  %v804_v3 = vsel %vm792_vm6, %v789_v37, %v791_v45  ;;  %v830_v51 = vadd.f32 %v791_v45, %v732_v59 }
 0x1bc   :  { %v828_v55 = vadd.f32 %v803_v36, %v730_v19  ;;  %v829_v62 = vadd.f32 %v804_v3, %v731_v63 }
 0x1bd   :  { %v16422_v10 = vld [vmem:[#allocation2 + $0x40] sm:$0x3f]  ;;  %v16424_v30 = vld [vmem:[#allocation2 + $0x48] sm:$0x3f] }
 0x1be   :  { %v887_v47 = vpop.permute.xlu0 %886  ;;  %1017 = vrot.lane.b32.xlu0 %v16422_v10, %s15422_s0  ;;  %v889_v38 = vpop.permute.xlu1 %888  ;;  %1019 = vrot.lane.b32.xlu1 %v16424_v30, %s15422_s0 }
 0x1bf   :  { %v901_v5 = vsel %vm890_vm8, %v885_v14, %v887_v47  ;;  %v902_v9 = vsel %vm890_vm8, %v887_v47, %v889_v38  ;;  %v928_v33 = vadd.f32 %v889_v38, %v830_v51 }
 0x1c0   :  { %v926_v15 = vadd.f32 %v901_v5, %v828_v55  ;;  %v927_v58 = vadd.f32 %v902_v9, %v829_v62 }
 0x1c1   :  { %v947_v39 = vadd.f32 %v15790_v50, %v928_v33 }
 0x1c2   :  { %v945_v8 = vadd.f32 %v15790_v50, %v926_v15  ;;  %v946_v40 = vadd.f32 %v15790_v50, %v927_v58  ;;  %1081 = vrot.lane.b32.xlu0 %v16422_v10, %s15424_s21  ;;  %1083 = vrot.lane.b32.xlu1 %v16424_v30, %s15424_s21 }
 0x1c3   :  { %v960_v43 = vmax.f32 %v947_v39, 0.0 }
 0x1c4   :  { %v958_v14 = vmax.f32 %v945_v8, 0.0  ;;  %v959_v61 = vmax.f32 %v946_v40, 0.0 }
 0x1c5   :  { %974 = vst.msk [vmem:[#allocation2 + $0x60] sm:$0x3f] %vm973_vm9, %v960_v43 }
 0x1c6   :  { %971 = vst [vmem:[#allocation2 + $0x50] sm:$0x3f] %v958_v14  ;;  %972 = vst [vmem:[#allocation2 + $0x58] sm:$0x3f] %v959_v61  ;;  %1145 = vrot.lane.b32.xlu0 %v16422_v10, %s15425_s22  ;;  %1147 = vrot.lane.b32.xlu1 %v16424_v30, %s15425_s22 }
 0x1cc   :  { %v1004_v50 = vpop.permute.xlu0 %1003  ;;  %v1006_v1 = vpop.permute.xlu1 %1005  ;;  %v16462_v16 = vld [vmem:[#allocation2 + $0x60] sm:$0x3f] }
 0x1cd   :  { %v16444_v0 = vld [vmem:[#allocation2 + $0x50] sm:$0x3f]  ;;  %v16446_v2 = vld [vmem:[#allocation2 + $0x58] sm:$0x3f]  ;;  %v1028_v28 = vsel %vm204_vm0, %v1004_v50, %v1006_v1 }
 0x1ce   :  { %1021 = vrot.lane.b32.xlu0 %v16444_v0, %s15422_s0  ;;  %1023 = vrot.lane.b32.xlu1 %v16446_v2, %s15422_s0  ;;  %v1053_v21 = vmax.f32 %v16146_v22, %v1028_v28 }
 0x1d0   :  { %v1008_v48 = vpop.permute.xlu0 %1007  ;;  %v1002_v6 = vpop.permute.xlu1 %1001 }
 0x1d1   :  { %v1029_v7 = vsel %vm204_vm0, %v1006_v1, %v1008_v48  ;;  %v1027_v4 = vsel %vm204_vm0, %v1002_v6, %v1004_v50 }
 0x1d2   :  { %1085 = vrot.lane.b32.xlu0 %v16444_v0, %s15424_s21  ;;  %1087 = vrot.lane.b32.xlu1 %v16446_v2, %s15424_s21  ;;  %v1054_v22 = vmax.f32 %v16148_v31, %v1029_v7  ;;  %v1052_v56 = vmax.f32 %v16160_v46, %v1027_v4 }
 0x1d4   :  { %v1068_v49 = vpop.permute.xlu0 %1067  ;;  %v1070_v25 = vpop.permute.xlu1 %1069 }
 0x1d5   :  { %v1092_v34 = vsel %vm400_vm2, %v1068_v49, %v1070_v25 }
 0x1d6   :  { %1149 = vrot.lane.b32.xlu0 %v16444_v0, %s15425_s22  ;;  %1151 = vrot.lane.b32.xlu1 %v16446_v2, %s15425_s22  ;;  %v1117_v18 = vmax.f32 %v1053_v21, %v1092_v34 }
 0x1d8   :  { %v1072_v57 = vpop.permute.xlu0 %1071  ;;  %v1066_v60 = vpop.permute.xlu1 %1065 }
 0x1d9   :  { %v1093_v13 = vsel %vm400_vm2, %v1070_v25, %v1072_v57  ;;  %v1091_v12 = vsel %vm400_vm2, %v1066_v60, %v1068_v49 }
 0x1da   :  { %1089 = vrot.lane.b32.xlu1 %v16462_v16, %s15424_s21  ;;  %1025 = vrot.lane.b32.xlu0 %v16462_v16, %s15422_s0  ;;  %v1118_v24 = vmax.f32 %v1054_v22, %v1093_v13  ;;  %v1116_v23 = vmax.f32 %v1052_v56, %v1091_v12  ;;  %s15434_s21 = smov 14  }
 0x1dc   :  { %v1132_v27 = vpop.permute.xlu0 %1131  ;;  %v1134_v52 = vpop.permute.xlu1 %1133 }
 0x1dd   :  { %v1156_v29 = vsel %vm498_vm3, %v1132_v27, %v1134_v52 }
 0x1de   :  { %v1181_v32 = vmax.f32 %v1117_v18, %v1156_v29  ;;  %1153 = vrot.lane.b32.xlu0 %v16462_v16, %s15425_s22  ;;  %s15436_s22 = smov 28  }
 0x1e0   :  { %1194 = vst [vmem:[#allocation3 + $0x8] sm:$0x3f] %v1181_v32  ;;  %v1136_v20 = vpop.permute.xlu0 %1135  ;;  %v1130_v41 = vpop.permute.xlu1 %1129 }
 0x1e1   :  { %v1157_v44 = vsel %vm498_vm3, %v1134_v52, %v1136_v20  ;;  %v1155_v35 = vsel %vm498_vm3, %v1130_v41, %v1132_v27 }
 0x1e2   :  { %v1182_v37 = vmax.f32 %v1118_v24, %v1157_v44  ;;  %v1180_v45 = vmax.f32 %v1116_v23, %v1155_v35 }
 0x1e4   :  { %1195 = vst [vmem:[#allocation3 + $0x10] sm:$0x3f] %v1182_v37  ;;  %1193 = vst [vmem:[#allocation3] sm:$0x3f] %v1180_v45 }
 0x1e7   :  { %v16480_v31 = vld [vmem:[#allocation3 + $0x8] sm:$0x3f] }
 0x1e8   :  { %1239 = vrot.lane.b32.xlu1 %v16480_v31, %s15423_s20 }
 0x1eb   :  { %v16484_v46 = vld [vmem:[#allocation3] sm:$0x3f]  ;;  %v16486_v59 = vld [vmem:[#allocation3 + $0x10] sm:$0x3f] }
 0x1ec   :  { %1237 = vrot.lane.b32.xlu1 %v16484_v46, %s15423_s20  ;;  %1241 = vrot.lane.b32.xlu0 %v16486_v59, %s15423_s20 }
 0x1f0   :  { %v1010_v36 = vpop.permute.xlu0 %1009  ;;  %v1012_v3 = vpop.permute.xlu1 %1011 }
 0x1f1   :  { %v1030_v19 = vsel %vm204_vm0, %v1008_v48, %v1010_v36  ;;  %v1031_v63 = vsel %vm204_vm0, %v1010_v36, %v1012_v3 }
 0x1f2   :  { %v1055_v38 = vmax.f32 %v16158_v54, %v1030_v19  ;;  %v1056_v5 = vmax.f32 %v16250_v26, %v1031_v63  ;;  %v16507_v54 = vld [vmem:[%s21761_s3] sm:$0xff]  ;;  %v16523_v26 = vld [vmem:[%s21761_s3 + $0x8] sm:$0xff] }
 0x1f4   :  { %v1074_v51 = vpop.permute.xlu0 %1073  ;;  %v1076_v55 = vpop.permute.xlu1 %1075 }
 0x1f5   :  { %v1094_v62 = vsel %vm400_vm2, %v1072_v57, %v1074_v51  ;;  %v1095_v47 = vsel %vm400_vm2, %v1074_v51, %v1076_v55 }
 0x1f6   :  { %v1119_v9 = vmax.f32 %v1055_v38, %v1094_v62  ;;  %v1120_v33 = vmax.f32 %v1056_v5, %v1095_v47 }
 0x1f8   :  { %v1138_v15 = vpop.permute.xlu0 %1137  ;;  %v1140_v58 = vpop.permute.xlu1 %1139 }
 0x1f9   :  { %v1158_v39 = vsel %vm498_vm3, %v1136_v20, %v1138_v15  ;;  %v1159_v8 = vsel %vm498_vm3, %v1138_v15, %v1140_v58 }
 0x1fa   :  { %v1183_v40 = vmax.f32 %v1119_v9, %v1158_v39  ;;  %v1184_v43 = vmax.f32 %v1120_v33, %v1159_v8 }
 0x1fc   :  { %1196 = vst [vmem:[#allocation3 + $0x18] sm:$0x3f] %v1183_v40  ;;  %1197 = vst [vmem:[#allocation3 + $0x20] sm:$0x3f] %v1184_v43 }
 0x203   :  { %v16500_v14 = vld [vmem:[#allocation3 + $0x18] sm:$0x3f]  ;;  %v16502_v61 = vld [vmem:[#allocation3 + $0x20] sm:$0x3f] }
 0x204   :  { %14508 = vmatprep.subr.msk.mxu0 %vm1282_vm10, %v16500_v14  ;;  %1245 = vrot.lane.b32.xlu1 %v16502_v61, %s15423_s20 }
 0x205   :  { %1243 = vrot.lane.b32.xlu0 %v16500_v14, %s15423_s20  ;;  %14509 = vmatpush1.msk.msra.mxu0 %vm1282_vm10, %v16486_v59 }
 0x206   :  { %14510 = vmatmul.mubr.msk.f32.vlgmr.msra.gmra.mxu0 %vm1275_vm11, %v16507_v54 }
 0x207   :  { %2025 = vmatprep.mubr.f32.mxu0 %v15430_v17 }
 0x20a   :  { %14511 = vmatmul.mubr.msk.f32.gmra.mxu0 %vm1275_vm11, %v16523_v26 }
 0x20b   :  { %2173 = vmatprep.mubr.f32.mxu0 %v15430_v17 }
 0x210   :  { %v1014_v50 = vpop.permute.xlu0 %1013  ;;  %v1016_v1 = vpop.permute.xlu1 %1015 }
 0x211   :  { %v1032_v48 = vsel %vm204_vm0, %v1012_v3, %v1014_v50  ;;  %v1033_v6 = vsel %vm204_vm0, %v1014_v50, %v1016_v1 }
 0x212   :  { %v1057_v60 = vmax.f32 %v16252_v53, %v1032_v48  ;;  %v1058_v34 = vmax.f32 %v16328_v11, %v1033_v6 }
 0x214   :  { %v1078_v49 = vpop.permute.xlu0 %1077  ;;  %v1080_v25 = vpop.permute.xlu1 %1079 }
 0x215   :  { %v1096_v28 = vsel %vm400_vm2, %v1076_v55, %v1078_v49  ;;  %v1097_v57 = vsel %vm400_vm2, %v1078_v49, %v1080_v25 }
 0x216   :  { %v1121_v21 = vmax.f32 %v1057_v60, %v1096_v28  ;;  %v1122_v7 = vmax.f32 %v1058_v34, %v1097_v57 }
 0x218   :  { %v1142_v4 = vpop.permute.xlu0 %1141  ;;  %v1144_v18 = vpop.permute.xlu1 %1143 }
 0x219   :  { %v1160_v27 = vsel %vm498_vm3, %v1140_v58, %v1142_v4  ;;  %v1161_v52 = vsel %vm498_vm3, %v1142_v4, %v1144_v18 }
 0x21a   :  { %v1185_v13 = vmax.f32 %v1121_v21, %v1160_v27  ;;  %v1186_v12 = vmax.f32 %v1122_v7, %v1161_v52 }
 0x21c   :  { %1198 = vst [vmem:[#allocation3 + $0x28] sm:$0x3f] %v1185_v13  ;;  %1199 = vst [vmem:[#allocation3 + $0x30] sm:$0x3f] %v1186_v12 }
 0x223   :  { %v16536_v29 = vld [vmem:[#allocation3 + $0x30] sm:$0x3f]  ;;  %v16538_v22 = vld [vmem:[#allocation3 + $0x28] sm:$0x3f] }
 0x224   :  { %1249 = vrot.lane.b32.xlu1 %v16536_v29, %s15423_s20  ;;  %1247 = vrot.lane.b32.xlu0 %v16538_v22, %s15423_s20 }
 0x230   :  { %v1018_v53 = vpop.permute.xlu0 %1017  ;;  %v1020_v11 = vpop.permute.xlu1 %1019 }
 0x231   :  { %v1034_v56 = vsel %vm204_vm0, %v1016_v1, %v1018_v53  ;;  %v1035_v32 = vsel %vm204_vm0, %v1018_v53, %v1020_v11 }
 0x232   :  { %v1059_v44 = vmax.f32 %v16330_v42, %v1034_v56  ;;  %v1060_v35 = vmax.f32 %v16422_v10, %v1035_v32 }
 0x234   :  { %v1082_v24 = vpop.permute.xlu0 %1081  ;;  %v1084_v23 = vpop.permute.xlu1 %1083 }
 0x235   :  { %v1098_v20 = vsel %vm400_vm2, %v1080_v25, %v1082_v24  ;;  %v1099_v41 = vsel %vm400_vm2, %v1082_v24, %v1084_v23  ;;  %v16613_v24 = vld [vmem:[%s21761_s3 + $0x10] sm:$0xff] }
 0x236   :  { %v1123_v37 = vmax.f32 %v1059_v44, %v1098_v20  ;;  %v1124_v45 = vmax.f32 %v1060_v35, %v1099_v41  ;;  %v16632_v20 = vld [vmem:[%s21761_s3 + $0x18] sm:$0xff] }
 0x238   :  { %v1146_v36 = vpop.permute.xlu0 %1145  ;;  %v1148_v3 = vpop.permute.xlu1 %1147 }
 0x239   :  { %v1162_v19 = vsel %vm498_vm3, %v1144_v18, %v1146_v36  ;;  %v1163_v63 = vsel %vm498_vm3, %v1146_v36, %v1148_v3 }
 0x23a   :  { %v1187_v51 = vmax.f32 %v1123_v37, %v1162_v19  ;;  %v1188_v55 = vmax.f32 %v1124_v45, %v1163_v63 }
 0x23c   :  { %1200 = vst [vmem:[#allocation3 + $0x38] sm:$0x3f] %v1187_v51  ;;  %1201 = vst [vmem:[#allocation3 + $0x40] sm:$0x3f] %v1188_v55 }
 0x240   :  { %v1022_v62 = vpop.permute.xlu0 %1021  ;;  %v1024_v47 = vpop.permute.xlu1 %1023 }
 0x241   :  { %v1036_v38 = vsel %vm204_vm0, %v1020_v11, %v1022_v62  ;;  %v1037_v42 = vsel %vm204_vm0, %v1022_v62, %v1024_v47 }
 0x242   :  { %v1061_v39 = vmax.f32 %v16424_v30, %v1036_v38  ;;  %v1062_v8 = vmax.f32 %v16444_v0, %v1037_v42  ;;  %v16771_v38 = vld [vmem:[#allocation3 + $0x8] sm:$0x3f] }
 0x243   :  { %v16554_v5 = vld [vmem:[#allocation3 + $0x38] sm:$0x3f]  ;;  %v16556_v10 = vld [vmem:[#allocation3 + $0x40] sm:$0x3f] }
 0x244   :  { %v1086_v9 = vpop.permute.xlu0 %1085  ;;  %14516 = vmatprep.subr.msk.mxu0 %vm1282_vm10, %v16554_v5  ;;  %v1088_v33 = vpop.permute.xlu1 %1087  ;;  %1253 = vrot.lane.b32.xlu1 %v16556_v10, %s15423_s20 }
 0x245   :  { %v1100_v15 = vsel %vm400_vm2, %v1084_v23, %v1086_v9  ;;  %v1101_v58 = vsel %vm400_vm2, %v1086_v9, %v1088_v33  ;;  %1251 = vrot.lane.b32.xlu0 %v16554_v5, %s15423_s20  ;;  %14517 = vmatpush1.msk.msra.mxu0 %vm1282_vm10, %v16536_v29  ;;  %v16615_v23 = vld [vmem:[#allocation4 + $0x68] sm:$0xff]  ;;  %v16784_v9 = vld [vmem:[#allocation3] sm:$0x3f] }
 0x246   :  { %14518 = vmatmul.mubr.msk.f32.vlgmr.msra.gmra.mxu0 %vm1275_vm11, %v16507_v54  ;;  %v1125_v40 = vmax.f32 %v1061_v39, %v1100_v15  ;;  %v1126_v43 = vmax.f32 %v1062_v8, %v1101_v58  ;;  %v16791_v58 = vld [vmem:[#allocation3 + $0x28] sm:$0x3f]  ;;  %v16796_v8 = vld [vmem:[#allocation3 + $0x20] sm:$0x3f] }
 0x247   :  { %2179 = vmatprep.mubr.f32.mxu0 %v15430_v17 }
 0x248   :  { %v1150_v50 = vpop.permute.xlu0 %1149  ;;  %v1152_v1 = vpop.permute.xlu1 %1151 }
 0x249   :  { %v1164_v48 = vsel %vm498_vm3, %v1148_v3, %v1150_v50  ;;  %v1165_v6 = vsel %vm498_vm3, %v1150_v50, %v1152_v1 }
 0x24a   :  { %v1189_v49 = vmax.f32 %v1125_v40, %v1164_v48  ;;  %v1190_v25 = vmax.f32 %v1126_v43, %v1165_v6  ;;  %14519 = vmatmul.mubr.msk.f32.gmra.mxu0 %vm1275_vm11, %v16523_v26  ;;  %v16816_v48 = vld [vmem:[#allocation3 + $0x30] sm:$0x3f] }
 0x24b   :  { %2327 = vmatprep.mubr.f32.mxu0 %v15430_v17 }
 0x24c   :  { %1202 = vst [vmem:[#allocation3 + $0x48] sm:$0x3f] %v1189_v49  ;;  %1203 = vst [vmem:[#allocation3 + $0x50] sm:$0x3f] %v1190_v25  ;;  %v1090_v30 = vpop.permute.xlu1 %1089  ;;  %v1026_v0 = vpop.permute.xlu0 %1025 }
 0x24d   :  { %v1038_v28 = vsel %vm204_vm0, %v1024_v47, %v1026_v0  ;;  %v1064_v57 = vmax.f32 %v16462_v16, %v1026_v0  ;;  %v1102_v34 = vsel %vm400_vm2, %v1088_v33, %v1090_v30  ;;  %vm6300_vm0 = vcmask 97280  }
 0x24e   :  { %v1063_v60 = vmax.f32 %v16446_v2, %v1038_v28  ;;  %vm44_vm2 = vcmask 1047808  }
 0x24f   :  { %v1128_v21 = vmax.f32 %v1064_v57, %v1090_v30  ;;  %v16831_v30 = vld [vmem:[#allocation3 + $0x40] sm:$0x3f] }
 0x250   :  { %v1127_v7 = vmax.f32 %v1063_v60, %v1102_v34  ;;  %v1154_v4 = vpop.permute.xlu0 %1153 }
 0x251   :  { %v1166_v18 = vsel %vm498_vm3, %v1152_v1, %v1154_v4  ;;  %v1192_v27 = vmax.f32 %v1128_v21, %v1154_v4  ;;  %v16811_v1 = vld [vmem:[#allocation3 + $0x38] sm:$0x3f]  ;;  %v16854_v21 = vld [vmem:[%s21761_s3 + $0x20] sm:$0xff]  ;;  %vm6985_vm3 = vcmask 261120  }
 0x252   :  { %v1191_v52 = vmax.f32 %v1127_v7, %v1166_v18  ;;  %v16860_v7 = vld [vmem:[#allocation3 + $0x68] sm:$0x3f]  ;;  %v16879_v18 = vld [vmem:[%s21761_s3 + $0x28] sm:$0xff] }
 0x253   :  { %1205 = vst.msk [vmem:[#allocation3 + $0x60] sm:$0x3f] %vm973_vm9, %v1192_v27  ;;  %v16584_v17 = vld [vmem:[#allocation3 + $0x50] sm:$0x3f]  ;;  %v16586_v13 = vld [vmem:[#allocation3 + $0x48] sm:$0x3f] }
 0x254   :  { %1204 = vst [vmem:[#allocation3 + $0x58] sm:$0x3f] %v1191_v52  ;;  %1257 = vrot.lane.b32.xlu1 %v16584_v17, %s15423_s20  ;;  %1255 = vrot.lane.b32.xlu0 %v16586_v13, %s15423_s20  ;;  %v16827_v25 = vld [vmem:[#allocation3 + $0x48] sm:$0x3f]  ;;  %v16849_v34 = vld [vmem:[#allocation3 + $0x50] sm:$0x3f] }
 0x25a   :  { %v1240_v2 = vpop.permute.xlu1 %1239  ;;  %v16592_v16 = vld [vmem:[#allocation3 + $0x60] sm:$0x3f] }
 0x25b   :  { %1261 = vrot.lane.b32.xlu1 %v16592_v16, %s15423_s20  ;;  %v16596_v12 = vld [vmem:[#allocation3 + $0x58] sm:$0x3f] }
 0x25c   :  { %1259 = vrot.lane.b32.xlu0 %v16596_v12, %s15423_s20  ;;  %14524 = vmatprep.subr.msk.mxu0 %vm1282_vm10, %v16596_v12  ;;  %v16842_v57 = vld [vmem:[#allocation3 + $0x58] sm:$0x3f] }
 0x25d   :  { %14525 = vmatpush1.msk.msra.mxu0 %vm1282_vm10, %v16584_v17 }
 0x25e   :  { %v1238_v53 = vpop.permute.xlu1 %1237  ;;  %v1242_v11 = vpop.permute.xlu0 %1241  ;;  %14526 = vmatmul.mubr.msk.f32.vlgmr.msra.gmra.mxu0 %vm1275_vm11, %v16507_v54 }
 0x25f   :  { %2422 = vrot.lane.b32.xlu1 %v16486_v59, %s15431_s12  ;;  %v1264_v56 = vsel %vm302_vm1, %v1240_v2, %v1242_v11  ;;  %v1263_v32 = vsel %vm302_vm1, %v1238_v53, %v1240_v2  ;;  %2333 = vmatprep.mubr.f32.mxu0 %v16615_v23 }
 0x260   :  { %2442 = vrot.lane.b32.xlu0 %v16592_v16, %s15431_s12  ;;  %14477 = vmatprep.subr.msk.mxu1 %vm1282_vm10, %v1264_v56 }
 0x261   :  { %14478 = vmatpush1.msk.msra.mxu1 %vm1282_vm10, %v1263_v32 }
 0x262   :  { %14479 = vmatmul.mubr.msk.f32.vlgmr.msra.gmra.mxu1 %vm1275_vm11, %v16613_v24  ;;  %14527 = vmatmul.mubr.msk.f32.gmra.mxu0 %vm1275_vm11, %v16523_v26 }
 0x263   :  { %2424 = vrot.lane.b32.xlu1 %v16500_v14, %s15431_s12  ;;  %1379 = vmatprep.mubr.f32.mxu1 %v16615_v23 }
 0x264   :  { %2420 = vrot.lane.b32.xlu0 %v16480_v31, %s15431_s12  ;;  %2553 = vmatprep.mubr.f32.mxu0 %v16615_v23 }
 0x266   :  { %14480 = vmatmul.mubr.msk.f32.gmra.mxu1 %vm1275_vm11, %v16632_v20 }
 0x267   :  { %2428 = vrot.lane.b32.xlu1 %v16538_v22, %s15431_s12  ;;  %1450 = vmatprep.mubr.f32.mxu1 %v16615_v23 }
 0x268   :  { %2418 = vrot.lane.b32.xlu0 %v16484_v46, %s15431_s12 }
 0x26b   :  { %2432 = vrot.lane.b32.xlu1 %v16554_v5, %s15431_s12 }
 0x26c   :  { %2426 = vrot.lane.b32.xlu0 %v16502_v61, %s15431_s12 }
 0x26f   :  { %2436 = vrot.lane.b32.xlu1 %v16586_v13, %s15431_s12 }
 0x270   :  { %2430 = vrot.lane.b32.xlu0 %v16536_v29, %s15431_s12 }
 0x273   :  { %2440 = vrot.lane.b32.xlu1 %v16596_v12, %s15431_s12 }
 0x274   :  { %2434 = vrot.lane.b32.xlu0 %v16556_v10, %s15431_s12 }
 0x276   :  { %v1246_v41 = vpop.permute.xlu1 %1245 }
 0x277   :  { %v1244_v44 = vpop.permute.xlu0 %1243  ;;  %3057 = vrot.lane.b32.xlu1 %v16480_v31, %s15427_s24 }
 0x278   :  { %v1265_v35 = vsel %vm302_vm1, %v1242_v11, %v1244_v44  ;;  %2438 = vrot.lane.b32.xlu0 %v16584_v17, %s15431_s12  ;;  %v1266_v37 = vsel %vm302_vm1, %v1244_v44, %v1246_v41 }
 0x279   :  { %14481 = vmatprep.subr.msk.mxu1 %vm1282_vm10, %v1266_v37 }
 0x27a   :  { %14482 = vmatpush1.msk.msra.mxu1 %vm1282_vm10, %v1265_v35 }
 0x27b   :  { %3055 = vrot.lane.b32.xlu1 %v16484_v46, %s15427_s24  ;;  %14483 = vmatmul.mubr.msk.f32.vlgmr.msra.gmra.mxu1 %vm1275_vm11, %v16613_v24 }
 0x27c   :  { %3059 = vrot.lane.b32.xlu0 %v16486_v59, %s15427_s24  ;;  %1456 = vmatprep.mubr.f32.mxu1 %v16615_v23 }
 0x27f   :  { %3063 = vrot.lane.b32.xlu1 %v16502_v61, %s15427_s24  ;;  %14484 = vmatmul.mubr.msk.f32.gmra.mxu1 %vm1275_vm11, %v16632_v20 }
 0x280   :  { %3061 = vrot.lane.b32.xlu0 %v16500_v14, %s15427_s24  ;;  %1527 = vmatprep.mubr.f32.mxu1 %v16615_v23 }
 0x283   :  { %3067 = vrot.lane.b32.xlu1 %v16536_v29, %s15427_s24 }
 0x284   :  { %3065 = vrot.lane.b32.xlu0 %v16538_v22, %s15427_s24 }
 0x287   :  { %3071 = vrot.lane.b32.xlu1 %v16556_v10, %s15427_s24 }
 0x288   :  { %3069 = vrot.lane.b32.xlu0 %v16554_v5, %s15427_s24 }
 0x28b   :  { %3079 = vrot.lane.b32.xlu1 %v16592_v16, %s15427_s24 }
 0x28c   :  { %3073 = vrot.lane.b32.xlu0 %v16586_v13, %s15427_s24 }
 0x28f   :  { %3075 = vrot.lane.b32.xlu1 %v16584_v17, %s15427_s24 }
 0x290   :  { %3077 = vrot.lane.b32.xlu0 %v16596_v12, %s15427_s24 }
 0x293   :  { %3695 = vrot.lane.b32.xlu1 %v16486_v59, %s15429_s26 }
 0x294   :  { %3693 = vrot.lane.b32.xlu0 %v16480_v31, %s15429_s26 }
 0x296   :  { %v1250_v45 = vpop.permute.xlu1 %1249  ;;  %v1248_v36 = vpop.permute.xlu0 %1247 }
 0x297   :  { %v1267_v3 = vsel %vm302_vm1, %v1246_v41, %v1248_v36  ;;  %3697 = vrot.lane.b32.xlu1 %v16500_v14, %s15429_s26  ;;  %v1268_v19 = vsel %vm302_vm1, %v1248_v36, %v1250_v45 }
 0x298   :  { %3691 = vrot.lane.b32.xlu0 %v16484_v46, %s15429_s26  ;;  %14485 = vmatprep.subr.msk.mxu1 %vm1282_vm10, %v1268_v19 }
 0x299   :  { %14486 = vmatpush1.msk.msra.mxu1 %vm1282_vm10, %v1267_v3 }
 0x29a   :  { %14487 = vmatmul.mubr.msk.f32.vlgmr.msra.gmra.mxu1 %vm1275_vm11, %v16613_v24 }
 0x29b   :  { %3701 = vrot.lane.b32.xlu1 %v16538_v22, %s15429_s26  ;;  %1533 = vmatprep.mubr.f32.mxu1 %v16615_v23 }
 0x29c   :  { %3699 = vrot.lane.b32.xlu0 %v16502_v61, %s15429_s26 }
 0x29e   :  { %14488 = vmatmul.mubr.msk.f32.gmra.mxu1 %vm1275_vm11, %v16632_v20 }
 0x29f   :  { %3705 = vrot.lane.b32.xlu1 %v16554_v5, %s15429_s26  ;;  %1604 = vmatprep.mubr.f32.mxu1 %v16615_v23 }
 0x2a0   :  { %3703 = vrot.lane.b32.xlu0 %v16536_v29, %s15429_s26 }
 0x2a3   :  { %3709 = vrot.lane.b32.xlu1 %v16586_v13, %s15429_s26 }
 0x2a4   :  { %3707 = vrot.lane.b32.xlu0 %v16556_v10, %s15429_s26 }
 0x2a7   :  { %3713 = vrot.lane.b32.xlu1 %v16596_v12, %s15429_s26 }
 0x2a8   :  { %3711 = vrot.lane.b32.xlu0 %v16584_v17, %s15429_s26 }
 0x2ab   :  { %4329 = vrot.lane.b32.xlu1 %v16480_v31, %s15432_s17 }
 0x2ac   :  { %3715 = vrot.lane.b32.xlu0 %v16592_v16, %s15429_s26 }
 0x2af   :  { %4327 = vrot.lane.b32.xlu1 %v16484_v46, %s15432_s17 }
 0x2b0   :  { %4331 = vrot.lane.b32.xlu0 %v16486_v59, %s15432_s17 }
 0x2b3   :  { %4335 = vrot.lane.b32.xlu1 %v16502_v61, %s15432_s17 }
 0x2b4   :  { %4333 = vrot.lane.b32.xlu0 %v16500_v14, %s15432_s17 }
 0x2b6   :  { %v1254_v63 = vpop.permute.xlu1 %1253 }
 0x2b7   :  { %v1252_v51 = vpop.permute.xlu0 %1251  ;;  %4339 = vrot.lane.b32.xlu1 %v16536_v29, %s15432_s17  ;;  %v16766_v29 = vld [vmem:[#allocation3 + $0x10] sm:$0x3f] }
 0x2b8   :  { %v1269_v55 = vsel %vm302_vm1, %v1250_v45, %v1252_v51  ;;  %4337 = vrot.lane.b32.xlu0 %v16538_v22, %s15432_s17  ;;  %v1270_v62 = vsel %vm302_vm1, %v1252_v51, %v1254_v63 }
 0x2b9   :  { %14489 = vmatprep.subr.msk.mxu1 %vm1282_vm10, %v1270_v62 }
 0x2ba   :  { %14490 = vmatpush1.msk.msra.mxu1 %vm1282_vm10, %v1269_v55 }
 0x2bb   :  { %4343 = vrot.lane.b32.xlu1 %v16556_v10, %s15432_s17  ;;  %14491 = vmatmul.mubr.msk.f32.vlgmr.msra.gmra.mxu1 %vm1275_vm11, %v16613_v24 }
 0x2bc   :  { %4341 = vrot.lane.b32.xlu0 %v16554_v5, %s15432_s17  ;;  %1610 = vmatprep.mubr.f32.mxu1 %v16615_v23  ;;  %v16780_v5 = vld [vmem:[#allocation3 + $0x18] sm:$0x3f] }
 0x2bf   :  { %4347 = vrot.lane.b32.xlu1 %v16584_v17, %s15432_s17  ;;  %14492 = vmatmul.mubr.msk.f32.gmra.mxu1 %vm1275_vm11, %v16632_v20 }
 0x2c0   :  { %4345 = vrot.lane.b32.xlu0 %v16586_v13, %s15432_s17  ;;  %1681 = vmatprep.mubr.f32.mxu1 %v16615_v23 }
 0x2c3   :  { %4351 = vrot.lane.b32.xlu1 %v16592_v16, %s15432_s17 }
 0x2c4   :  { %4349 = vrot.lane.b32.xlu0 %v16596_v12, %s15432_s17 }
 0x2c6   :  { %v1258_v59 = vpop.permute.xlu1 %1257  ;;  %v1256_v14 = vpop.permute.xlu0 %1255 }
 0x2c7   :  { %v1271_v47 = vsel %vm302_vm1, %v1254_v63, %v1256_v14  ;;  %4996 = vrot.lane.b32.xlu1 %v16766_v29, %s15433_s18  ;;  %v1272_v42 = vsel %vm302_vm1, %v1256_v14, %v1258_v59 }
 0x2c8   :  { %4994 = vrot.lane.b32.xlu0 %v16771_v38, %s15433_s18  ;;  %14493 = vmatprep.subr.msk.mxu1 %vm1282_vm10, %v1272_v42 }
 0x2c9   :  { %14494 = vmatpush1.msk.msra.mxu1 %vm1282_vm10, %v1271_v47 }
 0x2ca   :  { %14495 = vmatmul.mubr.msk.f32.vlgmr.msra.gmra.mxu1 %vm1275_vm11, %v16613_v24 }
 0x2cb   :  { %4998 = vrot.lane.b32.xlu1 %v16780_v5, %s15433_s18  ;;  %1687 = vmatprep.mubr.f32.mxu1 %v16615_v23 }
 0x2cc   :  { %4992 = vrot.lane.b32.xlu0 %v16784_v9, %s15433_s18 }
 0x2cd   :  { %v1262_v33 = vpop.permute.xlu1 %1261 }
 0x2ce   :  { %14496 = vmatmul.mubr.msk.f32.gmra.mxu1 %vm1275_vm11, %v16632_v20  ;;  %v1260_v15 = vpop.permute.xlu0 %1259 }
 0x2cf   :  { %v1273_v39 = vsel %vm302_vm1, %v1258_v59, %v1260_v15  ;;  %5002 = vrot.lane.b32.xlu1 %v16791_v58, %s15433_s18  ;;  %v1274_v40 = vsel %vm302_vm1, %v1260_v15, %v1262_v33  ;;  %1758 = vmatprep.mubr.f32.mxu1 %v16615_v23  ;;  %v17036_v59 = vld [vmem:[%s21761_s3 + $0x38] sm:$0xff] }
 0x2d0   :  { %5000 = vrot.lane.b32.xlu0 %v16796_v8, %s15433_s18  ;;  %14497 = vmatprep.subr.msk.mxu1 %vm1282_vm10, %v1274_v40 }
 0x2d1   :  { %v16803_v43 = vpop.permute.xlu1 %2422  ;;  %14498 = vmatpush1.msk.msra.mxu1 %vm1282_vm10, %v1273_v39 }
 0x2d2   :  { %14499 = vmatmul.mubr.msk.f32.vlgmr.msra.gmra.mxu1 %vm1275_vm11, %v16613_v24  ;;  %14939 = vmatprep.subr.msk.mxu1 %vm1282_vm10, %v1262_v33  ;;  %v16809_v50 = vpop.permute.xlu0 %2442 }
 0x2d3   :  { %5006 = vrot.lane.b32.xlu1 %v16811_v1, %s15433_s18  ;;  %14940 = vmatpush3.msk.msra.mxu1 %vm1282_vm10, %v1262_v33 }
 0x2d4   :  { %5004 = vrot.lane.b32.xlu0 %v16816_v48, %s15433_s18  ;;  %14504 = vmatprep.subr.msk.mxu1 %vm1282_vm10, %v16480_v31 }
 0x2d5   :  { %v16822_v6 = vpop.permute.xlu1 %2424  ;;  %1764 = vmatprep.mubr.f32.mxu1 %v16615_v23 }
 0x2d6   :  { %14500 = vmatmul.mubr.msk.f32.gmra.mxu1 %vm1275_vm11, %v16632_v20  ;;  %v2421_v49 = vpop.permute.xlu0 %2420  ;;  %v2447_v37 = vsel %vm2444_vm12, %v16803_v43, %v16822_v6 }
 0x2d7   :  { %5010 = vrot.lane.b32.xlu1 %v16827_v25, %s15433_s18  ;;  %v2446_v0 = vsel %vm2444_vm12, %v2421_v49, %v16803_v43  ;;  %14941 = vmatprep.mubr.msk.f32.mxu1 %vm1275_vm11, %v16613_v24 }
 0x2d8   :  { %5008 = vrot.lane.b32.xlu0 %v16831_v30, %s15433_s18  ;;  %14533 = vmatprep.subr.msk.mxu0 %vm1282_vm10, %v2446_v0 }
 0x2d9   :  { %v2429_v31 = vpop.permute.xlu1 %2428 }
 0x2da   :  { %14942 = vmatmul.mubr.msk.f32.vlgmr.msra.gmra.mxu1 %vm1275_vm11, %v16632_v20  ;;  %v2419_v28 = vpop.permute.xlu0 %2418 }
 0x2db   :  { %14505 = vmatpush1.msk.msra.mxu1 %vm1282_vm10, %v16484_v46  ;;  %v2445_v60 = vsel %vm2444_vm12, %v2419_v28, %v2421_v49  ;;  %5014 = vrot.lane.b32.xlu1 %v16842_v57, %s15433_s18 }
 0x2dc   :  { %14512 = vmatprep.subr.msk.mxu1 %vm1282_vm10, %v16538_v22  ;;  %5012 = vrot.lane.b32.xlu0 %v16849_v34, %s15433_s18  ;;  %v16874_v22 = vld [vmem:[#allocation3 + $0x60] sm:$0x3f] }
 0x2dd   :  { %14534 = vmatpush1.msk.msra.mxu0 %vm1282_vm10, %v2445_v60  ;;  %v16863_v46 = vpop.permute.xlu1 %2432  ;;  %1942 = vmatprep.mubr.f32.mxu1 %v16615_v23 }
 0x2de   :  { %14506 = vmatmul.mubr.msk.f32.vlgmr.msra.gmra.mxu1 %vm1275_vm11, %v16507_v54  ;;  %14535 = vmatmul.mubr.msk.f32.vlgmr.msra.gmra.mxu0 %vm1275_vm11, %v16854_v21  ;;  %v2427_v4 = vpop.permute.xlu0 %2426 }
 0x2df   :  { %14513 = vmatpush1.msk.msra.mxu1 %vm1282_vm10, %v16502_v61  ;;  %5018 = vrot.lane.b32.xlu1 %v16860_v7, %s15433_s18  ;;  %v2449_v17 = vsel %vm2444_vm12, %v2427_v4, %v2429_v31  ;;  %v2448_v24 = vsel %vm2444_vm12, %v16822_v6, %v2427_v4 }
 0x2e0   :  { %14520 = vmatprep.subr.msk.mxu1 %vm1282_vm10, %v16586_v13  ;;  %5016 = vrot.lane.b32.xlu0 %v16874_v22, %s15433_s18 }
 0x2e1   :  { %v2437_v27 = vpop.permute.xlu1 %2436  ;;  %1948 = vmatprep.mubr.f32.mxu1 %v16615_v23  ;;  %2559 = vmatprep.mubr.f32.mxu0 %v16615_v23 }
 0x2e2   :  { %14507 = vmatmul.mubr.msk.f32.gmra.mxu1 %vm1275_vm11, %v16523_v26  ;;  %14536 = vmatmul.mubr.msk.f32.gmra.mxu0 %vm1275_vm11, %v16879_v18  ;;  %v16891_v61 = vpop.permute.xlu0 %2430 }
 0x2e3   :  { %5636 = vrot.lane.b32.xlu1 %v16766_v29, %s15434_s21  ;;  %v2450_v52 = vsel %vm2444_vm12, %v2429_v31, %v16891_v61  ;;  %2096 = vmatprep.mubr.f32.mxu1 %v16615_v23  ;;  %v2451_v19 = vsel %vm2444_vm12, %v16891_v61, %v16863_v46 }
 0x2e4   :  { %5634 = vrot.lane.b32.xlu0 %v16771_v38, %s15434_s21  ;;  %14541 = vmatprep.subr.msk.mxu0 %vm1282_vm10, %v2450_v52 }
 0x2e5   :  { %v16902_v13 = vpop.permute.xlu1 %2440  ;;  %14542 = vmatpush1.msk.msra.mxu0 %vm1282_vm10, %v2449_v17  ;;  %2707 = vmatprep.mubr.f32.mxu0 %v16615_v23 }
 0x2e6   :  { %14514 = vmatmul.mubr.msk.f32.vlgmr.msra.gmra.mxu1 %vm1275_vm11, %v16507_v54  ;;  %14543 = vmatmul.mubr.msk.f32.vlgmr.msra.gmra.mxu0 %vm1275_vm11, %v16854_v21  ;;  %v2435_v2 = vpop.permute.xlu0 %2434  ;;  %v2456_v51 = vsel %vm2444_vm12, %v16902_v13, %v16809_v50 }
 0x2e7   :  { %14521 = vmatpush1.msk.msra.mxu1 %vm1282_vm10, %v16556_v10  ;;  %5638 = vrot.lane.b32.xlu1 %v16780_v5, %s15434_s21  ;;  %v2453_v11 = vsel %vm2444_vm12, %v2435_v2, %v2437_v27 }
 0x2e8   :  { %14944 = vmatprep.subr.msk.mxu1 %vm1282_vm10, %v16592_v16  ;;  %5632 = vrot.lane.b32.xlu0 %v16784_v9, %s15434_s21 }
 0x2e9   :  { %v16918_v12 = vpop.permute.xlu1 %3057  ;;  %2102 = vmatprep.mubr.f32.mxu1 %v16615_v23  ;;  %2713 = vmatprep.mubr.f32.mxu0 %v16615_v23 }
 0x2ea   :  { %14515 = vmatmul.mubr.msk.f32.gmra.mxu1 %vm1275_vm11, %v16523_v26  ;;  %14544 = vmatmul.mubr.msk.f32.gmra.mxu0 %vm1275_vm11, %v16879_v18  ;;  %v16926_v10 = vpop.permute.xlu0 %2438 }
 0x2eb   :  { %5642 = vrot.lane.b32.xlu1 %v16791_v58, %s15434_s21  ;;  %v2454_v53 = vsel %vm2444_vm12, %v2437_v27, %v16926_v10  ;;  %2250 = vmatprep.mubr.f32.mxu1 %v16615_v23  ;;  %v2455_v15 = vsel %vm2444_vm12, %v16926_v10, %v16902_v13  ;;  %v6910_v27 = vld [vmem:[%s21762_s4 + $0x8] sm:$0xff] }
 0x2ec   :  { %5640 = vrot.lane.b32.xlu0 %v16796_v8, %s15434_s21  ;;  %14549 = vmatprep.subr.msk.mxu0 %vm1282_vm10, %v2454_v53 }
 0x2ed   :  { %v16937_v56 = vpop.permute.xlu1 %3055  ;;  %14550 = vmatpush1.msk.msra.mxu0 %vm1282_vm10, %v2453_v11  ;;  %2861 = vmatprep.mubr.f32.mxu0 %v16615_v23 }
 0x2ee   :  { %14522 = vmatmul.mubr.msk.f32.vlgmr.msra.gmra.mxu1 %vm1275_vm11, %v16507_v54  ;;  %14551 = vmatmul.mubr.msk.f32.vlgmr.msra.gmra.mxu0 %vm1275_vm11, %v16854_v21  ;;  %v16945_v32 = vpop.permute.xlu0 %3059 }
 0x2ef   :  { %14945 = vmatpush3.msk.msra.mxu1 %vm1282_vm10, %v16592_v16  ;;  %14949 = vmatprep.subr.msk.mxu0 %vm1282_vm10, %v16809_v50 }
 0x2f0   :  { %5646 = vrot.lane.b32.xlu1 %v16811_v1, %s15434_s21  ;;  %14537 = vmatprep.subr.msk.mxu1 %vm1282_vm10, %v2448_v24 }
 0x2f1   :  { %14950 = vmatpush3.msk.msra.mxu0 %vm1282_vm10, %v16809_v50  ;;  %5644 = vrot.lane.b32.xlu0 %v16816_v48, %s15434_s21  ;;  %v16960_v20 = vpop.permute.xlu1 %3063  ;;  %v3081_v50 = vsel %vm694_vm5, %v16937_v56, %v16918_v12 }
 0x2f2   :  { %2256 = vmatprep.mubr.f32.mxu1 %v16615_v23  ;;  %2867 = vmatprep.mubr.f32.mxu0 %v16615_v23  ;;  %v3062_v16 = vpop.permute.xlu0 %3061 }
 0x2f3   :  { %14523 = vmatmul.mubr.msk.f32.gmra.mxu1 %vm1275_vm11, %v16523_v26  ;;  %14552 = vmatmul.mubr.msk.f32.gmra.mxu0 %vm1275_vm11, %v16879_v18  ;;  %v3084_v41 = vsel %vm694_vm5, %v3062_v16, %v16960_v20  ;;  %v3083_v45 = vsel %vm694_vm5, %v16945_v32, %v3062_v16 }
 0x2f4   :  { %5650 = vrot.lane.b32.xlu1 %v16827_v25, %s15434_s21  ;;  %14566 = vmatprep.subr.msk.mxu0 %vm1282_vm10, %v3084_v41 }
 0x2f5   :  { %5648 = vrot.lane.b32.xlu0 %v16831_v30, %s15434_s21  ;;  %v16975_v44 = vpop.permute.xlu1 %3067  ;;  %14946 = vmatprep.mubr.msk.f32.mxu1 %vm1275_vm11, %v16507_v54  ;;  %v2452_v54 = vsel %vm2444_vm12, %v16863_v46, %v2435_v2 }
 0x2f6   :  { %14951 = vmatprep.mubr.msk.f32.mxu0 %vm1275_vm11, %v16854_v21  ;;  %v16981_v35 = vpop.permute.xlu0 %3065 }
 0x2f7   :  { %14947 = vmatmul.mubr.msk.f32.vlgmr.msra.gmra.mxu1 %vm1275_vm11, %v16523_v26  ;;  %14952 = vmatmul.mubr.msk.f32.vlgmr.msra.gmra.mxu0 %vm1275_vm11, %v16879_v18  ;;  %v17004_v26 = vld [vmem:[%s21761_s3 + $0x30] sm:$0xff] }
 0x2f8   :  { %14538 = vmatpush1.msk.msra.mxu1 %vm1282_vm10, %v2447_v37  ;;  %14567 = vmatpush1.msk.msra.mxu0 %vm1282_vm10, %v3083_v45 }
 0x2f9   :  { %5654 = vrot.lane.b32.xlu1 %v16842_v57, %s15434_s21  ;;  %14545 = vmatprep.subr.msk.mxu1 %vm1282_vm10, %v2452_v54  ;;  %v16999_v36 = vpop.permute.xlu1 %3071 }
 0x2fa   :  { %5652 = vrot.lane.b32.xlu0 %v16849_v34, %s15434_s21  ;;  %2630 = vmatprep.mubr.f32.mxu1 %v16615_v23  ;;  %v3070_v3 = vpop.permute.xlu0 %3069 }
 0x2fb   :  { %3266 = vmatprep.mubr.f32.mxu0 %v16615_v23  ;;  %14539 = vmatmul.mubr.msk.f32.vlgmr.msra.gmra.mxu1 %vm1275_vm11, %v16854_v21  ;;  %v3088_v63 = vsel %vm694_vm5, %v3070_v3, %v16999_v36  ;;  %v3087_v55 = vsel %vm694_vm5, %v16975_v44, %v3070_v3  ;;  %v17293_v3 = vld [vmem:[%s21761_s3 + $0x58] sm:$0xff] }
 0x2fc   :  { %14546 = vmatpush1.msk.msra.mxu1 %vm1282_vm10, %v2451_v19  ;;  %14568 = vmatmul.mubr.msk.f32.vlgmr.msra.gmra.mxu0 %vm1275_vm11, %v17004_v26 }
 0x2fd   :  { %5658 = vrot.lane.b32.xlu1 %v16860_v7, %s15434_s21  ;;  %14553 = vmatprep.subr.msk.mxu1 %vm1282_vm10, %v2456_v51  ;;  %v17028_v62 = vpop.permute.xlu1 %3079 }
 0x2fe   :  { %5656 = vrot.lane.b32.xlu0 %v16874_v22, %s15434_s21  ;;  %14574 = vmatprep.subr.msk.mxu0 %vm1282_vm10, %v3088_v63  ;;  %v17038_v14 = vpop.permute.xlu0 %3073 }
 0x2ff   :  { %2636 = vmatprep.mubr.f32.mxu1 %v16615_v23  ;;  %3272 = vmatprep.mubr.f32.mxu0 %v16615_v23  ;;  %v3089_v61 = vsel %vm694_vm5, %v16999_v36, %v17038_v14 }
 0x300   :  { %14575 = vmatpush1.msk.msra.mxu0 %vm1282_vm10, %v3087_v55  ;;  %14540 = vmatmul.mubr.msk.f32.gmra.mxu1 %vm1275_vm11, %v16879_v18 }
 0x301   :  { %14569 = vmatmul.mubr.msk.f32.gmra.mxu0 %vm1275_vm11, %v17036_v59  ;;  %6276 = vrot.lane.b32.xlu1 %v16766_v29, %s15435_s28  ;;  %v3076_v47 = vpop.permute.xlu1 %3075 }
 0x302   :  { %6274 = vrot.lane.b32.xlu0 %v16771_v38, %s15435_s28  ;;  %2784 = vmatprep.mubr.f32.mxu1 %v16615_v23  ;;  %v3078_v42 = vpop.permute.xlu0 %3077  ;;  %v3082_v38 = vsel %vm694_vm5, %v16918_v12, %v16945_v32  ;;  %v3090_v28 = vsel %vm694_vm5, %v17038_v14, %v3076_v47 }
 0x303   :  { %3420 = vmatprep.mubr.f32.mxu0 %v16615_v23  ;;  %v3092_v33 = vsel %vm694_vm5, %v3078_v42, %v17028_v62  ;;  %v3091_v29 = vsel %vm694_vm5, %v3076_v47, %v3078_v42 }
 0x304   :  { %14547 = vmatmul.mubr.msk.f32.vlgmr.msra.gmra.mxu1 %vm1275_vm11, %v16854_v21  ;;  %14582 = vmatprep.subr.msk.mxu0 %vm1282_vm10, %v3092_v33 }
 0x305   :  { %14554 = vmatpush1.msk.msra.mxu1 %vm1282_vm10, %v2455_v15  ;;  %14576 = vmatmul.mubr.msk.f32.vlgmr.msra.gmra.mxu0 %vm1275_vm11, %v17004_v26  ;;  %v17068_v39 = vpop.permute.xlu1 %3695 }
 0x306   :  { %6278 = vrot.lane.b32.xlu1 %v16780_v5, %s15435_s28  ;;  %14562 = vmatprep.subr.msk.mxu1 %vm1282_vm10, %v3082_v38  ;;  %v3694_v40 = vpop.permute.xlu0 %3693 }
 0x307   :  { %6272 = vrot.lane.b32.xlu0 %v16784_v9, %s15435_s28  ;;  %2790 = vmatprep.mubr.f32.mxu1 %v16615_v23  ;;  %v3718_v43 = vsel %vm890_vm8, %v3694_v40, %v17068_v39 }
 0x308   :  { %3426 = vmatprep.mubr.f32.mxu0 %v16615_v23  ;;  %14583 = vmatpush1.msk.msra.mxu0 %vm1282_vm10, %v3091_v29 }
 0x309   :  { %14548 = vmatmul.mubr.msk.f32.gmra.mxu1 %vm1275_vm11, %v16879_v18  ;;  %14577 = vmatmul.mubr.msk.f32.gmra.mxu0 %vm1275_vm11, %v17036_v59  ;;  %v17084_v5 = vpop.permute.xlu1 %3697 }
 0x30a   :  { %6282 = vrot.lane.b32.xlu1 %v16791_v58, %s15435_s28  ;;  %14591 = vmatprep.subr.msk.mxu0 %vm1282_vm10, %v3718_v43  ;;  %v3692_v9 = vpop.permute.xlu0 %3691  ;;  %v3719_v24 = vsel %vm890_vm8, %v17068_v39, %v17084_v5 }
 0x30b   :  { %6280 = vrot.lane.b32.xlu0 %v16796_v8, %s15435_s28  ;;  %2938 = vmatprep.mubr.f32.mxu1 %v16615_v23  ;;  %v3717_v58 = vsel %vm890_vm8, %v3692_v9, %v3694_v40  ;;  %v3086_v8 = vsel %vm694_vm5, %v16981_v35, %v16975_v44 }
 0x30c   :  { %3574 = vmatprep.mubr.f32.mxu0 %v16615_v23 }
 0x30d   :  { %14555 = vmatmul.mubr.msk.f32.vlgmr.msra.gmra.mxu1 %vm1275_vm11, %v16854_v21  ;;  %14584 = vmatmul.mubr.msk.f32.vlgmr.msra.gmra.mxu0 %vm1275_vm11, %v17004_v26  ;;  %v3702_v6 = vpop.permute.xlu1 %3701  ;;  %v17155_v21 = vld [vmem:[%s21761_s3 + $0x48] sm:$0xff] }
 0x30e   :  { %14563 = vmatpush1.msk.msra.mxu1 %vm1282_vm10, %v3081_v50  ;;  %6286 = vrot.lane.b32.xlu1 %v16811_v1, %s15435_s28  ;;  %v17107_v49 = vpop.permute.xlu0 %3699 }
 0x30f   :  { %14570 = vmatprep.subr.msk.mxu1 %vm1282_vm10, %v3086_v8  ;;  %6284 = vrot.lane.b32.xlu0 %v16816_v48, %s15435_s28  ;;  %v17131_v48 = vld [vmem:[%s21761_s3 + $0x40] sm:$0xff]  ;;  %v3721_v46 = vsel %vm890_vm8, %v17107_v49, %v3702_v6  ;;  %v3720_v10 = vsel %vm890_vm8, %v17084_v5, %v17107_v49 }
 0x310   :  { %14592 = vmatpush1.msk.msra.mxu0 %vm1282_vm10, %v3717_v58  ;;  %2944 = vmatprep.mubr.f32.mxu1 %v16615_v23  ;;  %v17371_v58 = vld [vmem:[%s21761_s3 + $0x60] sm:$0xff] }
 0x311   :  { %3580 = vmatprep.mubr.f32.mxu0 %v16615_v23  ;;  %14556 = vmatmul.mubr.msk.f32.gmra.mxu1 %vm1275_vm11, %v16879_v18  ;;  %v17117_v1 = vpop.permute.xlu1 %3705  ;;  %v6909_v18 = vld [vmem:[%s21762_s4] sm:$0xff] }
 0x312   :  { %14585 = vmatmul.mubr.msk.f32.gmra.mxu0 %vm1275_vm11, %v17036_v59  ;;  %6290 = vrot.lane.b32.xlu1 %v16827_v25, %s15435_s28  ;;  %v17123_v0 = vpop.permute.xlu0 %3703  ;;  %v3085_v25 = vsel %vm694_vm5, %v16960_v20, %v16981_v35  ;;  %v17267_v35 = vld [vmem:[%s21761_s3 + $0x50] sm:$0xff] }
 0x313   :  { %6288 = vrot.lane.b32.xlu0 %v16831_v30, %s15435_s28  ;;  %3189 = vmatprep.mubr.f32.mxu1 %v16615_v23  ;;  %v3722_v31 = vsel %vm890_vm8, %v3702_v6, %v17123_v0  ;;  %v3723_v45 = vsel %vm890_vm8, %v17123_v0, %v17117_v1 }
 0x314   :  { %3825 = vmatprep.mubr.f32.mxu0 %v16615_v23  ;;  %14599 = vmatprep.subr.msk.mxu0 %vm1282_vm10, %v3722_v31 }
 0x315   :  { %14564 = vmatmul.mubr.msk.f32.vlgmr.msra.gmra.mxu1 %vm1275_vm11, %v17004_v26  ;;  %v3710_v30 = vpop.permute.xlu1 %3709 }
 0x316   :  { %14571 = vmatpush1.msk.msra.mxu1 %vm1282_vm10, %v3085_v25  ;;  %14593 = vmatmul.mubr.msk.f32.vlgmr.msra.gmra.mxu0 %vm1275_vm11, %v17131_v48  ;;  %v17147_v60 = vpop.permute.xlu0 %3707 }
 0x317   :  { %6294 = vrot.lane.b32.xlu1 %v16842_v57, %s15435_s28  ;;  %14578 = vmatprep.subr.msk.mxu1 %vm1282_vm10, %v3090_v28  ;;  %v3725_v52 = vsel %vm890_vm8, %v17147_v60, %v3710_v30  ;;  %v3724_v41 = vsel %vm890_vm8, %v17117_v1, %v17147_v60 }
 0x318   :  { %6292 = vrot.lane.b32.xlu0 %v16849_v34, %s15435_s28  ;;  %3195 = vmatprep.mubr.f32.mxu1 %v16615_v23 }
 0x319   :  { %3831 = vmatprep.mubr.f32.mxu0 %v16615_v23  ;;  %14600 = vmatpush1.msk.msra.mxu0 %vm1282_vm10, %v3721_v46  ;;  %v17164_v57 = vpop.permute.xlu1 %3713 }
 0x31a   :  { %14565 = vmatmul.mubr.msk.f32.gmra.mxu1 %vm1275_vm11, %v17036_v59  ;;  %14594 = vmatmul.mubr.msk.f32.gmra.mxu0 %vm1275_vm11, %v17155_v21  ;;  %v17170_v4 = vpop.permute.xlu0 %3711 }
 0x31b   :  { %6298 = vrot.lane.b32.xlu1 %v16860_v7, %s15435_s28  ;;  %3343 = vmatprep.mubr.f32.mxu1 %v16615_v23  ;;  %v3726_v34 = vsel %vm890_vm8, %v3710_v30, %v17170_v4 }
 0x31c   :  { %6296 = vrot.lane.b32.xlu0 %v16874_v22, %s15435_s28  ;;  %3979 = vmatprep.mubr.f32.mxu0 %v16615_v23 }
 0x31d   :  { %14607 = vmatprep.subr.msk.mxu0 %vm1282_vm10, %v3726_v34  ;;  %v17187_v7 = vpop.permute.xlu1 %4329 }
 0x31e   :  { %14572 = vmatmul.mubr.msk.f32.vlgmr.msra.gmra.mxu1 %vm1275_vm11, %v17004_v26  ;;  %14601 = vmatmul.mubr.msk.f32.vlgmr.msra.gmra.mxu0 %vm1275_vm11, %v17131_v48  ;;  %v3716_v22 = vpop.permute.xlu0 %3715 }
 0x31f   :  { %14579 = vmatpush1.msk.msra.mxu1 %vm1282_vm10, %v3089_v61  ;;  %6913 = vperm.xlu1 %15078, %v6909_v18  }
 0x320   :  { %14954 = vmatprep.subr.msk.mxu1 %vm1282_vm10, %v17028_v62  ;;  %6918 = vperm.xlu0 %15077, %v6910_v27  }
 0x321   :  { %3349 = vmatprep.mubr.f32.mxu1 %v16615_v23  ;;  %3985 = vmatprep.mubr.f32.mxu0 %v16615_v23  ;;  %v17203_v17 = vpop.permute.xlu1 %4327 }
 0x322   :  { %14608 = vmatpush1.msk.msra.mxu0 %vm1282_vm10, %v3725_v52  ;;  %14573 = vmatmul.mubr.msk.f32.gmra.mxu1 %vm1275_vm11, %v17036_v59  ;;  %v17208_v13 = vpop.permute.xlu0 %4331  ;;  %v4354_v39 = vsel %vm4353_vm13, %v17203_v17, %v17187_v7  ;;  %v17396_v31 = vpop.f32.mrf.mxu1 }
 0x323   :  { %14602 = vmatmul.mubr.msk.f32.gmra.mxu0 %vm1275_vm11, %v17155_v21  ;;  %14959 = vmatprep.subr.msk.mxu0 %vm1282_vm10, %v3716_v22  ;;  %v4355_v47 = vsel %vm4353_vm13, %v17187_v7, %v17208_v13 }
 0x324   :  { %3497 = vmatprep.mubr.f32.mxu1 %v16615_v23  ;;  %4133 = vmatprep.mubr.f32.mxu0 %v16615_v23  ;;  %v17413_v60 = vpop.f32.mrf.mxu1 }
 0x325   :  { %v17215_v2 = vpop.permute.xlu1 %4335 }
 0x326   :  { %14580 = vmatmul.mubr.msk.f32.vlgmr.msra.gmra.mxu1 %vm1275_vm11, %v17004_v26  ;;  %v4334_v12 = vpop.permute.xlu0 %4333  ;;  %v17429_v18 = vpop.f32.mrf.mxu1 }
 0x327   :  { %14955 = vmatpush3.msk.msra.mxu1 %vm1282_vm10, %v17028_v62  ;;  %14609 = vmatmul.mubr.msk.f32.vlgmr.msra.gmra.mxu0 %vm1275_vm11, %v17131_v48  ;;  %v4357_v53 = vsel %vm4353_vm13, %v4334_v12, %v17215_v2  ;;  %v4356_v16 = vsel %vm4353_vm13, %v17208_v13, %v4334_v12  ;;  %v3727_v62 = vsel %vm890_vm8, %v17170_v4, %v17164_v57  ;;  %v17461_v13 = vld [vmem:[#allocation4 + $0x68] sm:$0xff] }
 0x328   :  { %14960 = vmatpush3.msk.msra.mxu0 %vm1282_vm10, %v3716_v22  ;;  %14595 = vmatprep.subr.msk.mxu1 %vm1282_vm10, %v3720_v10  ;;  %v17444_v61 = vpop.f32.mrf.mxu1  ;;  %47 = vst.msk [vmem:[#allocation4 + $0xd0] sm:$0xff] %vm44_vm2, %v17461_v13  ;;  %45 = vst.msk [vmem:[#allocation4 + $0x60] sm:$0xff] %vm44_vm2, %v17461_v13 }
 0x329   :  { %3503 = vmatprep.mubr.f32.mxu1 %v16615_v23  ;;  %4139 = vmatprep.mubr.f32.mxu0 %v16615_v23  ;;  %v17232_v11 = vpop.permute.xlu1 %4339  ;;  %49 = vst.msk [vmem:[#allocation5 + $0x60] sm:$0xff] %vm44_vm2, %v17461_v13  ;;  %51 = vst.msk [vmem:[#allocation5 + $0xd0] sm:$0xff] %vm44_vm2, %v17461_v13 }
 0x32a   :  { %14581 = vmatmul.mubr.msk.f32.gmra.mxu1 %vm1275_vm11, %v17036_v59  ;;  %14624 = vmatprep.subr.msk.mxu0 %vm1282_vm10, %v4357_v53  ;;  %v17237_v56 = vpop.permute.xlu0 %4337 }
 0x32b   :  { %14610 = vmatmul.mubr.msk.f32.gmra.mxu0 %vm1275_vm11, %v17155_v21  ;;  %14956 = vmatprep.mubr.msk.f32.mxu1 %vm1275_vm11, %v17004_v26  ;;  %v3728_v26 = vsel %vm890_vm8, %v17164_v57, %v3716_v22  ;;  %v4359_v43 = vsel %vm4353_vm13, %v17237_v56, %v17232_v11  ;;  %v4358_v8 = vsel %vm4353_vm13, %v17215_v2, %v17237_v56 }
 0x32c   :  { %14961 = vmatprep.mubr.msk.f32.mxu0 %vm1275_vm11, %v17131_v48 }
 0x32d   :  { %v17245_v32 = vpop.permute.xlu1 %4343 }
 0x32e   :  { %14957 = vmatmul.mubr.msk.f32.vlgmr.msra.gmra.mxu1 %vm1275_vm11, %v17036_v59  ;;  %v4342_v20 = vpop.permute.xlu0 %4341 }
 0x32f   :  { %14596 = vmatpush1.msk.msra.mxu1 %vm1282_vm10, %v3719_v24  ;;  %14962 = vmatmul.mubr.msk.f32.vlgmr.msra.gmra.mxu0 %vm1275_vm11, %v17155_v21  ;;  %v4361_v44 = vsel %vm4353_vm13, %v4342_v20, %v17245_v32  ;;  %v4360_v54 = vsel %vm4353_vm13, %v17232_v11, %v4342_v20 }
 0x330   :  { %14625 = vmatpush1.msk.msra.mxu0 %vm1282_vm10, %v4356_v16  ;;  %14603 = vmatprep.subr.msk.mxu1 %vm1282_vm10, %v3724_v41  ;;  %v17500_v16 = vld [vmem:[%s21761_s3 + $0x70] sm:$0xff] }
 0x331   :  { %3902 = vmatprep.mubr.f32.mxu1 %v16615_v23  ;;  %4539 = vmatprep.mubr.f32.mxu0 %v16615_v23  ;;  %v17271_v37 = vpop.permute.xlu1 %4347 }
 0x332   :  { %14597 = vmatmul.mubr.msk.f32.vlgmr.msra.gmra.mxu1 %vm1275_vm11, %v17131_v48  ;;  %14632 = vmatprep.subr.msk.mxu0 %vm1282_vm10, %v4361_v44  ;;  %v17281_v36 = vpop.permute.xlu0 %4345 }
 0x333   :  { %14604 = vmatpush1.msk.msra.mxu1 %vm1282_vm10, %v3723_v45  ;;  %14626 = vmatmul.mubr.msk.f32.vlgmr.msra.gmra.mxu0 %vm1275_vm11, %v17267_v35  ;;  %v4363_v1 = vsel %vm4353_vm13, %v17281_v36, %v17271_v37  ;;  %v4362_v46 = vsel %vm4353_vm13, %v17245_v32, %v17281_v36 }
 0x334   :  { %14611 = vmatprep.subr.msk.mxu1 %vm1282_vm10, %v3728_v26  ;;  %3908 = vmatprep.mubr.f32.mxu1 %v16615_v23 }
 0x335   :  { %4545 = vmatprep.mubr.f32.mxu0 %v16615_v23  ;;  %14633 = vmatpush1.msk.msra.mxu0 %vm1282_vm10, %v4360_v54  ;;  %v17297_v19 = vpop.permute.xlu1 %4351  ;;  %v17525_v54 = vld [vmem:[%s21761_s3 + $0x78] sm:$0xff] }
 0x336   :  { %14598 = vmatmul.mubr.msk.f32.gmra.mxu1 %vm1275_vm11, %v17155_v21  ;;  %v4350_v63 = vpop.permute.xlu0 %4349 }
 0x337   :  { %14627 = vmatmul.mubr.msk.f32.gmra.mxu0 %vm1275_vm11, %v17293_v3  ;;  %4056 = vmatprep.mubr.f32.mxu1 %v16615_v23  ;;  %v4365_v51 = vsel %vm4353_vm13, %v4350_v63, %v17297_v19  ;;  %v4364_v59 = vsel %vm4353_vm13, %v17271_v37, %v4350_v63 }
 0x338   :  { %4693 = vmatprep.mubr.f32.mxu0 %v16615_v23  ;;  %14640 = vmatprep.subr.msk.mxu0 %vm1282_vm10, %v4365_v51 }
 0x339   :  { %v17308_v55 = vpop.permute.xlu1 %4996 }
 0x33a   :  { %14605 = vmatmul.mubr.msk.f32.vlgmr.msra.gmra.mxu1 %vm1275_vm11, %v17131_v48  ;;  %v4995_v14 = vpop.permute.xlu0 %4994 }
 0x33b   :  { %14612 = vmatpush1.msk.msra.mxu1 %vm1282_vm10, %v3727_v62  ;;  %14634 = vmatmul.mubr.msk.f32.vlgmr.msra.gmra.mxu0 %vm1275_vm11, %v17267_v35  ;;  %v5022_v42 = vsel %vm5020_vm14, %v4995_v14, %v17308_v55 }
 0x33c   :  { %14620 = vmatprep.subr.msk.mxu1 %vm1282_vm10, %v4355_v47  ;;  %4062 = vmatprep.mubr.f32.mxu1 %v16615_v23 }
 0x33d   :  { %4699 = vmatprep.mubr.f32.mxu0 %v16615_v23  ;;  %14641 = vmatpush1.msk.msra.mxu0 %vm1282_vm10, %v4364_v59  ;;  %v17329_v33 = vpop.permute.xlu1 %4998 }
 0x33e   :  { %14606 = vmatmul.mubr.msk.f32.gmra.mxu1 %vm1275_vm11, %v17155_v21  ;;  %14649 = vmatprep.subr.msk.mxu0 %vm1282_vm10, %v5022_v42  ;;  %v4993_v15 = vpop.permute.xlu0 %4992  ;;  %v5023_v11 = vsel %vm5020_vm14, %v17308_v55, %v17329_v33 }
 0x33f   :  { %14635 = vmatmul.mubr.msk.f32.gmra.mxu0 %vm1275_vm11, %v17293_v3  ;;  %4210 = vmatprep.mubr.f32.mxu1 %v16615_v23  ;;  %v5021_v29 = vsel %vm5020_vm14, %v4993_v15, %v4995_v14 }
 0x340   :  { %4847 = vmatprep.mubr.f32.mxu0 %v16615_v23 }
 0x341   :  { %v5003_v38 = vpop.permute.xlu1 %5002 }
 0x342   :  { %14613 = vmatmul.mubr.msk.f32.vlgmr.msra.gmra.mxu1 %vm1275_vm11, %v17131_v48  ;;  %v17344_v40 = vpop.permute.xlu0 %5000  ;;  %v17394_v48 = vld [vmem:[%s21761_s3 + $0x68] sm:$0xff] }
 0x343   :  { %14621 = vmatpush1.msk.msra.mxu1 %vm1282_vm10, %v4354_v39  ;;  %14642 = vmatmul.mubr.msk.f32.vlgmr.msra.gmra.mxu0 %vm1275_vm11, %v17267_v35  ;;  %v5025_v0 = vsel %vm5020_vm14, %v17344_v40, %v5003_v38  ;;  %v5024_v17 = vsel %vm5020_vm14, %v17329_v33, %v17344_v40 }
 0x344   :  { %14628 = vmatprep.subr.msk.mxu1 %vm1282_vm10, %v4359_v43  ;;  %14650 = vmatpush1.msk.msra.mxu0 %vm1282_vm10, %v5021_v29  ;;  %v17574_v29 = vpop.f32.mrf.mxu0 }
 0x345   :  { %4216 = vmatprep.mubr.f32.mxu1 %v16615_v23  ;;  %4853 = vmatprep.mubr.f32.mxu0 %v16615_v23  ;;  %v17356_v5 = vpop.permute.xlu1 %5006 }
 0x346   :  { %14614 = vmatmul.mubr.msk.f32.gmra.mxu1 %vm1275_vm11, %v17155_v21  ;;  %v17360_v9 = vpop.permute.xlu0 %5004 }
 0x347   :  { %14643 = vmatmul.mubr.msk.f32.gmra.mxu0 %vm1275_vm11, %v17293_v3  ;;  %4462 = vmatprep.mubr.f32.mxu1 %v16615_v23  ;;  %v5026_v50 = vsel %vm5020_vm14, %v5003_v38, %v17360_v9  ;;  %v5027_v44 = vsel %vm5020_vm14, %v17360_v9, %v17356_v5  ;;  %v17591_v9 = vpop.f32.mrf.mxu0 }
 0x348   :  { %5130 = vmatprep.mubr.f32.mxu0 %v16615_v23  ;;  %14657 = vmatprep.subr.msk.mxu0 %vm1282_vm10, %v5026_v50 }
 0x349   :  { %v5011_v6 = vpop.permute.xlu1 %5010 }
 0x34a   :  { %14622 = vmatmul.mubr.msk.f32.vlgmr.msra.gmra.mxu1 %vm1275_vm11, %v17267_v35  ;;  %v17379_v49 = vpop.permute.xlu0 %5008 }
 0x34b   :  { %14629 = vmatpush1.msk.msra.mxu1 %vm1282_vm10, %v4358_v8  ;;  %14651 = vmatmul.mubr.msk.f32.vlgmr.msra.gmra.mxu0 %vm1275_vm11, %v17371_v58  ;;  %v5029_v34 = vsel %vm5020_vm14, %v17379_v49, %v5011_v6  ;;  %v5028_v32 = vsel %vm5020_vm14, %v17356_v5, %v17379_v49  ;;  %v17605_v49 = vpop.f32.mrf.mxu0 }
 0x34c   :  { %14636 = vmatprep.subr.msk.mxu1 %vm1282_vm10, %v4363_v1  ;;  %4468 = vmatprep.mubr.f32.mxu1 %v16615_v23 }
 0x34d   :  { %5136 = vmatprep.mubr.f32.mxu0 %v16615_v23  ;;  %14658 = vmatpush1.msk.msra.mxu0 %vm1282_vm10, %v5025_v0  ;;  %v17400_v25 = vpop.permute.xlu1 %5014  ;;  %v17615_v0 = vld [vmem:[%s21761_s3 + $0x80] sm:$0xff] }
 0x34e   :  { %14623 = vmatmul.mubr.msk.f32.gmra.mxu1 %vm1275_vm11, %v17293_v3  ;;  %v17404_v30 = vpop.permute.xlu0 %5012 }
 0x34f   :  { %14652 = vmatmul.mubr.msk.f32.gmra.mxu0 %vm1275_vm11, %v17394_v48  ;;  %4616 = vmatprep.mubr.f32.mxu1 %v16615_v23  ;;  %v5030_v28 = vsel %vm5020_vm14, %v5011_v6, %v17404_v30  ;;  %v5031_v55 = vsel %vm5020_vm14, %v17404_v30, %v17400_v25 }
 0x350   :  { %5284 = vmatprep.mubr.f32.mxu0 %v16615_v23  ;;  %14665 = vmatprep.subr.msk.mxu0 %vm1282_vm10, %v5030_v28  ;;  %v17624_v28 = vpop.f32.mrf.mxu0 }
 0x351   :  { %v5019_v21 = vpop.permute.xlu1 %5018 }
 0x352   :  { %14630 = vmatmul.mubr.msk.f32.vlgmr.msra.gmra.mxu1 %vm1275_vm11, %v17267_v35  ;;  %v5017_v57 = vpop.permute.xlu0 %5016 }
 0x353   :  { %14637 = vmatpush1.msk.msra.mxu1 %vm1282_vm10, %v4362_v46  ;;  %14659 = vmatmul.mubr.msk.f32.vlgmr.msra.gmra.mxu0 %vm1275_vm11, %v17371_v58  ;;  %v5033_v4 = vsel %vm5020_vm14, %v5017_v57, %v5019_v21  ;;  %v5032_v37 = vsel %vm5020_vm14, %v17400_v25, %v5017_v57  ;;  %v17638_v57 = vld [vmem:[%s21761_s3 + $0x88] sm:$0xff] }
 0x354   :  { %14964 = vmatprep.subr.msk.mxu1 %vm1282_vm10, %v17297_v19  ;;  %4622 = vmatprep.mubr.f32.mxu1 %v16615_v23 }
 0x355   :  { %5290 = vmatprep.mubr.f32.mxu0 %v16615_v23  ;;  %14666 = vmatpush1.msk.msra.mxu0 %vm1282_vm10, %v5029_v34  ;;  %v17433_v27 = vpop.permute.xlu1 %5636 }
 0x356   :  { %14631 = vmatmul.mubr.msk.f32.gmra.mxu1 %vm1275_vm11, %v17293_v3  ;;  %14969 = vmatprep.subr.msk.mxu0 %vm1282_vm10, %v5033_v4  ;;  %v17438_v7 = vpop.permute.xlu0 %5634 }
 0x357   :  { %14660 = vmatmul.mubr.msk.f32.gmra.mxu0 %vm1275_vm11, %v17394_v48  ;;  %4770 = vmatprep.mubr.f32.mxu1 %v16615_v23  ;;  %v5662_v62 = vsel %vm5660_vm15, %v17438_v7, %v17433_v27 }
 0x358   :  { %5438 = vmatprep.mubr.f32.mxu0 %v16615_v23  ;;  %v17459_v23 = vpop.f32.mrf.mxu1 }
 0x359   :  { %v5639_v22 = vpop.permute.xlu1 %5638 }
 0x35a   :  { %14638 = vmatmul.mubr.msk.f32.vlgmr.msra.gmra.mxu1 %vm1275_vm11, %v17267_v35  ;;  %v17448_v52 = vpop.permute.xlu0 %5632  ;;  %v17480_v53 = vpop.f32.mrf.mxu1  ;;  %v5663_v20 = vsel %vm5660_vm15, %v17433_v27, %v5639_v22 }
 0x35b   :  { %14965 = vmatpush3.msk.msra.mxu1 %vm1282_vm10, %v17297_v19  ;;  %14667 = vmatmul.mubr.msk.f32.vlgmr.msra.gmra.mxu0 %vm1275_vm11, %v17371_v58  ;;  %v5661_v43 = vsel %vm5660_vm15, %v17448_v52, %v17438_v7  ;;  %v17645_v27 = vpop.f32.mrf.mxu0 }
 0x35c   :  { %14970 = vmatpush3.msk.msra.mxu0 %vm1282_vm10, %v5033_v4  ;;  %14653 = vmatprep.subr.msk.mxu1 %vm1282_vm10, %v5024_v17  ;;  %v17502_v41 = vpop.f32.mrf.mxu1 }
 0x35d   :  { %4776 = vmatprep.mubr.f32.mxu1 %v17461_v13  ;;  %5444 = vmatprep.mubr.f32.mxu0 %v17461_v13  ;;  %v17465_v2 = vpop.permute.xlu1 %5642 }
 0x35e   :  { %14639 = vmatmul.mubr.msk.f32.gmra.mxu1 %vm1275_vm11, %v17293_v3  ;;  %v17469_v12 = vpop.permute.xlu0 %5640  ;;  %v17529_v26 = vpop.f32.mrf.mxu1 }
 0x35f   :  { %14668 = vmatmul.mubr.msk.f32.gmra.mxu0 %vm1275_vm11, %v17394_v48  ;;  %14966 = vmatprep.mubr.msk.f32.mxu1 %vm1275_vm11, %v17267_v35  ;;  %v5664_v10 = vsel %vm5660_vm15, %v5639_v22, %v17469_v12  ;;  %v5665_v30 = vsel %vm5660_vm15, %v17469_v12, %v17465_v2  ;;  %v17660_v12 = vpop.f32.mrf.mxu0 }
 0x360   :  { %14971 = vmatprep.mubr.msk.f32.mxu0 %vm1275_vm11, %v17371_v58  ;;  %14682 = vmatprep.subr.msk.mxu0 %vm1282_vm10, %v5664_v10  ;;  %v17541_v51 = vpop.f32.mrf.mxu1 }
 0x362   :  { %14967 = vmatmul.mubr.msk.f32.vlgmr.msra.gmra.mxu1 %vm1275_vm11, %v17293_v3  ;;  %v5647_v56 = vpop.permute.xlu1 %5646  ;;  %v17560_v47 = vpop.f32.mrf.mxu1 }
 0x363   :  { %14654 = vmatpush1.msk.msra.mxu1 %vm1282_vm10, %v5023_v11  ;;  %14972 = vmatmul.mubr.msk.f32.vlgmr.msra.gmra.mxu0 %vm1275_vm11, %v17394_v48  ;;  %v5645_v24 = vpop.permute.xlu0 %5644 }
 0x364   :  { %14661 = vmatprep.subr.msk.mxu1 %vm1282_vm10, %v5028_v32  ;;  %5207 = vmatprep.mubr.f32.mxu1 %v17461_v13  ;;  %v5667_v3 = vsel %vm5660_vm15, %v5645_v24, %v5647_v56  ;;  %v17578_v39 = vpop.f32.mrf.mxu1  ;;  %v5666_v5 = vsel %vm5660_vm15, %v17465_v2, %v5645_v24  ;;  %v17679_v24 = vpop.f32.mrf.mxu0 }
 0x365   :  { %14683 = vmatpush1.msk.msra.mxu0 %vm1282_vm10, %v5663_v20  ;;  %5847 = vmatprep.mubr.f32.mxu0 %v17461_v13 }
 0x366   :  { %14655 = vmatmul.mubr.msk.f32.vlgmr.msra.gmra.mxu1 %vm1275_vm11, %v17371_v58  ;;  %v17511_v35 = vpop.permute.xlu1 %5650  ;;  %v17599_v6 = vpop.f32.mrf.mxu1 }
 0x367   :  { %14662 = vmatpush1.msk.msra.mxu1 %vm1282_vm10, %v5027_v44  ;;  %14684 = vmatmul.mubr.msk.f32.vlgmr.msra.gmra.mxu0 %vm1275_vm11, %v17500_v16  ;;  %v17518_v45 = vpop.permute.xlu0 %5648 }
 0x368   :  { %14669 = vmatprep.subr.msk.mxu1 %vm1282_vm10, %v5032_v37  ;;  %5213 = vmatprep.mubr.f32.mxu1 %v17461_v13  ;;  %v5668_v36 = vsel %vm5660_vm15, %v5647_v56, %v17518_v45  ;;  %v5669_v10 = vsel %vm5660_vm15, %v17518_v45, %v17511_v35 }
 0x369   :  { %5853 = vmatprep.mubr.f32.mxu0 %v17461_v13  ;;  %14690 = vmatprep.subr.msk.mxu0 %vm1282_vm10, %v5668_v36  ;;  %v17695_v36 = vpop.f32.mrf.mxu0 }
 0x36a   :  { %14656 = vmatmul.mubr.msk.f32.gmra.mxu1 %vm1275_vm11, %v17394_v48  ;;  %14691 = vmatpush1.msk.msra.mxu0 %vm1282_vm10, %v5667_v3 }
 0x36b   :  { %14685 = vmatmul.mubr.msk.f32.gmra.mxu0 %vm1275_vm11, %v17525_v54  ;;  %v5655_v19 = vpop.permute.xlu1 %5654  ;;  %5361 = vmatprep.mubr.f32.mxu1 %v17461_v13 }
 0x36c   :  { %v5653_v63 = vpop.permute.xlu0 %5652  ;;  %6001 = vmatprep.mubr.f32.mxu0 %v17461_v13 }
 0x36d   :  { %v5671_v33 = vsel %vm5660_vm15, %v5653_v63, %v5655_v19  ;;  %v5670_v21 = vsel %vm5660_vm15, %v17511_v35, %v5653_v63 }
 0x36e   :  { %14663 = vmatmul.mubr.msk.f32.vlgmr.msra.gmra.mxu1 %vm1275_vm11, %v17371_v58 }
 0x36f   :  { %14670 = vmatpush1.msk.msra.mxu1 %vm1282_vm10, %v5031_v55  ;;  %14692 = vmatmul.mubr.msk.f32.vlgmr.msra.gmra.mxu0 %vm1275_vm11, %v17500_v16  ;;  %v17554_v59 = vpop.permute.xlu1 %5658 }
 0x370   :  { %14678 = vmatprep.subr.msk.mxu1 %vm1282_vm10, %v5662_v62  ;;  %5367 = vmatprep.mubr.f32.mxu1 %v17461_v13  ;;  %v17558_v14 = vpop.permute.xlu0 %5656 }
 0x371   :  { %6007 = vmatprep.mubr.f32.mxu0 %v17461_v13  ;;  %v5672_v42 = vsel %vm5660_vm15, %v5655_v19, %v17558_v14  ;;  %v5673_v11 = vsel %vm5660_vm15, %v17558_v14, %v17554_v59  ;;  %v17712_v14 = vpop.f32.mrf.mxu0 }
 0x372   :  { %14664 = vmatmul.mubr.msk.f32.gmra.mxu1 %vm1275_vm11, %v17394_v48  ;;  %14698 = vmatprep.subr.msk.mxu0 %vm1282_vm10, %v5672_v42 }
 0x373   :  { %14693 = vmatmul.mubr.msk.f32.gmra.mxu0 %vm1275_vm11, %v17525_v54  ;;  %v17571_v15 = vpop.permute.xlu1 %6276  ;;  %5515 = vmatprep.mubr.f32.mxu1 %v17461_v13 }
 0x374   :  { %14699 = vmatpush1.msk.msra.mxu0 %vm1282_vm10, %v5671_v33  ;;  %v6275_v38 = vpop.permute.xlu0 %6274  ;;  %6155 = vmatprep.mubr.f32.mxu0 %v17461_v13 }
 0x375   :  { %v6302_v40 = vsel %vm6300_vm0, %v6275_v38, %v17571_v15 }
 0x376   :  { %14671 = vmatmul.mubr.msk.f32.vlgmr.msra.gmra.mxu1 %vm1275_vm11, %v17371_v58  ;;  %14707 = vmatprep.subr.msk.mxu0 %vm1282_vm10, %v6302_v40 }
 0x377   :  { %14679 = vmatpush1.msk.msra.mxu1 %vm1282_vm10, %v5661_v43  ;;  %14700 = vmatmul.mubr.msk.f32.vlgmr.msra.gmra.mxu0 %vm1275_vm11, %v17500_v16 }
 0x378   :  { %14686 = vmatprep.subr.msk.mxu1 %vm1282_vm10, %v5666_v5  ;;  %v17596_v50 = vpop.permute.xlu1 %6278  ;;  %5521 = vmatprep.mubr.f32.mxu1 %v17461_v13 }
 0x379   :  { %v6273_v58 = vpop.permute.xlu0 %6272  ;;  %6161 = vmatprep.mubr.f32.mxu0 %v17461_v13  ;;  %v6303_v40 = vsel %vm6300_vm0, %v17571_v15, %v17596_v50 }
 0x37a   :  { %14672 = vmatmul.mubr.msk.f32.gmra.mxu1 %vm1275_vm11, %v17394_v48  ;;  %v6301_v8 = vsel %vm6300_vm0, %v6273_v58, %v6275_v38  ;;  %v17729_v38 = vpop.f32.mrf.mxu0 }
 0x37b   :  { %14701 = vmatmul.mubr.msk.f32.gmra.mxu0 %vm1275_vm11, %v17525_v54  ;;  %5770 = vmatprep.mubr.f32.mxu1 %v17461_v13  ;;  %v17617_v48 = vpop.f32.mrf.mxu1 }
 0x37c   :  { %14708 = vmatpush1.msk.msra.mxu0 %vm1282_vm10, %v6301_v8  ;;  %v6283_v1 = vpop.permute.xlu1 %6282  ;;  %6410 = vmatprep.mubr.f32.mxu0 %v17461_v13  ;;  %v17745_v5 = vpop.f32.mrf.mxu0 }
 0x37d   :  { %v6281_v25 = vpop.permute.xlu0 %6280  ;;  %v17640_v4 = vpop.f32.mrf.mxu1 }
 0x37e   :  { %14680 = vmatmul.mubr.msk.f32.vlgmr.msra.gmra.mxu1 %vm1275_vm11, %v17500_v16  ;;  %v6305_v22 = vsel %vm6300_vm0, %v6281_v25, %v6283_v1  ;;  %v6304_v55 = vsel %vm6300_vm0, %v17596_v50, %v6281_v25  ;;  %v17760_v8 = vpop.f32.mrf.mxu0 }
 0x37f   :  { %14687 = vmatpush1.msk.msra.mxu1 %vm1282_vm10, %v5665_v30  ;;  %14709 = vmatmul.mubr.msk.f32.vlgmr.msra.gmra.mxu0 %vm1275_vm11, %v17615_v0  ;;  %v17657_v17 = vpop.f32.mrf.mxu1 }
 0x380   :  { %14694 = vmatprep.subr.msk.mxu1 %vm1282_vm10, %v5670_v21  ;;  %v17632_v46 = vpop.permute.xlu1 %6286  ;;  %5776 = vmatprep.mubr.f32.mxu1 %v17461_v13 }
 0x381   :  { %v17642_v34 = vpop.permute.xlu0 %6284  ;;  %6416 = vmatprep.mubr.f32.mxu0 %v17461_v13  ;;  %v17675_v56 = vpop.f32.mrf.mxu1 }
 0x382   :  { %14681 = vmatmul.mubr.msk.f32.gmra.mxu1 %vm1275_vm11, %v17525_v54  ;;  %v6306_v7 = vsel %vm6300_vm0, %v6283_v1, %v17642_v34 }
 0x383   :  { %14710 = vmatmul.mubr.msk.f32.gmra.mxu0 %vm1275_vm11, %v17638_v57  ;;  %14715 = vmatprep.subr.msk.mxu0 %vm1282_vm10, %v6306_v7 }
 0x384   :  { %v6291_v52 = vpop.permute.xlu1 %6290  ;;  %5924 = vmatprep.mubr.f32.mxu1 %v17461_v13  ;;  %14716 = vmatpush1.msk.msra.mxu0 %vm1282_vm10, %v6305_v22 }
 0x385   :  { %v6289_v2 = vpop.permute.xlu0 %6288  ;;  %6564 = vmatprep.mubr.f32.mxu0 %v17461_v13 }
 0x386   :  { %14688 = vmatmul.mubr.msk.f32.vlgmr.msra.gmra.mxu1 %vm1275_vm11, %v17500_v16  ;;  %v6309_v37 = vsel %vm6300_vm0, %v6289_v2, %v6291_v52 }
 0x387   :  { %14695 = vmatpush1.msk.msra.mxu1 %vm1282_vm10, %v5669_v10  ;;  %14717 = vmatmul.mubr.msk.f32.vlgmr.msra.gmra.mxu0 %vm1275_vm11, %v17615_v0 }
 0x388   :  { %14974 = vmatprep.subr.msk.mxu1 %vm1282_vm10, %v5673_v11  ;;  %5930 = vmatprep.mubr.f32.mxu1 %v17461_v13 }
 0x389   :  { %v17677_v32 = vpop.permute.xlu1 %6294  ;;  %6570 = vmatprep.mubr.f32.mxu0 %v17461_v13 }
 0x38a   :  { %14689 = vmatmul.mubr.msk.f32.gmra.mxu1 %vm1275_vm11, %v17525_v54  ;;  %v6293_v20 = vpop.permute.xlu0 %6292  ;;  %v17684_v44 = vpop.f32.mrf.mxu1 }
 0x38b   :  { %14718 = vmatmul.mubr.msk.f32.gmra.mxu0 %vm1275_vm11, %v17638_v57  ;;  %v6310_v35 = vsel %vm6300_vm0, %v6291_v52, %v6293_v20  ;;  %6078 = vmatprep.mubr.f32.mxu1 %v17461_v13  ;;  %v6311_v22 = vsel %vm6300_vm0, %v6293_v20, %v17677_v32 }
 0x38c   :  { %14723 = vmatprep.subr.msk.mxu0 %vm1282_vm10, %v6310_v35  ;;  %6718 = vmatprep.mubr.f32.mxu0 %v17461_v13  ;;  %v17693_v45 = vpop.f32.mrf.mxu1 }
 0x38d   :  { %14724 = vmatpush1.msk.msra.mxu0 %vm1282_vm10, %v6309_v37  ;;  %v6299_v3 = vpop.permute.xlu1 %6298 }
 0x38e   :  { %14696 = vmatmul.mubr.msk.f32.vlgmr.msra.gmra.mxu1 %vm1275_vm11, %v17500_v16  ;;  %v6297_v19 = vpop.permute.xlu0 %6296  ;;  %v17700_v63 = vpop.f32.mrf.mxu1 }
 0x38f   :  { %14975 = vmatpush3.msk.msra.mxu1 %vm1282_vm10, %v5673_v11  ;;  %14725 = vmatmul.mubr.msk.f32.vlgmr.msra.gmra.mxu0 %vm1275_vm11, %v17615_v0  ;;  %v6313_v62 = vsel %vm6300_vm0, %v6297_v19, %v6299_v3  ;;  %v6312_v58 = vsel %vm6300_vm0, %v17677_v32, %v6297_v19 }
 0x390   :  { %14711 = vmatprep.subr.msk.mxu1 %vm1282_vm10, %v6304_v55  ;;  %14979 = vmatprep.subr.msk.mxu0 %vm1282_vm10, %v6313_v62  ;;  %v17710_v59 = vpop.f32.mrf.mxu1 }
 0x391   :  { %6084 = vmatprep.mubr.f32.mxu1 %v17461_v13  ;;  %14980 = vmatpush3.msk.msra.mxu0 %vm1282_vm10, %v6313_v62 }
 0x392   :  { %14697 = vmatmul.mubr.msk.f32.gmra.mxu1 %vm1275_vm11, %v17525_v54  ;;  %6724 = vmatprep.mubr.f32.mxu0 %v17461_v13  ;;  %v17719_v42 = vpop.f32.mrf.mxu1 }
 0x393   :  { %14726 = vmatmul.mubr.msk.f32.gmra.mxu0 %vm1275_vm11, %v17638_v57  ;;  %14976 = vmatprep.mubr.msk.f32.mxu1 %vm1275_vm11, %v17500_v16  ;;  %v6308_v16 = vsel %vm6300_vm0, %v17632_v46, %v6289_v2 }
 0x394   :  { %14981 = vmatprep.mubr.msk.f32.mxu0 %vm1275_vm11, %v17615_v0  ;;  %v17727_v33 = vpop.f32.mrf.mxu1 }
 0x396   :  { %14977 = vmatmul.mubr.msk.f32.vlgmr.msra.gmra.mxu1 %vm1275_vm11, %v17525_v54  ;;  %v17736_v43 = vpop.f32.mrf.mxu1  ;;  %v6307_v54 = vsel %vm6300_vm0, %v17642_v34, %v17632_v46 }
 0x397   :  { %14712 = vmatpush1.msk.msra.mxu1 %vm1282_vm10, %v6303_v40  ;;  %14982 = vmatmul.mubr.msk.f32.vlgmr.msra.gmra.mxu0 %vm1275_vm11, %v17638_v57 }
 0x398   :  { %14719 = vmatprep.subr.msk.mxu1 %vm1282_vm10, %v6308_v16  ;;  %6487 = vmatprep.mubr.f32.mxu1 %v17461_v13  ;;  %v17747_v15 = vpop.f32.mrf.mxu1 }
 0x399   :  { %7306 = vmatprep.mubr.f32.mxu0 %v17461_v13 }
 0x39a   :  { %14713 = vmatmul.mubr.msk.f32.vlgmr.msra.gmra.mxu1 %vm1275_vm11, %v17615_v0  ;;  %v14943_v50 = vpop.f32.mrf.mxu1 }
 0x39b   :  { %14720 = vmatpush1.msk.msra.mxu1 %vm1282_vm10, %v6307_v54  ;;  %6493 = vmatprep.mubr.f32.mxu1 %v17461_v13 }
 0x39c   :  { %14727 = vmatprep.subr.msk.mxu1 %vm1282_vm10, %v6312_v58  ;;  %v17762_v1 = vpop.f32.mrf.mxu1 }
 0x39e   :  { %14714 = vmatmul.mubr.msk.f32.gmra.mxu1 %vm1275_vm11, %v17638_v57  ;;  %v1944_v25 = vpop.f32.mrf.mxu1  ;;  %v2555_v30 = vpop.f32.mrf.mxu0 }
 0x39f   :  { %6641 = vmatprep.mubr.f32.mxu1 %v17461_v13  ;;  %v1945_v21 = vadd.f32 %v1944_v25, %v17396_v31 }
 0x3a0   :  { %v17768_v46 = vpop.f32.mrf.mxu1  ;;  %v17770_v34 = vpop.f32.mrf.mxu0 }
 0x3a1   :  { %v17772_v7 = vadd.f32 %v2555_v30, %v1945_v21 }
 0x3a2   :  { %14721 = vmatmul.mubr.msk.f32.vlgmr.msra.gmra.mxu1 %vm1275_vm11, %v17615_v0  ;;  %v1950_v52 = vpop.f32.mrf.mxu1  ;;  %v2561_v2 = vpop.f32.mrf.mxu0 }
 0x3a3   :  { %14728 = vmatpush1.msk.msra.mxu1 %vm1282_vm10, %v6311_v22  ;;  %6647 = vmatprep.mubr.f32.mxu1 %v17461_v13  ;;  %v1951_v31 = vadd.f32 %v1950_v52, %v17429_v18 }
 0x3a4   :  { %v17781_v10 = vpop.f32.mrf.mxu1  ;;  %v17783_v11 = vpop.f32.mrf.mxu0 }
 0x3a5   :  { %v17785_v35 = vadd.f32 %v2561_v2, %v1951_v31 }
 0x3a6   :  { %14722 = vmatmul.mubr.msk.f32.gmra.mxu1 %vm1275_vm11, %v17638_v57  ;;  %v2098_v32 = vpop.f32.mrf.mxu1  ;;  %v2709_v20 = vpop.f32.mrf.mxu0 }
 0x3a7   :  { %6795 = vmatprep.mubr.f32.mxu1 %v17461_v13  ;;  %v2099_v37 = vadd.f32 %v2098_v32, %v17541_v51 }
 0x3a8   :  { %v17791_v3 = vpop.f32.mrf.mxu1  ;;  %v17793_v19 = vpop.f32.mrf.mxu0 }
 0x3a9   :  { %v17795_v18 = vadd.f32 %v2709_v20, %v2099_v37 }
 0x3aa   :  { %14729 = vmatmul.mubr.msk.f32.vlgmr.msra.gmra.mxu1 %vm1275_vm11, %v17615_v0  ;;  %v2104_v55 = vpop.f32.mrf.mxu1  ;;  %v2715_v62 = vpop.f32.mrf.mxu0 }
 0x3ab   :  { %6801 = vmatprep.mubr.f32.mxu1 %v17461_v13  ;;  %v2105_v40 = vadd.f32 %v2104_v55, %v17578_v39 }
 0x3ac   :  { %v17801_v16 = vpop.f32.mrf.mxu1  ;;  %v17803_v54 = vpop.f32.mrf.mxu0 }
 0x3ad   :  { %v17805_v51 = vadd.f32 %v2715_v62, %v2105_v40  ;;  %v2022_v40 = vadd.f32 %v17574_v29, %v17459_v23  ;;  %v2176_v23 = vadd.f32 %v17645_v27, %v17617_v48 }
 0x3ae   :  { %14730 = vmatmul.mubr.msk.f32.gmra.mxu1 %vm1275_vm11, %v17638_v57  ;;  %v2252_v58 = vpop.f32.mrf.mxu1  ;;  %v2863_v25 = vpop.f32.mrf.mxu0 }
 0x3af   :  { %v2253_v30 = vadd.f32 %v2252_v58, %v17684_v44  ;;  %7229 = vmatprep.mubr.f32.mxu1 %v17461_v13 }
 0x3b0   :  { %v17811_v0 = vpop.f32.mrf.mxu1  ;;  %v17813_v21 = vpop.f32.mrf.mxu0 }
 0x3b1   :  { %v17815_v39 = vadd.f32 %v2863_v25, %v2253_v30 }
 0x3b3   :  { %v2258_v22 = vpop.f32.mrf.mxu1  ;;  %v2869_v52 = vpop.f32.mrf.mxu0 }
 0x3b4   :  { %v2259_v2 = vadd.f32 %v2258_v22, %v17700_v63 }
 0x3b5   :  { %v17818_v31 = vpop.f32.mrf.mxu1  ;;  %v17820_v32 = vpop.f32.mrf.mxu0 }
 0x3b6   :  { %21851 = vst [vmem:[#allocation15_spill] sm:$0xff] %v17820_v32  ;;  %v17822_v57 = vadd.f32 %v2869_v52, %v2259_v2 }
 0x3b7   :  { %v14948_v20 = vpop.f32.mrf.mxu1  ;;  %v14953_v44 = vpop.f32.mrf.mxu0 }
 0x3b8   :  { %v2412_v37 = vadd.f32 %v14948_v20, %v14943_v50  ;;  %v2028_v50 = vadd.f32 %v17605_v49, %v17502_v41  ;;  %v2182_v49 = vadd.f32 %v17679_v24, %v17657_v17  ;;  %v2336_v17 = vadd.f32 %v17745_v5, %v17736_v43 }
 0x3b9   :  { %v17824_v55 = vpop.f32.mrf.mxu1  ;;  %v17826_v62 = vpop.f32.mrf.mxu0 }
 0x3ba   :  { %21852 = vst [vmem:[#allocation16_spill] sm:$0xff] %v17824_v55  ;;  %21853 = vst [vmem:[#allocation17_spill] sm:$0xff] %v17826_v62  ;;  %v17830_v58 = vadd.f32 %v14953_v44, %v2412_v37 }
 0x3bb   :  { %v2632_v25 = vpop.f32.mrf.mxu1 }
 0x3bc   :  { %v3028_v63 = vadd.f32 %v2632_v25, %v2022_v40  ;;  %v3268_v30 = vpop.f32.mrf.mxu0 }
 0x3bd   :  { %v17832_v22 = vpop.f32.mrf.mxu1 }
 0x3be   :  { %21854 = vst [vmem:[#allocation18_spill] sm:$0xff] %v17832_v22  ;;  %v17834_v32 = vadd.f32 %v3268_v30, %v3028_v63  ;;  %v17836_v52 = vpop.f32.mrf.mxu0 }
 0x3bf   :  { %21855 = vst [vmem:[#allocation19_spill] sm:$0xff] %v17836_v52 }
 0x3c0   :  { %v2638_v2 = vpop.f32.mrf.mxu1 }
 0x3c1   :  { %v3041_v20 = vadd.f32 %v2638_v2, %v2028_v50  ;;  %v3274_v62 = vpop.f32.mrf.mxu0 }
 0x3c2   :  { %v17840_v55 = vpop.f32.mrf.mxu1 }
 0x3c3   :  { %21856 = vst [vmem:[#allocation20_spill] sm:$0xff] %v17840_v55  ;;  %v17844_v29 = vadd.f32 %v3274_v62, %v3041_v20  ;;  %v17846_v44 = vpop.f32.mrf.mxu0  ;;  %v2330_v62 = vadd.f32 %v17712_v14, %v17719_v42 }
 0x3c4   :  { %21857 = vst [vmem:[#allocation21_spill] sm:$0xff] %v17846_v44  ;;  %v2786_v37 = vpop.f32.mrf.mxu1 }
 0x3c5   :  { %v3032_v40 = vadd.f32 %v2786_v37, %v2176_v23  ;;  %v3422_v25 = vpop.f32.mrf.mxu0 }
 0x3c6   :  { %v17848_v63 = vpop.f32.mrf.mxu1 }
 0x3c7   :  { %21858 = vst [vmem:[#allocation22_spill] sm:$0xff] %v17848_v63  ;;  %v17850_v30 = vadd.f32 %v3422_v25, %v3032_v40  ;;  %v17852_v41 = vpop.f32.mrf.mxu0 }
 0x3c8   :  { %21859 = vst [vmem:[#allocation23_spill] sm:$0xff] %v17852_v41 }
 0x3c9   :  { %v2792_v50 = vpop.f32.mrf.mxu1  ;;  %v3428_v2 = vpop.f32.mrf.mxu0 }
 0x3ca   :  { %v3045_v52 = vadd.f32 %v2792_v50, %v2182_v49 }
 0x3cb   :  { %v17856_v48 = vpop.f32.mrf.mxu1  ;;  %v17858_v27 = vpop.f32.mrf.mxu0 }
 0x3cc   :  { %21860 = vst [vmem:[#allocation24_spill] sm:$0xff] %v17856_v48  ;;  %21861 = vst [vmem:[#allocation25_spill] sm:$0xff] %v17858_v27  ;;  %v17862_v20 = vadd.f32 %v3428_v2, %v3045_v52 }
 0x3cd   :  { %v2940_v23 = vpop.f32.mrf.mxu1  ;;  %v3576_v37 = vpop.f32.mrf.mxu0 }
 0x3ce   :  { %v3036_v40 = vadd.f32 %v2940_v23, %v2330_v62 }
 0x3cf   :  { %v17864_v25 = vpop.f32.mrf.mxu1  ;;  %v17866_v41 = vpop.f32.mrf.mxu0 }
 0x3d0   :  { %21862 = vst [vmem:[#allocation26_spill] sm:$0xff] %v17864_v25  ;;  %21863 = vst [vmem:[#allocation27_spill] sm:$0xff] %v17866_v41  ;;  %v17870_v24 = vadd.f32 %v3576_v37, %v3036_v40 }
 0x3d1   :  { %v2946_v49 = vpop.f32.mrf.mxu1 }
 0x3d2   :  { %v3049_v50 = vadd.f32 %v2946_v49, %v2336_v17  ;;  %v3582_v27 = vpop.f32.mrf.mxu0 }
 0x3d3   :  { %v17872_v48 = vpop.f32.mrf.mxu1 }
 0x3d4   :  { %21864 = vst [vmem:[#allocation28_spill] sm:$0xff] %v17872_v48  ;;  %v17874_v14 = vadd.f32 %v3582_v27, %v3049_v50  ;;  %v17876_v42 = vpop.f32.mrf.mxu0 }
 0x3d5   :  { %21865 = vst [vmem:[#allocation29_spill] sm:$0xff] %v17876_v42  ;;  %v3191_v52 = vpop.f32.mrf.mxu1 }
 0x3d6   :  { %v3662_v2 = vadd.f32 %v3191_v52, %v17772_v7  ;;  %v3827_v62 = vpop.f32.mrf.mxu0 }
 0x3d7   :  { %v17879_v23 = vpop.f32.mrf.mxu1 }
 0x3d8   :  { %v17881_v41 = vadd.f32 %v3827_v62, %v3662_v2  ;;  %v17883_v43 = vpop.f32.mrf.mxu0 }
 0x3da   :  { %v3197_v5 = vpop.f32.mrf.mxu1  ;;  %v3833_v37 = vpop.f32.mrf.mxu0 }
 0x3db   :  { %v3675_v40 = vadd.f32 %v3197_v5, %v17785_v35 }
 0x3dc   :  { %v17886_v17 = vpop.f32.mrf.mxu1  ;;  %v17888_v27 = vpop.f32.mrf.mxu0 }
 0x3dd   :  { %v17890_v49 = vadd.f32 %v3833_v37, %v3675_v40 }
 0x3de   :  { %v3345_v50 = vpop.f32.mrf.mxu1  ;;  %v3981_v7 = vpop.f32.mrf.mxu0 }
 0x3df   :  { %v3666_v52 = vadd.f32 %v3345_v50, %v17795_v18 }
 0x3e0   :  { %v17897_v35 = vpop.f32.mrf.mxu1  ;;  %v17899_v2 = vpop.f32.mrf.mxu0 }
 0x3e1   :  { %v17901_v62 = vadd.f32 %v3981_v7, %v3666_v52 }
 0x3e2   :  { %v3351_v5 = vpop.f32.mrf.mxu1 }
 0x3e3   :  { %v3679_v37 = vadd.f32 %v3351_v5, %v17805_v51  ;;  %v3987_v40 = vpop.f32.mrf.mxu0 }
 0x3e4   :  { %v17904_v42 = vpop.f32.mrf.mxu1 }
 0x3e5   :  { %v17906_v48 = vadd.f32 %v3987_v40, %v3679_v37  ;;  %v17908_v25 = vpop.f32.mrf.mxu0 }
 0x3e6   :  { %v3499_v63 = vpop.f32.mrf.mxu1 }
 0x3e7   :  { %21866 = vst [vmem:[#allocation30_spill] sm:$0xff] %v17906_v48  ;;  %v3670_v13 = vadd.f32 %v3499_v63, %v17815_v39  ;;  %v4135_v18 = vpop.f32.mrf.mxu0 }
 0x3e8   :  { %v17911_v50 = vpop.f32.mrf.mxu1 }
 0x3e9   :  { %v17913_v44 = vadd.f32 %v4135_v18, %v3670_v13  ;;  %v17915_v7 = vpop.f32.mrf.mxu0 }
 0x3ea   :  { %21868 = vst [vmem:[#allocation32_spill] sm:$0xff] %v17915_v7  ;;  %v3505_v52 = vpop.f32.mrf.mxu1 }
 0x3eb   :  { %21867 = vst [vmem:[#allocation31_spill] sm:$0xff] %v17913_v44  ;;  %v3683_v51 = vadd.f32 %v3505_v52, %v17822_v57  ;;  %v4141_v5 = vpop.f32.mrf.mxu0 }
 0x3ec   :  { %v17918_v55 = vpop.f32.mrf.mxu1 }
 0x3ed   :  { %21869 = vst [vmem:[#allocation33_spill] sm:$0xff] %v17918_v55  ;;  %v17920_v37 = vadd.f32 %v4141_v5, %v3683_v51  ;;  %v17922_v40 = vpop.f32.mrf.mxu0 }
 0x3ee   :  { %21871 = vst [vmem:[#allocation35_spill] sm:$0xff] %v17922_v40  ;;  %v14958_v22 = vpop.f32.mrf.mxu1 }
 0x3ef   :  { %21870 = vst [vmem:[#allocation34_spill] sm:$0xff] %v17920_v37  ;;  %v3687_v39 = vadd.f32 %v14958_v22, %v17830_v58  ;;  %v14963_v63 = vpop.f32.mrf.mxu0 }
 0x3f0   :  { %v17925_v48 = vpop.f32.mrf.mxu1 }
 0x3f1   :  { %21872 = vst [vmem:[#allocation36_spill] sm:$0xff] %v17925_v48  ;;  %v17927_v13 = vadd.f32 %v14963_v63, %v3687_v39  ;;  %v17929_v18 = vpop.f32.mrf.mxu0 }
 0x3f2   :  { %21874 = vst [vmem:[#allocation38_spill] sm:$0xff] %v17929_v18  ;;  %v3904_v44 = vpop.f32.mrf.mxu1 }
 0x3f3   :  { %21873 = vst [vmem:[#allocation37_spill] sm:$0xff] %v17927_v13  ;;  %v4300_v57 = vadd.f32 %v3904_v44, %v17834_v32  ;;  %v4541_v52 = vpop.f32.mrf.mxu0 }
 0x3f4   :  { %v17932_v7 = vpop.f32.mrf.mxu1 }
 0x3f5   :  { %21875 = vst [vmem:[#allocation39_spill] sm:$0xff] %v17932_v7  ;;  %v17934_v51 = vadd.f32 %v4541_v52, %v4300_v57  ;;  %v17936_v5 = vpop.f32.mrf.mxu0 }
 0x3f6   :  { %21877 = vst [vmem:[#allocation41_spill] sm:$0xff] %v17936_v5  ;;  %v3910_v37 = vpop.f32.mrf.mxu1 }
 0x3f7   :  { %21876 = vst [vmem:[#allocation40_spill] sm:$0xff] %v17934_v51  ;;  %v4313_v58 = vadd.f32 %v3910_v37, %v17844_v29  ;;  %v4547_v22 = vpop.f32.mrf.mxu0 }
 0x3f8   :  { %v17939_v40 = vpop.f32.mrf.mxu1 }
 0x3f9   :  { %21878 = vst [vmem:[#allocation42_spill] sm:$0xff] %v17939_v40  ;;  %v17941_v39 = vadd.f32 %v4547_v22, %v4313_v58  ;;  %v17943_v63 = vpop.f32.mrf.mxu0 }
 0x3fa   :  { %21880 = vst [vmem:[#allocation44_spill] sm:$0xff] %v17943_v63  ;;  %v4058_v13 = vpop.f32.mrf.mxu1 }
 0x3fb   :  { %21879 = vst [vmem:[#allocation43_spill] sm:$0xff] %v17941_v39  ;;  %v4304_v32 = vadd.f32 %v4058_v13, %v17850_v30  ;;  %v4695_v44 = vpop.f32.mrf.mxu0 }
 0x3fc   :  { %v17946_v18 = vpop.f32.mrf.mxu1 }
 0x3fd   :  { %21881 = vst [vmem:[#allocation45_spill] sm:$0xff] %v17946_v18  ;;  %v17948_v57 = vadd.f32 %v4695_v44, %v4304_v32  ;;  %v17950_v52 = vpop.f32.mrf.mxu0 }
 0x3fe   :  { %21883 = vst [vmem:[#allocation47_spill] sm:$0xff] %v17950_v52  ;;  %v4064_v51 = vpop.f32.mrf.mxu1 }
 0x3ff   :  { %21882 = vst [vmem:[#allocation46_spill] sm:$0xff] %v17948_v57  ;;  %v4317_v29 = vadd.f32 %v4064_v51, %v17862_v20  ;;  %v4701_v37 = vpop.f32.mrf.mxu0 }
 0x400   :  { %v17953_v5 = vpop.f32.mrf.mxu1 }
 0x401   :  { %21884 = vst [vmem:[#allocation48_spill] sm:$0xff] %v17953_v5  ;;  %v17955_v58 = vadd.f32 %v4701_v37, %v4317_v29  ;;  %v17957_v22 = vpop.f32.mrf.mxu0 }
 0x402   :  { %21886 = vst [vmem:[#allocation50_spill] sm:$0xff] %v17957_v22  ;;  %v4212_v39 = vpop.f32.mrf.mxu1 }
 0x403   :  { %21885 = vst [vmem:[#allocation49_spill] sm:$0xff] %v17955_v58  ;;  %v4308_v30 = vadd.f32 %v4212_v39, %v17870_v24  ;;  %v4849_v13 = vpop.f32.mrf.mxu0 }
 0x404   :  { %v17960_v63 = vpop.f32.mrf.mxu1 }
 0x405   :  { %21887 = vst [vmem:[#allocation51_spill] sm:$0xff] %v17960_v63  ;;  %v17962_v32 = vadd.f32 %v4849_v13, %v4308_v30  ;;  %v17964_v44 = vpop.f32.mrf.mxu0 }
 0x406   :  { %21889 = vst [vmem:[#allocation53_spill] sm:$0xff] %v17964_v44  ;;  %v4218_v57 = vpop.f32.mrf.mxu1 }
 0x407   :  { %21888 = vst [vmem:[#allocation52_spill] sm:$0xff] %v17962_v32  ;;  %v4321_v20 = vadd.f32 %v4218_v57, %v17874_v14  ;;  %v4855_v51 = vpop.f32.mrf.mxu0 }
 0x408   :  { %v17967_v52 = vpop.f32.mrf.mxu1 }
 0x409   :  { %21890 = vst [vmem:[#allocation54_spill] sm:$0xff] %v17967_v52  ;;  %v17969_v29 = vadd.f32 %v4855_v51, %v4321_v20  ;;  %v17971_v37 = vpop.f32.mrf.mxu0 }
 0x40a   :  { %21892 = vst [vmem:[#allocation56_spill] sm:$0xff] %v17971_v37  ;;  %v4464_v58 = vpop.f32.mrf.mxu1 }
 0x40b   :  { %21891 = vst [vmem:[#allocation55_spill] sm:$0xff] %v17969_v29  ;;  %v17973_v22 = vpop.f32.mrf.mxu0 }
 0x40c   :  { %v4466_v24 = vpop.f32.mrf.mxu1 }
 0x40d   :  { %v17975_v39 = vpop.f32.mrf.mxu0 }
 0x40e   :  { %v17977_v30 = vpop.f32.mrf.mxu1 }
 0x40f   :  { %v17979_v13 = vpop.f32.mrf.mxu0 }
 0x410   :  { %v17981_v32 = vpop.f32.mrf.mxu1 }
 0x411   :  { %v17983_v14 = vpop.f32.mrf.mxu0 }
 0x412   :  { %v17985_v57 = vpop.f32.mrf.mxu1 }
 0x413   :  { %v17987_v20 = vpop.f32.mrf.mxu0 }
 0x414   :  { %v17989_v51 = vpop.f32.mrf.mxu1 }
 0x415   :  { %v17991_v29 = vpop.f32.mrf.mxu0 }
 0x416   :  { %21893 = vst [vmem:[#allocation57_spill] sm:$0xff] %v17991_v29  ;;  %v17993_v37 = vpop.f32.mrf.mxu1 }
 0x417   :  { %21894 = vst [vmem:[#allocation58_spill] sm:$0xff] %v17993_v37  ;;  %v17995_v52 = vpop.f32.mrf.mxu0 }
 0x418   :  { %21895 = vst [vmem:[#allocation59_spill] sm:$0xff] %v17995_v52  ;;  %v17997_v44 = vpop.f32.mrf.mxu1 }
 0x419   :  { %21896 = vst [vmem:[#allocation60_spill] sm:$0xff] %v17997_v44  ;;  %v17999_v63 = vpop.f32.mrf.mxu0 }
 0x41a   :  { %21897 = vst [vmem:[#allocation61_spill] sm:$0xff] %v17999_v63  ;;  %v18001_v5 = vpop.f32.mrf.mxu1 }
 0x41b   :  { %21898 = vst [vmem:[#allocation62_spill] sm:$0xff] %v18001_v5  ;;  %v18003_v18 = vpop.f32.mrf.mxu0 }
 0x41c   :  { %21899 = vst [vmem:[#allocation63_spill] sm:$0xff] %v18003_v18  ;;  %v18005_v40 = vpop.f32.mrf.mxu1 }
 0x41d   :  { %21900 = vst [vmem:[#allocation64_spill] sm:$0xff] %v18005_v40  ;;  %v18007_v7 = vpop.f32.mrf.mxu0 }
 0x41e   :  { %21901 = vst [vmem:[#allocation65_spill] sm:$0xff] %v18007_v7  ;;  %v18009_v48 = vpop.f32.mrf.mxu1 }
 0x41f   :  { %21902 = vst [vmem:[#allocation66_spill] sm:$0xff] %v18009_v48  ;;  %v18011_v55 = vpop.f32.mrf.mxu0 }
 0x420   :  { %21903 = vst [vmem:[#allocation67_spill] sm:$0xff] %v18011_v55  ;;  %v18013_v29 = vpop.f32.mrf.mxu1 }
 0x421   :  { %21904 = vst [vmem:[#allocation68_spill] sm:$0xff] %v18013_v29  ;;  %v18015_v37 = vpop.f32.mrf.mxu0 }
 0x422   :  { %21905 = vst [vmem:[#allocation69_spill] sm:$0xff] %v18015_v37  ;;  %v18017_v52 = vpop.f32.mrf.mxu1 }
 0x423   :  { %21906 = vst [vmem:[#allocation70_spill] sm:$0xff] %v18017_v52  ;;  %v18019_v44 = vpop.f32.mrf.mxu0 }
 0x424   :  { %21907 = vst [vmem:[#allocation71_spill] sm:$0xff] %v18019_v44  ;;  %v18021_v63 = vpop.f32.mrf.mxu1 }
 0x425   :  { %v18023_v5 = vpop.f32.mrf.mxu0 }
 0x426   :  { %21908 = vst [vmem:[#allocation72_spill] sm:$0xff] %v18023_v5  ;;  %v18025_v18 = vpop.f32.mrf.mxu1  ;;  %v1947_v5 = vadd.f32 %v17768_v46, %v17413_v60  ;;  %v2101_v46 = vadd.f32 %v17791_v3, %v17560_v47  ;;  %v2107_v47 = vadd.f32 %v17801_v16, %v17599_v6  ;;  %v4948_v6 = vadd.f32 %v17977_v30, %v17890_v49 }
 0x427   :  { %21909 = vst [vmem:[#allocation73_spill] sm:$0xff] %v18025_v18  ;;  %v18027_v40 = vpop.f32.mrf.mxu0 }
 0x428   :  { %21910 = vst [vmem:[#allocation74_spill] sm:$0xff] %v18027_v40  ;;  %v18029_v7 = vpop.f32.mrf.mxu1 }
 0x429   :  { %21911 = vst [vmem:[#allocation75_spill] sm:$0xff] %v18029_v7  ;;  %v18031_v48 = vpop.f32.mrf.mxu0 }
 0x42a   :  { %21912 = vst [vmem:[#allocation76_spill] sm:$0xff] %v18031_v48  ;;  %v18033_v55 = vpop.f32.mrf.mxu1 }
 0x42b   :  { %21913 = vst [vmem:[#allocation77_spill] sm:$0xff] %v18033_v55  ;;  %v18035_v29 = vpop.f32.mrf.mxu0  ;;  %v3027_v55 = vadd.f32 %v17770_v34, %v1947_v5  ;;  %v4935_v5 = vadd.f32 %v4464_v58, %v17881_v41 }
 0x42c   :  { %21914 = vst [vmem:[#allocation78_spill] sm:$0xff] %v18035_v29  ;;  %v18037_v37 = vpop.f32.mrf.mxu1  ;;  %v1953_v29 = vadd.f32 %v17781_v10, %v17444_v61 }
 0x42d   :  { %21915 = vst [vmem:[#allocation79_spill] sm:$0xff] %v18037_v37  ;;  %v18039_v52 = vpop.f32.mrf.mxu0 }
 0x42e   :  { %21916 = vst [vmem:[#allocation80_spill] sm:$0xff] %v18039_v52  ;;  %v18041_v44 = vpop.f32.mrf.mxu1 }
 0x42f   :  { %21917 = vst [vmem:[#allocation81_spill] sm:$0xff] %v18041_v44  ;;  %v18045_v18 = vpop.f32.mrf.mxu0  ;;  %v3663_v44 = vadd.f32 %v17879_v23, %v3027_v55  ;;  %v3031_v23 = vadd.f32 %v17793_v19, %v2101_v46  ;;  %v5603_v19 = vadd.f32 %v17973_v22, %v4935_v5 }
 0x430   :  { %21918 = vst [vmem:[#allocation82_spill] sm:$0xff] %v18045_v18  ;;  %v18047_v40 = vpop.f32.mrf.mxu1 }
 0x431   :  { %v18049_v7 = vpop.f32.mrf.mxu0  ;;  %v4299_v61 = vadd.f32 %v17883_v43, %v3663_v44  ;;  %v18089_v43 = vadd.f32 %v17591_v9, %v17480_v53  ;;  %v3044_v53 = vadd.f32 %v17803_v54, %v2107_v47  ;;  %v2255_v9 = vadd.f32 %v17811_v0, %v17693_v45  ;;  %v18145_v47 = vpop.permute.xlu0 %6918 }
 0x432   :  { %21919 = vst [vmem:[#allocation83_spill] sm:$0xff] %v18049_v7  ;;  %v18051_v48 = vpop.f32.mrf.mxu1  ;;  %v3040_v7 = vadd.f32 %v17783_v11, %v1953_v29  ;;  %v4939_v45 = vadd.f32 %v17985_v57, %v17901_v62 }
 0x433   :  { %21920 = vst [vmem:[#allocation84_spill] sm:$0xff] %v18051_v48  ;;  %v18056_v37 = vpop.f32.mrf.mxu0  ;;  %v4936_v11 = vadd.f32 %v4466_v24, %v4299_v61  ;;  %v3680_v54 = vadd.f32 %v17904_v42, %v3044_v53  ;;  %v18127_v24 = vpop.permute.xlu1 %6913 }
 0x434   :  { %v18058_v52 = vpop.f32.mrf.mxu1  ;;  %v3676_v10 = vadd.f32 %v17886_v17, %v3040_v7  ;;  %v18099_v17 = vadd.f32 %v17624_v28, %v17529_v26  ;;  %v18110_v7 = vadd.f32 %v17695_v36, %v17675_v56  ;;  %v18124_v56 = vadd.f32 %v17760_v8, %v17747_v15 }
 0x435   :  { %v18061_v60 = vpop.f32.mrf.mxu0  ;;  %v5604_v49 = vadd.f32 %v17975_v39, %v4936_v11  ;;  %v5616_v36 = vadd.f32 %v17979_v13, %v4948_v6  ;;  %v4316_v57 = vadd.f32 %v17908_v25, %v3680_v54  ;;  %v5607_v46 = vadd.f32 %v17987_v20, %v4939_v45  ;;  %v21926_v11 = vld [vmem:[#allocation15_spill] sm:$0xff]  ;;  %v21927_v25 = vld [vmem:[#allocation17_spill] sm:$0xff]  ;;  %v21929_v20 = vld [vmem:[#allocation60_spill] sm:$0xff] }
 0x436   :  { %21921 = vst [vmem:[#allocation85_spill] sm:$0xff] %v18061_v60  ;;  %v18065_v18 = vpop.f32.mrf.mxu1  ;;  %v4312_v41 = vadd.f32 %v17888_v27, %v3676_v10  ;;  %v21931_v45 = vld [vmem:[#allocation33_spill] sm:$0xff] }
 0x437   :  { %v18068_v48 = vpop.f32.mrf.mxu0  ;;  %v4953_v53 = vadd.f32 %v21929_v20, %v4316_v57  ;;  %v21937_v57 = vld [vmem:[#allocation61_spill] sm:$0xff] }
 0x438   :  { %21922 = vst [vmem:[#allocation86_spill] sm:$0xff] %v18068_v48  ;;  %v18070_v34 = vpop.f32.mrf.mxu1  ;;  %v3667_v48 = vadd.f32 %v17897_v35, %v3031_v23  ;;  %v18103_v35 = vadd.f32 %v17660_v12, %v17640_v4  ;;  %v4949_v58 = vadd.f32 %v17981_v32, %v4312_v41  ;;  %v18116_v4 = vadd.f32 %v17729_v38, %v17727_v33 }
 0x439   :  { %v18075_v55 = vpop.f32.mrf.mxu0  ;;  %v3035_v33 = vadd.f32 %v17813_v21, %v2255_v9  ;;  %v2261_v38 = vadd.f32 %v17818_v31, %v17710_v59  ;;  %v21924_v59 = vld [vmem:[#allocation30_spill] sm:$0xff] }
 0x43a   :  { %v18080_v3 = vpop.f32.mrf.mxu1  ;;  %v4303_v12 = vadd.f32 %v17899_v2, %v3667_v48  ;;  %v21923_v48 = vld [vmem:[#allocation16_spill] sm:$0xff]  ;;  %v5617_v15 = vadd.f32 %v17983_v14, %v4949_v58  ;;  %v21925_v31 = vld [vmem:[#allocation58_spill] sm:$0xff] }
 0x43b   :  { %v18082_v29 = vpop.f32.mrf.mxu0  ;;  %v2407_v42 = vadd.f32 %v21923_v48, %v17762_v1  ;;  %v3671_v21 = vadd.f32 %v17911_v50, %v3035_v33  ;;  %v4952_v61 = vadd.f32 %v21925_v31, %v21924_v59  ;;  %v3048_v41 = vadd.f32 %v21926_v11, %v2261_v38  ;;  %v21928_v50 = vld [vmem:[#allocation57_spill] sm:$0xff] }
 0x43c   :  { %v18085_v60 = vpop.f32.mrf.mxu1  ;;  %v4940_v2 = vadd.f32 %v17989_v51, %v4303_v12  ;;  %v21930_v12 = vld [vmem:[#allocation32_spill] sm:$0xff] }
 0x43d   :  { %v18095_v16 = vpop.f32.mrf.mxu0  ;;  %v4307_v54 = vadd.f32 %v21930_v12, %v3671_v21  ;;  %v5621_v21 = vadd.f32 %v21937_v57, %v4953_v53  ;;  %v21944_v12 = vld [vmem:[#allocation19_spill] sm:$0xff] }
 0x43e   :  { %v5772_v27 = vpop.f32.mrf.mxu1  ;;  %v5608_v6 = vadd.f32 %v21928_v50, %v4940_v2  ;;  %v21942_v50 = vld [vmem:[#allocation34_spill] sm:$0xff] }
 0x43f   :  { %v6243_v26 = vadd.f32 %v5772_v27, %v5603_v19  ;;  %v6412_v28 = vpop.f32.mrf.mxu0  ;;  %v3038_v19 = vadd.f32 %v21927_v25, %v2407_v42 }
 0x440   :  { %v5774_v0 = vpop.f32.mrf.mxu1 }
 0x441   :  { %v6244_v22 = vadd.f32 %v5774_v0, %v5604_v49  ;;  %v6883_v32 = vadd.f32 %v6412_v28, %v6243_v26  ;;  %v6414_v44 = vpop.f32.mrf.mxu0  ;;  %v3684_v0 = vadd.f32 %v21931_v45, %v3048_v41  ;;  %v21941_v41 = vld [vmem:[#allocation63_spill] sm:$0xff] }
 0x442   :  { %v5778_v62 = vpop.f32.mrf.mxu1 }
 0x443   :  { %v6921_v8 = vadd.f32 %v18127_v24, %v6883_v32  ;;  %v6256_v39 = vadd.f32 %v5778_v62, %v5616_v36  ;;  %v6884_v30 = vadd.f32 %v6414_v44, %v6244_v22  ;;  %v6418_v13 = vpop.f32.mrf.mxu0  ;;  %v21932_v36 = vld [vmem:[#allocation59_spill] sm:$0xff]  ;;  %v21934_v44 = vld [vmem:[#allocation62_spill] sm:$0xff] }
 0x444   :  { %v5780_v1 = vpop.f32.mrf.mxu1  ;;  %v5620_v22 = vadd.f32 %v21932_v36, %v4952_v61  ;;  %v21933_v32 = vld [vmem:[#allocation31_spill] sm:$0xff] }
 0x445   :  { %v18142_v10 = vmax.f32 %v6921_v8, 0.0  ;;  %v6922_v51 = vadd.f32 %v18127_v24, %v6884_v30  ;;  %v6257_v14 = vadd.f32 %v5780_v1, %v5617_v15  ;;  %v6896_v5 = vadd.f32 %v6418_v13, %v6256_v39  ;;  %v6420_v23 = vpop.f32.mrf.mxu0  ;;  %v21935_v8 = vld [vmem:[#allocation18_spill] sm:$0xff]  ;;  %v21936_v30 = vld [vmem:[#allocation20_spill] sm:$0xff] }
 0x446   :  { %v5926_v9 = vpop.f32.mrf.mxu1  ;;  %v4943_v33 = vadd.f32 %v21934_v44, %v21933_v32  ;;  %v3029_v39 = vadd.f32 %v21935_v8, %v18089_v43  ;;  %v3042_v13 = vadd.f32 %v21936_v30, %v18099_v17  ;;  %v21939_v43 = vld [vmem:[#allocation35_spill] sm:$0xff]  ;;  %v21940_v17 = vld [vmem:[#allocation36_spill] sm:$0xff] }
 0x447   :  { %6973 = vst [vmem:[#allocation4] sm:$0xff] %v18142_v10  ;;  %v18152_v27 = vmax.f32 %v6922_v51, 0.0  ;;  %v6934_v49 = vadd.f32 %v18145_v47, %v6896_v5  ;;  %v6247_v58 = vadd.f32 %v5926_v9, %v5607_v46  ;;  %v6897_v26 = vadd.f32 %v6420_v23, %v6257_v14  ;;  %v6566_v28 = vpop.f32.mrf.mxu0  ;;  %7057 = vrot.lane.b32.xlu1 %v18142_v10, %s15423_s20  ;;  %v21938_v46 = vld [vmem:[#allocation64_spill] sm:$0xff] }
 0x448   :  { %v5928_v38 = vpop.f32.mrf.mxu1  ;;  %v4944_v59 = vadd.f32 %v21938_v46, %v4307_v54  ;;  %v4320_v23 = vadd.f32 %v21939_v43, %v3684_v0  ;;  %v3674_v11 = vadd.f32 %v21940_v17, %v3038_v19  ;;  %v5611_v25 = vadd.f32 %v21941_v41, %v4943_v33  ;;  %v21945_v54 = vld [vmem:[#allocation21_spill] sm:$0xff]  ;;  %v21952_v46 = vld [vmem:[#allocation70_spill] sm:$0xff] }
 0x449   :  { %6974 = vst [vmem:[#allocation4 + $0x8] sm:$0xff] %v18152_v27  ;;  %v18163_v48 = vmax.f32 %v6934_v49, 0.0  ;;  %v6935_v42 = vadd.f32 %v18145_v47, %v6897_v26  ;;  %v6248_v2 = vadd.f32 %v5928_v38, %v5608_v6  ;;  %v6887_v62 = vadd.f32 %v6566_v28, %v6247_v58  ;;  %v6568_v15 = vpop.f32.mrf.mxu0  ;;  %8924 = vrot.lane.b32.xlu0 %v18152_v27, %s15427_s24  ;;  %v21943_v6 = vld [vmem:[#allocation66_spill] sm:$0xff]  ;;  %v21946_v0 = vld [vmem:[#allocation65_spill] sm:$0xff] }
 0x44a   :  { %v5932_v31 = vpop.f32.mrf.mxu1  ;;  %v4956_v20 = vadd.f32 %v21943_v6, %v21942_v50  ;;  %v3665_v19 = vadd.f32 %v21944_v12, %v3029_v39  ;;  %v3678_v45 = vadd.f32 %v21945_v54, %v3042_v13  ;;  %v5612_v36 = vadd.f32 %v21946_v0, %v4944_v59  ;;  %v21949_v39 = vld [vmem:[#allocation39_spill] sm:$0xff] }
 0x44b   :  { %6987 = vst [vmem:[#allocation4 + $0x70] sm:$0xff] %v18163_v48  ;;  %v18175_v61 = vmax.f32 %v6935_v42, 0.0  ;;  %v6925_v1 = vadd.f32 %v18127_v24, %v6887_v62  ;;  %v6260_v51 = vadd.f32 %v5932_v31, %v5620_v22  ;;  %v6888_v14 = vadd.f32 %v6568_v15, %v6248_v2  ;;  %v6572_v5 = vpop.f32.mrf.mxu0  ;;  %8248 = vrot.lane.b32.xlu1 %v18142_v10, %s15431_s12  ;;  %v21947_v22 = vld [vmem:[#allocation68_spill] sm:$0xff]  ;;  %v21948_v15 = vld [vmem:[#allocation38_spill] sm:$0xff]  ;;  %v21950_v13 = vld [vmem:[#allocation67_spill] sm:$0xff] }
 0x44c   :  { %v5934_v53 = vpop.f32.mrf.mxu1  ;;  %v4957_v32 = vadd.f32 %v21947_v22, %v4320_v23  ;;  %v4310_v8 = vadd.f32 %v21948_v15, %v3674_v11  ;;  %v4301_v30 = vadd.f32 %v21949_v39, %v3665_v19  ;;  %v5624_v57 = vadd.f32 %v21950_v13, %v4956_v20  ;;  %v21953_v23 = vld [vmem:[#allocation22_spill] sm:$0xff]  ;;  %v21954_v11 = vld [vmem:[#allocation24_spill] sm:$0xff]  ;;  %v21958_v54 = vld [vmem:[#allocation71_spill] sm:$0xff] }
 0x44d   :  { %6988 = vst [vmem:[#allocation4 + $0x78] sm:$0xff] %v18175_v61  ;;  %v18186_v9 = vmax.f32 %v6925_v1, 0.0  ;;  %v6926_v49 = vadd.f32 %v18127_v24, %v6888_v14  ;;  %v6261_v58 = vadd.f32 %v5934_v53, %v5621_v21  ;;  %v6900_v26 = vadd.f32 %v6572_v5, %v6260_v51  ;;  %v6574_v28 = vpop.f32.mrf.mxu0  ;;  %7083 = vrot.lane.b32.xlu0 %v18163_v48, %s15423_s20  ;;  %v21951_v21 = vld [vmem:[#allocation37_spill] sm:$0xff]  ;;  %v21961_v15 = vld [vmem:[#allocation23_spill] sm:$0xff] }
 0x44e   :  { %v6080_v44 = vpop.f32.mrf.mxu1  ;;  %v4960_v59 = vadd.f32 %v21952_v46, %v21951_v21  ;;  %v3033_v17 = vadd.f32 %v21953_v23, %v18103_v35  ;;  %v3046_v41 = vadd.f32 %v21954_v11, %v18110_v7  ;;  %v4947_v6 = vadd.f32 %v18021_v63, %v4310_v8  ;;  %v21956_v35 = vld [vmem:[#allocation41_spill] sm:$0xff]  ;;  %v21957_v7 = vld [vmem:[#allocation42_spill] sm:$0xff]  ;;  %v21959_v63 = vld [vmem:[#allocation40_spill] sm:$0xff] }
 0x44f   :  { %6977 = vst [vmem:[#allocation4 + $0x20] sm:$0xff] %v18186_v9  ;;  %v18196_v33 = vmax.f32 %v6926_v49, 0.0  ;;  %v6938_v38 = vadd.f32 %v18145_v47, %v6900_v26  ;;  %v6251_v42 = vadd.f32 %v6080_v44, %v5611_v25  ;;  %v6901_v2 = vadd.f32 %v6574_v28, %v6261_v58  ;;  %v6720_v62 = vpop.f32.mrf.mxu0  ;;  %8922 = vrot.lane.b32.xlu1 %v18142_v10, %s15427_s24  ;;  %v21955_v25 = vld [vmem:[#allocation69_spill] sm:$0xff] }
 0x450   :  { %v6082_v31 = vpop.f32.mrf.mxu1  ;;  %v5625_v50 = vadd.f32 %v21955_v25, %v4957_v32  ;;  %v4938_v12 = vadd.f32 %v21956_v35, %v4301_v30  ;;  %v4314_v19 = vadd.f32 %v21957_v7, %v3678_v45  ;;  %v5628_v0 = vadd.f32 %v21958_v54, %v4960_v59  ;;  %v21962_v8 = vld [vmem:[#allocation25_spill] sm:$0xff]  ;;  %v21963_v30 = vld [vmem:[#allocation72_spill] sm:$0xff]  ;;  %v21970_v7 = vld [vmem:[#allocation26_spill] sm:$0xff] }
 0x451   :  { %6978 = vst [vmem:[#allocation4 + $0x28] sm:$0xff] %v18196_v33  ;;  %v18207_v1 = vmax.f32 %v6938_v38, 0.0  ;;  %v6939_v51 = vadd.f32 %v18145_v47, %v6901_v2  ;;  %v6252_v14 = vadd.f32 %v6082_v31, %v5612_v36  ;;  %v6891_v5 = vadd.f32 %v6720_v62, %v6251_v42  ;;  %v6722_v43 = vpop.f32.mrf.mxu0  ;;  %8274 = vrot.lane.b32.xlu0 %v18163_v48, %s15431_s12  ;;  %v21960_v36 = vld [vmem:[#allocation73_spill] sm:$0xff]  ;;  %v21971_v54 = vld [vmem:[#allocation76_spill] sm:$0xff] }
 0x452   :  { %v6086_v20 = vpop.f32.mrf.mxu1  ;;  %v5605_v22 = vadd.f32 %v21960_v36, %v21959_v63  ;;  %v3669_v45 = vadd.f32 %v21961_v15, %v3033_v17  ;;  %v3682_v39 = vadd.f32 %v21962_v8, %v3046_v41  ;;  %v5615_v13 = vadd.f32 %v21963_v30, %v4947_v6  ;;  %v21966_v17 = vld [vmem:[#allocation45_spill] sm:$0xff]  ;;  %v21967_v41 = vld [vmem:[#allocation74_spill] sm:$0xff]  ;;  %v21972_v63 = vld [vmem:[#allocation79_spill] sm:$0xff] }
 0x453   :  { %6991 = vst [vmem:[#allocation4 + $0x90] sm:$0xff] %v18207_v1  ;;  %v18219_v53 = vmax.f32 %v6939_v51, 0.0  ;;  %v6929_v49 = vadd.f32 %v18127_v24, %v6891_v5  ;;  %v6264_v58 = vadd.f32 %v6086_v20, %v5624_v57  ;;  %v6892_v26 = vadd.f32 %v6722_v43, %v6252_v14  ;;  %v6726_v28 = vpop.f32.mrf.mxu0  ;;  %9596 = vrot.lane.b32.xlu1 %v18142_v10, %s15429_s26  ;;  %v21964_v57 = vld [vmem:[#allocation75_spill] sm:$0xff]  ;;  %v21965_v43 = vld [vmem:[#allocation44_spill] sm:$0xff]  ;;  %v21969_v6 = vld [vmem:[#allocation77_spill] sm:$0xff] }
 0x454   :  { %v6088_v32 = vpop.f32.mrf.mxu1  ;;  %v5606_v21 = vadd.f32 %v21964_v57, %v4938_v12  ;;  %v4951_v23 = vadd.f32 %v21965_v43, %v4314_v19  ;;  %v4305_v11 = vadd.f32 %v21966_v17, %v3669_v45  ;;  %v6245_v25 = vadd.f32 %v21967_v41, %v5605_v22  ;;  %v21975_v8 = vld [vmem:[#allocation78_spill] sm:$0xff]  ;;  %v21977_v57 = vld [vmem:[#allocation81_spill] sm:$0xff]  ;;  %v21978_v43 = vld [vmem:[#allocation27_spill] sm:$0xff] }
 0x455   :  { %6992 = vst [vmem:[#allocation4 + $0x98] sm:$0xff] %v18219_v53  ;;  %v18230_v44 = vmax.f32 %v6929_v49, 0.0  ;;  %v6930_v38 = vadd.f32 %v18127_v24, %v6892_v26  ;;  %v6265_v42 = vadd.f32 %v6088_v32, %v5625_v50  ;;  %v6904_v2 = vadd.f32 %v6726_v28, %v6264_v58  ;;  %v6728_v62 = vpop.f32.mrf.mxu0  ;;  %9622 = vrot.lane.b32.xlu0 %v18163_v48, %s15429_s26  ;;  %v21968_v50 = vld [vmem:[#allocation43_spill] sm:$0xff] }
 0x456   :  { %v14978_v46 = vpop.f32.mrf.mxu1  ;;  %v5618_v20 = vadd.f32 %v21969_v6, %v21968_v50  ;;  %v3037_v19 = vadd.f32 %v21970_v7, %v18116_v4  ;;  %v5619_v36 = vadd.f32 %v21972_v63, %v4951_v23  ;;  %v21974_v4 = vld [vmem:[#allocation48_spill] sm:$0xff]  ;;  %v21983_v7 = vld [vmem:[#allocation82_spill] sm:$0xff] }
 0x457   :  { %6981 = vst [vmem:[#allocation4 + $0x40] sm:$0xff] %v18230_v44  ;;  %v18240_v59 = vmax.f32 %v6930_v38, 0.0  ;;  %v6942_v31 = vadd.f32 %v18145_v47, %v6904_v2  ;;  %v6268_v51 = vadd.f32 %v14978_v46, %v5628_v0  ;;  %v6905_v14 = vadd.f32 %v6728_v62, %v6265_v42  ;;  %v14983_v5 = vpop.f32.mrf.mxu0  ;;  %7059 = vrot.lane.b32.xlu1 %v18152_v27, %s15423_s20  ;;  %v21973_v62 = vld [vmem:[#allocation47_spill] sm:$0xff] }
 0x458   :  { %v6234_v49 = vpop.f32.mrf.mxu1  ;;  %v6246_v0 = vadd.f32 %v21971_v54, %v5606_v21  ;;  %v4942_v15 = vadd.f32 %v21973_v62, %v4305_v11  ;;  %v4318_v45 = vadd.f32 %v21974_v4, %v3682_v39  ;;  %v6258_v30 = vadd.f32 %v21975_v8, %v5618_v20  ;;  %v21979_v39 = vld [vmem:[#allocation28_spill] sm:$0xff]  ;;  %v21987_v62 = vld [vmem:[#allocation83_spill] sm:$0xff] }
 0x459   :  { %6982 = vst [vmem:[#allocation4 + $0x48] sm:$0xff] %v18240_v59  ;;  %v18251_v58 = vmax.f32 %v6942_v31, 0.0  ;;  %v6943_v26 = vadd.f32 %v18145_v47, %v6905_v14  ;;  %v6255_v28 = vadd.f32 %v6234_v49, %v5615_v13  ;;  %v6908_v35 = vadd.f32 %v14983_v5, %v6268_v51  ;;  %v6874_v12 = vpop.f32.mrf.mxu0  ;;  %7085 = vrot.lane.b32.xlu0 %v18175_v61, %s15423_s20  ;;  %v21976_v13 = vld [vmem:[#allocation46_spill] sm:$0xff]  ;;  %v21980_v11 = vld [vmem:[#allocation80_spill] sm:$0xff] }
 0x45a   :  { %v6489_v22 = vpop.f32.mrf.mxu1  ;;  %v5609_v21 = vadd.f32 %v21977_v57, %v21976_v13  ;;  %v3673_v23 = vadd.f32 %v21978_v43, %v3037_v19  ;;  %v3050_v17 = vadd.f32 %v21979_v39, %v18124_v56  ;;  %v6259_v41 = vadd.f32 %v21980_v11, %v5619_v36  ;;  %v21988_v57 = vld [vmem:[#allocation53_spill] sm:$0xff] }
 0x45b   :  { %6995 = vst [vmem:[#allocation4 + $0xb0] sm:$0xff] %v18251_v58  ;;  %v18261_v32 = vmax.f32 %v6943_v26, 0.0  ;;  %v6946_v38 = vadd.f32 %v18145_v47, %v6908_v35  ;;  %v6885_v42 = vadd.f32 %v6489_v22, %v6245_v25  ;;  %v6895_v2 = vadd.f32 %v6874_v12, %v6255_v28  ;;  %8250 = vrot.lane.b32.xlu1 %v18152_v27, %s15431_s12  ;;  %v21981_v28 = vld [vmem:[#allocation50_spill] sm:$0xff]  ;;  %v21982_v12 = vld [vmem:[#allocation51_spill] sm:$0xff] }
 0x45c   :  { %v6491_v46 = vpop.f32.mrf.mxu1  ;;  %v5610_v25 = vadd.f32 %v18047_v40, %v4942_v15  ;;  %v4955_v35 = vadd.f32 %v21981_v28, %v4318_v45  ;;  %v4309_v56 = vadd.f32 %v21982_v12, %v3673_v23  ;;  %v6249_v19 = vadd.f32 %v21983_v7, %v5609_v21  ;;  %v21984_v40 = vld [vmem:[#allocation49_spill] sm:$0xff]  ;;  %v21994_v12 = vld [vmem:[#allocation55_spill] sm:$0xff] }
 0x45d   :  { %6996 = vst [vmem:[#allocation4 + $0xb8] sm:$0xff] %v18261_v32  ;;  %v6972_v31 = vmax.f32 %v6946_v38, 0.0  ;;  %v6923_v51 = vadd.f32 %v18127_v24, %v6885_v42  ;;  %v6933_v14 = vadd.f32 %v18127_v24, %v6895_v2  ;;  %v6886_v5 = vadd.f32 %v6491_v46, %v6246_v0  ;;  %8276 = vrot.lane.b32.xlu0 %v18175_v61, %s15431_s12  ;;  %v21985_v0 = vld [vmem:[#allocation84_spill] sm:$0xff]  ;;  %v21986_v42 = vld [vmem:[#allocation29_spill] sm:$0xff]  ;;  %v21989_v46 = vld [vmem:[#allocation54_spill] sm:$0xff] }
 0x45e   :  { %v6495_v50 = vpop.f32.mrf.mxu1  ;;  %v5622_v63 = vadd.f32 %v21985_v0, %v21984_v40  ;;  %v3686_v2 = vadd.f32 %v21986_v42, %v3050_v17  ;;  %v6250_v15 = vadd.f32 %v21987_v62, %v5610_v25  ;;  %v5623_v45 = vadd.f32 %v18058_v52, %v4955_v35 }
 0x45f   :  { %6999 = vst.msk [vmem:[#allocation4 + $0xd0] sm:$0xff] %vm6985_vm3, %v6972_v31  ;;  %v18282_v6 = vmax.f32 %v6923_v51, 0.0  ;;  %v6959_v20 = vmax.f32 %v6933_v14, 0.0  ;;  %v6924_v49 = vadd.f32 %v18127_v24, %v6886_v5  ;;  %v6898_v26 = vadd.f32 %v6495_v50, %v6258_v30  ;;  %9598 = vrot.lane.b32.xlu1 %v18152_v27, %s15429_s26  ;;  %v21990_v51 = vld [vmem:[#allocation52_spill] sm:$0xff] }
 0x460   :  { %v6497_v54 = vpop.f32.mrf.mxu1  ;;  %v4946_v21 = vadd.f32 %v21988_v57, %v4309_v56  ;;  %v4322_v31 = vadd.f32 %v21989_v46, %v3686_v2  ;;  %v5613_v14 = vadd.f32 %v18065_v18, %v21990_v51  ;;  %v6262_v52 = vadd.f32 %v18056_v37, %v5622_v63 }
 0x461   :  { %6975 = vst [vmem:[#allocation4 + $0x10] sm:$0xff] %v18282_v6  ;;  %6986 = vst.msk [vmem:[#allocation4 + $0x60] sm:$0xff] %vm6985_vm3, %v6959_v20  ;;  %v18294_v36 = vmax.f32 %v6924_v49, 0.0  ;;  %v6936_v22 = vadd.f32 %v18145_v47, %v6898_v26  ;;  %v6899_v38 = vadd.f32 %v6497_v54, %v6259_v41  ;;  %9624 = vrot.lane.b32.xlu0 %v18175_v61, %s15429_s26  ;;  %v21991_v41 = vld [vmem:[#allocation85_spill] sm:$0xff]  ;;  %v21992_v20 = vld [vmem:[#allocation56_spill] sm:$0xff] }
 0x462   :  { %v6643_v4 = vpop.f32.mrf.mxu1  ;;  %v5614_v17 = vadd.f32 %v18070_v34, %v4946_v21  ;;  %v6263_v25 = vadd.f32 %v21991_v41, %v5623_v45  ;;  %v4959_v49 = vadd.f32 %v21992_v20, %v4322_v31  ;;  %v21993_v26 = vld [vmem:[#allocation86_spill] sm:$0xff]  ;;  %v5626_v34 = vadd.f32 %v18080_v3, %v21994_v12 }
 0x463   :  { %6976 = vst [vmem:[#allocation4 + $0x18] sm:$0xff] %v18294_v36  ;;  %v18303_v8 = vmax.f32 %v6936_v22, 0.0  ;;  %v6937_v30 = vadd.f32 %v18145_v47, %v6899_v38  ;;  %v6889_v13 = vadd.f32 %v6643_v4, %v6249_v19  ;;  %8948 = vrot.lane.b32.xlu1 %v18163_v48, %s15427_s24  ;;  %v6253_v28 = vadd.f32 %v21993_v26, %v5613_v14 }
 0x464   :  { %v6645_v5 = vpop.f32.mrf.mxu1  ;;  %v6254_v54 = vadd.f32 %v18075_v55, %v5614_v17  ;;  %v5627_v0 = vadd.f32 %v18085_v60, %v4959_v49  ;;  %v6266_v42 = vadd.f32 %v18082_v29, %v5626_v34 }
 0x465   :  { %6989 = vst [vmem:[#allocation4 + $0x80] sm:$0xff] %v18303_v8  ;;  %v18314_v43 = vmax.f32 %v6937_v30, 0.0  ;;  %v6927_v23 = vadd.f32 %v18127_v24, %v6889_v13  ;;  %v6890_v39 = vadd.f32 %v6645_v5, %v6250_v15  ;;  %8930 = vrot.lane.b32.xlu0 %v18186_v9, %s15427_s24 }
 0x466   :  { %v6649_v11 = vpop.f32.mrf.mxu1  ;;  %v6267_v15 = vadd.f32 %v18095_v16, %v5627_v0  ;;  %v18439_v31 = vld [vmem:[#allocation4 + $0xd0] sm:$0xff] }
 0x467   :  { %6990 = vst [vmem:[#allocation4 + $0x88] sm:$0xff] %v18314_v43  ;;  %v18322_v18 = vmax.f32 %v6927_v23, 0.0  ;;  %v6928_v37 = vadd.f32 %v18127_v24, %v6890_v39  ;;  %v6902_v50 = vadd.f32 %v6649_v11, %v6262_v52  ;;  %8950 = vrot.lane.b32.xlu1 %v18175_v61, %s15427_s24 }
 0x468   :  { %v6651_v35 = vpop.f32.mrf.mxu1 }
 0x469   :  { %6979 = vst [vmem:[#allocation4 + $0x30] sm:$0xff] %v18322_v18  ;;  %v18332_v56 = vmax.f32 %v6928_v37, 0.0  ;;  %v6940_v7 = vadd.f32 %v18145_v47, %v6902_v50  ;;  %v6903_v19 = vadd.f32 %v6651_v35, %v6263_v25  ;;  %7067 = vrot.lane.b32.xlu0 %v18196_v33, %s15423_s20 }
 0x46a   :  { %v6797_v40 = vpop.f32.mrf.mxu1 }
 0x46b   :  { %6980 = vst [vmem:[#allocation4 + $0x38] sm:$0xff] %v18332_v56  ;;  %v18340_v63 = vmax.f32 %v6940_v7, 0.0  ;;  %v6941_v3 = vadd.f32 %v18145_v47, %v6903_v19  ;;  %v6893_v22 = vadd.f32 %v6797_v40, %v6253_v28  ;;  %7065 = vrot.lane.b32.xlu1 %v18186_v9, %s15423_s20 }
 0x46c   :  { %v6799_v38 = vpop.f32.mrf.mxu1 }
 0x46d   :  { %6993 = vst [vmem:[#allocation4 + $0xa0] sm:$0xff] %v18340_v63  ;;  %v18347_v2 = vmax.f32 %v6941_v3, 0.0  ;;  %v6931_v55 = vadd.f32 %v18127_v24, %v6893_v22  ;;  %v6894_v60 = vadd.f32 %v6799_v38, %v6254_v54  ;;  %8258 = vrot.lane.b32.xlu0 %v18196_v33, %s15431_s12 }
 0x46e   :  { %v6803_v62 = vpop.f32.mrf.mxu1 }
 0x46f   :  { %6994 = vst [vmem:[#allocation4 + $0xa8] sm:$0xff] %v18347_v2  ;;  %v18354_v4 = vmax.f32 %v6931_v55, 0.0  ;;  %v6932_v45 = vadd.f32 %v18127_v24, %v6894_v60  ;;  %v6906_v29 = vadd.f32 %v6803_v62, %v6266_v42  ;;  %8256 = vrot.lane.b32.xlu1 %v18186_v9, %s15431_s12 }
 0x470   :  { %v6805_v30 = vpop.f32.mrf.mxu1 }
 0x471   :  { %6983 = vst [vmem:[#allocation4 + $0x50] sm:$0xff] %v18354_v4  ;;  %v18360_v13 = vmax.f32 %v6932_v45, 0.0  ;;  %v6944_v57 = vadd.f32 %v18145_v47, %v6906_v29  ;;  %v6907_v21 = vadd.f32 %v6805_v30, %v6267_v15  ;;  %9606 = vrot.lane.b32.xlu0 %v18196_v33, %s15429_s26 }
 0x473   :  { %6984 = vst [vmem:[#allocation4 + $0x58] sm:$0xff] %v18360_v13  ;;  %v18366_v16 = vmax.f32 %v6944_v57, 0.0  ;;  %v6945_v24 = vadd.f32 %v18145_v47, %v6907_v21  ;;  %9604 = vrot.lane.b32.xlu1 %v18186_v9, %s15429_s26  ;;  %v18427_v47 = vld [vmem:[#allocation4 + $0x60] sm:$0xff] }
 0x475   :  { %6997 = vst [vmem:[#allocation4 + $0xc0] sm:$0xff] %v18366_v16  ;;  %v18372_v46 = vmax.f32 %v6945_v24, 0.0  ;;  %7093 = vrot.lane.b32.xlu0 %v18219_v53, %s15423_s20 }
 0x477   :  { %6998 = vst [vmem:[#allocation4 + $0xc8] sm:$0xff] %v18372_v46  ;;  %8932 = vrot.lane.b32.xlu1 %v18196_v33, %s15427_s24 }
 0x479   :  { %8284 = vrot.lane.b32.xlu0 %v18219_v53, %s15431_s12 }
 0x47b   :  { %7091 = vrot.lane.b32.xlu1 %v18207_v1, %s15423_s20 }
 0x47d   :  { %9632 = vrot.lane.b32.xlu0 %v18219_v53, %s15429_s26 }
 0x47f   :  { %8282 = vrot.lane.b32.xlu1 %v18207_v1, %s15431_s12 }
 0x481   :  { %8938 = vrot.lane.b32.xlu0 %v18230_v44, %s15427_s24 }
 0x483   :  { %8956 = vrot.lane.b32.xlu1 %v18207_v1, %s15427_s24 }
 0x485   :  { %7075 = vrot.lane.b32.xlu0 %v18240_v59, %s15423_s20 }
 0x487   :  { %9630 = vrot.lane.b32.xlu1 %v18207_v1, %s15429_s26 }
 0x489   :  { %8266 = vrot.lane.b32.xlu0 %v18240_v59, %s15431_s12 }
 0x48b   :  { %8958 = vrot.lane.b32.xlu1 %v18219_v53, %s15427_s24 }
 0x48d   :  { %9614 = vrot.lane.b32.xlu0 %v18240_v59, %s15429_s26 }
 0x48f   :  { %7073 = vrot.lane.b32.xlu1 %v18230_v44, %s15423_s20 }
 0x491   :  { %7101 = vrot.lane.b32.xlu0 %v18261_v32, %s15423_s20 }
 0x493   :  { %8264 = vrot.lane.b32.xlu1 %v18230_v44, %s15431_s12 }
 0x495   :  { %8292 = vrot.lane.b32.xlu0 %v18261_v32, %s15431_s12 }
 0x497   :  { %9612 = vrot.lane.b32.xlu1 %v18230_v44, %s15429_s26 }
 0x499   :  { %9640 = vrot.lane.b32.xlu0 %v18261_v32, %s15429_s26 }
 0x49b   :  { %8940 = vrot.lane.b32.xlu1 %v18240_v59, %s15427_s24 }
 0x49d   :  { %7061 = vrot.lane.b32.xlu0 %v18282_v6, %s15423_s20 }
 0x49f   :  { %7099 = vrot.lane.b32.xlu1 %v18251_v58, %s15423_s20 }
 0x4a1   :  { %8252 = vrot.lane.b32.xlu0 %v18282_v6, %s15431_s12 }
 0x4a3   :  { %8290 = vrot.lane.b32.xlu1 %v18251_v58, %s15431_s12 }
 0x4a5   :  { %8926 = vrot.lane.b32.xlu0 %v18282_v6, %s15427_s24 }
 0x4a7   :  { %8964 = vrot.lane.b32.xlu1 %v18251_v58, %s15427_s24 }
 0x4a9   :  { %8946 = vrot.lane.b32.xlu0 %v18427_v47, %s15427_s24 }
 0x4ab   :  { %9638 = vrot.lane.b32.xlu1 %v18251_v58, %s15429_s26 }
 0x4ad   :  { %9600 = vrot.lane.b32.xlu0 %v18282_v6, %s15429_s26 }
 0x4af   :  { %8966 = vrot.lane.b32.xlu1 %v18261_v32, %s15427_s24 }
 0x4b1   :  { %7063 = vrot.lane.b32.xlu0 %v18294_v36, %s15423_s20 }
 0x4b3   :  { %7107 = vrot.lane.b32.xlu1 %v18439_v31, %s15423_s20 }
 0x4b5   :  { %8254 = vrot.lane.b32.xlu0 %v18294_v36, %s15431_s12 }
 0x4b7   :  { %8298 = vrot.lane.b32.xlu1 %v18439_v31, %s15431_s12 }
 0x4b9   :  { %v18447_v51 = vpop.permute.xlu1 %7057  ;;  %9602 = vrot.lane.b32.xlu0 %v18294_v36, %s15429_s26 }
 0x4bb   :  { %8972 = vrot.lane.b32.xlu1 %v18439_v31, %s15427_s24  ;;  %v18453_v14 = vpop.permute.xlu0 %8924 }
 0x4bc   :  { %21995 = vst [vmem:[#allocation16_spill] sm:$0xff] %v18453_v14 }
 0x4bd   :  { %v18455_v5 = vpop.permute.xlu1 %8248  ;;  %8952 = vrot.lane.b32.xlu0 %v18303_v8, %s15427_s24 }
 0x4bf   :  { %9646 = vrot.lane.b32.xlu1 %v18439_v31, %s15429_s26  ;;  %v18461_v52 = vpop.permute.xlu0 %7083 }
 0x4c1   :  { %v18463_v23 = vpop.permute.xlu1 %8922  ;;  %7089 = vrot.lane.b32.xlu0 %v18314_v43, %s15423_s20 }
 0x4c2   :  { %21996 = vst [vmem:[#allocation30_spill] sm:$0xff] %v18463_v23 }
 0x4c3   :  { %7081 = vrot.lane.b32.xlu1 %v18427_v47, %s15423_s20  ;;  %v18469_v39 = vpop.permute.xlu0 %8274 }
 0x4c5   :  { %v18471_v17 = vpop.permute.xlu1 %9596  ;;  %8280 = vrot.lane.b32.xlu0 %v18314_v43, %s15431_s12 }
 0x4c6   :  { %21997 = vst [vmem:[#allocation58_spill] sm:$0xff] %v18471_v17 }
 0x4c7   :  { %8272 = vrot.lane.b32.xlu1 %v18427_v47, %s15431_s12  ;;  %v18477_v11 = vpop.permute.xlu0 %9622 }
 0x4c8   :  { %21998 = vst [vmem:[#allocation15_spill] sm:$0xff] %v18477_v11 }
 0x4c9   :  { %v18479_v41 = vpop.permute.xlu1 %7059  ;;  %8954 = vrot.lane.b32.xlu0 %v18314_v43, %s15427_s24 }
 0x4cb   :  { %9620 = vrot.lane.b32.xlu1 %v18427_v47, %s15429_s26  ;;  %v18485_v25 = vpop.permute.xlu0 %7085 }
 0x4cd   :  { %v18487_v37 = vpop.permute.xlu1 %8250  ;;  %9628 = vrot.lane.b32.xlu0 %v18314_v43, %s15429_s26 }
 0x4cf   :  { %8928 = vrot.lane.b32.xlu1 %v18294_v36, %s15427_s24  ;;  %v18493_v50 = vpop.permute.xlu0 %8276 }
 0x4d1   :  { %v18495_v20 = vpop.permute.xlu1 %9598  ;;  %10302 = vrot.lane.b32.xlu0 %v18314_v43, %s15432_s17 }
 0x4d2   :  { %21999 = vst [vmem:[#allocation17_spill] sm:$0xff] %v18495_v20 }
 0x4d3   :  { %7087 = vrot.lane.b32.xlu1 %v18303_v8, %s15423_s20  ;;  %v18501_v49 = vpop.permute.xlu0 %9624 }
 0x4d4   :  { %22000 = vst [vmem:[#allocation57_spill] sm:$0xff] %v18501_v49 }
 0x4d5   :  { %v18503_v26 = vpop.permute.xlu1 %8948  ;;  %8934 = vrot.lane.b32.xlu0 %v18322_v18, %s15427_s24 }
 0x4d6   :  { %22001 = vst [vmem:[#allocation60_spill] sm:$0xff] %v18503_v26 }
 0x4d7   :  { %8278 = vrot.lane.b32.xlu1 %v18303_v8, %s15431_s12  ;;  %v18509_v28 = vpop.permute.xlu0 %8930 }
 0x4d8   :  { %22002 = vst [vmem:[#allocation32_spill] sm:$0xff] %v18509_v28 }
 0x4d9   :  { %v18511_v35 = vpop.permute.xlu1 %8950  ;;  %7071 = vrot.lane.b32.xlu0 %v18332_v56, %s15423_s20 }
 0x4da   :  { %22003 = vst [vmem:[#allocation33_spill] sm:$0xff] %v18511_v35 }
 0x4db   :  { %9626 = vrot.lane.b32.xlu1 %v18303_v8, %s15429_s26  ;;  %v18517_v12 = vpop.permute.xlu0 %7067 }
 0x4dd   :  { %v18519_v34 = vpop.permute.xlu1 %7065  ;;  %8262 = vrot.lane.b32.xlu0 %v18332_v56, %s15431_s12 }
 0x4df   :  { %7069 = vrot.lane.b32.xlu1 %v18322_v18, %s15423_s20  ;;  %v18525_v7 = vpop.permute.xlu0 %8258 }
 0x4e1   :  { %v18527_v19 = vpop.permute.xlu1 %8256  ;;  %9610 = vrot.lane.b32.xlu0 %v18332_v56, %s15429_s26 }
 0x4e3   :  { %8260 = vrot.lane.b32.xlu1 %v18322_v18, %s15431_s12  ;;  %v18533_v54 = vpop.permute.xlu0 %9606 }
 0x4e4   :  { %22004 = vst [vmem:[#allocation59_spill] sm:$0xff] %v18533_v54 }
 0x4e5   :  { %v18535_v40 = vpop.permute.xlu1 %9604  ;;  %8960 = vrot.lane.b32.xlu0 %v18340_v63, %s15427_s24 }
 0x4e6   :  { %22005 = vst [vmem:[#allocation31_spill] sm:$0xff] %v18535_v40 }
 0x4e7   :  { %9608 = vrot.lane.b32.xlu1 %v18322_v18, %s15429_s26  ;;  %v18541_v0 = vpop.permute.xlu0 %7093 }
 0x4e9   :  { %v18543_v3 = vpop.permute.xlu1 %8932  ;;  %7097 = vrot.lane.b32.xlu0 %v18347_v2, %s15423_s20 }
 0x4ea   :  { %22006 = vst [vmem:[#allocation62_spill] sm:$0xff] %v18543_v3 }
 0x4eb   :  { %8936 = vrot.lane.b32.xlu1 %v18332_v56, %s15427_s24  ;;  %v18549_v22 = vpop.permute.xlu0 %8284 }
 0x4ed   :  { %v18551_v38 = vpop.permute.xlu1 %7091  ;;  %8288 = vrot.lane.b32.xlu0 %v18347_v2, %s15431_s12 }
 0x4ef   :  { %7095 = vrot.lane.b32.xlu1 %v18340_v63, %s15423_s20  ;;  %v18557_v42 = vpop.permute.xlu0 %9632 }
 0x4f0   :  { %22007 = vst [vmem:[#allocation18_spill] sm:$0xff] %v18557_v42 }
 0x4f1   :  { %v18559_v55 = vpop.permute.xlu1 %8282  ;;  %8962 = vrot.lane.b32.xlu0 %v18347_v2, %s15427_s24 }
 0x4f3   :  { %8286 = vrot.lane.b32.xlu1 %v18340_v63, %s15431_s12  ;;  %v18565_v60 = vpop.permute.xlu0 %8938 }
 0x4f4   :  { %22008 = vst [vmem:[#allocation20_spill] sm:$0xff] %v18565_v60 }
 0x4f5   :  { %v18567_v62 = vpop.permute.xlu1 %8956  ;;  %9636 = vrot.lane.b32.xlu0 %v18347_v2, %s15429_s26 }
 0x4f6   :  { %22009 = vst [vmem:[#allocation61_spill] sm:$0xff] %v18567_v62 }
 0x4f7   :  { %9634 = vrot.lane.b32.xlu1 %v18340_v63, %s15429_s26  ;;  %v18573_v15 = vpop.permute.xlu0 %7075 }
 0x4f9   :  { %v18575_v45 = vpop.permute.xlu1 %9630  ;;  %8942 = vrot.lane.b32.xlu0 %v18354_v4, %s15427_s24 }
 0x4fa   :  { %22010 = vst [vmem:[#allocation64_spill] sm:$0xff] %v18575_v45 }
 0x4fb   :  { %7077 = vrot.lane.b32.xlu1 %v18354_v4, %s15423_s20  ;;  %v18581_v29 = vpop.permute.xlu0 %8266 }
 0x4fd   :  { %v18583_v30 = vpop.permute.xlu1 %8958  ;;  %7079 = vrot.lane.b32.xlu0 %v18360_v13, %s15423_s20 }
 0x4fe   :  { %22011 = vst [vmem:[#allocation35_spill] sm:$0xff] %v18583_v30 }
 0x4ff   :  { %8268 = vrot.lane.b32.xlu1 %v18354_v4, %s15431_s12  ;;  %v18589_v57 = vpop.permute.xlu0 %9614 }
 0x500   :  { %22012 = vst [vmem:[#allocation36_spill] sm:$0xff] %v18589_v57 }
 0x501   :  { %v18591_v21 = vpop.permute.xlu1 %7073  ;;  %8270 = vrot.lane.b32.xlu0 %v18360_v13, %s15431_s12 }
 0x503   :  { %9616 = vrot.lane.b32.xlu1 %v18354_v4, %s15429_s26  ;;  %v18597_v24 = vpop.permute.xlu0 %7101 }
 0x505   :  { %v18599_v40 = vpop.permute.xlu1 %8264  ;;  %9618 = vrot.lane.b32.xlu0 %v18360_v13, %s15429_s26 }
 0x507   :  { %8944 = vrot.lane.b32.xlu1 %v18360_v13, %s15427_s24  ;;  %v18605_v54 = vpop.permute.xlu0 %8292 }
 0x509   :  { %v18607_v57 = vpop.permute.xlu1 %9612  ;;  %10300 = vrot.lane.b32.xlu0 %v18303_v8, %s15432_s17 }
 0x50a   :  { %22013 = vst [vmem:[#allocation63_spill] sm:$0xff] %v18607_v57 }
 0x50b   :  { %7103 = vrot.lane.b32.xlu1 %v18366_v16, %s15423_s20  ;;  %v18613_v45 = vpop.permute.xlu0 %9640 }
 0x50c   :  { %22014 = vst [vmem:[#allocation34_spill] sm:$0xff] %v18613_v45 }
 0x50d   :  { %v18615_v42 = vpop.permute.xlu1 %8940  ;;  %10278 = vrot.lane.b32.xlu0 %v18186_v9, %s15432_s17 }
 0x50e   :  { %22015 = vst [vmem:[#allocation66_spill] sm:$0xff] %v18615_v42 }
 0x50f   :  { %10304 = vrot.lane.b32.xlu1 %v18207_v1, %s15432_s17  ;;  %v18621_v17 = vpop.permute.xlu0 %7061 }
 0x511   :  { %v18623_v20 = vpop.permute.xlu1 %7099  ;;  %8968 = vrot.lane.b32.xlu0 %v18366_v16, %s15427_s24 }
 0x513   :  { %10276 = vrot.lane.b32.xlu1 %v18294_v36, %s15432_s17  ;;  %v18629_v57 = vpop.permute.xlu0 %8252 }
 0x515   :  { %v18631_v45 = vpop.permute.xlu1 %8290  ;;  %7105 = vrot.lane.b32.xlu0 %v18372_v46, %s15423_s20 }
 0x517   :  { %10298 = vrot.lane.b32.xlu1 %v18175_v61, %s15432_s17  ;;  %v18637_v11 = vpop.permute.xlu0 %8926 }
 0x518   :  { %22016 = vst [vmem:[#allocation19_spill] sm:$0xff] %v18637_v11 }
 0x519   :  { %v18639_v49 = vpop.permute.xlu1 %8964  ;;  %10274 = vrot.lane.b32.xlu0 %v18282_v6, %s15432_s17 }
 0x51a   :  { %22017 = vst [vmem:[#allocation21_spill] sm:$0xff] %v18639_v49 }
 0x51b   :  { %8294 = vrot.lane.b32.xlu1 %v18366_v16, %s15431_s12  ;;  %v18645_v42 = vpop.permute.xlu0 %8946 }
 0x51c   :  { %22018 = vst [vmem:[#allocation65_spill] sm:$0xff] %v18645_v42 }
 0x51d   :  { %v18647_v3 = vpop.permute.xlu1 %9638  ;;  %10272 = vrot.lane.b32.xlu0 %v18152_v27, %s15432_s17 }
 0x51e   :  { %22019 = vst [vmem:[#allocation68_spill] sm:$0xff] %v18647_v3 }
 0x51f   :  { %9642 = vrot.lane.b32.xlu1 %v18366_v16, %s15429_s26  ;;  %v18653_v30 = vpop.permute.xlu0 %9600 }
 0x520   :  { %22020 = vst [vmem:[#allocation38_spill] sm:$0xff] %v18653_v30 }
 0x521   :  { %v18655_v60 = vpop.permute.xlu1 %8966  ;;  %10310 = vrot.lane.b32.xlu0 %v18347_v2, %s15432_s17 }
 0x522   :  { %22021 = vst [vmem:[#allocation39_spill] sm:$0xff] %v18655_v60 }
 0x523   :  { %10296 = vrot.lane.b32.xlu1 %v18163_v48, %s15432_s17  ;;  %v7064_v23 = vpop.permute.xlu0 %7063 }
 0x525   :  { %v18661_v42 = vpop.permute.xlu1 %7107  ;;  %10308 = vrot.lane.b32.xlu0 %v18340_v63, %s15432_s17 }
 0x527   :  { %10270 = vrot.lane.b32.xlu1 %v18142_v10, %s15432_s17  ;;  %v18667_v3 = vpop.permute.xlu0 %8254 }
 0x529   :  { %v18669_v30 = vpop.permute.xlu1 %8298  ;;  %10286 = vrot.lane.b32.xlu0 %v18230_v44, %s15432_s17 }
 0x52a   :  { %22022 = vst [vmem:[#allocation67_spill] sm:$0xff] %v18669_v30 }
 0x52b   :  { %10312 = vrot.lane.b32.xlu1 %v18251_v58, %s15432_s17  ;;  %v18675_v60 = vpop.permute.xlu0 %9602 }
 0x52c   :  { %22023 = vst [vmem:[#allocation37_spill] sm:$0xff] %v18675_v60 }
 0x52d   :  { %v18677_v14 = vpop.permute.xlu1 %8972  ;;  %10282 = vrot.lane.b32.xlu0 %v18322_v18, %s15432_s17 }
 0x52e   :  { %22024 = vst [vmem:[#allocation70_spill] sm:$0xff] %v18677_v14 }
 0x52f   :  { %10284 = vrot.lane.b32.xlu1 %v18332_v56, %s15432_s17  ;;  %v18683_v49 = vpop.permute.xlu0 %8952 }
 0x530   :  { %22025 = vst [vmem:[#allocation22_spill] sm:$0xff] %v18683_v49 }
 0x531   :  { %v18685_v26 = vpop.permute.xlu1 %9646  ;;  %10316 = vrot.lane.b32.xlu0 %v18366_v16, %s15432_s17 }
 0x532   :  { %22026 = vst [vmem:[#allocation24_spill] sm:$0xff] %v18685_v26 }
 0x533   :  { %10306 = vrot.lane.b32.xlu1 %v18219_v53, %s15432_s17  ;;  %v7090_v35 = vpop.permute.xlu0 %7089 }
 0x534   :  { %v7124_v60 = vsel %vm302_vm1, %v7090_v35, %v18551_v38 }
 0x535   :  { %v18693_v14 = vpop.permute.xlu1 %7081  ;;  %10294 = vrot.lane.b32.xlu0 %v18427_v47, %s15432_s17  ;;  %7270 = vmatprep.subr.mxu0 %v7124_v60 }
 0x537   :  { %10280 = vrot.lane.b32.xlu1 %v18196_v33, %s15432_s17  ;;  %v18699_v26 = vpop.permute.xlu0 %8280 }
 0x539   :  { %v18701_v11 = vpop.permute.xlu1 %8272  ;;  %10290 = vrot.lane.b32.xlu0 %v18354_v4, %s15432_s17 }
 0x53a   :  { %22027 = vst [vmem:[#allocation69_spill] sm:$0xff] %v18701_v11 }
 0x53b   :  { %10320 = vrot.lane.b32.xlu1 %v18439_v31, %s15432_s17  ;;  %v18707_v28 = vpop.permute.xlu0 %8954 }
 0x53c   :  { %22028 = vst [vmem:[#allocation41_spill] sm:$0xff] %v18707_v28 }
 0x53d   :  { %v18709_v49 = vpop.permute.xlu1 %9620  ;;  %11030 = vrot.lane.b32.xlu0 %v18175_v61, %s15433_s18 }
 0x53e   :  { %22029 = vst [vmem:[#allocation42_spill] sm:$0xff] %v18709_v49 }
 0x53f   :  { %10292 = vrot.lane.b32.xlu1 %v18360_v13, %s15432_s17  ;;  %v18715_v60 = vpop.permute.xlu0 %9628 }
 0x540   :  { %22030 = vst [vmem:[#allocation71_spill] sm:$0xff] %v18715_v60 }
 0x541   :  { %v18717_v62 = vpop.permute.xlu1 %8928  ;;  %11028 = vrot.lane.b32.xlu0 %v18163_v48, %s15433_s18  ;;  %v7121_v48 = vsel %vm302_vm1, %v18461_v52, %v18485_v25  ;;  %v18751_v52 = vld [vmem:[%s21763_s5 + $0x10] sm:$0xff] }
 0x542   :  { %22031 = vst [vmem:[#allocation40_spill] sm:$0xff] %v18717_v62 }
 0x543   :  { %10314 = vrot.lane.b32.xlu1 %v18261_v32, %s15432_s17  ;;  %v18723_v11 = vpop.permute.xlu0 %10302 }
 0x544   :  { %22032 = vst [vmem:[#allocation73_spill] sm:$0xff] %v18723_v11  ;;  %v7112_v11 = vsel %vm302_vm1, %v7064_v23, %v18519_v34 }
 0x545   :  { %v7088_v28 = vpop.permute.xlu1 %7087  ;;  %11004 = vrot.lane.b32.xlu0 %v18282_v6, %s15433_s18 }
 0x546   :  { %v7122_v49 = vsel %vm302_vm1, %v18485_v25, %v7088_v28  ;;  %v7123_v30 = vsel %vm302_vm1, %v7088_v28, %v7090_v35  ;;  %v7111_v28 = vsel %vm302_vm1, %v18621_v17, %v7064_v23 }
 0x547   :  { %10288 = vrot.lane.b32.xlu1 %v18240_v59, %s15432_s17  ;;  %7193 = vmatprep.subr.mxu1 %v7122_v49  ;;  %v18732_v60 = vpop.permute.xlu0 %8934  ;;  %v7110_v49 = vsel %vm302_vm1, %v18479_v41, %v18621_v17  ;;  %v18766_v17 = vld [vmem:[#allocation4 + $0x68] sm:$0xff] }
 0x548   :  { %22033 = vst [vmem:[#allocation23_spill] sm:$0xff] %v18732_v60  ;;  %7271 = vmatpush1.msra.mxu0 %v7123_v30  ;;  %7194 = vmatpush1.msra.mxu1 %v7121_v48 }
 0x549   :  { %7272 = vmatprep.subr.mxu0 %v7112_v11  ;;  %v18739_v62 = vpop.permute.xlu1 %8278  ;;  %8296 = vrot.lane.b32.xlu0 %v18372_v46, %s15431_s12  ;;  %v7109_v11 = vsel %vm302_vm1, %v18447_v51, %v18479_v41  ;;  %v18772_v51 = vld [vmem:[%s21763_s5 + $0x18] sm:$0xff] }
 0x54a   :  { %7195 = vmatprep.subr.mxu1 %v7110_v49  ;;  %7273 = vmatpush1.msra.mxu0 %v7111_v28 }
 0x54b   :  { %7196 = vmatpush1.msra.mxu1 %v7109_v11  ;;  %11032 = vrot.lane.b32.xlu1 %v18303_v8, %s15433_s18  ;;  %v7072_v25 = vpop.permute.xlu0 %7071 }
 0x54c   :  { %14738 = vmatmul.mubr.msk.f32.vlgmr.msra.gmra.mxu0 %vm5020_vm14, %v18751_v52  ;;  %14736 = vmatmul.mubr.msk.f32.vlgmr.msra.gmra.mxu1 %vm5020_vm14, %v18751_v52 }
 0x54d   :  { %v18762_v23 = vpop.permute.xlu1 %9626  ;;  %11034 = vrot.lane.b32.xlu0 %v18314_v43, %s15433_s18  ;;  %7235 = vmatprep.mubr.f32.mxu1 %v18766_v17 }
 0x54e   :  { %22034 = vst [vmem:[#allocation25_spill] sm:$0xff] %v18762_v23  ;;  %7312 = vmatprep.mubr.f32.mxu0 %v18766_v17 }
 0x54f   :  { %11002 = vrot.lane.b32.xlu1 %v18152_v27, %s15433_s18  ;;  %v18777_v41 = vpop.permute.xlu0 %8262 }
 0x550   :  { %14737 = vmatmul.mubr.msk.f32.gmra.mxu1 %vm5020_vm14, %v18772_v51  ;;  %14739 = vmatmul.mubr.msk.f32.gmra.mxu0 %vm5020_vm14, %v18772_v51 }
 0x551   :  { %v7070_v35 = vpop.permute.xlu1 %7069  ;;  %11006 = vrot.lane.b32.xlu0 %v18294_v36, %s15433_s18  ;;  %7383 = vmatprep.mubr.f32.mxu1 %v18766_v17 }
 0x552   :  { %7460 = vmatprep.mubr.f32.mxu0 %v18766_v17 }
 0x553   :  { %11000 = vrot.lane.b32.xlu1 %v18142_v10, %s15433_s18  ;;  %v18789_v27 = vpop.permute.xlu0 %9610 }
 0x554   :  { %22035 = vst [vmem:[#allocation72_spill] sm:$0xff] %v18789_v27 }
 0x555   :  { %v18791_v30 = vpop.permute.xlu1 %8260  ;;  %11038 = vrot.lane.b32.xlu0 %v18219_v53, %s15433_s18 }
 0x557   :  { %11036 = vrot.lane.b32.xlu1 %v18207_v1, %s15433_s18  ;;  %v18797_v48 = vpop.permute.xlu0 %8960 }
 0x558   :  { %22036 = vst [vmem:[#allocation75_spill] sm:$0xff] %v18797_v48  ;;  %v7114_v48 = vsel %vm302_vm1, %v18517_v12, %v7070_v35 }
 0x559   :  { %v18799_v49 = vpop.permute.xlu1 %9608  ;;  %11010 = vrot.lane.b32.xlu0 %v18196_v33, %s15433_s18 }
 0x55a   :  { %22037 = vst [vmem:[#allocation44_spill] sm:$0xff] %v18799_v49 }
 0x55b   :  { %11008 = vrot.lane.b32.xlu1 %v18186_v9, %s15433_s18  ;;  %v7098_v10 = vpop.permute.xlu0 %7097 }
 0x55c   :  { %v7128_v28 = vsel %vm302_vm1, %v7098_v10, %v18623_v20 }
 0x55d   :  { %v18807_v11 = vpop.permute.xlu1 %8936  ;;  %8970 = vrot.lane.b32.xlu0 %v18372_v46, %s15427_s24  ;;  %7424 = vmatprep.subr.mxu0 %v7128_v28  ;;  %v7125_v28 = vsel %vm302_vm1, %v18551_v38, %v18541_v0 }
 0x55e   :  { %22038 = vst [vmem:[#allocation45_spill] sm:$0xff] %v18807_v11  ;;  %v7116_v11 = vsel %vm302_vm1, %v7072_v25, %v18591_v21 }
 0x55f   :  { %11040 = vrot.lane.b32.xlu1 %v18340_v63, %s15433_s18  ;;  %v18813_v27 = vpop.permute.xlu0 %8288 }
 0x561   :  { %v7096_v49 = vpop.permute.xlu1 %7095  ;;  %11042 = vrot.lane.b32.xlu0 %v18347_v2, %s15433_s18 }
 0x562   :  { %v7126_v33 = vsel %vm302_vm1, %v18541_v0, %v7096_v49  ;;  %v7127_v23 = vsel %vm302_vm1, %v7096_v49, %v7098_v10  ;;  %v7115_v10 = vsel %vm302_vm1, %v7070_v35, %v7072_v25  ;;  %v7113_v0 = vsel %vm302_vm1, %v18519_v34, %v18517_v12 }
 0x563   :  { %11012 = vrot.lane.b32.xlu1 %v18322_v18, %s15433_s18  ;;  %7347 = vmatprep.subr.mxu1 %v7126_v33  ;;  %v18822_v60 = vpop.permute.xlu0 %8962  ;;  %v18873_v35 = vpack.i.bf16 %v18766_v17, %v18766_v17 }
 0x564   :  { %7425 = vmatpush1.msra.mxu0 %v7127_v23  ;;  %7348 = vmatpush1.msra.mxu1 %v7125_v28 }
 0x565   :  { %7426 = vmatprep.subr.mxu0 %v7116_v11  ;;  %v18831_v49 = vpop.permute.xlu1 %8286  ;;  %7349 = vmatprep.subr.mxu1 %v7114_v48 }
 0x566   :  { %11014 = vrot.lane.b32.xlu0 %v18332_v56, %s15433_s18  ;;  %7427 = vmatpush1.msra.mxu0 %v7115_v10 }
 0x567   :  { %7350 = vmatpush1.msra.mxu1 %v7113_v0  ;;  %11044 = vrot.lane.b32.xlu1 %v18251_v58, %s15433_s18  ;;  %v18841_v38 = vpop.permute.xlu0 %9636 }
 0x568   :  { %22039 = vst [vmem:[#allocation74_spill] sm:$0xff] %v18841_v38  ;;  %14740 = vmatmul.mubr.msk.f32.vlgmr.msra.gmra.mxu1 %vm5020_vm14, %v18751_v52  ;;  %14742 = vmatmul.mubr.msk.f32.vlgmr.msra.gmra.mxu0 %vm5020_vm14, %v18751_v52  ;;  %v7117_v38 = vsel %vm302_vm1, %v18591_v21, %v18573_v15 }
 0x569   :  { %v18847_v25 = vpop.permute.xlu1 %9634  ;;  %7389 = vmatprep.mubr.f32.mxu1 %v18766_v17  ;;  %7466 = vmatprep.mubr.f32.mxu0 %v18766_v17 }
 0x56a   :  { %11046 = vrot.lane.b32.xlu0 %v18261_v32, %s15433_s18 }
 0x56b   :  { %11016 = vrot.lane.b32.xlu1 %v18230_v44, %s15433_s18  ;;  %v18855_v12 = vpop.permute.xlu0 %8942 }
 0x56c   :  { %14741 = vmatmul.mubr.msk.f32.gmra.mxu1 %vm5020_vm14, %v18772_v51  ;;  %14743 = vmatmul.mubr.msk.f32.gmra.mxu0 %vm5020_vm14, %v18772_v51 }
 0x56d   :  { %v7078_v34 = vpop.permute.xlu1 %7077  ;;  %7537 = vmatprep.mubr.f32.mxu1 %v18766_v17  ;;  %7614 = vmatprep.mubr.f32.mxu0 %v18766_v17 }
 0x56e   :  { %11018 = vrot.lane.b32.xlu0 %v18240_v59, %s15433_s18 }
 0x56f   :  { %11048 = vrot.lane.b32.xlu1 %v18366_v16, %s15433_s18  ;;  %v7080_v44 = vpop.permute.xlu0 %7079 }
 0x571   :  { %v18867_v23 = vpop.permute.xlu1 %8268 }
 0x572   :  { %11022 = vrot.lane.b32.xlu0 %v18360_v13, %s15433_s18 }
 0x573   :  { %11020 = vrot.lane.b32.xlu1 %v18354_v4, %s15433_s18  ;;  %v18877_v48 = vpop.permute.xlu0 %8270 }
 0x575   :  { %v18879_v11 = vpop.permute.xlu1 %9616 }
 0x576   :  { %22040 = vst [vmem:[#allocation43_spill] sm:$0xff] %v18879_v11  ;;  %15080 = vrot.lane.b32.xlu0 %v18873_v35, %s15433_s18 }
 0x577   :  { %11052 = vrot.lane.b32.xlu1 %v18439_v31, %s15433_s18  ;;  %v18885_v59 = vpop.permute.xlu0 %9618 }
 0x578   :  { %22041 = vst [vmem:[#allocation77_spill] sm:$0xff] %v18885_v59 }
 0x579   :  { %v18887_v33 = vpop.permute.xlu1 %8944 }
 0x57a   :  { %11716 = vrot.lane.b32.xlu0 %v18207_v1, %s15434_s21  ;;  %v7129_v1 = vsel %vm302_vm1, %v18623_v20, %v18597_v24 }
 0x57b   :  { %11024 = vrot.lane.b32.xlu1 %v18427_v47, %s15433_s18  ;;  %v18893_v28 = vpop.permute.xlu0 %10300 }
 0x57c   :  { %22042 = vst [vmem:[#allocation26_spill] sm:$0xff] %v18893_v28  ;;  %v7118_v28 = vsel %vm302_vm1, %v18573_v15, %v7078_v34 }
 0x57d   :  { %v7104_v10 = vpop.permute.xlu1 %7103 }
 0x57e   :  { %9644 = vrot.lane.b32.xlu0 %v18372_v46, %s15429_s26  ;;  %v7130_v0 = vsel %vm302_vm1, %v18597_v24, %v7104_v10 }
 0x57f   :  { %11714 = vrot.lane.b32.xlu1 %v18314_v43, %s15434_s21  ;;  %7501 = vmatprep.subr.mxu1 %v7130_v0  ;;  %v18901_v59 = vpop.permute.xlu0 %10278  ;;  %v19000_v0 = vld [vmem:[%s21763_s5 + $0x8] sm:$0xff] }
 0x580   :  { %7502 = vmatpush1.msra.mxu1 %v7129_v1 }
 0x581   :  { %v18908_v11 = vpop.permute.xlu1 %10304  ;;  %7503 = vmatprep.subr.mxu1 %v7118_v28 }
 0x582   :  { %11686 = vrot.lane.b32.xlu0 %v18294_v36, %s15434_s21  ;;  %7504 = vmatpush1.msra.mxu1 %v7117_v38 }
 0x583   :  { %11712 = vrot.lane.b32.xlu1 %v18303_v8, %s15434_s21  ;;  %14744 = vmatmul.mubr.msk.f32.vlgmr.msra.gmra.mxu1 %vm5020_vm14, %v18751_v52  ;;  %v18919_v20 = vpop.permute.xlu0 %8968 }
 0x584   :  { %14984 = vmatprep.subr.mxu1 %v18661_v42  ;;  %7543 = vmatprep.mubr.f32.mxu1 %v18766_v17 }
 0x585   :  { %14985 = vmatpush3.msra.mxu1 %v18661_v42  ;;  %v18924_v24 = vpop.permute.xlu1 %10276 }
 0x586   :  { %14986 = vmatprep.subr.mxu1 %v18693_v14  ;;  %11710 = vrot.lane.b32.xlu0 %v18175_v61, %s15434_s21  ;;  %v18942_v61 = vld [vmem:[#allocation4 + $0x70] sm:$0xff] }
 0x587   :  { %14987 = vmatpush3.msra.mxu1 %v18693_v14  ;;  %11688 = vrot.lane.b32.xlu1 %v18186_v9, %s15434_s21  ;;  %v7106_v15 = vpop.permute.xlu0 %7105  ;;  %v7120_v9 = vsel %vm302_vm1, %v7080_v44, %v18693_v14  ;;  %v18961_v14 = vld [vmem:[#allocation4] sm:$0xff] }
 0x588   :  { %14745 = vmatmul.mubr.msk.f32.gmra.mxu1 %vm5020_vm14, %v18772_v51  ;;  %7813 = vmatprep.subr.mxu1 %v18314_v43  ;;  %v7132_v21 = vsel %vm302_vm1, %v7106_v15, %v18661_v42  ;;  %v7131_v38 = vsel %vm302_vm1, %v7104_v10, %v7106_v15  ;;  %v7119_v42 = vsel %vm302_vm1, %v7078_v34, %v7080_v44  ;;  %v18966_v34 = vld [vmem:[#allocation4 + $0x78] sm:$0xff] }
 0x589   :  { %v18938_v28 = vpop.permute.xlu1 %10298  ;;  %7578 = vmatprep.subr.mxu0 %v7132_v21  ;;  %14988 = vmatprep.mubr.msk.f32.mxu1 %vm5020_vm14, %v18751_v52  ;;  %v19034_v21 = vld [vmem:[#allocation4 + $0x20] sm:$0xff] }
 0x58a   :  { %11708 = vrot.lane.b32.xlu0 %v18942_v61, %s15434_s21  ;;  %7579 = vmatpush1.msra.mxu0 %v7131_v38 }
 0x58b   :  { %11684 = vrot.lane.b32.xlu1 %v18282_v6, %s15434_s21  ;;  %7580 = vmatprep.subr.mxu0 %v7120_v9  ;;  %v18950_v43 = vpop.permute.xlu0 %10274 }
 0x58c   :  { %14989 = vmatmul.mubr.msk.f32.vlgmr.msra.gmra.mxu1 %vm5020_vm14, %v18772_v51  ;;  %7581 = vmatpush1.msra.mxu0 %v7119_v42  ;;  %v19057_v42 = vld [vmem:[#allocation4 + $0x40] sm:$0xff] }
 0x58d   :  { %7814 = vmatpush1.msra.mxu1 %v18303_v8  ;;  %v18956_v10 = vpop.permute.xlu1 %8294  ;;  %14746 = vmatmul.mubr.msk.f32.vlgmr.msra.gmra.mxu0 %vm5020_vm14, %v18751_v52  ;;  %v18972_v8 = vld [vmem:[%s21763_s5] sm:$0xff] }
 0x58e   :  { %7815 = vmatprep.subr.mxu1 %v18294_v36  ;;  %11680 = vrot.lane.b32.xlu0 %v18961_v14, %s15434_s21  ;;  %v18979_v36 = vld [vmem:[#allocation4 + $0x8] sm:$0xff] }
 0x58f   :  { %7816 = vmatpush1.msra.mxu1 %v18282_v6  ;;  %7736 = vmatprep.subr.mxu0 %v18966_v34  ;;  %v18974_v44 = vpop.permute.xlu0 %10272 }
 0x590   :  { %7737 = vmatpush1.msra.mxu0 %v18942_v61  ;;  %7849 = vmatprep.mubr.f32.mxu1 %v18766_v17 }
 0x591   :  { %7967 = vmatprep.subr.mxu1 %v18347_v2  ;;  %11682 = vrot.lane.b32.xlu1 %v18979_v36, %s15434_s21  ;;  %v18983_v6 = vpop.permute.xlu1 %9642 }
 0x592   :  { %7738 = vmatprep.subr.mxu0 %v18979_v36  ;;  %14752 = vmatmul.mubr.msk.f32.vlgmr.msra.gmra.mxu1 %vm5020_vm14, %v18972_v8 }
 0x593   :  { %7968 = vmatpush1.msra.mxu1 %v18340_v63  ;;  %7620 = vmatprep.mubr.f32.mxu0 %v18766_v17  ;;  %v18990_v52 = vpop.permute.xlu0 %10310 }
 0x594   :  { %7739 = vmatpush1.msra.mxu0 %v18961_v14  ;;  %7969 = vmatprep.subr.mxu1 %v18332_v56 }
 0x595   :  { %7970 = vmatpush1.msra.mxu1 %v18322_v18  ;;  %10318 = vrot.lane.b32.xlu0 %v18372_v46, %s15432_s17  ;;  %v19002_v1 = vpop.permute.xlu1 %10296  ;;  %s15443_s17 = smov 40  }
 0x596   :  { %14747 = vmatmul.mubr.msk.f32.gmra.mxu0 %vm5020_vm14, %v18772_v51  ;;  %7890 = vmatprep.subr.mxu0 %v18219_v53  ;;  %v19023_v53 = vld [vmem:[#allocation4 + $0x90] sm:$0xff] }
 0x597   :  { %7855 = vmatprep.mubr.f32.mxu1 %v18766_v17  ;;  %8121 = vmatprep.subr.mxu1 %v18372_v46  ;;  %v19009_v15 = vpop.permute.xlu0 %10308  ;;  %v19029_v46 = vld [vmem:[#allocation4 + $0x28] sm:$0xff] }
 0x598   :  { %11722 = vrot.lane.b32.xlu1 %v18347_v2, %s15434_s21  ;;  %14753 = vmatmul.mubr.msk.f32.gmra.mxu1 %vm5020_vm14, %v19000_v0 }
 0x599   :  { %7772 = vmatprep.mubr.f32.mxu0 %v18766_v17  ;;  %11724 = vrot.lane.b32.xlu0 %v18251_v58, %s15434_s21  ;;  %v19018_v51 = vpop.permute.xlu1 %10270 }
 0x59a   :  { %14750 = vmatmul.mubr.msk.f32.vlgmr.msra.gmra.mxu0 %vm5020_vm14, %v18972_v8  ;;  %8003 = vmatprep.mubr.f32.mxu1 %v18766_v17 }
 0x59b   :  { %7891 = vmatpush1.msra.mxu0 %v19023_v53  ;;  %7778 = vmatprep.mubr.f32.mxu0 %v18766_v17  ;;  %v19027_v2 = vpop.permute.xlu0 %10286 }
 0x59c   :  { %22043 = vst [vmem:[#allocation76_spill] sm:$0xff] %v19027_v2  ;;  %7892 = vmatprep.subr.mxu0 %v19029_v46  ;;  %11720 = vrot.lane.b32.xlu1 %v18340_v63, %s15434_s21  ;;  %v8313_v63 = vsel %vm2444_vm12, %v18493_v50, %v18739_v62  ;;  %v8301_v2 = vsel %vm2444_vm12, %v18487_v37, %v18629_v57 }
 0x59d   :  { %7893 = vmatpush1.msra.mxu0 %v19034_v21  ;;  %14756 = vmatmul.mubr.msk.f32.vlgmr.msra.gmra.mxu1 %vm5020_vm14, %v18972_v8  ;;  %v19039_v38 = vpop.permute.xlu1 %10312 }
 0x59e   :  { %8122 = vmatpush1.msra.mxu1 %v18366_v16  ;;  %8044 = vmatprep.subr.mxu0 %v18261_v32 }
 0x59f   :  { %8123 = vmatprep.subr.mxu1 %v18360_v13  ;;  %11694 = vrot.lane.b32.xlu0 %v18332_v56, %s15434_s21  ;;  %v19046_v9 = vpop.permute.xlu0 %10282  ;;  %v19064_v56 = vld [vmem:[#allocation4 + $0x98] sm:$0xff] }
 0x5a0   :  { %22044 = vst [vmem:[#allocation79_spill] sm:$0xff] %v19046_v9  ;;  %8124 = vmatpush1.msra.mxu1 %v18354_v4  ;;  %14751 = vmatmul.mubr.msk.f32.gmra.mxu0 %vm5020_vm14, %v19000_v0 }
 0x5a1   :  { %8009 = vmatprep.mubr.f32.mxu1 %v18766_v17  ;;  %8384 = vmatprep.subr.mxu1 %v8313_v63  ;;  %v19055_v32 = vpop.permute.xlu1 %10284 }
 0x5a2   :  { %22045 = vst [vmem:[#allocation47_spill] sm:$0xff] %v19055_v32  ;;  %11696 = vrot.lane.b32.xlu1 %v19057_v42, %s15434_s21  ;;  %14757 = vmatmul.mubr.msk.f32.gmra.mxu1 %vm5020_vm14, %v19000_v0  ;;  %v19077_v32 = vld [vmem:[#allocation4 + $0x48] sm:$0xff] }
 0x5a3   :  { %7926 = vmatprep.mubr.f32.mxu0 %v18766_v17  ;;  %11718 = vrot.lane.b32.xlu0 %v19064_v56, %s15434_s21  ;;  %v19068_v9 = vpop.permute.xlu0 %10316 }
 0x5a4   :  { %22046 = vst [vmem:[#allocation48_spill] sm:$0xff] %v19068_v9  ;;  %14754 = vmatmul.mubr.msk.f32.vlgmr.msra.gmra.mxu0 %vm5020_vm14, %v18972_v8  ;;  %8157 = vmatprep.mubr.f32.mxu1 %v18766_v17 }
 0x5a5   :  { %8045 = vmatpush1.msra.mxu0 %v18251_v58  ;;  %7932 = vmatprep.mubr.f32.mxu0 %v18766_v17  ;;  %v19075_v63 = vpop.permute.xlu1 %10306  ;;  %v8312_v58 = vsel %vm2444_vm12, %v18469_v39, %v18493_v50  ;;  %v8317_v39 = vsel %vm2444_vm12, %v18549_v22, %v18831_v49 }
 0x5a6   :  { %22047 = vst [vmem:[#allocation78_spill] sm:$0xff] %v19075_v63  ;;  %8046 = vmatprep.subr.mxu0 %v19077_v32  ;;  %11692 = vrot.lane.b32.xlu1 %v18322_v18, %s15434_s21  ;;  %v8300_v18 = vsel %vm2444_vm12, %v18455_v5, %v18487_v37  ;;  %v19124_v37 = vld [vmem:[%s21763_s5 + $0x20] sm:$0xff] }
 0x5a7   :  { %8047 = vmatpush1.msra.mxu0 %v19057_v42  ;;  %14760 = vmatmul.mubr.msk.f32.vlgmr.msra.gmra.mxu1 %vm5020_vm14, %v18972_v8  ;;  %v19088_v9 = vpop.permute.xlu0 %10294 }
 0x5a8   :  { %8385 = vmatpush1.msra.mxu1 %v8312_v58  ;;  %14991 = vmatprep.subr.mxu0 %v18439_v31 }
 0x5a9   :  { %8386 = vmatprep.subr.mxu1 %v8301_v2  ;;  %11690 = vrot.lane.b32.xlu0 %v19029_v46, %s15434_s21  ;;  %v19099_v63 = vpop.permute.xlu1 %10280  ;;  %v8316_v2 = vsel %vm2444_vm12, %v18559_v55, %v18549_v22  ;;  %v19155_v22 = vld [vmem:[%s21763_s5 + $0x28] sm:$0xff] }
 0x5aa   :  { %8387 = vmatpush1.msra.mxu1 %v8300_v18  ;;  %14755 = vmatmul.mubr.msk.f32.gmra.mxu0 %vm5020_vm14, %v19000_v0  ;;  %v8305_v18 = vsel %vm2444_vm12, %v18525_v7, %v18791_v30 }
 0x5ab   :  { %8163 = vmatprep.mubr.f32.mxu1 %v18766_v17  ;;  %8538 = vmatprep.subr.mxu1 %v8317_v39  ;;  %v19107_v50 = vpop.permute.xlu0 %10290  ;;  %v8321_v39 = vsel %vm2444_vm12, %v18605_v54, %v18956_v10 }
 0x5ac   :  { %11728 = vrot.lane.b32.xlu1 %v18366_v16, %s15434_s21  ;;  %14761 = vmatmul.mubr.msk.f32.gmra.mxu1 %vm5020_vm14, %v19000_v0 }
 0x5ad   :  { %8080 = vmatprep.mubr.f32.mxu0 %v18766_v17  ;;  %11732 = vrot.lane.b32.xlu0 %v18439_v31, %s15434_s21  ;;  %v19116_v5 = vpop.permute.xlu1 %10320 }
 0x5ae   :  { %14758 = vmatmul.mubr.msk.f32.vlgmr.msra.gmra.mxu0 %vm5020_vm14, %v18972_v8  ;;  %8420 = vmatprep.mubr.f32.mxu1 %v18766_v17 }
 0x5af   :  { %14992 = vmatpush3.msra.mxu0 %v18439_v31  ;;  %8086 = vmatprep.mubr.f32.mxu0 %v18766_v17  ;;  %v19128_v16 = vpop.permute.xlu0 %11030  ;;  %v8315_v31 = vsel %vm2444_vm12, %v18699_v26, %v18559_v55 }
 0x5b0   :  { %14993 = vmatprep.subr.mxu0 %v18427_v47  ;;  %11704 = vrot.lane.b32.xlu1 %v18427_v47, %s15434_s21 }
 0x5b1   :  { %14994 = vmatpush3.msra.mxu0 %v18427_v47  ;;  %14766 = vmatmul.mubr.msk.f32.vlgmr.msra.gmra.mxu1 %vm5020_vm14, %v19124_v37  ;;  %v19142_v58 = vpop.permute.xlu1 %10292  ;;  %v8304_v47 = vsel %vm2444_vm12, %v18527_v19, %v18525_v7 }
 0x5b2   :  { %8539 = vmatpush1.msra.mxu1 %v8316_v2  ;;  %8461 = vmatprep.subr.mxu0 %v8315_v31 }
 0x5b3   :  { %8540 = vmatprep.subr.mxu1 %v8305_v18  ;;  %11702 = vrot.lane.b32.xlu0 %v18360_v13, %s15434_s21  ;;  %v19157_v55 = vpop.permute.xlu0 %11028  ;;  %v19173_v13 = vld [vmem:[#allocation4 + $0xb8] sm:$0xff] }
 0x5b4   :  { %8541 = vmatpush1.msra.mxu1 %v8304_v47  ;;  %14759 = vmatmul.mubr.msk.f32.gmra.mxu0 %vm5020_vm14, %v19000_v0  ;;  %v22048_v47 = vld [vmem:[#allocation67_spill] sm:$0xff] }
 0x5b5   :  { %8426 = vmatprep.mubr.f32.mxu1 %v18766_v17  ;;  %8692 = vmatprep.subr.mxu1 %v8321_v39  ;;  %v19165_v7 = vpop.permute.xlu1 %10314 }
 0x5b6   :  { %11700 = vrot.lane.b32.xlu1 %v18354_v4, %s15434_s21  ;;  %14767 = vmatmul.mubr.msk.f32.gmra.mxu1 %vm5020_vm14, %v19155_v22  ;;  %v8314_v4 = vsel %vm2444_vm12, %v18739_v62, %v18699_v26  ;;  %v8320_v26 = vsel %vm2444_vm12, %v18631_v45, %v18605_v54 }
 0x5b7   :  { %14995 = vmatprep.mubr.msk.f32.mxu0 %vm5020_vm14, %v18972_v8  ;;  %11726 = vrot.lane.b32.xlu0 %v19173_v13, %s15434_s21  ;;  %v19177_v2 = vpop.permute.xlu0 %11004  ;;  %v8303_v8 = vsel %vm2444_vm12, %v18667_v3, %v18527_v19  ;;  %v8319_v19 = vsel %vm2444_vm12, %v18813_v27, %v18631_v45  ;;  %v8318_v45 = vsel %vm2444_vm12, %v18831_v49, %v18813_v27 }
 0x5b8   :  { %14996 = vmatmul.mubr.msk.f32.vlgmr.msra.gmra.mxu0 %vm5020_vm14, %v19000_v0  ;;  %8574 = vmatprep.mubr.f32.mxu1 %v18766_v17  ;;  %v8302_v0 = vsel %vm2444_vm12, %v18629_v57, %v18667_v3  ;;  %v19207_v3 = vld [vmem:[#allocation4 + $0xc8] sm:$0xff]  ;;  %v8308_v57 = vsel %vm2444_vm12, %v18599_v40, %v18581_v29  ;;  %v8306_v27 = vsel %vm2444_vm12, %v18791_v30, %v18777_v41  ;;  %v22049_v30 = vld [vmem:[#allocation69_spill] sm:$0xff] }
 0x5b9   :  { %8462 = vmatpush1.msra.mxu0 %v8314_v4  ;;  %8497 = vmatprep.mubr.f32.mxu0 %v18766_v17  ;;  %v19189_v31 = vpop.permute.xlu1 %10288  ;;  %v22051_v4 = vld [vmem:[#allocation41_spill] sm:$0xff] }
 0x5ba   :  { %8463 = vmatprep.subr.mxu0 %v8303_v8  ;;  %12390 = vrot.lane.b32.xlu1 %v18966_v34, %s15435_s28  ;;  %v8309_v34 = vsel %vm2444_vm12, %v18581_v29, %v18867_v23  ;;  %v8307_v29 = vsel %vm2444_vm12, %v18777_v41, %v18599_v40 }
 0x5bb   :  { %8464 = vmatpush1.msra.mxu0 %v8302_v0  ;;  %14770 = vmatmul.mubr.msk.f32.vlgmr.msra.gmra.mxu1 %vm5020_vm14, %v19124_v37  ;;  %v8297_v62 = vpop.permute.xlu0 %8296 }
 0x5bc   :  { %8693 = vmatpush1.msra.mxu1 %v8320_v26  ;;  %8615 = vmatprep.subr.mxu0 %v8319_v19  ;;  %v8323_v0 = vsel %vm2444_vm12, %v8297_v62, %v22048_v47  ;;  %v8322_v19 = vsel %vm2444_vm12, %v18956_v10, %v8297_v62  ;;  %v8311_v10 = vsel %vm2444_vm12, %v18877_v48, %v22049_v30 }
 0x5bd   :  { %8694 = vmatprep.subr.mxu1 %v8309_v34  ;;  %11050 = vrot.lane.b32.xlu0 %v19207_v3, %s15433_s18  ;;  %v19214_v54 = vpop.permute.xlu1 %11032 }
 0x5be   :  { %8695 = vmatpush1.msra.mxu1 %v8308_v57  ;;  %14768 = vmatmul.mubr.msk.f32.vlgmr.msra.gmra.mxu0 %vm5020_vm14, %v19124_v37  ;;  %v8310_v57 = vsel %vm2444_vm12, %v18867_v23, %v18877_v48  ;;  %v22056_v23 = vld [vmem:[#allocation33_spill] sm:$0xff] }
 0x5bf   :  { %8616 = vmatpush1.msra.mxu0 %v8318_v45  ;;  %8580 = vmatprep.mubr.f32.mxu1 %v18766_v17  ;;  %v19225_v18 = vpop.permute.xlu0 %11034  ;;  %v22054_v45 = vld [vmem:[#allocation40_spill] sm:$0xff] }
 0x5c0   :  { %8617 = vmatprep.subr.mxu0 %v8307_v29  ;;  %14998 = vmatprep.subr.mxu1 %v22048_v47 }
 0x5c1   :  { %12388 = vrot.lane.b32.xlu1 %v18942_v61, %s15435_s28  ;;  %14771 = vmatmul.mubr.msk.f32.gmra.mxu1 %vm5020_vm14, %v19155_v22  ;;  %v19235_v49 = vpop.permute.xlu1 %11002  ;;  %v15370_v61 = vld [vmem:[#allocation4 + $0x80] sm:$0xff] }
 0x5c2   :  { %8618 = vmatpush1.msra.mxu0 %v8306_v27  ;;  %8503 = vmatprep.mubr.f32.mxu0 %v18766_v17  ;;  %v22055_v27 = vld [vmem:[#allocation19_spill] sm:$0xff] }
 0x5c3   :  { %11698 = vrot.lane.b32.xlu0 %v19077_v32, %s15434_s21  ;;  %14769 = vmatmul.mubr.msk.f32.gmra.mxu0 %vm5020_vm14, %v19155_v22  ;;  %v19242_v40 = vpop.permute.xlu0 %11006 }
 0x5c4   :  { %8728 = vmatprep.mubr.f32.mxu1 %v18766_v17  ;;  %8651 = vmatprep.mubr.f32.mxu0 %v18766_v17 }
 0x5c5   :  { %12362 = vrot.lane.b32.xlu1 %v18979_v36, %s15435_s28  ;;  %14774 = vmatmul.mubr.msk.f32.vlgmr.msra.gmra.mxu1 %vm5020_vm14, %v19124_v37  ;;  %v19250_v41 = vpop.permute.xlu1 %11000  ;;  %v22050_v36 = vld [vmem:[#allocation61_spill] sm:$0xff] }
 0x5c6   :  { %14999 = vmatpush3.msra.mxu1 %v22048_v47  ;;  %8734 = vmatprep.mubr.f32.mxu1 %v18766_v17  ;;  %v8989_v8 = vsel %vm694_vm5, %v22051_v4, %v22050_v36 }
 0x5c7   :  { %15000 = vmatprep.subr.mxu1 %v22049_v30  ;;  %12392 = vrot.lane.b32.xlu0 %v15370_v61, %s15435_s28  ;;  %v19256_v39 = vpop.permute.xlu0 %11038  ;;  %v15371_v61 = vld [vmem:[#allocation4 + $0x10] sm:$0xff] }
 0x5c8   :  { %15001 = vmatpush3.msra.mxu1 %v22049_v30  ;;  %14772 = vmatmul.mubr.msk.f32.vlgmr.msra.gmra.mxu0 %vm5020_vm14, %v19124_v37  ;;  %v8976_v30 = vsel %vm694_vm5, %v22055_v27, %v22054_v45 }
 0x5c9   :  { %9135 = vmatprep.subr.mxu1 %v8989_v8  ;;  %12360 = vrot.lane.b32.xlu1 %v18961_v14, %s15435_s28  ;;  %v19268_v26 = vpop.permute.xlu1 %11036  ;;  %v22057_v8 = vld [vmem:[#allocation60_spill] sm:$0xff] }
 0x5ca   :  { %14775 = vmatmul.mubr.msk.f32.gmra.mxu1 %vm5020_vm14, %v19155_v22  ;;  %8657 = vmatprep.mubr.f32.mxu0 %v18766_v17 }
 0x5cb   :  { %15085 = vrot.lane.b32.xlu0 %v18873_v35, %s15434_s21  ;;  %8769 = vmatprep.subr.mxu0 %v8323_v0  ;;  %v19277_v34 = vpop.permute.xlu0 %11010  ;;  %v22052_v35 = vld [vmem:[#allocation22_spill] sm:$0xff]  ;;  %v8986_v0 = vsel %vm694_vm5, %v22057_v8, %v22056_v23  ;;  %v22064_v8 = vld [vmem:[#allocation23_spill] sm:$0xff] }
 0x5cc   :  { %14773 = vmatmul.mubr.msk.f32.gmra.mxu0 %vm5020_vm14, %v19155_v22  ;;  %15002 = vmatprep.mubr.msk.f32.mxu1 %vm5020_vm14, %v19124_v37  ;;  %v8988_v62 = vsel %vm694_vm5, %v22052_v35, %v22051_v4  ;;  %v8987_v48 = vsel %vm694_vm5, %v22056_v23, %v22052_v35 }
 0x5cd   :  { %8770 = vmatpush1.msra.mxu0 %v8322_v19  ;;  %12396 = vrot.lane.b32.xlu1 %v19023_v53, %s15435_s28  ;;  %v19288_v14 = vpop.permute.xlu1 %11008  ;;  %v22053_v53 = vld [vmem:[#allocation32_spill] sm:$0xff]  ;;  %v19321_v19 = vld [vmem:[%s21763_s5 + $0x30] sm:$0xff] }
 0x5ce   :  { %8771 = vmatprep.subr.mxu0 %v8311_v10  ;;  %15003 = vmatmul.mubr.msk.f32.vlgmr.msra.gmra.mxu1 %vm5020_vm14, %v19155_v22  ;;  %v8977_v29 = vsel %vm694_vm5, %v22054_v45, %v22053_v53  ;;  %v22058_v10 = vld [vmem:[#allocation21_spill] sm:$0xff]  ;;  %v22060_v45 = vld [vmem:[#allocation75_spill] sm:$0xff] }
 0x5cf   :  { %9136 = vmatpush1.msra.mxu1 %v8988_v62  ;;  %8772 = vmatpush1.msra.mxu0 %v8310_v57  ;;  %v19301_v47 = vpop.permute.xlu0 %8970  ;;  %v8993_v35 = vsel %vm694_vm5, %v18822_v60, %v22058_v10 }
 0x5d0   :  { %8805 = vmatprep.mubr.f32.mxu0 %v18766_v17  ;;  %9137 = vmatprep.subr.mxu1 %v8977_v29  ;;  %v8992_v29 = vsel %vm694_vm5, %v22060_v45, %v18822_v60  ;;  %v15372_v60 = vld [vmem:[#allocation4 + $0x88] sm:$0xff] }
 0x5d1   :  { %9138 = vmatpush1.msra.mxu1 %v8976_v30  ;;  %12364 = vrot.lane.b32.xlu0 %v15371_v61, %s15435_s28  ;;  %v19311_v4 = vpop.permute.xlu1 %11040  ;;  %v22061_v61 = vld [vmem:[#allocation30_spill] sm:$0xff] }
 0x5d2   :  { %14776 = vmatmul.mubr.msk.f32.vlgmr.msra.gmra.mxu0 %vm5020_vm14, %v19124_v37  ;;  %9058 = vmatprep.subr.mxu0 %v8987_v48  ;;  %v22059_v37 = vld [vmem:[#allocation16_spill] sm:$0xff]  ;;  %v22063_v48 = vld [vmem:[#allocation45_spill] sm:$0xff] }
 0x5d3   :  { %9059 = vmatpush1.msra.mxu0 %v8986_v0  ;;  %9171 = vmatprep.mubr.f32.mxu1 %v18766_v17  ;;  %v19327_v62 = vpop.permute.xlu0 %11042  ;;  %v8975_v57 = vsel %vm694_vm5, %v22059_v37, %v22055_v27  ;;  %v8974_v23 = vsel %vm694_vm5, %v22061_v61, %v22059_v37  ;;  %v8980_v0 = vsel %vm694_vm5, %v22064_v8, %v22063_v48 }
 0x5d4   :  { %9289 = vmatprep.subr.mxu1 %v8993_v35  ;;  %11730 = vrot.lane.b32.xlu1 %v19207_v3, %s15434_s21  ;;  %v22062_v3 = vld [vmem:[#allocation20_spill] sm:$0xff]  ;;  %v22065_v35 = vld [vmem:[#allocation35_spill] sm:$0xff] }
 0x5d5   :  { %9060 = vmatprep.subr.mxu0 %v8975_v57  ;;  %14784 = vmatmul.mubr.msk.f32.vlgmr.msra.gmra.mxu1 %vm5020_vm14, %v19321_v19  ;;  %v19339_v30 = vpop.permute.xlu1 %11012  ;;  %v8981_v27 = vsel %vm694_vm5, %v22063_v48, %v22062_v3  ;;  %v8991_v37 = vsel %vm694_vm5, %v22065_v35, %v22060_v45  ;;  %v19358_v57 = vld [vmem:[%s21763_s5 + $0x38] sm:$0xff] }
 0x5d6   :  { %9290 = vmatpush1.msra.mxu1 %v8992_v29  ;;  %8811 = vmatprep.mubr.f32.mxu0 %v18766_v17  ;;  %v15373_v48 = vld [vmem:[#allocation4 + $0x18] sm:$0xff] }
 0x5d7   :  { %9061 = vmatpush1.msra.mxu0 %v8974_v23  ;;  %9291 = vmatprep.subr.mxu1 %v8981_v27  ;;  %v22066_v23 = vld [vmem:[#allocation70_spill] sm:$0xff] }
 0x5d8   :  { %9292 = vmatpush1.msra.mxu1 %v8980_v0  ;;  %12394 = vrot.lane.b32.xlu0 %v15372_v60, %s15435_s28  ;;  %v19360_v29 = vpop.permute.xlu0 %11014  ;;  %v8997_v45 = vsel %vm694_vm5, %v19301_v47, %v22066_v23  ;;  %v22067_v0 = vld [vmem:[#allocation62_spill] sm:$0xff] }
 0x5d9   :  { %14777 = vmatmul.mubr.msk.f32.gmra.mxu0 %vm5020_vm14, %v19155_v22  ;;  %9212 = vmatprep.subr.mxu0 %v8991_v37  ;;  %v19364_v61 = vpop.permute.xlu1 %11044  ;;  %v8979_v60 = vsel %vm694_vm5, %v22067_v0, %v22064_v8  ;;  %v15374_v37 = vld [vmem:[#allocation4 + $0xa0] sm:$0xff] }
 0x5da   :  { %9177 = vmatprep.mubr.f32.mxu1 %v18766_v17  ;;  %12368 = vrot.lane.b32.xlu1 %v19034_v21, %s15435_s28  ;;  %v8990_v21 = vsel %vm694_vm5, %v22050_v36, %v22065_v35  ;;  %v22068_v36 = vld [vmem:[#allocation39_spill] sm:$0xff] }
 0x5db   :  { %14785 = vmatmul.mubr.msk.f32.gmra.mxu1 %vm5020_vm14, %v19358_v57  ;;  %9094 = vmatprep.mubr.f32.mxu0 %v18766_v17  ;;  %v8995_v35 = vsel %vm694_vm5, %v22068_v36, %v18919_v20 }
 0x5dc   :  { %12366 = vrot.lane.b32.xlu0 %v15373_v48, %s15435_s28  ;;  %9325 = vmatprep.mubr.f32.mxu1 %v18766_v17  ;;  %v19377_v22 = vpop.permute.xlu0 %11046  ;;  %v8978_v48 = vsel %vm694_vm5, %v22053_v53, %v22067_v0  ;;  %v8996_v53 = vsel %vm694_vm5, %v18919_v20, %v19301_v47  ;;  %v8984_v0 = vsel %vm694_vm5, %v18855_v12, %v18887_v33 }
 0x5dd   :  { %14782 = vmatmul.mubr.msk.f32.vlgmr.msra.gmra.mxu0 %vm5020_vm14, %v19321_v19  ;;  %9443 = vmatprep.subr.mxu1 %v8997_v45  ;;  %v19384_v27 = vpop.permute.xlu1 %11016 }
 0x5de   :  { %9213 = vmatpush1.msra.mxu0 %v8990_v21  ;;  %12400 = vrot.lane.b32.xlu1 %v15374_v37, %s15435_s28  ;;  %v15375_v21 = vld [vmem:[#allocation4 + $0x30] sm:$0xff]  ;;  %v8994_v37 = vsel %vm694_vm5, %v22058_v10, %v22068_v36  ;;  %v22073_v36 = vld [vmem:[#allocation57_spill] sm:$0xff] }
 0x5df   :  { %9214 = vmatprep.subr.mxu0 %v8979_v60  ;;  %14788 = vmatmul.mubr.msk.f32.vlgmr.msra.gmra.mxu1 %vm5020_vm14, %v19321_v19 }
 0x5e0   :  { %9215 = vmatpush1.msra.mxu0 %v8978_v48  ;;  %9100 = vmatprep.mubr.f32.mxu0 %v18766_v17  ;;  %v19399_v45 = vpop.permute.xlu0 %11018  ;;  %v22071_v48 = vld [vmem:[#allocation66_spill] sm:$0xff] }
 0x5e1   :  { %9366 = vmatprep.subr.mxu0 %v8995_v35  ;;  %12398 = vrot.lane.b32.xlu0 %v19064_v56, %s15435_s28  ;;  %v19406_v8 = vpop.permute.xlu1 %11048  ;;  %v22069_v56 = vld [vmem:[#allocation65_spill] sm:$0xff]  ;;  %v15376_v35 = vld [vmem:[#allocation4 + $0xb0] sm:$0xff] }
 0x5e2   :  { %14783 = vmatmul.mubr.msk.f32.gmra.mxu0 %vm5020_vm14, %v19358_v57  ;;  %9331 = vmatprep.mubr.f32.mxu1 %v18766_v17  ;;  %v8985_v20 = vsel %vm694_vm5, %v18887_v33, %v22069_v56  ;;  %v8982_v33 = vsel %vm694_vm5, %v22062_v3, %v22071_v48  ;;  %v22072_v3 = vld [vmem:[#allocation25_spill] sm:$0xff] }
 0x5e3   :  { %12372 = vrot.lane.b32.xlu1 %v15375_v21, %s15435_s28  ;;  %14789 = vmatmul.mubr.msk.f32.gmra.mxu1 %vm5020_vm14, %v19358_v57  ;;  %v9661_v21 = vsel %vm890_vm8, %v22073_v36, %v22072_v3 }
 0x5e4   :  { %9248 = vmatprep.mubr.f32.mxu0 %v18766_v17  ;;  %9444 = vmatpush1.msra.mxu1 %v8996_v53  ;;  %v19418_v47 = vpop.permute.xlu0 %11022 }
 0x5e5   :  { %22070 = vst [vmem:[#allocation46_spill] sm:$0xff] %v19418_v47  ;;  %12370 = vrot.lane.b32.xlu0 %v19029_v46, %s15435_s28  ;;  %9445 = vmatprep.subr.mxu1 %v8985_v20  ;;  %v19425_v60 = vpop.permute.xlu1 %11020  ;;  %v8983_v46 = vsel %vm694_vm5, %v22071_v48, %v18855_v12  ;;  %v15377_v12 = vld [vmem:[#allocation4 + $0xa8] sm:$0xff]  ;;  %v22074_v20 = vld [vmem:[#allocation15_spill] sm:$0xff] }
 0x5e6   :  { %14786 = vmatmul.mubr.msk.f32.vlgmr.msra.gmra.mxu0 %vm5020_vm14, %v19321_v19  ;;  %9446 = vmatpush1.msra.mxu1 %v8984_v0  ;;  %v9660_v0 = vsel %vm890_vm8, %v22074_v20, %v22073_v36  ;;  %v22075_v48 = vld [vmem:[#allocation38_spill] sm:$0xff]  ;;  %v15380_v47 = vld [vmem:[#allocation4 + $0x50] sm:$0xff] }
 0x5e7   :  { %9367 = vmatpush1.msra.mxu0 %v8994_v37  ;;  %12404 = vrot.lane.b32.xlu1 %v15376_v35, %s15435_s28 }
 0x5e8   :  { %9368 = vmatprep.subr.mxu0 %v8983_v46  ;;  %9254 = vmatprep.mubr.f32.mxu0 %v18766_v17  ;;  %v19440_v53 = vpop.permute.xlu0 %15080  ;;  %v22076_v46 = vld [vmem:[#allocation17_spill] sm:$0xff] }
 0x5e9   :  { %9369 = vmatpush1.msra.mxu0 %v8982_v33  ;;  %9479 = vmatprep.mubr.f32.mxu1 %v18766_v17  ;;  %v19443_v10 = vpop.permute.xlu1 %11052  ;;  %v9649_v35 = vsel %vm890_vm8, %v22076_v46, %v22075_v48 }
 0x5ea   :  { %15005 = vmatprep.subr.mxu0 %v22066_v23  ;;  %12402 = vrot.lane.b32.xlu0 %v15377_v12, %s15435_s28  ;;  %v22077_v12 = vld [vmem:[#allocation58_spill] sm:$0xff] }
 0x5eb   :  { %14787 = vmatmul.mubr.msk.f32.gmra.mxu0 %vm5020_vm14, %v19358_v57  ;;  %14792 = vmatmul.mubr.msk.f32.vlgmr.msra.gmra.mxu1 %vm5020_vm14, %v19321_v19  ;;  %v9648_v36 = vsel %vm890_vm8, %v22077_v12, %v22076_v46  ;;  %v22080_v12 = vld [vmem:[#allocation64_spill] sm:$0xff] }
 0x5ec   :  { %9732 = vmatprep.subr.mxu1 %v9661_v21  ;;  %12376 = vrot.lane.b32.xlu1 %v19057_v42, %s15435_s28  ;;  %v19459_v37 = vpop.permute.xlu0 %11716  ;;  %v15378_v42 = vld [vmem:[#allocation4 + $0x38] sm:$0xff]  ;;  %v22078_v21 = vld [vmem:[#allocation18_spill] sm:$0xff] }
 0x5ed   :  { %9733 = vmatpush1.msra.mxu1 %v9660_v0  ;;  %9402 = vmatprep.mubr.f32.mxu0 %v18766_v17  ;;  %v19465_v33 = vpop.permute.xlu1 %11024  ;;  %v9665_v20 = vsel %vm890_vm8, %v22078_v21, %v18847_v25 }
 0x5ee   :  { %9734 = vmatprep.subr.mxu1 %v9649_v35  ;;  %9485 = vmatprep.mubr.f32.mxu1 %v18766_v17  ;;  %v15379_v35 = vld [vmem:[#allocation4 + $0xc0] sm:$0xff] }
 0x5ef   :  { %9735 = vmatpush1.msra.mxu1 %v9648_v36  ;;  %12374 = vrot.lane.b32.xlu0 %v15378_v42, %s15435_s28  ;;  %v22081_v36 = vld [vmem:[#allocation71_spill] sm:$0xff] }
 0x5f0   :  { %14790 = vmatmul.mubr.msk.f32.vlgmr.msra.gmra.mxu0 %vm5020_vm14, %v19321_v19  ;;  %14793 = vmatmul.mubr.msk.f32.gmra.mxu1 %vm5020_vm14, %v19358_v57  ;;  %v19479_v0 = vpop.permute.xlu0 %9644  ;;  %v9663_v42 = vsel %vm890_vm8, %v22081_v36, %v22080_v12 }
 0x5f1   :  { %15006 = vmatpush3.msra.mxu0 %v22066_v23  ;;  %9886 = vmatprep.subr.mxu1 %v9665_v20  ;;  %v19482_v46 = vpop.permute.xlu1 %11714  ;;  %v19494_v23 = vld [vmem:[%s21763_s5 + $0x40] sm:$0xff] }
 0x5f2   :  { %22079 = vst [vmem:[#allocation81_spill] sm:$0xff] %v19482_v46  ;;  %15007 = vmatprep.subr.mxu0 %v22069_v56  ;;  %12408 = vrot.lane.b32.xlu1 %v15379_v35, %s15435_s28  ;;  %v9664_v35 = vsel %vm890_vm8, %v22080_v12, %v22078_v21  ;;  %v19523_v21 = vld [vmem:[%s21763_s5 + $0x48] sm:$0xff] }
 0x5f3   :  { %15008 = vmatpush3.msra.mxu0 %v22069_v56  ;;  %9408 = vmatprep.mubr.f32.mxu0 %v18766_v17  ;;  %v22087_v12 = vld [vmem:[#allocation34_spill] sm:$0xff] }
 0x5f4   :  { %9768 = vmatprep.mubr.f32.mxu1 %v18766_v17  ;;  %9809 = vmatprep.subr.mxu0 %v9663_v42  ;;  %v19497_v20 = vpop.permute.xlu0 %11686  ;;  %v22084_v42 = vld [vmem:[#allocation44_spill] sm:$0xff] }
 0x5f5   :  { %22082 = vst [vmem:[#allocation27_spill] sm:$0xff] %v19497_v20  ;;  %12406 = vrot.lane.b32.xlu0 %v19173_v13, %s15435_s28  ;;  %14791 = vmatmul.mubr.msk.f32.gmra.mxu0 %vm5020_vm14, %v19358_v57  ;;  %v19503_v56 = vpop.permute.xlu1 %11712  ;;  %v22085_v20 = vld [vmem:[#allocation59_spill] sm:$0xff] }
 0x5f6   :  { %22083 = vst [vmem:[#allocation28_spill] sm:$0xff] %v19503_v56  ;;  %14798 = vmatmul.mubr.msk.f32.vlgmr.msra.gmra.mxu1 %vm5020_vm14, %v19494_v23  ;;  %12380 = vrot.lane.b32.xlu1 %v15380_v47, %s15435_s28  ;;  %v9653_v13 = vsel %vm890_vm8, %v22085_v20, %v22084_v42  ;;  %v22086_v56 = vld [vmem:[#allocation31_spill] sm:$0xff] }
 0x5f7   :  { %9887 = vmatpush1.msra.mxu1 %v9664_v35  ;;  %15009 = vmatprep.mubr.msk.f32.mxu0 %vm5020_vm14, %v19321_v19  ;;  %v9652_v46 = vsel %vm890_vm8, %v22086_v56, %v22085_v20  ;;  %v9669_v35 = vsel %vm890_vm8, %v22087_v12, %v18983_v6  ;;  %v13038_v19 = vld [vmem:[%s21764_s6 + $0x8] sm:$0xff] }
 0x5f8   :  { %9888 = vmatprep.subr.mxu1 %v9653_v13  ;;  %9774 = vmatprep.mubr.f32.mxu1 %v18766_v17  ;;  %v19525_v47 = vpop.permute.xlu0 %11710 }
 0x5f9   :  { %9889 = vmatpush1.msra.mxu1 %v9652_v46  ;;  %12378 = vrot.lane.b32.xlu0 %v19077_v32, %s15435_s28  ;;  %v19535_v20 = vpop.permute.xlu1 %11688  ;;  %v9662_v46 = vsel %vm890_vm8, %v22072_v3, %v22081_v36  ;;  %v22089_v32 = vld [vmem:[#allocation37_spill] sm:$0xff]  ;;  %v22090_v3 = vld [vmem:[#allocation68_spill] sm:$0xff]  ;;  %v22091_v36 = vld [vmem:[#allocation74_spill] sm:$0xff] }
 0x5fa   :  { %22088 = vst [vmem:[#allocation80_spill] sm:$0xff] %v19535_v20  ;;  %10040 = vmatprep.subr.mxu1 %v9669_v35  ;;  %15010 = vmatmul.mubr.msk.f32.vlgmr.msra.gmra.mxu0 %vm5020_vm14, %v19358_v57  ;;  %v9651_v13 = vsel %vm890_vm8, %v22089_v32, %v22086_v56  ;;  %v9650_v35 = vsel %vm890_vm8, %v22075_v48, %v22089_v32  ;;  %v13037_v57 = vld [vmem:[%s21764_s6] sm:$0xff]  ;;  %v22093_v32 = vld [vmem:[#allocation63_spill] sm:$0xff]  ;;  %s15439_s6 = smov 20  }
 0x5fb   :  { %14799 = vmatmul.mubr.msk.f32.gmra.mxu1 %vm5020_vm14, %v19523_v21  ;;  %9810 = vmatpush1.msra.mxu0 %v9662_v46  ;;  %v9667_v46 = vsel %vm890_vm8, %v22091_v36, %v22090_v3  ;;  %v9666_v48 = vsel %vm890_vm8, %v18847_v25, %v22091_v36 }
 0x5fc   :  { %9811 = vmatprep.subr.mxu0 %v9651_v13  ;;  %13046 = vperm.xlu1 %15078, %v13038_v19   ;;  %v19553_v20 = vpop.permute.xlu0 %11708  ;;  %v9668_v19 = vsel %vm890_vm8, %v22090_v3, %v22087_v12  ;;  %v22094_v13 = vld [vmem:[#allocation72_spill] sm:$0xff] }
 0x5fd   :  { %9812 = vmatpush1.msra.mxu0 %v9650_v35  ;;  %9845 = vmatprep.mubr.f32.mxu0 %v18766_v17  ;;  %v19560_v56 = vpop.permute.xlu1 %11684  ;;  %v9655_v35 = vsel %vm890_vm8, %v22094_v13, %v22093_v32  ;;  %v9654_v25 = vsel %vm890_vm8, %v22084_v42, %v22094_v13  ;;  %v22097_v3 = vld [vmem:[#allocation24_spill] sm:$0xff]  ;;  %v22098_v13 = vld [vmem:[#allocation42_spill] sm:$0xff] }
 0x5fe   :  { %9922 = vmatprep.mubr.f32.mxu1 %v18766_v17  ;;  %9963 = vmatprep.subr.mxu0 %v9667_v46  ;;  %22092 = vst [vmem:[#allocation50_spill] sm:$0xff] %v19560_v56  ;;  %v22096_v46 = vld [vmem:[#allocation36_spill] sm:$0xff] }
 0x5ff   :  { %13041 = vperm.xlu0 %15077, %v13037_v57   ;;  %14800 = vmatmul.mubr.msk.f32.vlgmr.msra.gmra.mxu0 %vm5020_vm14, %v19494_v23  ;;  %v22095_v57 = vld [vmem:[#allocation43_spill] sm:$0xff]  ;;  %v9656_v12 = vsel %vm890_vm8, %v22093_v32, %v22096_v46 }
 0x600   :  { %14802 = vmatmul.mubr.msk.f32.vlgmr.msra.gmra.mxu1 %vm5020_vm14, %v19494_v23  ;;  %9964 = vmatpush1.msra.mxu0 %v9666_v48  ;;  %v9657_v56 = vsel %vm890_vm8, %v22096_v46, %v22095_v57  ;;  %v19581_v36 = vpop.permute.xlu0 %11680  ;;  %v9671_v48 = vsel %vm890_vm8, %v19479_v0, %v22097_v3 }
 0x601   :  { %10041 = vmatpush1.msra.mxu1 %v9668_v19  ;;  %9965 = vmatprep.subr.mxu0 %v9655_v35  ;;  %v9670_v19 = vsel %vm890_vm8, %v18983_v6, %v19479_v0  ;;  %v19614_v35 = vld [vmem:[#allocation4 + $0x68] sm:$0xff] }
 0x602   :  { %10042 = vmatprep.subr.mxu1 %v9657_v56  ;;  %9966 = vmatpush1.msra.mxu0 %v9654_v25  ;;  %v22099_v25 = vld [vmem:[#allocation73_spill] sm:$0xff] }
 0x603   :  { %10043 = vmatpush1.msra.mxu1 %v9656_v12  ;;  %9851 = vmatprep.mubr.f32.mxu0 %v18766_v17  ;;  %v19592_v42 = vpop.permute.xlu1 %11682  ;;  %v10337_v6 = vsel %vm4353_vm13, %v22099_v25, %v18908_v11 }
 0x604   :  { %9928 = vmatprep.mubr.f32.mxu1 %v18766_v17  ;;  %15012 = vmatprep.subr.mxu1 %v22097_v3 }
 0x605   :  { %14801 = vmatmul.mubr.msk.f32.gmra.mxu0 %vm5020_vm14, %v19523_v21  ;;  %14803 = vmatmul.mubr.msk.f32.gmra.mxu1 %vm5020_vm14, %v19523_v21 }
 0x606   :  { %9999 = vmatprep.mubr.f32.mxu0 %v18766_v17  ;;  %10076 = vmatprep.mubr.f32.mxu1 %v18766_v17 }
 0x607   :  { %10117 = vmatprep.subr.mxu0 %v9671_v48  ;;  %v19600_v56 = vpop.permute.xlu0 %10318  ;;  %v22101_v48 = vld [vmem:[#allocation26_spill] sm:$0xff] }
 0x609   :  { %14804 = vmatmul.mubr.msk.f32.vlgmr.msra.gmra.mxu0 %vm5020_vm14, %v19494_v23  ;;  %14806 = vmatmul.mubr.msk.f32.vlgmr.msra.gmra.mxu1 %vm5020_vm14, %v19494_v23 }
 0x60a   :  { %15013 = vmatpush3.msra.mxu1 %v22097_v3  ;;  %10005 = vmatprep.mubr.f32.mxu0 %v18766_v17  ;;  %v19611_v32 = vpop.permute.xlu1 %11722  ;;  %v22100_v17 = vld [vmem:[#allocation77_spill] sm:$0xff] }
 0x60b   :  { %15014 = vmatprep.subr.mxu1 %v22098_v13  ;;  %10082 = vmatprep.mubr.f32.mxu1 %v19614_v35  ;;  %v19617_v46 = vpop.permute.xlu0 %11724  ;;  %v9659_v0 = vsel %vm890_vm8, %v22100_v17, %v22098_v13  ;;  %v9658_v12 = vsel %vm890_vm8, %v22095_v57, %v22100_v17  ;;  %v10323_v17 = vsel %vm4353_vm13, %v18974_v44, %v18950_v43 }
 0x60c   :  { %15015 = vmatpush3.msra.mxu1 %v22098_v13  ;;  %10118 = vmatpush1.msra.mxu0 %v9670_v19  ;;  %v10335_v19 = vsel %vm4353_vm13, %v18938_v28, %v22101_v48  ;;  %v10334_v13 = vsel %vm4353_vm13, %v19002_v1, %v18938_v28  ;;  %v10325_v28 = vsel %vm4353_vm13, %v18924_v24, %v18901_v59 }
 0x60d   :  { %10483 = vmatprep.subr.mxu1 %v10337_v6  ;;  %14805 = vmatmul.mubr.msk.f32.gmra.mxu0 %vm5020_vm14, %v19523_v21  ;;  %v10336_v6 = vsel %vm4353_vm13, %v22101_v48, %v22099_v25  ;;  %v10322_v1 = vsel %vm4353_vm13, %v19018_v51, %v18974_v44  ;;  %v19669_v25 = vld [vmem:[%s21763_s5 + $0x50] sm:$0xff]  ;;  %v10341_v44 = vsel %vm4353_vm13, %v18990_v52, %v19039_v38  ;;  %v22103_v48 = vld [vmem:[#allocation76_spill] sm:$0xff] }
 0x60e   :  { %14807 = vmatmul.mubr.msk.f32.gmra.mxu1 %vm5020_vm14, %v19523_v21  ;;  %10119 = vmatprep.subr.mxu0 %v9659_v0  ;;  %v19633_v3 = vpop.permute.xlu1 %11720 }
 0x60f   :  { %10120 = vmatpush1.msra.mxu0 %v9658_v12  ;;  %10153 = vmatprep.mubr.f32.mxu0 %v19614_v35  ;;  %v10340_v12 = vsel %vm4353_vm13, %v19009_v15, %v18990_v52 }
 0x610   :  { %15016 = vmatprep.mubr.msk.f32.mxu1 %vm5020_vm14, %v19494_v23  ;;  %10406 = vmatprep.subr.mxu0 %v10335_v19  ;;  %v22104_v19 = vld [vmem:[#allocation47_spill] sm:$0xff] }
 0x611   :  { %14808 = vmatmul.mubr.msk.f32.vlgmr.msra.gmra.mxu0 %vm5020_vm14, %v19494_v23  ;;  %v19646_v57 = vpop.permute.xlu0 %11694  ;;  %v10324_v23 = vsel %vm4353_vm13, %v18950_v43, %v18924_v24  ;;  %v22102_v24 = vld [vmem:[#allocation78_spill] sm:$0xff] }
 0x612   :  { %15017 = vmatmul.mubr.msk.f32.vlgmr.msra.gmra.mxu1 %vm5020_vm14, %v19523_v21  ;;  %10407 = vmatpush1.msra.mxu0 %v10334_v13  ;;  %v10339_v43 = vsel %vm4353_vm13, %v22102_v24, %v19009_v15  ;;  %v10329_v13 = vsel %vm4353_vm13, %v22104_v19, %v22103_v48  ;;  %v10338_v52 = vsel %vm4353_vm13, %v18908_v11, %v22102_v24  ;;  %v22106_v11 = vld [vmem:[#allocation48_spill] sm:$0xff] }
 0x613   :  { %10484 = vmatpush1.msra.mxu1 %v10336_v6  ;;  %10408 = vmatprep.subr.mxu0 %v10323_v17  ;;  %v22105_v17 = vld [vmem:[#allocation79_spill] sm:$0xff]  ;;  %v10345_v15 = vsel %vm4353_vm13, %v19600_v56, %v19116_v5  ;;  %v10343_v24 = vsel %vm4353_vm13, %v19165_v7, %v22106_v11 }
 0x614   :  { %10485 = vmatprep.subr.mxu1 %v10325_v28  ;;  %10159 = vmatprep.mubr.f32.mxu0 %v19614_v35  ;;  %v19671_v0 = vpop.permute.xlu1 %11696  ;;  %v10328_v28 = vsel %vm4353_vm13, %v22105_v17, %v22104_v19 }
 0x615   :  { %10486 = vmatpush1.msra.mxu1 %v10324_v23  ;;  %10409 = vmatpush1.msra.mxu0 %v10322_v1  ;;  %v19676_v51 = vpop.permute.xlu0 %11718  ;;  %v10327_v23 = vsel %vm4353_vm13, %v19099_v63, %v22105_v17  ;;  %v19753_v17 = vpop.f32.mrf.mxu1 }
 0x616   :  { %10519 = vmatprep.mubr.f32.mxu1 %v19614_v35  ;;  %10637 = vmatprep.subr.mxu1 %v10341_v44  ;;  %v10326_v44 = vsel %vm4353_vm13, %v18901_v59, %v19099_v63  ;;  %v10333_v59 = vsel %vm4353_vm13, %v19142_v58, %v19088_v9  ;;  %v10332_v63 = vsel %vm4353_vm13, %v19107_v50, %v19142_v58 }
 0x617   :  { %14809 = vmatmul.mubr.msk.f32.gmra.mxu0 %vm5020_vm14, %v19523_v21  ;;  %14816 = vmatmul.mubr.msk.f32.vlgmr.msra.gmra.mxu1 %vm5020_vm14, %v19669_v25  ;;  %v19695_v21 = vld [vmem:[%s21763_s5 + $0x58] sm:$0xff]  ;;  %v10331_v58 = vsel %vm4353_vm13, %v19189_v31, %v19107_v50  ;;  %v19773_v50 = vpop.f32.mrf.mxu1 }
 0x618   :  { %10560 = vmatprep.subr.mxu0 %v10339_v43  ;;  %10638 = vmatpush1.msra.mxu1 %v10340_v12  ;;  %v19697_v6 = vpop.permute.xlu1 %11692  ;;  %v10344_v43 = vsel %vm4353_vm13, %v22106_v11, %v19600_v56 }
 0x619   :  { %10639 = vmatprep.subr.mxu1 %v10329_v13  ;;  %10442 = vmatprep.mubr.f32.mxu0 %v19614_v35  ;;  %v10342_v13 = vsel %vm4353_vm13, %v19039_v38, %v19165_v7  ;;  %v11070_v38 = vsel %vm5020_vm14, %v19128_v16, %v19214_v54  ;;  %v11069_v7 = vsel %vm5020_vm14, %v19157_v55, %v19128_v16  ;;  %v19794_v16 = vpop.f32.mrf.mxu1 }
 0x61a   :  { %10640 = vmatpush1.msra.mxu1 %v10328_v28  ;;  %10525 = vmatprep.mubr.f32.mxu1 %v19614_v35  ;;  %v10330_v28 = vsel %vm4353_vm13, %v22103_v48, %v19189_v31  ;;  %v11057_v48 = vsel %vm5020_vm14, %v19235_v49, %v19177_v2  ;;  %v11074_v55 = vsel %vm5020_vm14, %v19256_v39, %v19311_v4 }
 0x61b   :  { %14814 = vmatmul.mubr.msk.f32.vlgmr.msra.gmra.mxu0 %vm5020_vm14, %v19669_v25  ;;  %14817 = vmatmul.mubr.msk.f32.gmra.mxu1 %vm5020_vm14, %v19695_v21  ;;  %v19714_v1 = vpop.permute.xlu0 %11690 }
 0x61c   :  { %10561 = vmatpush1.msra.mxu0 %v10338_v52  ;;  %10448 = vmatprep.mubr.f32.mxu0 %v19614_v35 }
 0x61d   :  { %10562 = vmatprep.subr.mxu0 %v10327_v23  ;;  %10673 = vmatprep.mubr.f32.mxu1 %v19614_v35  ;;  %v11056_v23 = vsel %vm5020_vm14, %v19250_v41, %v19235_v49  ;;  %v19806_v49 = vld [vmem:[%s21763_s5 + $0x60] sm:$0xff] }
 0x61e   :  { %10563 = vmatpush1.msra.mxu0 %v10326_v44  ;;  %10791 = vmatprep.subr.mxu1 %v10345_v15  ;;  %v19730_v12 = vpop.permute.xlu1 %11728  ;;  %v19815_v44 = vpop.f32.mrf.mxu0 }
 0x61f   :  { %10714 = vmatprep.subr.mxu0 %v10343_v24  ;;  %14815 = vmatmul.mubr.msk.f32.gmra.mxu0 %vm5020_vm14, %v19695_v21  ;;  %v19734_v19 = vpop.permute.xlu0 %11732  ;;  %v19820_v24 = vpop.f32.mrf.mxu1 }
 0x620   :  { %14820 = vmatmul.mubr.msk.f32.vlgmr.msra.gmra.mxu1 %vm5020_vm14, %v19669_v25  ;;  %10596 = vmatprep.mubr.f32.mxu0 %v19614_v35 }
 0x621   :  { %10679 = vmatprep.mubr.f32.mxu1 %v19614_v35  ;;  %10792 = vmatpush1.msra.mxu1 %v10344_v43  ;;  %v11061_v43 = vsel %vm5020_vm14, %v19277_v34, %v19339_v30 }
 0x622   :  { %10793 = vmatprep.subr.mxu1 %v10333_v59  ;;  %v19746_v56 = vpop.permute.xlu1 %11704  ;;  %v11060_v59 = vsel %vm5020_vm14, %v19288_v14, %v19277_v34  ;;  %v11071_v34 = vsel %vm5020_vm14, %v19214_v54, %v19225_v18  ;;  %v11076_v54 = vsel %vm5020_vm14, %v19327_v62, %v19364_v61 }
 0x623   :  { %14818 = vmatmul.mubr.msk.f32.vlgmr.msra.gmra.mxu0 %vm5020_vm14, %v19669_v25  ;;  %10794 = vmatpush1.msra.mxu1 %v10332_v63  ;;  %v19841_v63 = vld [vmem:[%s21763_s5 + $0x68] sm:$0xff] }
 0x624   :  { %14821 = vmatmul.mubr.msk.f32.gmra.mxu1 %vm5020_vm14, %v19695_v21  ;;  %10715 = vmatpush1.msra.mxu0 %v10342_v13 }
 0x625   :  { %10716 = vmatprep.subr.mxu0 %v10331_v58  ;;  %10602 = vmatprep.mubr.f32.mxu0 %v19614_v35  ;;  %v19764_v52 = vpop.permute.xlu0 %11702  ;;  %v11059_v58 = vsel %vm5020_vm14, %v19242_v40, %v19288_v14 }
 0x626   :  { %10717 = vmatpush1.msra.mxu0 %v10330_v28  ;;  %10827 = vmatprep.mubr.f32.mxu1 %v19614_v35 }
 0x627   :  { %15019 = vmatprep.subr.mxu0 %v19116_v5  ;;  %14819 = vmatmul.mubr.msk.f32.gmra.mxu0 %vm5020_vm14, %v19695_v21 }
 0x628   :  { %14824 = vmatmul.mubr.msk.f32.vlgmr.msra.gmra.mxu1 %vm5020_vm14, %v19669_v25  ;;  %11142 = vmatprep.subr.mxu1 %v11070_v38  ;;  %v19780_v31 = vpop.permute.xlu1 %11700  ;;  %v19850_v13 = vpop.f32.mrf.mxu1  ;;  %v11058_v38 = vsel %vm5020_vm14, %v19177_v2, %v19242_v40  ;;  %v11075_v2 = vsel %vm5020_vm14, %v19311_v4, %v19327_v62  ;;  %v11077_v40 = vsel %vm5020_vm14, %v19364_v61, %v19377_v22 }
 0x629   :  { %11143 = vmatpush1.msra.mxu1 %v11069_v7  ;;  %10750 = vmatprep.mubr.f32.mxu0 %v19614_v35  ;;  %v19786_v15 = vpop.permute.xlu0 %11726  ;;  %v15082_v7 = vunpack.i.l.bf16 %v19440_v53  ;;  %v11065_v4 = vsel %vm5020_vm14, %v19399_v45, %v19425_v60  ;;  %v11062_v62 = vsel %vm5020_vm14, %v19339_v30, %v19360_v29  ;;  %v11064_v61 = vsel %vm5020_vm14, %v19384_v27, %v19399_v45 }
 0x62a   :  { %11144 = vmatprep.subr.mxu1 %v11057_v48  ;;  %10833 = vmatprep.mubr.f32.mxu1 %v19614_v35  ;;  %v19876_v14 = vpop.f32.mrf.mxu1  ;;  %v11063_v48 = vsel %vm5020_vm14, %v19360_v29, %v19384_v27 }
 0x62b   :  { %11145 = vmatpush1.msra.mxu1 %v11056_v23  ;;  %14822 = vmatmul.mubr.msk.f32.vlgmr.msra.gmra.mxu0 %vm5020_vm14, %v19669_v25 }
 0x62c   :  { %14825 = vmatmul.mubr.msk.f32.gmra.mxu1 %vm5020_vm14, %v19695_v21  ;;  %15020 = vmatpush3.msra.mxu0 %v19116_v5  ;;  %v19808_v41 = vpop.permute.xlu1 %12390  ;;  %v11072_v5 = vsel %vm5020_vm14, %v19225_v18, %v19268_v26 }
 0x62d   :  { %11296 = vmatprep.subr.mxu1 %v11074_v55  ;;  %15021 = vmatprep.subr.mxu0 %v19088_v9 }
 0x62e   :  { %15022 = vmatpush3.msra.mxu0 %v19088_v9  ;;  %10756 = vmatprep.mubr.f32.mxu0 %v19614_v35  ;;  %v11073_v9 = vsel %vm5020_vm14, %v19268_v26, %v19256_v39  ;;  %v19843_v39 = vpop.f32.mrf.mxu0  ;;  %v11078_v26 = vsel %vm5020_vm14, %v19377_v22, %v19406_v8  ;;  %v19905_v22 = vpop.f32.mrf.mxu1 }
 0x62f   :  { %11178 = vmatprep.mubr.f32.mxu1 %v19614_v35  ;;  %11219 = vmatprep.subr.mxu0 %v11072_v5  ;;  %v19818_v11 = vpop.permute.xlu0 %11050  ;;  %v11081_v5 = vsel %vm5020_vm14, %v19443_v10, %v15082_v7 }
 0x630   :  { %14823 = vmatmul.mubr.msk.f32.gmra.mxu0 %vm5020_vm14, %v19695_v21  ;;  %14830 = vmatmul.mubr.msk.f32.vlgmr.msra.gmra.mxu1 %vm5020_vm14, %v19806_v49  ;;  %v11080_v30 = vsel %vm5020_vm14, %v19818_v11, %v19443_v10  ;;  %v15083_v10 = vunpack.i.h.bf16 %v19440_v53 }
 0x631   :  { %11297 = vmatpush1.msra.mxu1 %v11073_v9  ;;  %15023 = vmatprep.mubr.msk.f32.mxu0 %vm5020_vm14, %v19669_v25  ;;  %v19926_v9 = vpop.f32.mrf.mxu1 }
 0x632   :  { %11298 = vmatprep.subr.mxu1 %v11061_v43  ;;  %11184 = vmatprep.mubr.f32.mxu1 %v19614_v35  ;;  %v11079_v43 = vsel %vm5020_vm14, %v19406_v8, %v19818_v11  ;;  %v22107_v8 = vld [vmem:[#allocation81_spill] sm:$0xff] }
 0x633   :  { %11299 = vmatpush1.msra.mxu1 %v11060_v59  ;;  %v19848_v25 = vpop.permute.xlu1 %12388  ;;  %v11752_v11 = vsel %vm5660_vm15, %v22107_v8, %v19459_v37 }
 0x634   :  { %11450 = vmatprep.subr.mxu1 %v11078_v26  ;;  %15024 = vmatmul.mubr.msk.f32.vlgmr.msra.gmra.mxu0 %vm5020_vm14, %v19695_v21  ;;  %v19868_v21 = vpop.f32.mrf.mxu0  ;;  %v11068_v26 = vsel %vm5020_vm14, %v19465_v33, %v15083_v10  ;;  %v22110_v10 = vld [vmem:[#allocation50_spill] sm:$0xff] }
 0x635   :  { %14831 = vmatmul.mubr.msk.f32.gmra.mxu1 %vm5020_vm14, %v19841_v63  ;;  %11220 = vmatpush1.msra.mxu0 %v11071_v34  ;;  %v19862_v28 = vpop.permute.xlu0 %11698 }
 0x636   :  { %11221 = vmatprep.subr.mxu0 %v11059_v58  ;;  %11255 = vmatprep.mubr.f32.mxu0 %v19614_v35  ;;  %v19900_v55 = vpop.f32.mrf.mxu0 }
 0x637   :  { %11222 = vmatpush1.msra.mxu0 %v11058_v38  ;;  %11332 = vmatprep.mubr.f32.mxu1 %v19614_v35  ;;  %v19874_v18 = vpop.permute.xlu1 %12362 }
 0x638   :  { %11373 = vmatprep.subr.mxu0 %v11076_v54  ;;  %14832 = vmatmul.mubr.msk.f32.vlgmr.msra.gmra.mxu0 %vm5020_vm14, %v19806_v49  ;;  %v19922_v45 = vpop.f32.mrf.mxu0  ;;  %v22108_v54 = vld [vmem:[#allocation46_spill] sm:$0xff] }
 0x639   :  { %14834 = vmatmul.mubr.msk.f32.vlgmr.msra.gmra.mxu1 %vm5020_vm14, %v19806_v49  ;;  %11374 = vmatpush1.msra.mxu0 %v11075_v2  ;;  %v19892_v23 = vpop.permute.xlu0 %12392  ;;  %v11067_v7 = vsel %vm5020_vm14, %v22108_v54, %v19465_v33  ;;  %v11066_v2 = vsel %vm5020_vm14, %v19425_v60, %v22108_v54  ;;  %v11749_v60 = vsel %vm5660_vm15, %v19553_v20, %v19525_v47  ;;  %v22111_v20 = vld [vmem:[#allocation80_spill] sm:$0xff] }
 0x63a   :  { %11451 = vmatpush1.msra.mxu1 %v11077_v40  ;;  %11375 = vmatprep.subr.mxu0 %v11063_v48  ;;  %v19936_v59 = vpop.f32.mrf.mxu0  ;;  %v22109_v48 = vld [vmem:[#allocation28_spill] sm:$0xff]  ;;  %v11736_v54 = vsel %vm5660_vm15, %v19581_v36, %v19592_v42 }
 0x63b   :  { %11452 = vmatprep.subr.mxu1 %v11065_v4  ;;  %11376 = vmatpush1.msra.mxu0 %v11062_v62  ;;  %v19914_v29 = vpop.permute.xlu1 %12360  ;;  %v11750_v4 = vsel %vm5660_vm15, %v19525_v47, %v22109_v48 }
 0x63c   :  { %11453 = vmatpush1.msra.mxu1 %v11064_v61  ;;  %11261 = vmatprep.mubr.f32.mxu0 %v19614_v35  ;;  %v19963_v40 = vpop.f32.mrf.mxu0 }
 0x63d   :  { %11338 = vmatprep.mubr.f32.mxu1 %v19614_v35  ;;  %15026 = vmatprep.subr.mxu1 %v11081_v5  ;;  %v19920_v27 = vpop.permute.xlu0 %15085 }
 0x63e   :  { %14833 = vmatmul.mubr.msk.f32.gmra.mxu0 %vm5020_vm14, %v19841_v63  ;;  %14835 = vmatmul.mubr.msk.f32.gmra.mxu1 %vm5020_vm14, %v19841_v63  ;;  %v19990_v47 = vpop.f32.mrf.mxu0 }
 0x63f   :  { %11409 = vmatprep.mubr.f32.mxu0 %v19614_v35  ;;  %11486 = vmatprep.mubr.f32.mxu1 %v19614_v35  ;;  %v19941_v34 = vpop.permute.xlu1 %12396 }
 0x640   :  { %11527 = vmatprep.subr.mxu0 %v11080_v30  ;;  %v11751_v30 = vsel %vm5660_vm15, %v22109_v48, %v22107_v8  ;;  %v11756_v48 = vsel %vm5660_vm15, %v19611_v32, %v19617_v46 }
 0x642   :  { %14836 = vmatmul.mubr.msk.f32.vlgmr.msra.gmra.mxu0 %vm5020_vm14, %v19806_v49  ;;  %14838 = vmatmul.mubr.msk.f32.vlgmr.msra.gmra.mxu1 %vm5020_vm14, %v19806_v49 }
 0x643   :  { %15027 = vmatpush3.msra.mxu1 %v11081_v5  ;;  %11415 = vmatprep.mubr.f32.mxu0 %v19614_v35  ;;  %v19943_v53 = vpop.f32.mrf.mxu1  ;;  %v19946_v58 = vpop.permute.xlu0 %12364 }
 0x644   :  { %15028 = vmatprep.subr.mxu1 %v11068_v26  ;;  %11492 = vmatprep.mubr.f32.mxu1 %v19614_v35 }
 0x645   :  { %15029 = vmatpush3.msra.mxu1 %v11068_v26  ;;  %11528 = vmatpush1.msra.mxu0 %v11079_v43  ;;  %v19951_v38 = vpop.f32.mrf.mxu1  ;;  %v11737_v43 = vsel %vm5660_vm15, %v19592_v42, %v22110_v10  ;;  %v11754_v42 = vsel %vm5660_vm15, %v19676_v51, %v19633_v3 }
 0x646   :  { %11899 = vmatprep.subr.mxu1 %v11752_v11  ;;  %14837 = vmatmul.mubr.msk.f32.gmra.mxu0 %vm5020_vm14, %v19841_v63  ;;  %v11731_v33 = vpop.permute.xlu1 %11730 }
 0x647   :  { %14839 = vmatmul.mubr.msk.f32.gmra.mxu1 %vm5020_vm14, %v19841_v63  ;;  %11529 = vmatprep.subr.mxu0 %v11067_v7  ;;  %v20007_v7 = vld [vmem:[%s21763_s5 + $0x70] sm:$0xff] }
 0x648   :  { %11530 = vmatpush1.msra.mxu0 %v11066_v2  ;;  %11563 = vmatprep.mubr.f32.mxu0 %v19614_v35  ;;  %v19969_v62 = vpop.f32.mrf.mxu1 }
 0x649   :  { %15030 = vmatprep.mubr.msk.f32.mxu1 %vm5020_vm14, %v19806_v49  ;;  %11822 = vmatprep.subr.mxu0 %v11750_v4 }
 0x64a   :  { %14840 = vmatmul.mubr.msk.f32.vlgmr.msra.gmra.mxu0 %vm5020_vm14, %v19806_v49  ;;  %v19978_v61 = vpop.permute.xlu0 %12394  ;;  %v19980_v5 = vpop.f32.mrf.mxu1  ;;  %v22112_v49 = vld [vmem:[#allocation27_spill] sm:$0xff] }
 0x64b   :  { %15031 = vmatmul.mubr.msk.f32.vlgmr.msra.gmra.mxu1 %vm5020_vm14, %v19841_v63  ;;  %11823 = vmatpush1.msra.mxu0 %v11749_v60  ;;  %v11739_v26 = vsel %vm5660_vm15, %v22112_v49, %v22111_v20  ;;  %v11738_v8 = vsel %vm5660_vm15, %v22110_v10, %v22112_v49  ;;  %v11743_v10 = vsel %vm5660_vm15, %v19646_v57, %v19671_v0 }
 0x64c   :  { %11900 = vmatpush1.msra.mxu1 %v11751_v30  ;;  %11824 = vmatprep.subr.mxu0 %v11737_v43  ;;  %v19995_v11 = vpop.f32.mrf.mxu1  ;;  %v20019_v36 = vpop.permute.xlu1 %12368  ;;  %v11755_v30 = vsel %vm5660_vm15, %v19633_v3, %v19611_v32  ;;  %v11742_v43 = vsel %vm5660_vm15, %v19697_v6, %v19646_v57  ;;  %v11753_v57 = vsel %vm5660_vm15, %v19459_v37, %v19676_v51 }
 0x64d   :  { %11901 = vmatprep.subr.mxu1 %v11739_v26  ;;  %11569 = vmatprep.mubr.f32.mxu0 %v19614_v35  ;;  %v20009_v2 = vpop.f32.mrf.mxu0  ;;  %v11760_v26 = vsel %vm5660_vm15, %v11731_v33, %v19734_v19  ;;  %v11758_v51 = vsel %vm5660_vm15, %v19786_v15, %v19730_v12 }
 0x64e   :  { %11902 = vmatpush1.msra.mxu1 %v11738_v8  ;;  %11825 = vmatpush1.msra.mxu0 %v11736_v54  ;;  %v20014_v4 = vpop.permute.xlu0 %12366  ;;  %v20016_v60 = vpop.f32.mrf.mxu1  ;;  %v11741_v54 = vsel %vm5660_vm15, %v19714_v1, %v19697_v6  ;;  %v11759_v6 = vsel %vm5660_vm15, %v19730_v12, %v11731_v33  ;;  %v11747_v12 = vsel %vm5660_vm15, %v19764_v52, %v19746_v56 }
 0x64f   :  { %11935 = vmatprep.mubr.f32.mxu1 %v19614_v35  ;;  %12053 = vmatprep.subr.mxu1 %v11756_v48  ;;  %v20043_v49 = vpop.f32.mrf.mxu0 }
 0x650   :  { %14841 = vmatmul.mubr.msk.f32.gmra.mxu0 %vm5020_vm14, %v19841_v63  ;;  %14848 = vmatmul.mubr.msk.f32.vlgmr.msra.gmra.mxu1 %vm5020_vm14, %v20007_v7  ;;  %v20037_v63 = vld [vmem:[%s21763_s5 + $0x78] sm:$0xff]  ;;  %v20065_v48 = vpop.permute.xlu1 %12400 }
 0x651   :  { %11976 = vmatprep.subr.mxu0 %v11754_v42  ;;  %12054 = vmatpush1.msra.mxu1 %v11755_v30  ;;  %v11740_v42 = vsel %vm5660_vm15, %v22111_v20, %v19714_v1 }
 0x652   :  { %12055 = vmatprep.subr.mxu1 %v11743_v10  ;;  %11858 = vmatprep.mubr.f32.mxu0 %v19614_v35  ;;  %v20045_v32 = vpop.f32.mrf.mxu1 }
 0x653   :  { %12056 = vmatpush1.msra.mxu1 %v11742_v43  ;;  %11941 = vmatprep.mubr.f32.mxu1 %v19614_v35  ;;  %v20048_v3 = vpop.permute.xlu0 %12398  ;;  %v15087_v43 = vunpack.i.l.bf16 %v19920_v27 }
 0x654   :  { %14846 = vmatmul.mubr.msk.f32.vlgmr.msra.gmra.mxu0 %vm5020_vm14, %v20007_v7  ;;  %14849 = vmatmul.mubr.msk.f32.gmra.mxu1 %vm5020_vm14, %v20037_v63  ;;  %v20059_v8 = vpop.f32.mrf.mxu1 }
 0x655   :  { %11977 = vmatpush1.msra.mxu0 %v11753_v57  ;;  %11864 = vmatprep.mubr.f32.mxu0 %v19614_v35  ;;  %v11746_v57 = vsel %vm5660_vm15, %v19780_v31, %v19764_v52  ;;  %v11745_v52 = vsel %vm5660_vm15, %v19862_v28, %v19780_v31  ;;  %v11761_v31 = vsel %vm5660_vm15, %v19734_v19, %v15087_v43 }
 0x656   :  { %11978 = vmatprep.subr.mxu0 %v11741_v54  ;;  %12089 = vmatprep.mubr.f32.mxu1 %v19614_v35  ;;  %v20071_v37 = vpop.f32.mrf.mxu0  ;;  %v11757_v54 = vsel %vm5660_vm15, %v19617_v46, %v19786_v15  ;;  %v11744_v46 = vsel %vm5660_vm15, %v19671_v0, %v19862_v28  ;;  %v12429_v0 = vsel %vm6300_vm0, %v19848_v25, %v19808_v41  ;;  %v15088_v28 = vunpack.i.h.bf16 %v19920_v27 }
 0x657   :  { %11979 = vmatpush1.msra.mxu0 %v11740_v42  ;;  %12207 = vmatprep.subr.mxu1 %v11760_v26  ;;  %v20087_v20 = vpop.permute.xlu0 %12370  ;;  %v20101_v26 = vpop.permute.xlu1 %12372  ;;  %v12416_v25 = vsel %vm6300_vm0, %v19914_v29, %v19874_v18  ;;  %v12434_v27 = vsel %vm6300_vm0, %v20048_v3, %v20065_v48 }
 0x658   :  { %12130 = vmatprep.subr.mxu0 %v11758_v51  ;;  %14847 = vmatmul.mubr.msk.f32.gmra.mxu0 %vm5020_vm14, %v20037_v63  ;;  %v20080_v30 = vpop.f32.mrf.mxu0  ;;  %v20082_v1 = vpop.f32.mrf.mxu1  ;;  %v12430_v51 = vsel %vm6300_vm0, %v19808_v41, %v19892_v23 }
 0x659   :  { %14852 = vmatmul.mubr.msk.f32.vlgmr.msra.gmra.mxu1 %vm5020_vm14, %v20007_v7  ;;  %12012 = vmatprep.mubr.f32.mxu0 %v19614_v35 }
 0x65a   :  { %12095 = vmatprep.mubr.f32.mxu1 %v19614_v35  ;;  %12208 = vmatpush1.msra.mxu1 %v11759_v6  ;;  %v20093_v33 = vpop.f32.mrf.mxu0  ;;  %v20095_v10 = vpop.f32.mrf.mxu1 }
 0x65b   :  { %12209 = vmatprep.subr.mxu1 %v11747_v12  ;;  %v20141_v19 = vpop.permute.xlu1 %12404 }
 0x65c   :  { %14850 = vmatmul.mubr.msk.f32.vlgmr.msra.gmra.mxu0 %vm5020_vm14, %v20007_v7  ;;  %12210 = vmatpush1.msra.mxu1 %v11746_v57  ;;  %v20108_v42 = vpop.f32.mrf.mxu0  ;;  %v20127_v12 = vpop.permute.xlu0 %12402 }
 0x65d   :  { %14853 = vmatmul.mubr.msk.f32.gmra.mxu1 %vm5020_vm14, %v20037_v63  ;;  %12131 = vmatpush1.msra.mxu0 %v11757_v54  ;;  %v8005_v6 = vpop.f32.mrf.mxu1 }
 0x65e   :  { %12132 = vmatprep.subr.mxu0 %v11745_v52  ;;  %12502 = vmatprep.subr.mxu1 %v12430_v51  ;;  %v20122_v15 = vadd.f32 %v8005_v6, %v19922_v45  ;;  %v12417_v45 = vsel %vm6300_vm0, %v19874_v18, %v19946_v58 }
 0x65f   :  { %12133 = vmatpush1.msra.mxu0 %v11744_v46  ;;  %12018 = vmatprep.mubr.f32.mxu0 %v19614_v35  ;;  %v20129_v57 = vpop.f32.mrf.mxu1 }
 0x660   :  { %12243 = vmatprep.mubr.f32.mxu1 %v19614_v35  ;;  %15033 = vmatprep.subr.mxu0 %v11761_v31  ;;  %v20132_v54 = vpop.f32.mrf.mxu0 }
 0x661   :  { %14851 = vmatmul.mubr.msk.f32.gmra.mxu0 %vm5020_vm14, %v20037_v63  ;;  %14856 = vmatmul.mubr.msk.f32.vlgmr.msra.gmra.mxu1 %vm5020_vm14, %v20007_v7  ;;  %v20164_v6 = vpop.permute.xlu0 %12374 }
 0x662   :  { %12503 = vmatpush1.msra.mxu1 %v12429_v0  ;;  %12166 = vmatprep.mubr.f32.mxu0 %v19614_v35  ;;  %v20148_v43 = vpop.f32.mrf.mxu0  ;;  %v8011_v41 = vpop.f32.mrf.mxu1  ;;  %v20179_v0 = vld [vmem:[%s21763_s5 + $0x80] sm:$0xff] }
 0x663   :  { %12504 = vmatprep.subr.mxu1 %v12417_v45  ;;  %12249 = vmatprep.mubr.f32.mxu1 %v19614_v35  ;;  %v20158_v52 = vadd.f32 %v8011_v41, %v19963_v40  ;;  %v11748_v40 = vsel %vm5660_vm15, %v19746_v56, %v15088_v28  ;;  %v20181_v45 = vpop.permute.xlu1 %12376  ;;  %v12432_v56 = vsel %vm6300_vm0, %v19978_v61, %v19941_v34 }
 0x664   :  { %12505 = vmatpush1.msra.mxu1 %v12416_v25  ;;  %v7928_v51 = vpop.f32.mrf.mxu0  ;;  %v20169_v29 = vpop.f32.mrf.mxu1  ;;  %v12421_v28 = vsel %vm6300_vm0, %v20087_v20, %v20101_v26  ;;  %v12433_v25 = vsel %vm6300_vm0, %v19941_v34, %v20048_v3  ;;  %v12420_v34 = vsel %vm6300_vm0, %v20019_v36, %v20087_v20  ;;  %v12431_v3 = vsel %vm6300_vm0, %v19892_v23, %v19978_v61 }
 0x665   :  { %14854 = vmatmul.mubr.msk.f32.vlgmr.msra.gmra.mxu0 %vm5020_vm14, %v20007_v7  ;;  %14857 = vmatmul.mubr.msk.f32.gmra.mxu1 %vm5020_vm14, %v20037_v63  ;;  %v20167_v18 = vadd.f32 %v7928_v51, %v19850_v13  ;;  %v20209_v51 = vld [vmem:[%s21763_s5 + $0x88] sm:$0xff]  ;;  %v12419_v20 = vsel %vm6300_vm0, %v20014_v4, %v20019_v36  ;;  %v12418_v23 = vsel %vm6300_vm0, %v19946_v58, %v20014_v4 }
 0x666   :  { %15034 = vmatpush3.msra.mxu0 %v11761_v31  ;;  %12656 = vmatprep.subr.mxu1 %v12434_v27  ;;  %v20173_v46 = vpop.f32.mrf.mxu0  ;;  %v12436_v36 = vsel %vm6300_vm0, %v20127_v12, %v20141_v19  ;;  %v7775_v58 = vadd.f32 %v20093_v33, %v19753_v17 }
 0x667   :  { %15035 = vmatprep.subr.mxu0 %v11748_v40  ;;  %12172 = vmatprep.mubr.f32.mxu0 %v19614_v35  ;;  %v8159_v13 = vpop.f32.mrf.mxu1 }
 0x668   :  { %15036 = vmatpush3.msra.mxu0 %v11748_v40  ;;  %12538 = vmatprep.mubr.f32.mxu1 %v19614_v35  ;;  %v20188_v31 = vadd.f32 %v8159_v13, %v20009_v2  ;;  %v12407_v40 = vpop.permute.xlu0 %12406 }
 0x669   :  { %12579 = vmatprep.subr.mxu0 %v12432_v56  ;;  %14855 = vmatmul.mubr.msk.f32.gmra.mxu0 %vm5020_vm14, %v20037_v63  ;;  %v8161_v41 = vpop.f32.mrf.mxu1  ;;  %v20224_v56 = vpop.permute.xlu1 %12408 }
 0x66a   :  { %14862 = vmatmul.mubr.msk.f32.vlgmr.msra.gmra.mxu1 %vm5020_vm14, %v20179_v0  ;;  %15037 = vmatprep.mubr.msk.f32.mxu0 %vm5020_vm14, %v20007_v7  ;;  %v7934_v2 = vpop.f32.mrf.mxu0  ;;  %v20203_v27 = vadd.f32 %v8161_v41, %v20043_v49  ;;  %22113 = vst [vmem:[#allocation51_spill] sm:$0xff] %v20224_v56  ;;  %v12438_v17 = vsel %vm6300_vm0, %v12407_v40, %v20224_v56 }
 0x66b   :  { %12657 = vmatpush1.msra.mxu1 %v12433_v25  ;;  %12544 = vmatprep.mubr.f32.mxu1 %v19614_v35  ;;  %v20212_v13 = vadd.f32 %v7934_v2, %v19905_v22  ;;  %v7777_v2 = vadd.f32 %v20108_v42, %v19773_v50  ;;  %v7781_v42 = vadd.f32 %v20132_v54, %v19794_v16 }
 0x66c   :  { %12658 = vmatprep.subr.mxu1 %v12421_v28  ;;  %v20217_v7 = vpop.f32.mrf.mxu0  ;;  %v8165_v49 = vpop.f32.mrf.mxu1 }
 0x66d   :  { %12659 = vmatpush1.msra.mxu1 %v12420_v34  ;;  %15038 = vmatmul.mubr.msk.f32.vlgmr.msra.gmra.mxu0 %vm5020_vm14, %v20037_v63  ;;  %v20227_v22 = vadd.f32 %v8165_v49, %v20071_v37  ;;  %v12423_v37 = vsel %vm6300_vm0, %v20164_v6, %v20181_v45  ;;  %v12379_v33 = vpop.permute.xlu0 %12378  ;;  %v12437_v49 = vsel %vm6300_vm0, %v20141_v19, %v12407_v40 }
 0x66e   :  { %14863 = vmatmul.mubr.msk.f32.gmra.mxu1 %vm5020_vm14, %v20209_v51  ;;  %12580 = vmatpush1.msra.mxu0 %v12431_v3  ;;  %v8082_v28 = vpop.f32.mrf.mxu0  ;;  %v8167_v41 = vpop.f32.mrf.mxu1  ;;  %v12424_v19 = vsel %vm6300_vm0, %v20181_v45, %v12379_v33 }
 0x66f   :  { %12581 = vmatprep.subr.mxu0 %v12419_v20  ;;  %12615 = vmatprep.mubr.f32.mxu0 %v19614_v35  ;;  %v20239_v61 = vadd.f32 %v8082_v28, %v19943_v53  ;;  %v20242_v63 = vadd.f32 %v8167_v41, %v20080_v30  ;;  %v12435_v53 = vsel %vm6300_vm0, %v20065_v48, %v20127_v12  ;;  %v20274_v12 = vpop.permute.xlu1 %12380 }
 0x670   :  { %12582 = vmatpush1.msra.mxu0 %v12418_v23  ;;  %12692 = vmatprep.mubr.f32.mxu1 %v19614_v35  ;;  %v8084_v4 = vpop.f32.mrf.mxu0  ;;  %22114 = vst [vmem:[#allocation82_spill] sm:$0xff] %v20274_v12  ;;  %v7783_v28 = vadd.f32 %v20148_v43, %v19820_v24 }
 0x671   :  { %12733 = vmatprep.subr.mxu0 %v12436_v36  ;;  %14864 = vmatmul.mubr.msk.f32.vlgmr.msra.gmra.mxu0 %vm5020_vm14, %v20179_v0  ;;  %v20259_v30 = vadd.f32 %v8084_v4, %v19951_v38  ;;  %v8422_v25 = vpop.f32.mrf.mxu1  ;;  %v12422_v38 = vsel %vm6300_vm0, %v20101_v26, %v20164_v6  ;;  %v12425_v26 = vsel %vm6300_vm0, %v12379_v33, %v20274_v12 }
 0x672   :  { %14866 = vmatmul.mubr.msk.f32.vlgmr.msra.gmra.mxu1 %vm5020_vm14, %v20179_v0  ;;  %12734 = vmatpush1.msra.mxu0 %v12435_v53  ;;  %v20267_v34 = vadd.f32 %v8422_v25, %v7775_v58  ;;  %v7931_v36 = vadd.f32 %v20173_v46, %v19876_v14  ;;  %v7854_v14 = vadd.f32 %v20059_v8, %v19843_v39 }
 0x673   :  { %12735 = vmatprep.subr.mxu0 %v12423_v37  ;;  %12621 = vmatprep.mubr.f32.mxu0 %v19614_v35  ;;  %v8424_v48 = vpop.f32.mrf.mxu1  ;;  %v7858_v46 = vadd.f32 %v20082_v1, %v19868_v21  ;;  %v7860_v39 = vadd.f32 %v20095_v10, %v19900_v55 }
 0x674   :  { %12736 = vmatpush1.msra.mxu0 %v12422_v38  ;;  %12698 = vmatprep.mubr.f32.mxu1 %v19614_v35  ;;  %v8088_v3 = vpop.f32.mrf.mxu0  ;;  %v20278_v50 = vadd.f32 %v8424_v48, %v7777_v2 }
 0x675   :  { %14865 = vmatmul.mubr.msk.f32.gmra.mxu0 %vm5020_vm14, %v20209_v51  ;;  %12810 = vmatprep.subr.mxu1 %v12438_v17  ;;  %v8089_v6 = vadd.f32 %v8088_v3, %v19969_v62 }
 0x676   :  { %14867 = vmatmul.mubr.msk.f32.gmra.mxu1 %vm5020_vm14, %v20209_v51  ;;  %12769 = vmatprep.mubr.f32.mxu0 %v19614_v35  ;;  %v8090_v40 = vpop.f32.mrf.mxu0  ;;  %v8428_v20 = vpop.f32.mrf.mxu1 }
 0x677   :  { %12811 = vmatpush1.msra.mxu1 %v12437_v49  ;;  %12846 = vmatprep.mubr.f32.mxu1 %v19614_v35  ;;  %v8091_v16 = vadd.f32 %v8090_v40, %v19980_v5  ;;  %v20296_v54 = vadd.f32 %v8428_v20, %v7781_v42 }
 0x678   :  { %12812 = vmatprep.subr.mxu1 %v12425_v26  ;;  %v14997_v62 = vpop.f32.mrf.mxu0  ;;  %v8430_v41 = vpop.f32.mrf.mxu1 }
 0x679   :  { %14868 = vmatmul.mubr.msk.f32.vlgmr.msra.gmra.mxu0 %vm5020_vm14, %v20179_v0  ;;  %12813 = vmatpush1.msra.mxu1 %v12424_v19  ;;  %v8242_v45 = vadd.f32 %v14997_v62, %v19995_v11  ;;  %v20301_v23 = vadd.f32 %v8430_v41, %v7783_v28  ;;  %v7852_v11 = vadd.f32 %v20045_v32, %v19815_v44 }
 0x67a   :  { %14870 = vmatmul.mubr.msk.f32.vlgmr.msra.gmra.mxu1 %vm5020_vm14, %v20179_v0  ;;  %12775 = vmatprep.mubr.f32.mxu0 %v19614_v35  ;;  %v8236_v24 = vpop.f32.mrf.mxu0 }
 0x67b   :  { %12852 = vmatprep.mubr.f32.mxu1 %v19614_v35  ;;  %v8237_v5 = vadd.f32 %v8236_v24, %v20016_v60  ;;  %v8576_v43 = vpop.f32.mrf.mxu1 }
 0x67c   :  { %v20311_v37 = vadd.f32 %v8576_v43, %v20167_v18 }
 0x67d   :  { %14869 = vmatmul.mubr.msk.f32.gmra.mxu0 %vm5020_vm14, %v20209_v51  ;;  %v8578_v58 = vpop.f32.mrf.mxu1 }
 0x67e   :  { %14871 = vmatmul.mubr.msk.f32.gmra.mxu1 %vm5020_vm14, %v20209_v51  ;;  %v8499_v4 = vpop.f32.mrf.mxu0  ;;  %v20319_v53 = vadd.f32 %v8578_v58, %v7931_v36  ;;  %12923 = vmatprep.mubr.f32.mxu0 %v19614_v35  ;;  %v7937_v51 = vadd.f32 %v20217_v7, %v19926_v9 }
 0x67f   :  { %v8895_v60 = vadd.f32 %v8499_v4, %v7852_v11  ;;  %15044 = vmatprep.mubr.msk.f32.mxu1 %vm5020_vm14, %v20179_v0 }
 0x680   :  { %v8501_v44 = vpop.f32.mrf.mxu0 }
 0x681   :  { %v8896_v32 = vadd.f32 %v8501_v44, %v7854_v14  ;;  %v8582_v18 = vpop.f32.mrf.mxu1 }
 0x682   :  { %v20331_v25 = vadd.f32 %v8582_v18, %v20212_v13  ;;  %v8008_v13 = vadd.f32 %v20129_v57, %v19936_v59 }
 0x683   :  { %v8505_v35 = vpop.f32.mrf.mxu0  ;;  %v8584_v17 = vpop.f32.mrf.mxu1 }
 0x684   :  { %v8908_v8 = vadd.f32 %v8505_v35, %v7858_v46  ;;  %v20335_v33 = vadd.f32 %v8584_v17, %v7937_v51 }
 0x685   :  { %v8507_v0 = vpop.f32.mrf.mxu0  ;;  %v8730_v2 = vpop.f32.mrf.mxu1 }
 0x686   :  { %v8909_v38 = vadd.f32 %v8507_v0, %v7860_v39  ;;  %v20338_v48 = vadd.f32 %v8730_v2, %v20239_v61  ;;  %v8014_v61 = vadd.f32 %v20169_v29, %v19990_v47 }
 0x687   :  { %v8732_v21 = vpop.f32.mrf.mxu1 }
 0x688   :  { %v8653_v1 = vpop.f32.mrf.mxu0  ;;  %v20341_v9 = vadd.f32 %v8732_v21, %v20259_v30 }
 0x689   :  { %v8899_v7 = vadd.f32 %v8653_v1, %v20122_v15 }
 0x68a   :  { %v8655_v55 = vpop.f32.mrf.mxu0  ;;  %v8736_v10 = vpop.f32.mrf.mxu1 }
 0x68b   :  { %v8900_v49 = vadd.f32 %v8655_v55, %v8008_v13  ;;  %v20346_v3 = vadd.f32 %v8736_v10, %v8089_v6 }
 0x68c   :  { %v8659_v26 = vpop.f32.mrf.mxu0  ;;  %v8738_v42 = vpop.f32.mrf.mxu1 }
 0x68d   :  { %v8912_v19 = vadd.f32 %v8659_v26, %v20158_v52  ;;  %v20351_v40 = vadd.f32 %v8738_v42, %v8091_v16 }
 0x68e   :  { %v8661_v30 = vpop.f32.mrf.mxu0  ;;  %v15004_v20 = vpop.f32.mrf.mxu1 }
 0x68f   :  { %v8913_v28 = vadd.f32 %v8661_v30, %v8014_v61  ;;  %v20353_v59 = vadd.f32 %v15004_v20, %v8242_v45 }
 0x690   :  { %v8884_v15 = vpop.f32.mrf.mxu1 }
 0x691   :  { %v20355_v57 = vadd.f32 %v8884_v15, %v8237_v5 }
 0x692   :  { %v8807_v62 = vpop.f32.mrf.mxu0 }
 0x693   :  { %v8903_v6 = vadd.f32 %v8807_v62, %v20188_v31 }
 0x694   :  { %v8809_v41 = vpop.f32.mrf.mxu0 }
 0x695   :  { %v8904_v24 = vadd.f32 %v8809_v41, %v20203_v27  ;;  %v9173_v43 = vpop.f32.mrf.mxu1 }
 0x696   :  { %v20359_v47 = vadd.f32 %v9173_v43, %v8895_v60 }
 0x697   :  { %v9175_v52 = vpop.f32.mrf.mxu1 }
 0x698   :  { %v20361_v29 = vadd.f32 %v9175_v52, %v8896_v32 }
 0x699   :  { %v8813_v16 = vpop.f32.mrf.mxu0 }
 0x69a   :  { %v8916_v36 = vadd.f32 %v8813_v16, %v20227_v22 }
 0x69b   :  { %v8815_v45 = vpop.f32.mrf.mxu0  ;;  %v9179_v11 = vpop.f32.mrf.mxu1 }
 0x69c   :  { %v8917_v5 = vadd.f32 %v8815_v45, %v20242_v63  ;;  %v20365_v58 = vadd.f32 %v9179_v11, %v8908_v8 }
 0x69d   :  { %v9096_v4 = vpop.f32.mrf.mxu0  ;;  %v9181_v31 = vpop.f32.mrf.mxu1 }
 0x69e   :  { %v9567_v14 = vadd.f32 %v9096_v4, %v20267_v34  ;;  %v20368_v27 = vadd.f32 %v9181_v31, %v8909_v38 }
 0x69f   :  { %v9098_v60 = vpop.f32.mrf.mxu0  ;;  %v9327_v44 = vpop.f32.mrf.mxu1 }
 0x6a0   :  { %v9568_v32 = vadd.f32 %v9098_v60, %v20278_v50  ;;  %v20371_v18 = vadd.f32 %v9327_v44, %v8899_v7 }
 0x6a1   :  { %v9329_v46 = vpop.f32.mrf.mxu1 }
 0x6a2   :  { %v9102_v22 = vpop.f32.mrf.mxu0  ;;  %v20373_v51 = vadd.f32 %v9329_v46, %v8900_v49 }
 0x6a3   :  { %v9580_v63 = vadd.f32 %v9102_v22, %v20296_v54  ;;  %v9333_v35 = vpop.f32.mrf.mxu1 }
 0x6a4   :  { %v9104_v17 = vpop.f32.mrf.mxu0  ;;  %v20376_v39 = vadd.f32 %v9333_v35, %v8912_v19 }
 0x6a5   :  { %v9581_v34 = vadd.f32 %v9104_v17, %v20301_v23  ;;  %v9335_v8 = vpop.f32.mrf.mxu1 }
 0x6a6   :  { %v9250_v0 = vpop.f32.mrf.mxu0  ;;  %v20379_v2 = vadd.f32 %v9335_v8, %v8913_v28 }
 0x6a7   :  { %v9571_v50 = vadd.f32 %v9250_v0, %v20311_v37 }
 0x6a8   :  { %v9252_v38 = vpop.f32.mrf.mxu0 }
 0x6a9   :  { %v9572_v21 = vadd.f32 %v9252_v38, %v20319_v53 }
 0x6ab   :  { %v9256_v1 = vpop.f32.mrf.mxu0  ;;  %v9481_v13 = vpop.f32.mrf.mxu1 }
 0x6ac   :  { %v9584_v7 = vadd.f32 %v9256_v1, %v20331_v25  ;;  %v9577_v54 = vadd.f32 %v9481_v13, %v8903_v6 }
 0x6ad   :  { %v9258_v55 = vpop.f32.mrf.mxu0  ;;  %v9483_v10 = vpop.f32.mrf.mxu1 }
 0x6ae   :  { %v9585_v49 = vadd.f32 %v9258_v55, %v20335_v33  ;;  %v9578_v26 = vadd.f32 %v9483_v10, %v8904_v24 }
 0x6b0   :  { %v9404_v23 = vpop.f32.mrf.mxu0  ;;  %v9487_v42 = vpop.f32.mrf.mxu1 }
 0x6b1   :  { %v9575_v61 = vadd.f32 %v9404_v23, %v20338_v48  ;;  %v20386_v19 = vadd.f32 %v9487_v42, %v8916_v36 }
 0x6b2   :  { %v9406_v37 = vpop.f32.mrf.mxu0  ;;  %v9489_v30 = vpop.f32.mrf.mxu1 }
 0x6b3   :  { %v9576_v53 = vadd.f32 %v9406_v37, %v20341_v9  ;;  %v20389_v20 = vadd.f32 %v9489_v30, %v8917_v5 }
 0x6b5   :  { %v9410_v28 = vpop.f32.mrf.mxu0 }
 0x6b6   :  { %v9588_v25 = vadd.f32 %v9410_v28, %v20346_v3  ;;  %v9770_v15 = vpop.f32.mrf.mxu1 }
 0x6b7   :  { %v20392_v62 = vadd.f32 %v9770_v15, %v9567_v14  ;;  %v9412_v33 = vpop.f32.mrf.mxu0 }
 0x6b8   :  { %v9589_v6 = vadd.f32 %v9412_v33, %v20351_v40  ;;  %v9772_v41 = vpop.f32.mrf.mxu1 }
 0x6b9   :  { %v20395_v24 = vadd.f32 %v9772_v41, %v9568_v32 }
 0x6ba   :  { %v15011_v48 = vpop.f32.mrf.mxu0 }
 0x6bb   :  { %v9592_v43 = vadd.f32 %v15011_v48, %v20353_v59  ;;  %v9776_v52 = vpop.f32.mrf.mxu1 }
 0x6bc   :  { %v10254_v16 = vadd.f32 %v9776_v52, %v9580_v63  ;;  %v9558_v9 = vpop.f32.mrf.mxu0 }
 0x6bd   :  { %v9579_v36 = vadd.f32 %v9558_v9, %v20355_v57  ;;  %v9778_v45 = vpop.f32.mrf.mxu1 }
 0x6be   :  { %v10255_v11 = vadd.f32 %v9778_v45, %v9581_v34 }
 0x6bf   :  { %v9847_v3 = vpop.f32.mrf.mxu0 }
 0x6c0   :  { %v10243_v5 = vadd.f32 %v9847_v3, %v20359_v47  ;;  %v9924_v4 = vpop.f32.mrf.mxu1 }
 0x6c1   :  { %v10245_v31 = vadd.f32 %v9924_v4, %v9571_v50  ;;  %v9849_v14 = vpop.f32.mrf.mxu0 }
 0x6c2   :  { %v10244_v40 = vadd.f32 %v9849_v14, %v20361_v29  ;;  %v9926_v60 = vpop.f32.mrf.mxu1 }
 0x6c3   :  { %v10246_v44 = vadd.f32 %v9926_v60, %v9572_v21 }
 0x6c5   :  { %v9853_v32 = vpop.f32.mrf.mxu0  ;;  %v9930_v46 = vpop.f32.mrf.mxu1 }
 0x6c6   :  { %v10256_v59 = vadd.f32 %v9853_v32, %v20365_v58  ;;  %v10258_v22 = vadd.f32 %v9930_v46, %v9584_v7 }
 0x6c7   :  { %v9855_v63 = vpop.f32.mrf.mxu0  ;;  %v9932_v35 = vpop.f32.mrf.mxu1 }
 0x6c8   :  { %v10257_v57 = vadd.f32 %v9855_v63, %v20368_v27  ;;  %v10259_v17 = vadd.f32 %v9932_v35, %v9585_v49 }
 0x6c9   :  { %v10001_v34 = vpop.f32.mrf.mxu0  ;;  %v10078_v8 = vpop.f32.mrf.mxu1 }
 0x6ca   :  { %v10247_v47 = vadd.f32 %v10001_v34, %v20371_v18  ;;  %v10249_v0 = vadd.f32 %v10078_v8, %v9575_v61 }
 0x6cb   :  { %v10003_v50 = vpop.f32.mrf.mxu0  ;;  %v10080_v38 = vpop.f32.mrf.mxu1 }
 0x6cc   :  { %v10248_v29 = vadd.f32 %v10003_v50, %v20373_v51  ;;  %v10250_v21 = vadd.f32 %v10080_v38, %v9576_v53 }
 0x6cd   :  { %v10007_v1 = vpop.f32.mrf.mxu0 }
 0x6ce   :  { %v10260_v13 = vadd.f32 %v10007_v1, %v20376_v39  ;;  %v10084_v58 = vpop.f32.mrf.mxu1 }
 0x6cf   :  { %v20406_v7 = vadd.f32 %v10084_v58, %v9588_v25  ;;  %v10009_v55 = vpop.f32.mrf.mxu0 }
 0x6d0   :  { %v10261_v27 = vadd.f32 %v10009_v55, %v20379_v2  ;;  %v10086_v10 = vpop.f32.mrf.mxu1 }
 0x6d1   :  { %v10263_v49 = vadd.f32 %v10086_v10, %v9589_v6  ;;  %v10155_v23 = vpop.f32.mrf.mxu0 }
 0x6d2   :  { %v10251_v42 = vadd.f32 %v10155_v23, %v9577_v54  ;;  %v15018_v18 = vpop.f32.mrf.mxu1 }
 0x6d3   :  { %v10266_v61 = vadd.f32 %v15018_v18, %v9592_v43  ;;  %v10157_v37 = vpop.f32.mrf.mxu0 }
 0x6d4   :  { %v10252_v30 = vadd.f32 %v10157_v37, %v9578_v26  ;;  %v10232_v28 = vpop.f32.mrf.mxu1 }
 0x6d5   :  { %v10253_v51 = vadd.f32 %v10232_v28, %v9579_v36 }
 0x6d7   :  { %v10161_v53 = vpop.f32.mrf.mxu0  ;;  %v10521_v15 = vpop.f32.mrf.mxu1 }
 0x6d8   :  { %v10264_v39 = vadd.f32 %v10161_v53, %v20386_v19  ;;  %v20410_v33 = vadd.f32 %v10521_v15, %v10243_v5 }
 0x6d9   :  { %v10163_v25 = vpop.f32.mrf.mxu0  ;;  %v10523_v41 = vpop.f32.mrf.mxu1 }
 0x6da   :  { %v10265_v2 = vadd.f32 %v10163_v25, %v20389_v20  ;;  %v20413_v48 = vadd.f32 %v10523_v41, %v10244_v40 }
 0x6db   :  { %v10444_v6 = vpop.f32.mrf.mxu0  ;;  %v10527_v54 = vpop.f32.mrf.mxu1 }
 0x6dc   :  { %v20416_v43 = vadd.f32 %v10444_v6, %v20392_v62  ;;  %v20418_v26 = vadd.f32 %v10527_v54, %v10256_v59 }
 0x6dd   :  { %v10446_v52 = vpop.f32.mrf.mxu0  ;;  %v10529_v9 = vpop.f32.mrf.mxu1 }
 0x6de   :  { %v20421_v36 = vadd.f32 %v10446_v52, %v20395_v24  ;;  %v20423_v19 = vadd.f32 %v10529_v9, %v10257_v57 }
 0x6df   :  { %v10450_v45 = vpop.f32.mrf.mxu0 }
 0x6e0   :  { %v20425_v3 = vadd.f32 %v10450_v45, %v10254_v16  ;;  %v10675_v20 = vpop.f32.mrf.mxu1 }
 0x6e1   :  { %v20427_v5 = vadd.f32 %v10675_v20, %v10247_v47  ;;  %v10452_v4 = vpop.f32.mrf.mxu0 }
 0x6e2   :  { %v20429_v14 = vadd.f32 %v10452_v4, %v10255_v11  ;;  %v10677_v62 = vpop.f32.mrf.mxu1 }
 0x6e3   :  { %v20431_v40 = vadd.f32 %v10677_v62, %v10248_v29  ;;  %v10598_v60 = vpop.f32.mrf.mxu0 }
 0x6e4   :  { %v20433_v32 = vadd.f32 %v10598_v60, %v10245_v31  ;;  %v10681_v46 = vpop.f32.mrf.mxu1 }
 0x6e5   :  { %v20435_v24 = vadd.f32 %v10681_v46, %v10260_v13  ;;  %v10600_v59 = vpop.f32.mrf.mxu0 }
 0x6e6   :  { %v20437_v63 = vadd.f32 %v10600_v59, %v10246_v44  ;;  %v10683_v16 = vpop.f32.mrf.mxu1 }
 0x6e7   :  { %v20439_v35 = vadd.f32 %v10683_v16, %v10261_v27  ;;  %v10604_v57 = vpop.f32.mrf.mxu0 }
 0x6e8   :  { %v20441_v34 = vadd.f32 %v10604_v57, %v10258_v22  ;;  %v10829_v11 = vpop.f32.mrf.mxu1 }
 0x6e9   :  { %v10925_v8 = vadd.f32 %v10829_v11, %v10251_v42  ;;  %v10606_v47 = vpop.f32.mrf.mxu0 }
 0x6ea   :  { %v20443_v50 = vadd.f32 %v10606_v47, %v10259_v17  ;;  %v10831_v38 = vpop.f32.mrf.mxu1 }
 0x6eb   :  { %v10926_v31 = vadd.f32 %v10831_v38, %v10252_v30  ;;  %v10752_v29 = vpop.f32.mrf.mxu0 }
 0x6ec   :  { %v20445_v1 = vadd.f32 %v10752_v29, %v10249_v0  ;;  %v10835_v13 = vpop.f32.mrf.mxu1 }
 0x6ed   :  { %v10938_v58 = vadd.f32 %v10835_v13, %v10264_v39  ;;  %v10754_v44 = vpop.f32.mrf.mxu0 }
 0x6ee   :  { %v20447_v55 = vadd.f32 %v10754_v44, %v10250_v21  ;;  %v10837_v27 = vpop.f32.mrf.mxu1 }
 0x6ef   :  { %v10939_v10 = vadd.f32 %v10837_v27, %v10265_v2 }
 0x6f0   :  { %v10758_v23 = vpop.f32.mrf.mxu0  ;;  %v11180_v22 = vpop.f32.mrf.mxu1 }
 0x6f1   :  { %v20450_v18 = vadd.f32 %v10758_v23, %v20406_v7 }
 0x6f2   :  { %v10760_v42 = vpop.f32.mrf.mxu0  ;;  %v20452_v17 = vpop.f32.mrf.mxu1 }
 0x6f3   :  { %v20454_v37 = vadd.f32 %v10760_v42, %v10263_v49 }
 0x6f4   :  { %v15025_v30 = vpop.f32.mrf.mxu0 }
 0x6f5   :  { %22115 = vst [vmem:[#allocation49_spill] sm:$0xff] %v20454_v37  ;;  %v10940_v0 = vadd.f32 %v15025_v30, %v10266_v61  ;;  %v11186_v28 = vpop.f32.mrf.mxu1 }
 0x6f6   :  { %v10906_v53 = vpop.f32.mrf.mxu0 }
 0x6f7   :  { %v10927_v15 = vadd.f32 %v10906_v53, %v10253_v51  ;;  %v11188_v39 = vpop.f32.mrf.mxu1 }
 0x6f8   :  { %v11257_v21 = vpop.f32.mrf.mxu0 }
 0x6f9   :  { %v11334_v25 = vpop.f32.mrf.mxu1 }
 0x6fa   :  { %v11259_v41 = vpop.f32.mrf.mxu0 }
 0x6fb   :  { %v20456_v2 = vpop.f32.mrf.mxu1 }
 0x6fe   :  { %v20458_v6 = vpop.f32.mrf.mxu0  ;;  %v20460_v7 = vpop.f32.mrf.mxu1 }
 0x700   :  { %v20462_v54 = vpop.f32.mrf.mxu0  ;;  %v20464_v52 = vpop.f32.mrf.mxu1 }
 0x702   :  { %v20466_v49 = vpop.f32.mrf.mxu0  ;;  %v20468_v61 = vpop.f32.mrf.mxu1 }
 0x704   :  { %v20470_v9 = vpop.f32.mrf.mxu0  ;;  %v20472_v51 = vpop.f32.mrf.mxu1 }
 0x706   :  { %v20474_v45 = vpop.f32.mrf.mxu0 }
 0x707   :  { %v20476_v20 = vpop.f32.mrf.mxu1 }
 0x708   :  { %v20478_v4 = vpop.f32.mrf.mxu0 }
 0x709   :  { %v20480_v62 = vpop.f32.mrf.mxu1 }
 0x70a   :  { %22116 = vst [vmem:[#allocation84_spill] sm:$0xff] %v20480_v62  ;;  %v11565_v60 = vpop.f32.mrf.mxu0 }
 0x70b   :  { %v11661_v46 = vadd.f32 %v11565_v60, %v10925_v8  ;;  %v15032_v59 = vpop.f32.mrf.mxu1 }
 0x70c   :  { %v11676_v16 = vadd.f32 %v15032_v59, %v10940_v0  ;;  %v11567_v57 = vpop.f32.mrf.mxu0 }
 0x70d   :  { %v11662_v11 = vadd.f32 %v11567_v57, %v10926_v31  ;;  %v11642_v47 = vpop.f32.mrf.mxu1 }
 0x70e   :  { %v20482_v38 = vadd.f32 %v11642_v47, %v10927_v15 }
 0x710   :  { %v11571_v29 = vpop.f32.mrf.mxu0  ;;  %v20484_v13 = vpop.f32.mrf.mxu1 }
 0x711   :  { %v11674_v44 = vadd.f32 %v11571_v29, %v10938_v58 }
 0x712   :  { %v11573_v27 = vpop.f32.mrf.mxu0  ;;  %v20486_v23 = vpop.f32.mrf.mxu1 }
 0x713   :  { %v11675_v42 = vadd.f32 %v11573_v27, %v10939_v10 }
 0x714   :  { %v11860_v30 = vpop.f32.mrf.mxu0  ;;  %v20488_v53 = vpop.f32.mrf.mxu1 }
 0x715   :  { %22117 = vst [vmem:[#allocation29_spill] sm:$0xff] %v20488_v53 }
 0x716   :  { %v11862_v12 = vpop.f32.mrf.mxu0  ;;  %v20490_v8 = vpop.f32.mrf.mxu1 }
 0x717   :  { %22118 = vst [vmem:[#allocation83_spill] sm:$0xff] %v20490_v8 }
 0x718   :  { %v11866_v0 = vpop.f32.mrf.mxu0 }
 0x719   :  { %v20492_v60 = vpop.f32.mrf.mxu1 }
 0x71a   :  { %22119 = vst [vmem:[#allocation53_spill] sm:$0xff] %v20492_v60  ;;  %v11868_v31 = vpop.f32.mrf.mxu0 }
 0x71b   :  { %v20494_v15 = vpop.f32.mrf.mxu1 }
 0x71c   :  { %22120 = vst [vmem:[#allocation54_spill] sm:$0xff] %v20494_v15  ;;  %v12014_v59 = vpop.f32.mrf.mxu0 }
 0x71d   :  { %v20496_v57 = vpop.f32.mrf.mxu1 }
 0x71e   :  { %22121 = vst [vmem:[#allocation52_spill] sm:$0xff] %v20496_v57  ;;  %v20498_v58 = vpop.f32.mrf.mxu0  ;;  %v11651_v57 = vadd.f32 %v11180_v22, %v20416_v43  ;;  %v11655_v43 = vadd.f32 %v11334_v25, %v20433_v32  ;;  %v11654_v22 = vadd.f32 %v11259_v41, %v20413_v48 }
 0x71f   :  { %22122 = vst [vmem:[#allocation85_spill] sm:$0xff] %v20498_v58  ;;  %v20500_v47 = vpop.f32.mrf.mxu1 }
 0x720   :  { %22123 = vst [vmem:[#allocation56_spill] sm:$0xff] %v20500_v47 }
 0x721   :  { %v20502_v10 = vpop.f32.mrf.mxu0  ;;  %v12245_v29 = vpop.f32.mrf.mxu1 }
 0x722   :  { %v20504_v27 = vadd.f32 %v12245_v29, %v11661_v46  ;;  %v11652_v46 = vadd.f32 %v20452_v17, %v20421_v36  ;;  %v12331_v29 = vadd.f32 %v11860_v30, %v11651_v57  ;;  %v11656_v36 = vadd.f32 %v20456_v2, %v20437_v63 }
 0x723   :  { %v20506_v56 = vpop.f32.mrf.mxu0  ;;  %v12247_v8 = vpop.f32.mrf.mxu1  ;;  %v11657_v63 = vadd.f32 %v20466_v49, %v20427_v5  ;;  %v11660_v5 = vadd.f32 %v20472_v51, %v20447_v55  ;;  %v12335_v49 = vadd.f32 %v12014_v59, %v11655_v43  ;;  %v11672_v55 = vadd.f32 %v20476_v20, %v20450_v18  ;;  %v22128_v18 = vld [vmem:[#allocation49_spill] sm:$0xff]  ;;  %v22129_v20 = vld [vmem:[#allocation84_spill] sm:$0xff] }
 0x724   :  { %22124 = vst [vmem:[#allocation86_spill] sm:$0xff] %v20504_v27  ;;  %v20508_v53 = vadd.f32 %v12247_v8, %v11662_v11  ;;  %v11664_v11 = vadd.f32 %v11186_v28, %v20425_v3  ;;  %v11665_v8 = vadd.f32 %v11188_v39, %v20429_v14  ;;  %v11666_v3 = vadd.f32 %v20458_v6, %v20418_v26 }
 0x725   :  { %v20510_v60 = vpop.f32.mrf.mxu0  ;;  %v12251_v15 = vpop.f32.mrf.mxu1  ;;  %v11667_v14 = vadd.f32 %v20462_v54, %v20423_v19  ;;  %v11659_v26 = vadd.f32 %v20468_v61, %v20445_v1  ;;  %v20560_v1 = vadd.f32 %v20474_v45, %v20435_v24  ;;  %v20573_v24 = vadd.f32 %v20478_v4, %v20439_v35  ;;  %v22130_v35 = vld [vmem:[#allocation29_spill] sm:$0xff] }
 0x726   :  { %v20512_v62 = vadd.f32 %v12251_v15, %v11674_v44  ;;  %v11653_v44 = vadd.f32 %v11257_v21, %v20410_v33  ;;  %v11668_v33 = vadd.f32 %v20460_v7, %v20441_v34  ;;  %v12344_v48 = vadd.f32 %v11866_v0, %v11664_v11  ;;  %v20554_v7 = vpop.permute.xlu1 %13046 }
 0x727   :  { %v20515_v37 = vpop.f32.mrf.mxu0  ;;  %v12253_v47 = vpop.f32.mrf.mxu1  ;;  %v11658_v34 = vadd.f32 %v20470_v9, %v20431_v40  ;;  %v12345_v25 = vadd.f32 %v11868_v31, %v11665_v8  ;;  %v12334_v51 = vadd.f32 %v20486_v23, %v11654_v22  ;;  %v12346_v4 = vadd.f32 %v22130_v35, %v11666_v3 }
 0x728   :  { %22125 = vst [vmem:[#allocation55_spill] sm:$0xff] %v20512_v62  ;;  %v20517_v58 = vadd.f32 %v12253_v47, %v11675_v42  ;;  %v12332_v62 = vadd.f32 %v11862_v12, %v11652_v46  ;;  %v11669_v12 = vadd.f32 %v20464_v52, %v20443_v50  ;;  %v12333_v40 = vadd.f32 %v20484_v13, %v11653_v44  ;;  %v22127_v13 = vld [vmem:[#allocation85_spill] sm:$0xff] }
 0x729   :  { %v20521_v27 = vpop.f32.mrf.mxu0  ;;  %v12336_v30 = vadd.f32 %v22127_v13, %v11656_v36  ;;  %v11673_v46 = vadd.f32 %v22129_v20, %v22128_v18  ;;  %v12348_v8 = vadd.f32 %v20502_v10, %v11668_v33  ;;  %v12340_v13 = vadd.f32 %v20515_v37, %v11660_v5 }
 0x72a   :  { %22126 = vst [vmem:[#allocation67_spill] sm:$0xff] %v20517_v58  ;;  %v12540_v15 = vpop.f32.mrf.mxu1  ;;  %v20530_v58 = vpop.permute.xlu0 %13041 }
 0x72b   :  { %v13011_v42 = vadd.f32 %v12540_v15, %v12331_v29  ;;  %v20528_v47 = vpop.f32.mrf.mxu0 }
 0x72c   :  { %v12542_v32 = vpop.f32.mrf.mxu1 }
 0x72d   :  { %v13049_v17 = vadd.f32 %v20530_v58, %v13011_v42  ;;  %v13012_v28 = vadd.f32 %v12542_v32, %v12332_v62  ;;  %v15039_v39 = vpop.f32.mrf.mxu0  ;;  %v22131_v42 = vld [vmem:[#allocation83_spill] sm:$0xff] }
 0x72e   :  { %v20549_v21 = vadd.f32 %v15039_v39, %v11676_v16  ;;  %v12546_v19 = vpop.f32.mrf.mxu1  ;;  %v12347_v36 = vadd.f32 %v22131_v42, %v11667_v14  ;;  %v12353_v42 = vadd.f32 %v20528_v47, %v11673_v46 }
 0x72f   :  { %v20551_v41 = vmax.f32 %v13049_v17, 0.0  ;;  %v13050_v50 = vadd.f32 %v20530_v58, %v13012_v28  ;;  %v13024_v2 = vadd.f32 %v12546_v19, %v12344_v48  ;;  %v12322_v6 = vpop.f32.mrf.mxu0  ;;  %v12349_v28 = vadd.f32 %v20506_v56, %v11669_v12 }
 0x730   :  { %v20564_v54 = vadd.f32 %v12322_v6, %v20482_v38  ;;  %v12548_v52 = vpop.f32.mrf.mxu1 }
 0x731   :  { %v20566_v61 = vmax.f32 %v13050_v50, 0.0  ;;  %v13062_v9 = vadd.f32 %v20554_v7, %v13024_v2  ;;  %v13025_v62 = vadd.f32 %v12548_v52, %v12345_v25  ;;  %v12617_v16 = vpop.f32.mrf.mxu0  ;;  %v22132_v25 = vld [vmem:[#allocation53_spill] sm:$0xff]  ;;  %v12339_v52 = vadd.f32 %v20510_v60, %v11659_v26 }
 0x732   :  { %v13013_v45 = vadd.f32 %v12617_v16, %v12333_v40  ;;  %v12694_v38 = vpop.f32.mrf.mxu1  ;;  %v12337_v50 = vadd.f32 %v22132_v25, %v11657_v63 }
 0x733   :  { %v20577_v0 = vmax.f32 %v13062_v9, 0.0  ;;  %v13063_v31 = vadd.f32 %v20554_v7, %v13025_v62  ;;  %v13015_v59 = vadd.f32 %v12694_v38, %v12335_v49  ;;  %v12619_v57 = vpop.f32.mrf.mxu0  ;;  %13181 = vrot.lane.b32.xlu0 %v20566_v61, %s15423_s20  ;;  %v22133_v62 = vld [vmem:[#allocation54_spill] sm:$0xff] }
 0x734   :  { %v13051_v23 = vadd.f32 %v20530_v58, %v13013_v45  ;;  %v13014_v29 = vadd.f32 %v12619_v57, %v12334_v51  ;;  %v12696_v11 = vpop.f32.mrf.mxu1  ;;  %v12338_v16 = vadd.f32 %v22133_v62, %v11658_v34  ;;  %v22134_v34 = vld [vmem:[#allocation52_spill] sm:$0xff] }
 0x735   :  { %v20587_v44 = vmax.f32 %v13063_v31, 0.0  ;;  %v13053_v15 = vadd.f32 %v20530_v58, %v13015_v59  ;;  %v13016_v43 = vadd.f32 %v12696_v11, %v12336_v30  ;;  %v12623_v22 = vpop.f32.mrf.mxu0  ;;  %v12350_v59 = vadd.f32 %v22134_v34, %v20560_v1  ;;  %v22135_v11 = vld [vmem:[#allocation56_spill] sm:$0xff] }
 0x736   :  { %v20591_v32 = vmax.f32 %v13051_v23, 0.0  ;;  %v13052_v48 = vadd.f32 %v20530_v58, %v13014_v29  ;;  %v13026_v17 = vadd.f32 %v12623_v22, %v12346_v4  ;;  %v12700_v3 = vpop.f32.mrf.mxu1  ;;  %v12352_v4 = vadd.f32 %v20521_v27, %v11672_v55 }
 0x737   :  { %v13079_v39 = vmax.f32 %v13053_v15, 0.0  ;;  %v20596_v19 = vadd.f32 %v20530_v58, %v13016_v43  ;;  %v13028_v10 = vadd.f32 %v12700_v3, %v12348_v8  ;;  %v12625_v33 = vpop.f32.mrf.mxu0  ;;  %v12351_v8 = vadd.f32 %v22135_v11, %v20573_v24 }
 0x738   :  { %v20599_v2 = vmax.f32 %v13052_v48, 0.0  ;;  %v13064_v14 = vadd.f32 %v20554_v7, %v13026_v17  ;;  %v13027_v6 = vadd.f32 %v12625_v33, %v12347_v36  ;;  %v12702_v40 = vpop.f32.mrf.mxu1 }
 0x739   :  { %13105 = vst [vmem:[#allocation5 + $0x20] sm:$0xff] %v13079_v39  ;;  %v13080_v49 = vmax.f32 %v20596_v19, 0.0  ;;  %v13066_v56 = vadd.f32 %v20554_v7, %v13028_v10  ;;  %v13029_v12 = vadd.f32 %v12702_v40, %v12349_v28  ;;  %v12771_v9 = vpop.f32.mrf.mxu0  ;;  %v15382_v40 = vld [vmem:[#allocation4 + $0xd0] sm:$0xff]  ;;  %v14018_v19 = vld [vmem:[%s21765_s7 + $0xe8] sm:$0xff] }
 0x73a   :  { %13104 = vst [vmem:[#allocation5 + $0x18] sm:$0xff] %v20599_v2  ;;  %v20607_v63 = vmax.f32 %v13064_v14, 0.0  ;;  %v13065_v51 = vadd.f32 %v20554_v7, %v13027_v6  ;;  %v13017_v45 = vadd.f32 %v12771_v9, %v12337_v50  ;;  %v12848_v38 = vpop.f32.mrf.mxu1 }
 0x73b   :  { %13106 = vst [vmem:[#allocation5 + $0x28] sm:$0xff] %v13080_v49  ;;  %v13092_v60 = vmax.f32 %v13066_v56, 0.0  ;;  %v13067_v26 = vadd.f32 %v20554_v7, %v13029_v12  ;;  %v12773_v30 = vpop.f32.mrf.mxu0  ;;  %v13019_v31 = vadd.f32 %v12848_v38, %v12339_v52  ;;  %v15383_v52 = vld [vmem:[#allocation4 + $0x60] sm:$0xff]  ;;  %v15384_v56 = vld [vmem:[#allocation4 + $0xc8] sm:$0xff]  ;;  %v15385_v12 = vld [vmem:[#allocation4 + $0x58] sm:$0xff] }
 0x73c   :  { %v20616_v57 = vmax.f32 %v13065_v51, 0.0  ;;  %v13055_v18 = vadd.f32 %v20530_v58, %v13017_v45  ;;  %v13018_v20 = vadd.f32 %v12773_v30, %v12338_v16  ;;  %v12850_v35 = vpop.f32.mrf.mxu1 }
 0x73d   :  { %13118 = vst [vmem:[#allocation5 + $0x90] sm:$0xff] %v13092_v60  ;;  %v13093_v37 = vmax.f32 %v13067_v26, 0.0  ;;  %v13057_v5 = vadd.f32 %v20530_v58, %v13019_v31  ;;  %v12777_v23 = vpop.f32.mrf.mxu0  ;;  %v13020_v29 = vadd.f32 %v12850_v35, %v12340_v13 }
 0x73e   :  { %13117 = vst [vmem:[#allocation5 + $0x88] sm:$0xff] %v20616_v57  ;;  %v20624_v1 = vmax.f32 %v13055_v18, 0.0  ;;  %v13056_v15 = vadd.f32 %v20530_v58, %v13018_v20  ;;  %v13030_v43 = vadd.f32 %v12777_v23, %v12350_v59  ;;  %v12854_v22 = vpop.f32.mrf.mxu1 }
 0x73f   :  { %13119 = vst [vmem:[#allocation5 + $0x98] sm:$0xff] %v13093_v37  ;;  %v20628_v27 = vmax.f32 %v13057_v5, 0.0  ;;  %v13058_v55 = vadd.f32 %v20530_v58, %v13020_v29  ;;  %v12779_v36 = vpop.f32.mrf.mxu0  ;;  %v13032_v48 = vadd.f32 %v12854_v22, %v12352_v4 }
 0x740   :  { %v20631_v17 = vmax.f32 %v13056_v15, 0.0  ;;  %v13068_v24 = vadd.f32 %v20554_v7, %v13030_v43  ;;  %v13031_v3 = vadd.f32 %v12779_v36, %v12351_v8  ;;  %v12856_v28 = vpop.f32.mrf.mxu1  ;;  %13191 = vrot.lane.b32.xlu0 %v20624_v1, %s15423_s20 }
 0x741   :  { %v13084_v39 = vmax.f32 %v13058_v55, 0.0  ;;  %v13070_v10 = vadd.f32 %v20554_v7, %v13032_v48  ;;  %v13033_v47 = vadd.f32 %v12856_v28, %v12353_v42 }
 0x742   :  { %v20637_v46 = vmax.f32 %v13068_v24, 0.0  ;;  %v13069_v33 = vadd.f32 %v20554_v7, %v13031_v3 }
 0x743   :  { %13110 = vst [vmem:[#allocation5 + $0x48] sm:$0xff] %v13084_v39  ;;  %v20640_v25 = vmax.f32 %v13070_v10, 0.0  ;;  %v13071_v50 = vadd.f32 %v20554_v7, %v13033_v47 }
 0x744   :  { %v20643_v14 = vmax.f32 %v13069_v33, 0.0  ;;  %13217 = vrot.lane.b32.xlu1 %v20637_v46, %s15423_s20  ;;  %13319 = vrot.lane.b32.xlu0 %v20624_v1, %s15427_s24 }
 0x745   :  { %v13097_v6 = vmax.f32 %v13071_v50, 0.0 }
 0x747   :  { %13123 = vst [vmem:[#allocation5 + $0xb8] sm:$0xff] %v13097_v6 }
 0x748   :  { %13345 = vrot.lane.b32.xlu1 %v20637_v46, %s15427_s24  ;;  %13447 = vrot.lane.b32.xlu0 %v20624_v1, %s15429_s26 }
 0x74c   :  { %13473 = vrot.lane.b32.xlu1 %v20637_v46, %s15429_s26  ;;  %13193 = vrot.lane.b32.xlu0 %v20631_v17, %s15423_s20 }
 0x750   :  { %13321 = vrot.lane.b32.xlu0 %v20631_v17, %s15427_s24  ;;  %13195 = vrot.lane.b32.xlu1 %v20628_v27, %s15423_s20 }
 0x754   :  { %13449 = vrot.lane.b32.xlu0 %v20631_v17, %s15429_s26  ;;  %13323 = vrot.lane.b32.xlu1 %v20628_v27, %s15427_s24 }
 0x758   :  { %13219 = vrot.lane.b32.xlu0 %v20643_v14, %s15423_s20  ;;  %13451 = vrot.lane.b32.xlu1 %v20628_v27, %s15429_s26 }
 0x75c   :  { %13347 = vrot.lane.b32.xlu0 %v20643_v14, %s15427_s24  ;;  %13475 = vrot.lane.b32.xlu1 %v20643_v14, %s15429_s26 }
 0x760   :  { %13197 = vrot.lane.b32.xlu0 %v13084_v39, %s15423_s20  ;;  %13221 = vrot.lane.b32.xlu1 %v20640_v25, %s15423_s20 }
 0x764   :  { %13325 = vrot.lane.b32.xlu0 %v13084_v39, %s15427_s24  ;;  %13349 = vrot.lane.b32.xlu1 %v20640_v25, %s15427_s24 }
 0x768   :  { %13453 = vrot.lane.b32.xlu0 %v13084_v39, %s15429_s26  ;;  %13183 = vrot.lane.b32.xlu1 %v20591_v32, %s15423_s20 }
 0x76c   :  { %13207 = vrot.lane.b32.xlu0 %v20587_v44, %s15423_s20  ;;  %13209 = vrot.lane.b32.xlu1 %v20607_v63, %s15423_s20 }
 0x770   :  { %13309 = vrot.lane.b32.xlu0 %v20566_v61, %s15427_s24  ;;  %13223 = vrot.lane.b32.xlu1 %v13097_v6, %s15423_s20 }
 0x774   :  { %13477 = vrot.lane.b32.xlu0 %v20640_v25, %s15429_s26  ;;  %13351 = vrot.lane.b32.xlu1 %v13097_v6, %s15427_s24 }
 0x778   :  { %13335 = vrot.lane.b32.xlu0 %v20587_v44, %s15427_s24  ;;  %13479 = vrot.lane.b32.xlu1 %v13097_v6, %s15429_s26 }
 0x77c   :  { %13437 = vrot.lane.b32.xlu0 %v20566_v61, %s15429_s26  ;;  %13311 = vrot.lane.b32.xlu1 %v20591_v32, %s15427_s24 }
 0x780   :  { %13179 = vrot.lane.b32.xlu0 %v20551_v41, %s15423_s20  ;;  %13337 = vrot.lane.b32.xlu1 %v20607_v63, %s15427_s24 }
 0x784   :  { %13465 = vrot.lane.b32.xlu0 %v20607_v63, %s15429_s26  ;;  %13439 = vrot.lane.b32.xlu1 %v20591_v32, %s15429_s26 }
 0x788   :  { %13307 = vrot.lane.b32.xlu0 %v20551_v41, %s15427_s24  ;;  %13463 = vrot.lane.b32.xlu1 %v20587_v44, %s15429_s26 }
 0x78c   :  { %13435 = vrot.lane.b32.xlu0 %v20551_v41, %s15429_s26  ;;  %13205 = vrot.lane.b32.xlu1 %v20577_v0, %s15423_s20 }
 0x790   :  { %13211 = vrot.lane.b32.xlu0 %v20616_v57, %s15423_s20  ;;  %13333 = vrot.lane.b32.xlu1 %v20577_v0, %s15427_s24 }
 0x794   :  { %13441 = vrot.lane.b32.xlu0 %v20599_v2, %s15429_s26  ;;  %13461 = vrot.lane.b32.xlu1 %v20577_v0, %s15429_s26 }
 0x798   :  { %13467 = vrot.lane.b32.xlu0 %v20616_v57, %s15429_s26  ;;  %13185 = vrot.lane.b32.xlu1 %v20599_v2, %s15423_s20 }
 0x79c   :  { %12412 = vrot.lane.b32.xlu0 %v15382_v40, %s15435_s28  ;;  %13313 = vrot.lane.b32.xlu1 %v20599_v2, %s15427_s24 }
 0x7a0   :  { %12384 = vrot.lane.b32.xlu0 %v15383_v52, %s15435_s28  ;;  %13339 = vrot.lane.b32.xlu1 %v20616_v57, %s15427_s24 }
 0x7a4   :  { %12410 = vrot.lane.b32.xlu1 %v15384_v56, %s15435_s28 }
 0x7a5   :  { %v20735_v9 = vpop.permute.xlu0 %13181 }
 0x7a8   :  { %12382 = vrot.lane.b32.xlu1 %v15385_v12, %s15435_s28 }
 0x7b2   :  { %v13192_v62 = vpop.permute.xlu0 %13191 }
 0x7b6   :  { %v13218_v16 = vpop.permute.xlu1 %13217  ;;  %v13320_v51 = vpop.permute.xlu0 %13319 }
 0x7ba   :  { %v13346_v45 = vpop.permute.xlu1 %13345  ;;  %v13448_v38 = vpop.permute.xlu0 %13447 }
 0x7be   :  { %v13474_v2 = vpop.permute.xlu1 %13473  ;;  %v13194_v13 = vpop.permute.xlu0 %13193 }
 0x7bf   :  { %v13237_v60 = vsel %vm302_vm1, %v13192_v62, %v13194_v13 }
 0x7c0   :  { %v13287_v34 = vmax.f32 %v20624_v1, %v13237_v60 }
 0x7c2   :  { %v13322_v26 = vpop.permute.xlu0 %13321  ;;  %v13196_v30 = vpop.permute.xlu1 %13195 }
 0x7c3   :  { %v13365_v31 = vsel %vm694_vm5, %v13320_v51, %v13322_v26  ;;  %v13238_v59 = vsel %vm302_vm1, %v13194_v13, %v13196_v30 }
 0x7c4   :  { %v13415_v57 = vmax.f32 %v13287_v34, %v13365_v31  ;;  %v13288_v37 = vmax.f32 %v20631_v17, %v13238_v59 }
 0x7c6   :  { %v13450_v18 = vpop.permute.xlu0 %13449  ;;  %v13324_v20 = vpop.permute.xlu1 %13323 }
 0x7c7   :  { %v13493_v35 = vsel %vm890_vm8, %v13448_v38, %v13450_v18  ;;  %v13366_v4 = vsel %vm694_vm5, %v13322_v26, %v13324_v20 }
 0x7c8   :  { %v20744_v5 = vmax.f32 %v13415_v57, %v13493_v35  ;;  %v20746_v23 = vmax.f32 %v13288_v37, %v13366_v4 }
 0x7ca   :  { %v13220_v29 = vpop.permute.xlu0 %13219  ;;  %v13452_v11 = vpop.permute.xlu1 %13451 }
 0x7cb   :  { %v13249_v8 = vsel %vm302_vm1, %v13218_v16, %v13220_v29  ;;  %v20750_v1 = vsel %vm890_vm8, %v13450_v18, %v13452_v11 }
 0x7cc   :  { %v13544_v15 = vmax.f32 %v20746_v23, %v20750_v1  ;;  %v13300_v43 = vmax.f32 %v20637_v46, %v13249_v8 }
 0x7ce   :  { %v13348_v22 = vpop.permute.xlu0 %13347  ;;  %v13476_v42 = vpop.permute.xlu1 %13475 }
 0x7cf   :  { %v13377_v55 = vsel %vm694_vm5, %v13346_v45, %v13348_v22  ;;  %v13505_v48 = vsel %vm890_vm8, %v13474_v2, %v13476_v42 }
 0x7d0   :  { %v13428_v36 = vmax.f32 %v13300_v43, %v13377_v55 }
 0x7d2   :  { %v20757_v17 = vmax.f32 %v13428_v36, %v13505_v48  ;;  %v13198_v24 = vpop.permute.xlu0 %13197  ;;  %v13222_v3 = vpop.permute.xlu1 %13221 }
 0x7d3   :  { %v13239_v28 = vsel %vm302_vm1, %v13196_v30, %v13198_v24  ;;  %v13250_v62 = vsel %vm302_vm1, %v13220_v29, %v13222_v3 }
 0x7d4   :  { %v13289_v33 = vmax.f32 %v20628_v27, %v13239_v28  ;;  %v13301_v45 = vmax.f32 %v20643_v14, %v13250_v62 }
 0x7d6   :  { %v13326_v39 = vpop.permute.xlu0 %13325  ;;  %v13350_v10 = vpop.permute.xlu1 %13349 }
 0x7d7   :  { %v13367_v47 = vsel %vm694_vm5, %v13324_v20, %v13326_v39  ;;  %v13378_v27 = vsel %vm694_vm5, %v13348_v22, %v13350_v10 }
 0x7d8   :  { %v20762_v46 = vmax.f32 %v13289_v33, %v13367_v47  ;;  %v13429_v2 = vmax.f32 %v13301_v45, %v13378_v27 }
 0x7da   :  { %v13454_v50 = vpop.permute.xlu0 %13453  ;;  %v20764_v6 = vpop.permute.xlu1 %13183 }
 0x7db   :  { %v20767_v40 = vsel %vm890_vm8, %v13452_v11, %v13454_v50  ;;  %v13232_v37 = vsel %vm302_vm1, %v20735_v9, %v20764_v6 }
 0x7dc   :  { %v13545_v52 = vmax.f32 %v20762_v46, %v20767_v40  ;;  %v13282_v8 = vmax.f32 %v20566_v61, %v13232_v37 }
 0x7de   :  { %v13208_v56 = vpop.permute.xlu0 %13207  ;;  %v20771_v12 = vpop.permute.xlu1 %13209 }
 0x7df   :  { %v13244_v43 = vsel %vm302_vm1, %v13208_v56, %v20771_v12 }
 0x7e0   :  { %v13295_v24 = vmax.f32 %v20587_v44, %v13244_v43 }
 0x7e2   :  { %v13310_v16 = vpop.permute.xlu0 %13309  ;;  %v13224_v51 = vpop.permute.xlu1 %13223 }
 0x7e3   :  { %v13251_v38 = vsel %vm302_vm1, %v13222_v3, %v13224_v51 }
 0x7e4   :  { %v13302_v31 = vmax.f32 %v20640_v25, %v13251_v38 }
 0x7e6   :  { %v13478_v13 = vpop.permute.xlu0 %13477  ;;  %v13352_v60 = vpop.permute.xlu1 %13351 }
 0x7e7   :  { %v13506_v26 = vsel %vm890_vm8, %v13476_v42, %v13478_v13  ;;  %v13379_v30 = vsel %vm694_vm5, %v13350_v10, %v13352_v60 }
 0x7e8   :  { %v13557_v34 = vmax.f32 %v13429_v2, %v13506_v26  ;;  %v20780_v59 = vmax.f32 %v13302_v31, %v13379_v30 }
 0x7ea   :  { %v13336_v57 = vpop.permute.xlu0 %13335  ;;  %v13480_v18 = vpop.permute.xlu1 %13479 }
 0x7eb   :  { %v13507_v20 = vsel %vm890_vm8, %v13478_v13, %v13480_v18 }
 0x7ec   :  { %v13558_v14 = vmax.f32 %v20780_v59, %v13507_v20  ;;  %v20819_v59 = vpack.i.bf16 %v13557_v34, %v13544_v15 }
 0x7ee   :  { %v13438_v35 = vpop.permute.xlu0 %13437  ;;  %v13312_v4 = vpop.permute.xlu1 %13311  ;;  %v15219_v34 = vpack.i.bf16 %v13558_v14, %v13545_v52 }
 0x7ef   :  { %v13360_v25 = vsel %vm694_vm5, %v13310_v16, %v13312_v4 }
 0x7f0   :  { %v13410_v22 = vmax.f32 %v13282_v8, %v13360_v25 }
 0x7f2   :  { %v13180_v29 = vpop.permute.xlu0 %13179  ;;  %v20787_v11 = vpop.permute.xlu1 %13337 }
 0x7f3   :  { %v13372_v36 = vsel %vm694_vm5, %v13336_v57, %v20787_v11  ;;  %v13231_v28 = vsel %vm302_vm1, %v13180_v29, %v20735_v9 }
 0x7f4   :  { %v13423_v39 = vmax.f32 %v13295_v24, %v13372_v36  ;;  %v13281_v50 = vmax.f32 %v20551_v41, %v13231_v28  ;;  %v15119_v41 = vpack.i.bf16 %v20757_v17, %v20744_v5  ;;  %v20869_v28 = vld [vmem:[#allocation4 + $0x68] sm:$0xff] }
 0x7f6   :  { %v20793_v42 = vpop.permute.xlu0 %13465  ;;  %v13440_v55 = vpop.permute.xlu1 %13439 }
 0x7f7   :  { %v13488_v48 = vsel %vm890_vm8, %v13438_v35, %v13440_v55 }
 0x7f8   :  { %v13538_v3 = vmax.f32 %v13410_v22, %v13488_v48  ;;  %v22136_v22 = vld [vmem:[#allocation51_spill] sm:$0xff]  ;;  %v22137_v48 = vld [vmem:[#allocation82_spill] sm:$0xff] }
 0x7fa   :  { %v13308_v61 = vpop.permute.xlu0 %13307  ;;  %v13464_v10 = vpop.permute.xlu1 %13463 }
 0x7fb   :  { %v13359_v47 = vsel %vm694_vm5, %v13308_v61, %v13310_v16  ;;  %v13500_v33 = vsel %vm890_vm8, %v13464_v10, %v20793_v42 }
 0x7fc   :  { %v13551_v62 = vmax.f32 %v13423_v39, %v13500_v33  ;;  %v13409_v51 = vmax.f32 %v13281_v50, %v13359_v47  ;;  %v20875_v39 = vld [vmem:[%s21763_s5 + $0x88] sm:$0xff] }
 0x7fe   :  { %v13436_v27 = vpop.permute.xlu0 %13435  ;;  %v13206_v45 = vpop.permute.xlu1 %13205  ;;  %v15094_v38 = vpack.i.bf16 %v13551_v62, %v13538_v3  ;;  %v15386_v3 = vld [vmem:[%s21763_s5 + $0x80] sm:$0xff]  ;;  %s15446_s5 = smov 8  }
 0x7ff   :  { %v13487_v44 = vsel %vm890_vm8, %v13436_v27, %v13438_v35  ;;  %v13243_v9 = vsel %vm302_vm1, %v13206_v45, %v13208_v56 }
 0x800   :  { %v20806_v2 = vmax.f32 %v13409_v51, %v13487_v44  ;;  %15095 = vrot.lane.b32.xlu0 %v15094_v38, %s15436_s22  ;;  %15090 = vrot.lane.b32.xlu1 %v15094_v38, %s15437_s23  ;;  %v13294_v26 = vmax.f32 %v20577_v0, %v13243_v9 }
 0x802   :  { %v13212_v16 = vpop.permute.xlu0 %13211  ;;  %v13334_v13 = vpop.permute.xlu1 %13333 }
 0x803   :  { %v13371_v60 = vsel %vm694_vm5, %v13334_v13, %v13336_v57  ;;  %v13245_v37 = vsel %vm302_vm1, %v20771_v12, %v13212_v16 }
 0x804   :  { %15120 = vrot.lane.b32.xlu1 %v15119_v41, %s15431_s12  ;;  %v13422_v30 = vmax.f32 %v13294_v26, %v13371_v60  ;;  %v13296_v8 = vmax.f32 %v20607_v63, %v13245_v37 }
 0x806   :  { %v13462_v31 = vpop.permute.xlu1 %13461  ;;  %v13442_v18 = vpop.permute.xlu0 %13441 }
 0x807   :  { %v13499_v56 = vsel %vm890_vm8, %v13462_v31, %v13464_v10  ;;  %v13489_v25 = vsel %vm890_vm8, %v13440_v55, %v13442_v18 }
 0x808   :  { %v20822_v20 = vmax.f32 %v13422_v30, %v13499_v56  ;;  %15155 = vrot.lane.b32.xlu1 %v20819_v59, %s15438_s25 }
 0x80a   :  { %v13186_v57 = vpop.permute.xlu1 %13185  ;;  %v20827_v0 = vpack.i.bf16 %v20822_v20, %v20806_v2  ;;  %v13468_v23 = vpop.permute.xlu0 %13467 }
 0x80b   :  { %v13233_v35 = vsel %vm302_vm1, %v20764_v6, %v13186_v57  ;;  %v13501_v12 = vsel %vm890_vm8, %v20793_v42, %v13468_v23  ;;  %vm13859_vm1 = vcmask 7168  }
 0x80c   :  { %15160 = vrot.lane.b32.xlu1 %v20819_v59, %s15439_s6  ;;  %15100 = vrot.lane.b32.xlu0 %v20827_v0, %s15431_s12  ;;  %v13283_v1 = vmax.f32 %v20591_v32, %v13233_v35  ;;  %s15441_s12 = smov 44  }
 0x80e   :  { %v13314_v15 = vpop.permute.xlu1 %13313  ;;  %v20847_v40 = vpop.permute.xlu0 %12412 }
 0x80f   :  { %v13361_v6 = vsel %vm694_vm5, %v13312_v4, %v13314_v15 }
 0x810   :  { %v13411_v29 = vmax.f32 %v13283_v1, %v13361_v6  ;;  %15220 = vrot.lane.b32.xlu1 %v15219_v34, %s15440_s27  ;;  %15105 = vrot.lane.b32.xlu0 %v15094_v38, %s15438_s25 }
 0x812   :  { %v13539_v32 = vmax.f32 %v13411_v29, %v13489_v25  ;;  %v13340_v43 = vpop.permute.xlu1 %13339  ;;  %v20859_v55 = vpop.permute.xlu0 %12384 }
 0x813   :  { %v13373_v46 = vsel %vm694_vm5, %v20787_v11, %v13340_v43 }
 0x814   :  { %v13424_v52 = vmax.f32 %v13296_v8, %v13373_v46  ;;  %15225 = vrot.lane.b32.xlu1 %v15219_v34, %s15441_s12  ;;  %15110 = vrot.lane.b32.xlu0 %v20827_v0, %s15442_s29 }
 0x816   :  { %v13552_v14 = vmax.f32 %v13424_v52, %v13501_v12  ;;  %v12411_v4 = vpop.permute.xlu1 %12410 }
 0x817   :  { %v12440_v63 = vsel %vm6300_vm0, %v12411_v4, %v20847_v40  ;;  %v12439_v11 = vsel %vm6300_vm0, %v22136_v22, %v12411_v4 }
 0x818   :  { %12887 = vmatprep.subr.mxu0 %v12440_v63  ;;  %15230 = vrot.lane.b32.xlu1 %v15219_v34, %s15443_s17  ;;  %v15149_v61 = vpack.i.bf16 %v13552_v14, %v13539_v32 }
 0x819   :  { %12888 = vmatpush1.msra.mxu0 %v12439_v11  ;;  %15115 = vrot.lane.b32.xlu0 %v15094_v38, %s15439_s6 }
 0x81a   :  { %v12383_v36 = vpop.permute.xlu1 %12382 }
 0x81b   :  { %v12427_v42 = vsel %vm6300_vm0, %v12383_v36, %v20859_v55  ;;  %v12426_v24 = vsel %vm6300_vm0, %v22137_v48, %v12383_v36 }
 0x81c   :  { %12889 = vmatprep.subr.mxu0 %v12427_v42  ;;  %15235 = vrot.lane.b32.xlu1 %v15219_v34, %s15444_s30 }
 0x81d   :  { %12890 = vmatpush1.msra.mxu0 %v12426_v24  ;;  %15125 = vrot.lane.b32.xlu0 %v15119_v41, %s15442_s29 }
 0x81e   :  { %14872 = vmatmul.mubr.msk.f32.vlgmr.msra.gmra.mxu0 %vm5020_vm14, %v15386_v3 }
 0x81f   :  { %12929 = vmatprep.mubr.f32.mxu0 %v20869_v28 }
 0x821   :  { %15130 = vrot.lane.b32.xlu0 %v15119_v41, %s15445_s15 }
 0x822   :  { %14873 = vmatmul.mubr.msk.f32.gmra.mxu0 %vm5020_vm14, %v20875_v39 }
 0x825   :  { %15135 = vrot.lane.b32.xlu0 %v20819_v59, %s15437_s23 }
 0x829   :  { %15140 = vrot.lane.b32.xlu0 %v20819_v59, %s15436_s22 }
 0x82d   :  { %15145 = vrot.lane.b32.xlu0 %v20827_v0, %s15445_s15 }
 0x831   :  { %15150 = vrot.lane.b32.xlu0 %v15149_v61, %s15440_s27 }
 0x835   :  { %15165 = vrot.lane.b32.xlu0 %v20819_v59, %s15433_s18 }
 0x839   :  { %15170 = vrot.lane.b32.xlu0 %v20819_v59, %s15435_s28 }
 0x83d   :  { %15175 = vrot.lane.b32.xlu0 %v20819_v59, %s15446_s5 }
 0x841   :  { %15180 = vrot.lane.b32.xlu0 %v20819_v59, %s15447_s19 }
 0x845   :  { %15185 = vrot.lane.b32.xlu0 %v20827_v0, %s15433_s18  ;;  %s15448_s18 = smov 113  }
 0x849   :  { %15190 = vrot.lane.b32.xlu0 %v15149_v61, %s15441_s12 }
 0x84d   :  { %15195 = vrot.lane.b32.xlu0 %v20827_v0, %s15435_s28 }
 0x851   :  { %15200 = vrot.lane.b32.xlu0 %v15149_v61, %s15443_s17 }
 0x855   :  { %15205 = vrot.lane.b32.xlu0 %v20827_v0, %s15446_s5 }
 0x859   :  { %15210 = vrot.lane.b32.xlu0 %v15149_v61, %s15444_s30 }
 0x85d   :  { %15215 = vrot.lane.b32.xlu0 %v20827_v0, %s15447_s19 }
 0x872   :  { %v20899_v10 = vpop.permute.xlu0 %15095  ;;  %v20907_v62 = vpop.permute.xlu1 %15090 }
 0x876   :  { %v15121_v27 = vpop.permute.xlu1 %15120 }
 0x877   :  { %v15122_v26 = vunpack.i.l.bf16 %v15121_v27  ;;  %v15123_v61 = vunpack.i.h.bf16 %v15121_v27 }
 0x87a   :  { %v15156_v38 = vpop.permute.xlu1 %15155 }
 0x87b   :  { %v15157_v57 = vunpack.i.l.bf16 %v15156_v38 }
 0x87e   :  { %v20901_v47 = vpop.permute.xlu0 %15100  ;;  %v15161_v13 = vpop.permute.xlu1 %15160 }
 0x87f   :  { %v15162_v1 = vunpack.i.l.bf16 %v15161_v13 }
 0x882   :  { %v20903_v33 = vpop.permute.xlu0 %15105  ;;  %v15221_v56 = vpop.permute.xlu1 %15220 }
 0x883   :  { %v15222_v37 = vunpack.i.l.bf16 %v15221_v56 }
 0x886   :  { %v20905_v50 = vpop.permute.xlu0 %15110 }
 0x88b   :  { %v20909_v51 = vpop.permute.xlu0 %15115 }
 0x88f   :  { %v15126_v45 = vpop.permute.xlu0 %15125 }
 0x890   :  { %v15127_v31 = vunpack.i.l.bf16 %v15126_v45 }
 0x892   :  { %v15249_v0 = vpack.i.bf16 %v15127_v31, %v15157_v57 }
 0x893   :  { %v15131_v44 = vpop.permute.xlu0 %15130 }
 0x894   :  { %v15132_v35 = vunpack.i.l.bf16 %v15131_v44  ;;  %v15133_v31 = vunpack.i.h.bf16 %v15131_v44 }
 0x896   :  { %v15254_v15 = vpack.i.bf16 %v15132_v35, %v15162_v1 }
 0x897   :  { %v15136_v9 = vpop.permute.xlu0 %15135 }
 0x898   :  { %v15137_v16 = vunpack.i.l.bf16 %v15136_v9  ;;  %v15138_v42 = vunpack.i.h.bf16 %v15136_v9 }
 0x89a   :  { %v15239_v41 = vpack.i.bf16 %v20744_v5, %v15137_v16  ;;  %v15226_v5 = vpop.permute.xlu1 %15225  ;;  %v15279_v24 = vpack.i.bf16 %v20757_v17, %v15138_v42  ;;  %v15128_v16 = vunpack.i.h.bf16 %v15126_v45 }
 0x89b   :  { %v15141_v60 = vpop.permute.xlu0 %15140  ;;  %v15227_v32 = vunpack.i.l.bf16 %v15226_v5  ;;  %v15228_v27 = vunpack.i.h.bf16 %v15226_v5  ;;  %v22138_v5 = vld [vmem:[#allocation86_spill] sm:$0xff] }
 0x89c   :  { %v15142_v30 = vunpack.i.l.bf16 %v15141_v60  ;;  %15240 = vrot.lane.b32.xlu0 %v15239_v41, %s15448_s18  ;;  %v15143_v3 = vunpack.i.h.bf16 %v15141_v60 }
 0x89e   :  { %v15244_v59 = vpack.i.bf16 %v15122_v26, %v15142_v30  ;;  %v15231_v25 = vpop.permute.xlu1 %15230  ;;  %v15284_v41 = vpack.i.bf16 %v15123_v61, %v15143_v3  ;;  %v15158_v26 = vunpack.i.h.bf16 %v15156_v38  ;;  %v14016_v3 = vld [vmem:[%s21765_s7 + $0xd8] sm:$0xff]  ;;  %v14015_v61 = vld [vmem:[%s21765_s7 + $0xd0] sm:$0xff] }
 0x89f   :  { %v20913_v18 = vpop.permute.xlu0 %15145  ;;  %v15232_v12 = vunpack.i.l.bf16 %v15231_v25  ;;  %v15233_v38 = vunpack.i.h.bf16 %v15231_v25 }
 0x8a0   :  { %15245 = vrot.lane.b32.xlu1 %v15244_v59, %s15448_s18  ;;  %v15289_v30 = vpack.i.bf16 %v15128_v16, %v15158_v26  ;;  %v15163_v59 = vunpack.i.h.bf16 %v15161_v13  ;;  %v14014_v16 = vld [vmem:[%s21765_s7 + $0xc8] sm:$0xff]  ;;  %v14013_v26 = vld [vmem:[%s21765_s7 + $0xc0] sm:$0xff] }
 0x8a2   :  { %v15236_v4 = vpop.permute.xlu1 %15235  ;;  %v15294_v9 = vpack.i.bf16 %v15133_v31, %v15163_v59  ;;  %v14011_v31 = vld [vmem:[%s21765_s7 + $0xb0] sm:$0xff]  ;;  %v14010_v59 = vld [vmem:[%s21765_s7 + $0xa8] sm:$0xff] }
 0x8a3   :  { %v20916_v23 = vpop.permute.xlu0 %15150  ;;  %v15237_v11 = vunpack.i.l.bf16 %v15236_v4  ;;  %v15238_v13 = vunpack.i.h.bf16 %v15236_v4 }
 0x8a4   :  { %15250 = vrot.lane.b32.xlu1 %v15249_v0, %s15448_s18  ;;  %v15223_v0 = vunpack.i.h.bf16 %v15221_v56 }
 0x8a7   :  { %v15166_v34 = vpop.permute.xlu0 %15165 }
 0x8a8   :  { %v15167_v6 = vunpack.i.l.bf16 %v15166_v34  ;;  %15255 = vrot.lane.b32.xlu1 %v15254_v15, %s15448_s18  ;;  %v15168_v57 = vunpack.i.h.bf16 %v15166_v34 }
 0x8aa   :  { %v15259_v29 = vpack.i.bf16 %v15167_v6, %v15222_v37  ;;  %v15299_v17 = vpack.i.bf16 %v15168_v57, %v15223_v0  ;;  %v14008_v57 = vld [vmem:[%s21765_s7 + $0x98] sm:$0xff] }
 0x8ab   :  { %v15171_v8 = vpop.permute.xlu0 %15170 }
 0x8ac   :  { %v15172_v43 = vunpack.i.l.bf16 %v15171_v8  ;;  %15260 = vrot.lane.b32.xlu1 %v15259_v29, %s15448_s18  ;;  %v15173_v60 = vunpack.i.h.bf16 %v15171_v8 }
 0x8ae   :  { %v15264_v46 = vpack.i.bf16 %v15172_v43, %v15227_v32  ;;  %v15304_v45 = vpack.i.bf16 %v15173_v60, %v15228_v27  ;;  %v22139_v43 = vld [vmem:[#allocation55_spill] sm:$0xff]  ;;  %v14006_v60 = vld [vmem:[%s21765_s7 + $0x88] sm:$0xff]  ;;  %v14005_v27 = vld [vmem:[%s21765_s7 + $0x80] sm:$0xff] }
 0x8af   :  { %v15176_v52 = vpop.permute.xlu0 %15175 }
 0x8b0   :  { %v15177_v14 = vunpack.i.l.bf16 %v15176_v52  ;;  %15265 = vrot.lane.b32.xlu1 %v15264_v46, %s15448_s18  ;;  %v15178_v35 = vunpack.i.h.bf16 %v15176_v52  ;;  %v13131_v52 = vld [vmem:[#allocation5 + $0x20] sm:$0xff] }
 0x8b2   :  { %v15269_v63 = vpack.i.bf16 %v15177_v14, %v15232_v12  ;;  %v15309_v1 = vpack.i.bf16 %v15178_v35, %v15233_v38  ;;  %v14003_v35 = vld [vmem:[%s21765_s7 + $0x70] sm:$0xff]  ;;  %v14002_v38 = vld [vmem:[%s21765_s7 + $0x68] sm:$0xff] }
 0x8b3   :  { %v15181_v22 = vpop.permute.xlu0 %15180 }
 0x8b4   :  { %v15182_v36 = vunpack.i.l.bf16 %v15181_v22  ;;  %15270 = vrot.lane.b32.xlu1 %v15269_v63, %s15448_s18  ;;  %v15183_v44 = vunpack.i.h.bf16 %v15181_v22  ;;  %v22140_v63 = vld [vmem:[#allocation67_spill] sm:$0xff] }
 0x8b6   :  { %v15274_v48 = vpack.i.bf16 %v15182_v36, %v15237_v11  ;;  %v15314_v15 = vpack.i.bf16 %v15183_v44, %v15238_v13  ;;  %v14001_v44 = vld [vmem:[%s21765_s7 + $0x60] sm:$0xff]  ;;  %v14000_v13 = vld [vmem:[%s21765_s7 + $0x58] sm:$0xff] }
 0x8b7   :  { %v20945_v22 = vpop.permute.xlu0 %15185 }
 0x8b8   :  { %15275 = vrot.lane.b32.xlu1 %v15274_v48, %s15448_s18  ;;  %v14020_v48 = vld [vmem:[%s21765_s7 + $0xf8] sm:$0xff] }
 0x8b9   :  { %14065 = vmatprep.subr.mxu0 %v14020_v48  ;;  %v14048_v48 = vld [vmem:[%s21765_s7 + $0x1d8] sm:$0xff] }
 0x8bb   :  { %v20951_v42 = vpop.permute.xlu0 %15190 }
 0x8bc   :  { %15280 = vrot.lane.b32.xlu1 %v15279_v24, %s15448_s18  ;;  %v14019_v24 = vld [vmem:[%s21765_s7 + $0xf0] sm:$0xff] }
 0x8bd   :  { %14066 = vmatpush1.msra.mxu0 %v14019_v24 }
 0x8be   :  { %14067 = vmatprep.subr.mxu0 %v14018_v19 }
 0x8c0   :  { %15285 = vrot.lane.b32.xlu1 %v15284_v41, %s15448_s18  ;;  %v20976_v41 = vpop.permute.xlu0 %15195 }
 0x8c4   :  { %15290 = vrot.lane.b32.xlu1 %v15289_v30, %s15448_s18  ;;  %v14012_v30 = vld [vmem:[%s21765_s7 + $0xb8] sm:$0xff]  ;;  %v20996_v0 = vpop.permute.xlu0 %15200 }
 0x8c8   :  { %15295 = vrot.lane.b32.xlu1 %v15294_v9, %s15448_s18  ;;  %v14009_v9 = vld [vmem:[%s21765_s7 + $0xa0] sm:$0xff] }
 0x8cc   :  { %15300 = vrot.lane.b32.xlu1 %v15299_v17, %s15448_s18  ;;  %v14007_v17 = vld [vmem:[%s21765_s7 + $0x90] sm:$0xff] }
 0x8d0   :  { %15305 = vrot.lane.b32.xlu1 %v15304_v45, %s15448_s18  ;;  %v14004_v45 = vld [vmem:[%s21765_s7 + $0x78] sm:$0xff] }
 0x8d4   :  { %15310 = vrot.lane.b32.xlu1 %v15309_v1, %s15448_s18  ;;  %v21016_v1 = vpop.permute.xlu0 %15205 }
 0x8d8   :  { %15315 = vrot.lane.b32.xlu1 %v15314_v15, %s15448_s18  ;;  %v13999_v15 = vld [vmem:[%s21765_s7 + $0x50] sm:$0xff] }
 0x8dc   :  { %12414 = vrot.lane.b32.xlu1 %v20869_v28, %s15435_s28 }
 0x8de   :  { %v12925_v56 = vpop.f32.mrf.mxu0 }
 0x8df   :  { %v13021_v34 = vadd.f32 %v12925_v56, %v22138_v5  ;;  %v13998_v56 = vld [vmem:[%s21765_s7 + $0x48] sm:$0xff]  ;;  %v13997_v5 = vld [vmem:[%s21765_s7 + $0x40] sm:$0xff] }
 0x8e0   :  { %v12927_v37 = vpop.f32.mrf.mxu0  ;;  %12386 = vrot.lane.b32.xlu1 %v20869_v28, %s15435_s28 }
 0x8e1   :  { %v13059_v6 = vadd.f32 %v20530_v58, %v13021_v34  ;;  %v13022_v29 = vadd.f32 %v12927_v37, %v20508_v53  ;;  %v13996_v34 = vld [vmem:[%s21765_s7 + $0x38] sm:$0xff]  ;;  %v21036_v37 = vpop.permute.xlu0 %15210 }
 0x8e2   :  { %v12931_v25 = vpop.f32.mrf.mxu0 }
 0x8e3   :  { %v13085_v8 = vmax.f32 %v13059_v6, 0.0  ;;  %v13060_v32 = vadd.f32 %v20530_v58, %v13022_v29  ;;  %v13034_v46 = vadd.f32 %v12931_v25, %v22139_v43  ;;  %v13995_v6 = vld [vmem:[%s21765_s7 + $0x30] sm:$0xff]  ;;  %v13994_v29 = vld [vmem:[%s21765_s7 + $0x28] sm:$0xff]  ;;  %v13993_v25 = vld [vmem:[%s21765_s7 + $0x20] sm:$0xff] }
 0x8e4   :  { %v12933_v12 = vpop.f32.mrf.mxu0  ;;  %13187 = vrot.lane.b32.xlu1 %v13131_v52, %s15423_s20  ;;  %v13990_v43 = vld [vmem:[%s21765_s7 + $0x8] sm:$0xff]  ;;  %v13989_v52 = vld [vmem:[%s21765_s7] sm:$0xff] }
 0x8e5   :  { %13111 = vst [vmem:[#allocation5 + $0x50] sm:$0xff] %v13085_v8  ;;  %v13086_v14 = vmax.f32 %v13060_v32, 0.0  ;;  %v13072_v4 = vadd.f32 %v20554_v7, %v13034_v46  ;;  %v13035_v28 = vadd.f32 %v12933_v12, %v22140_v63  ;;  %v13991_v32 = vld [vmem:[%s21765_s7 + $0x10] sm:$0xff]  ;;  %v21056_v46 = vpop.permute.xlu0 %15215  ;;  %v14052_v12 = vld [vmem:[%s21765_s7 + $0x1f8] sm:$0xff] }
 0x8e7   :  { %13112 = vst [vmem:[#allocation5 + $0x58] sm:$0xff] %v13086_v14  ;;  %v13098_v53 = vmax.f32 %v13072_v4, 0.0  ;;  %v13073_v11 = vadd.f32 %v20554_v7, %v13035_v28  ;;  %v14050_v4 = vld [vmem:[%s21765_s7 + $0x1e8] sm:$0xff]  ;;  %v14049_v28 = vld [vmem:[%s21765_s7 + $0x1e0] sm:$0xff] }
 0x8e8   :  { %13189 = vrot.lane.b32.xlu1 %v13080_v49, %s15423_s20  ;;  %v14017_v49 = vld [vmem:[%s21765_s7 + $0xe0] sm:$0xff] }
 0x8e9   :  { %13124 = vst [vmem:[#allocation5 + $0xc0] sm:$0xff] %v13098_v53  ;;  %v13099_v36 = vmax.f32 %v13073_v11, 0.0  ;;  %14068 = vmatpush1.msra.mxu0 %v14017_v49  ;;  %v15092_v53 = vunpack.i.l.bf16 %v20907_v62  ;;  %v15097_v49 = vunpack.i.l.bf16 %v20899_v10 }
 0x8ea   :  { %14069 = vmatprep.subr.mxu0 %v14016_v3 }
 0x8eb   :  { %13125 = vst [vmem:[#allocation5 + $0xc8] sm:$0xff] %v13099_v36  ;;  %14070 = vmatpush1.msra.mxu0 %v14015_v61 }
 0x8ec   :  { %13199 = vrot.lane.b32.xlu1 %v13085_v8, %s15423_s20  ;;  %14071 = vmatprep.subr.mxu0 %v14014_v16  ;;  %v13992_v8 = vld [vmem:[%s21765_s7 + $0x18] sm:$0xff] }
 0x8ed   :  { %14072 = vmatpush1.msra.mxu0 %v14013_v26  ;;  %v15102_v26 = vunpack.i.l.bf16 %v20901_v47 }
 0x8ee   :  { %14073 = vmatprep.subr.mxu0 %v14012_v30 }
 0x8ef   :  { %14074 = vmatpush1.msra.mxu0 %v14011_v31 }
 0x8f0   :  { %13201 = vrot.lane.b32.xlu1 %v13086_v14, %s15423_s20  ;;  %14075 = vmatprep.subr.mxu0 %v14010_v59  ;;  %v14051_v14 = vld [vmem:[%s21765_s7 + $0x1f0] sm:$0xff] }
 0x8f1   :  { %14076 = vmatpush1.msra.mxu0 %v14009_v9 }
 0x8f2   :  { %14077 = vmatprep.subr.mxu0 %v14008_v57  ;;  %v15107_v57 = vunpack.i.l.bf16 %v20903_v33 }
 0x8f3   :  { %14078 = vmatpush1.msra.mxu0 %v14007_v17 }
 0x8f4   :  { %14079 = vmatprep.subr.mxu0 %v14006_v60 }
 0x8f5   :  { %14080 = vmatpush1.msra.mxu0 %v14005_v27 }
 0x8f6   :  { %14081 = vmatprep.subr.mxu0 %v14004_v45  ;;  %v14047_v45 = vld [vmem:[%s21765_s7 + $0x1d0] sm:$0xff] }
 0x8f7   :  { %14082 = vmatpush1.msra.mxu0 %v14003_v35  ;;  %v14046_v35 = vld [vmem:[%s21765_s7 + $0x1c8] sm:$0xff] }
 0x8f8   :  { %14083 = vmatprep.subr.mxu0 %v14002_v38  ;;  %v14045_v38 = vld [vmem:[%s21765_s7 + $0x1c0] sm:$0xff] }
 0x8f9   :  { %14084 = vmatpush1.msra.mxu0 %v14001_v44  ;;  %v15112_v44 = vunpack.i.l.bf16 %v20905_v50 }
 0x8fa   :  { %14085 = vmatprep.subr.mxu0 %v14000_v13 }
 0x8fb   :  { %14086 = vmatpush1.msra.mxu0 %v13999_v15 }
 0x8fc   :  { %14087 = vmatprep.subr.mxu0 %v13998_v56 }
 0x8fd   :  { %14088 = vmatpush1.msra.mxu0 %v13997_v5  ;;  %v14044_v5 = vld [vmem:[%s21765_s7 + $0x1b8] sm:$0xff] }
 0x8fe   :  { %14089 = vmatprep.subr.mxu0 %v13996_v34  ;;  %v14043_v34 = vld [vmem:[%s21765_s7 + $0x1b0] sm:$0xff] }
 0x8ff   :  { %14090 = vmatpush1.msra.mxu0 %v13995_v6 }
 0x900   :  { %14091 = vmatprep.subr.mxu0 %v13994_v29 }
 0x901   :  { %14092 = vmatpush1.msra.mxu0 %v13993_v25  ;;  %v14042_v25 = vld [vmem:[%s21765_s7 + $0x1a8] sm:$0xff] }
 0x902   :  { %14093 = vmatprep.subr.mxu0 %v13992_v8  ;;  %v15117_v8 = vunpack.i.l.bf16 %v20909_v51 }
 0x903   :  { %14094 = vmatpush1.msra.mxu0 %v13991_v32 }
 0x904   :  { %14095 = vmatprep.subr.mxu0 %v13990_v43 }
 0x905   :  { %14096 = vmatpush1.msra.mxu0 %v13989_v52 }
 0x906   :  { %14097 = vmatprep.subr.mxu0 %v14052_v12  ;;  %v14041_v12 = vld [vmem:[%s21765_s7 + $0x1a0] sm:$0xff] }
 0x907   :  { %14098 = vmatpush2.msra.mxu0 %v14051_v14  ;;  %v15147_v14 = vunpack.i.l.bf16 %v20913_v18 }
 0x908   :  { %14099 = vmatprep.subr.mxu0 %v14050_v4 }
 0x909   :  { %14100 = vmatpush2.msra.mxu0 %v14049_v28 }
 0x90a   :  { %14101 = vmatprep.subr.mxu0 %v14048_v48 }
 0x90b   :  { %14102 = vmatpush2.msra.mxu0 %v14047_v45  ;;  %v14034_v45 = vld [vmem:[%s21765_s7 + $0x168] sm:$0xff] }
 0x90c   :  { %14103 = vmatprep.subr.mxu0 %v14046_v35  ;;  %v15192_v35 = vunpack.i.l.bf16 %v20951_v42 }
 0x90d   :  { %14104 = vmatpush2.msra.mxu0 %v14045_v38 }
 0x90e   :  { %v15241_v63 = vpop.permute.xlu0 %15240  ;;  %14105 = vmatprep.subr.mxu0 %v14044_v5  ;;  %v15197_v5 = vunpack.i.l.bf16 %v20976_v41 }
 0x90f   :  { %v15243_v11 = vunpack.i.h.bf16 %v15241_v63  ;;  %v15242_v36 = vunpack.i.l.bf16 %v15241_v63  ;;  %14106 = vmatpush2.msra.mxu0 %v14043_v34 }
 0x910   :  { %14107 = vmatprep.subr.mxu0 %v14042_v25  ;;  %v14032_v25 = vld [vmem:[%s21765_s7 + $0x158] sm:$0xff] }
 0x911   :  { %v13860_v24 = vsel %vm13859_vm1, %v20806_v2, %v15243_v11  ;;  %v13876_v19 = vsel %vm13859_vm1, %v15092_v53, %v15242_v36  ;;  %v14040_v53 = vld [vmem:[%s21765_s7 + $0x198] sm:$0xff]  ;;  %v14039_v11 = vld [vmem:[%s21765_s7 + $0x190] sm:$0xff]  ;;  %14108 = vmatpush2.msra.mxu0 %v14041_v12 }
 0x912   :  { %v13893_v3 = vsel %vm13892_vm4, %v13860_v24, 0.0  ;;  %v13909_v61 = vsel %vm13892_vm4, %v13876_v19, 0.0  ;;  %v15246_v16 = vpop.permute.xlu1 %15245  ;;  %v14038_v24 = vld [vmem:[%s21765_s7 + $0x188] sm:$0xff]  ;;  %v15152_v19 = vunpack.i.l.bf16 %v20916_v23  ;;  %14109 = vmatprep.subr.mxu0 %v14040_v53 }
 0x913   :  { %v15248_v30 = vunpack.i.h.bf16 %v15246_v16  ;;  %v15247_v31 = vunpack.i.l.bf16 %v15246_v16  ;;  %v15319_v59 = vpack.i.bf16 %v13893_v3, %v13909_v61  ;;  %v14037_v16 = vld [vmem:[%s21765_s7 + $0x180] sm:$0xff]  ;;  %14110 = vmatpush2.msra.mxu0 %v14039_v11 }
 0x914   :  { %14111 = vmatprep.subr.mxu0 %v14038_v24 }
 0x915   :  { %v13862_v9 = vsel %vm13859_vm1, %v15102_v26, %v15248_v30  ;;  %v13878_v2 = vsel %vm13859_vm1, %v15097_v49, %v15247_v31  ;;  %15320 = vxpose.xlu0.b32.start [1/16] (narrow) %v15319_v59, 8  ;;  %v15187_v26 = vunpack.i.l.bf16 %v20945_v22  ;;  %14112 = vmatpush2.msra.mxu0 %v14037_v16  ;;  %v14028_v16 = vld [vmem:[%s21765_s7 + $0x138] sm:$0xff] }
 0x916   :  { %v21088_v17 = vsel %vm13892_vm4, %v13862_v9, 0.0  ;;  %v21091_v60 = vsel %vm13892_vm4, %v13878_v2, 0.0  ;;  %v15251_v27 = vpop.permute.xlu1 %15250  ;;  %v14036_v9 = vld [vmem:[%s21765_s7 + $0x178] sm:$0xff]  ;;  %v14035_v2 = vld [vmem:[%s21765_s7 + $0x170] sm:$0xff] }
 0x917   :  { %v15253_v13 = vunpack.i.h.bf16 %v15251_v27  ;;  %v15252_v15 = vunpack.i.l.bf16 %v15251_v27  ;;  %v15323_v56 = vpack.i.bf16 %v21088_v17, %v21091_v60  ;;  %14113 = vmatprep.subr.mxu0 %v14036_v9  ;;  %v14026_v9 = vld [vmem:[%s21765_s7 + $0x128] sm:$0xff]  ;;  %v15153_v17 = vunpack.i.h.bf16 %v20916_v23 }
 0x918   :  { %14114 = vmatpush2.msra.mxu0 %v14035_v2  ;;  %v15212_v2 = vunpack.i.l.bf16 %v21036_v37  ;;  %v15193_v23 = vunpack.i.h.bf16 %v20951_v42 }
 0x919   :  { %v13864_v6 = vsel %vm13859_vm1, %v15112_v44, %v15253_v13  ;;  %v13880_v29 = vsel %vm13859_vm1, %v15107_v57, %v15252_v15  ;;  %v14033_v15 = vld [vmem:[%s21765_s7 + $0x160] sm:$0xff]  ;;  %14115 = vmatprep.subr.mxu0 %v14034_v45 }
 0x91a   :  { %v21118_v32 = vsel %vm13892_vm4, %v13864_v6, 0.0  ;;  %v21121_v43 = vsel %vm13892_vm4, %v13880_v29, 0.0  ;;  %v15256_v52 = vpop.permute.xlu1 %15255  ;;  %14116 = vmatpush2.msra.mxu0 %v14033_v15 }
 0x91b   :  { %v15258_v4 = vunpack.i.h.bf16 %v15256_v52  ;;  %v15257_v63 = vunpack.i.l.bf16 %v15256_v52  ;;  %v15327_v28 = vpack.i.bf16 %v21118_v32, %v21121_v43  ;;  %14117 = vmatprep.subr.mxu0 %v14032_v25  ;;  %v15203_v32 = vunpack.i.h.bf16 %v20996_v0 }
 0x91d   :  { %v13866_v36 = vsel %vm13859_vm1, %v15147_v14, %v15258_v4  ;;  %v13882_v48 = vsel %vm13859_vm1, %v15117_v8, %v15257_v63  ;;  %v14031_v8 = vld [vmem:[%s21765_s7 + $0x150] sm:$0xff]  ;;  %v14030_v14 = vld [vmem:[%s21765_s7 + $0x148] sm:$0xff]  ;;  %v15202_v4 = vunpack.i.l.bf16 %v20996_v0  ;;  %v15213_v0 = vunpack.i.h.bf16 %v21036_v37 }
 0x91e   :  { %v21142_v49 = vsel %vm13892_vm4, %v13866_v36, 0.0  ;;  %v21145_v3 = vsel %vm13892_vm4, %v13882_v48, 0.0  ;;  %v15261_v61 = vpop.permute.xlu1 %15260  ;;  %v14029_v36 = vld [vmem:[%s21765_s7 + $0x140] sm:$0xff]  ;;  %v15207_v48 = vunpack.i.l.bf16 %v21016_v1  ;;  %14118 = vmatpush2.msra.mxu0 %v14031_v8 }
 0x91f   :  { %v15263_v30 = vunpack.i.h.bf16 %v15261_v61  ;;  %v15262_v31 = vunpack.i.l.bf16 %v15261_v61  ;;  %v15331_v59 = vpack.i.bf16 %v21142_v49, %v21145_v3  ;;  %14119 = vmatprep.subr.mxu0 %v14030_v14 }
 0x920   :  { %14120 = vmatpush2.msra.mxu0 %v14029_v36  ;;  %v14021_v36 = vld [vmem:[%s21765_s7 + $0x100] sm:$0xff] }
 0x921   :  { %v13868_v57 = vsel %vm13859_vm1, %v15187_v26, %v15263_v30  ;;  %v13884_v27 = vsel %vm13859_vm1, %v15152_v19, %v15262_v31  ;;  %v14027_v26 = vld [vmem:[%s21765_s7 + $0x130] sm:$0xff]  ;;  %14121 = vmatprep.subr.mxu0 %v14028_v16 }
 0x922   :  { %v21166_v38 = vsel %vm13892_vm4, %v13868_v57, 0.0  ;;  %v21169_v44 = vsel %vm13892_vm4, %v13884_v27, 0.0  ;;  %v15266_v13 = vpop.permute.xlu1 %15265  ;;  %14122 = vmatpush2.msra.mxu0 %v14027_v26 }
 0x923   :  { %v15268_v34 = vunpack.i.h.bf16 %v15266_v13  ;;  %v15267_v6 = vunpack.i.l.bf16 %v15266_v13  ;;  %v15335_v29 = vpack.i.bf16 %v21166_v38, %v21169_v44  ;;  %v15217_v13 = vunpack.i.l.bf16 %v21056_v46  ;;  %14123 = vmatprep.subr.mxu0 %v14026_v9 }
 0x925   :  { %v13870_v52 = vsel %vm13859_vm1, %v15197_v5, %v15268_v34  ;;  %v13886_v12 = vsel %vm13859_vm1, %v15192_v35, %v15267_v6  ;;  %v14025_v35 = vld [vmem:[%s21765_s7 + $0x120] sm:$0xff]  ;;  %v14024_v6 = vld [vmem:[%s21765_s7 + $0x118] sm:$0xff] }
 0x926   :  { %v21190_v63 = vsel %vm13892_vm4, %v13870_v52, 0.0  ;;  %v21193_v53 = vsel %vm13892_vm4, %v13886_v12, 0.0  ;;  %v15271_v11 = vpop.permute.xlu1 %15270  ;;  %14124 = vmatpush2.msra.mxu0 %v14025_v35 }
 0x927   :  { %v15273_v24 = vunpack.i.h.bf16 %v15271_v11  ;;  %v15272_v19 = vunpack.i.l.bf16 %v15271_v11  ;;  %v15339_v61 = vpack.i.bf16 %v21190_v63, %v21193_v53  ;;  %14125 = vmatprep.subr.mxu0 %v14024_v6  ;;  %v14022_v11 = vld [vmem:[%s21765_s7 + $0x108] sm:$0xff]  ;;  %v14201_v63 = vld [vmem:[%s21767_s9 + $0x1f8] sm:$0xff]  ;;  %v14198_v53 = vld [vmem:[%s21767_s9 + $0x1e0] sm:$0xff] }
 0x929   :  { %v13872_v30 = vsel %vm13859_vm1, %v15207_v48, %v15273_v24  ;;  %v13888_v31 = vsel %vm13859_vm1, %v15202_v4, %v15272_v19  ;;  %v14023_v4 = vld [vmem:[%s21765_s7 + $0x110] sm:$0xff]  ;;  %v15093_v48 = vunpack.i.h.bf16 %v20907_v62 }
 0x92a   :  { %v21214_v57 = vsel %vm13892_vm4, %v13872_v30, 0.0  ;;  %v21217_v27 = vsel %vm13892_vm4, %v13888_v31, 0.0  ;;  %v15276_v45 = vpop.permute.xlu1 %15275  ;;  %14126 = vmatpush2.msra.mxu0 %v14023_v4  ;;  %v15098_v31 = vunpack.i.h.bf16 %v20899_v10 }
 0x92b   :  { %v15278_v15 = vunpack.i.h.bf16 %v15276_v45  ;;  %v15277_v5 = vunpack.i.l.bf16 %v15276_v45  ;;  %v15343_v34 = vpack.i.bf16 %v21214_v57, %v21217_v27  ;;  %14127 = vmatprep.subr.mxu0 %v14022_v11  ;;  %v15103_v45 = vunpack.i.h.bf16 %v20901_v47  ;;  %v14195_v57 = vld [vmem:[%s21767_s9 + $0x1c8] sm:$0xff]  ;;  %v14197_v27 = vld [vmem:[%s21767_s9 + $0x1d8] sm:$0xff] }
 0x92c   :  { %14128 = vmatpush2.msra.mxu0 %v14021_v36 }
 0x92d   :  { %v13874_v25 = vsel %vm13859_vm1, %v15217_v13, %v15278_v15  ;;  %v13890_v8 = vsel %vm13859_vm1, %v15212_v2, %v15277_v5  ;;  %14359 = vmatprep.subr.mxu0 %v14201_v63  ;;  %v14139_v63 = vld [vmem:[%s21767_s9 + $0x8] sm:$0xff] }
 0x92e   :  { %v21231_v52 = vsel %vm13892_vm4, %v13874_v25, 0.0  ;;  %v21234_v12 = vsel %vm13892_vm4, %v13890_v8, 0.0  ;;  %v15281_v14 = vpop.permute.xlu1 %15280 }
 0x92f   :  { %v15283_v24 = vunpack.i.h.bf16 %v15281_v14  ;;  %v15282_v19 = vunpack.i.l.bf16 %v15281_v14  ;;  %v15347_v16 = vpack.i.bf16 %v21231_v52, %v21234_v12  ;;  %v15113_v14 = vunpack.i.h.bf16 %v20905_v50  ;;  %v14196_v52 = vld [vmem:[%s21767_s9 + $0x1d0] sm:$0xff]  ;;  %v14191_v12 = vld [vmem:[%s21767_s9 + $0x1a8] sm:$0xff] }
 0x930   :  { %v15148_v50 = vunpack.i.h.bf16 %v20913_v18 }
 0x931   :  { %v13861_v26 = vsel %vm13859_vm1, %v20822_v20, %v15283_v24  ;;  %v13877_v30 = vsel %vm13859_vm1, %v15093_v48, %v15282_v19  ;;  %v15108_v20 = vunpack.i.h.bf16 %v20903_v33  ;;  %v15118_v33 = vunpack.i.h.bf16 %v20909_v51 }
 0x932   :  { %v13894_v9 = vsel %vm13892_vm4, %v13861_v26, 0.0  ;;  %v13910_v2 = vsel %vm13892_vm4, %v13877_v30, 0.0  ;;  %v15286_v62 = vpop.permute.xlu1 %15285 }
 0x933   :  { %v15288_v35 = vunpack.i.h.bf16 %v15286_v62  ;;  %v15287_v13 = vunpack.i.l.bf16 %v15286_v62  ;;  %v15321_v15 = vpack.i.bf16 %v13894_v9, %v13910_v2 }
 0x935   :  { %v13863_v5 = vsel %vm13859_vm1, %v15103_v45, %v15288_v35  ;;  %v13879_v6 = vsel %vm13859_vm1, %v15098_v31, %v15287_v13  ;;  %15322 = vxpose.xlu0.b32.cont [2/16] (narrow) %v15321_v15, 8  ;;  %v15188_v45 = vunpack.i.h.bf16 %v20945_v22  ;;  %v15198_v22 = vunpack.i.h.bf16 %v20976_v41 }
 0x936   :  { %v13896_v25 = vsel %vm13892_vm4, %v13863_v5, 0.0  ;;  %v13912_v10 = vsel %vm13892_vm4, %v13879_v6, 0.0  ;;  %v15291_v8 = vpop.permute.xlu1 %15290 }
 0x937   :  { %v15293_v4 = vunpack.i.h.bf16 %v15291_v8  ;;  %v15292_v11 = vunpack.i.l.bf16 %v15291_v8  ;;  %v15325_v47 = vpack.i.bf16 %v13896_v25, %v13912_v10 }
 0x939   :  { %v13865_v36 = vsel %vm13859_vm1, %v15113_v14, %v15293_v4  ;;  %v13881_v48 = vsel %vm13859_vm1, %v15108_v20, %v15292_v11  ;;  %15324 = vxpose.xlu0.b32.cont [3/16] (narrow) %v15323_v56, 8 }
 0x93a   :  { %v13898_v24 = vsel %vm13892_vm4, %v13865_v36, 0.0  ;;  %v13914_v19 = vsel %vm13892_vm4, %v13881_v48, 0.0  ;;  %v15296_v26 = vpop.permute.xlu1 %15295 }
 0x93b   :  { %v15298_v30 = vunpack.i.h.bf16 %v15296_v26  ;;  %v15297_v31 = vunpack.i.l.bf16 %v15296_v26  ;;  %v15329_v9 = vpack.i.bf16 %v13898_v24, %v13914_v19 }
 0x93d   :  { %v13867_v2 = vsel %vm13859_vm1, %v15148_v50, %v15298_v30  ;;  %v13883_v62 = vsel %vm13859_vm1, %v15118_v33, %v15297_v31  ;;  %15326 = vxpose.xlu0.b32.cont [4/16] (narrow) %v15325_v47, 8  ;;  %v15208_v47 = vunpack.i.h.bf16 %v21016_v1  ;;  %v15218_v1 = vunpack.i.h.bf16 %v21056_v46 }
 0x93e   :  { %v13900_v60 = vsel %vm13892_vm4, %v13867_v2, 0.0  ;;  %v13916_v51 = vsel %vm13892_vm4, %v13883_v62, 0.0  ;;  %v15301_v56 = vpop.permute.xlu1 %15300 }
 0x93f   :  { %v15303_v35 = vunpack.i.h.bf16 %v15301_v56  ;;  %v15302_v13 = vunpack.i.l.bf16 %v15301_v56  ;;  %v15333_v18 = vpack.i.bf16 %v13900_v60, %v13916_v51  ;;  %v14190_v56 = vld [vmem:[%s21767_s9 + $0x1a0] sm:$0xff] }
 0x941   :  { %v13869_v15 = vsel %vm13859_vm1, %v15188_v45, %v15303_v35  ;;  %v13885_v5 = vsel %vm13859_vm1, %v15153_v17, %v15302_v13  ;;  %15328 = vxpose.xlu0.b32.cont [5/16] (narrow) %v15327_v28, 8  ;;  %v14192_v45 = vld [vmem:[%s21767_s9 + $0x1b0] sm:$0xff]  ;;  %v14187_v35 = vld [vmem:[%s21767_s9 + $0x188] sm:$0xff]  ;;  %v14189_v13 = vld [vmem:[%s21767_s9 + $0x198] sm:$0xff] }
 0x942   :  { %v13902_v6 = vsel %vm13892_vm4, %v13869_v15, 0.0  ;;  %v13918_v20 = vsel %vm13892_vm4, %v13885_v5, 0.0  ;;  %v15306_v25 = vpop.permute.xlu1 %15305  ;;  %v14188_v15 = vld [vmem:[%s21767_s9 + $0x190] sm:$0xff]  ;;  %v14183_v5 = vld [vmem:[%s21767_s9 + $0x168] sm:$0xff] }
 0x943   :  { %v15308_v10 = vunpack.i.h.bf16 %v15306_v25  ;;  %v15307_v8 = vunpack.i.l.bf16 %v15306_v25  ;;  %v15337_v14 = vpack.i.bf16 %v13902_v6, %v13918_v20  ;;  %v14182_v6 = vld [vmem:[%s21767_s9 + $0x160] sm:$0xff]  ;;  %v14184_v20 = vld [vmem:[%s21767_s9 + $0x170] sm:$0xff]  ;;  %v14179_v25 = vld [vmem:[%s21767_s9 + $0x148] sm:$0xff] }
 0x945   :  { %v13871_v4 = vsel %vm13859_vm1, %v15198_v22, %v15308_v10  ;;  %v13887_v11 = vsel %vm13859_vm1, %v15193_v23, %v15307_v8  ;;  %15330 = vxpose.xlu0.b32.cont [6/16] (narrow) %v15329_v9, 8  ;;  %v14185_v23 = vld [vmem:[%s21767_s9 + $0x178] sm:$0xff]  ;;  %v14178_v10 = vld [vmem:[%s21767_s9 + $0x140] sm:$0xff]  ;;  %v14180_v8 = vld [vmem:[%s21767_s9 + $0x150] sm:$0xff] }
 0x946   :  { %v13904_v43 = vsel %vm13892_vm4, %v13871_v4, 0.0  ;;  %v13920_v42 = vsel %vm13892_vm4, %v13887_v11, 0.0  ;;  %v15311_v28 = vpop.permute.xlu1 %15310  ;;  %v14181_v22 = vld [vmem:[%s21767_s9 + $0x158] sm:$0xff]  ;;  %v14174_v11 = vld [vmem:[%s21767_s9 + $0x120] sm:$0xff] }
 0x947   :  { %v15313_v36 = vunpack.i.h.bf16 %v15311_v28  ;;  %v15312_v48 = vunpack.i.l.bf16 %v15311_v28  ;;  %v15341_v41 = vpack.i.bf16 %v13904_v43, %v13920_v42  ;;  %v14177_v4 = vld [vmem:[%s21767_s9 + $0x138] sm:$0xff]  ;;  %v14171_v43 = vld [vmem:[%s21767_s9 + $0x108] sm:$0xff]  ;;  %v14170_v28 = vld [vmem:[%s21767_s9 + $0x100] sm:$0xff] }
 0x948   :  { %v14173_v42 = vld [vmem:[%s21767_s9 + $0x118] sm:$0xff] }
 0x949   :  { %v13873_v33 = vsel %vm13859_vm1, %v15208_v47, %v15313_v36  ;;  %v13889_v24 = vsel %vm13859_vm1, %v15203_v32, %v15312_v48  ;;  %15332 = vxpose.xlu0.b32.cont [7/16] (narrow) %v15331_v59, 8  ;;  %v14176_v32 = vld [vmem:[%s21767_s9 + $0x130] sm:$0xff]  ;;  %v14167_v36 = vld [vmem:[%s21767_s9 + $0xe8] sm:$0xff]  ;;  %v14169_v48 = vld [vmem:[%s21767_s9 + $0xf8] sm:$0xff] }
 0x94a   :  { %v13906_v19 = vsel %vm13892_vm4, %v13873_v33, 0.0  ;;  %v13922_v26 = vsel %vm13892_vm4, %v13889_v24, 0.0  ;;  %v15316_v50 = vpop.permute.xlu1 %15315  ;;  %v14172_v47 = vld [vmem:[%s21767_s9 + $0x110] sm:$0xff]  ;;  %v14163_v24 = vld [vmem:[%s21767_s9 + $0xc8] sm:$0xff] }
 0x94b   :  { %v15318_v30 = vunpack.i.h.bf16 %v15316_v50  ;;  %v15317_v31 = vunpack.i.l.bf16 %v15316_v50  ;;  %v15345_v9 = vpack.i.bf16 %v13906_v19, %v13922_v26  ;;  %v14168_v33 = vld [vmem:[%s21767_s9 + $0xf0] sm:$0xff]  ;;  %v14162_v19 = vld [vmem:[%s21767_s9 + $0xc0] sm:$0xff]  ;;  %v14159_v50 = vld [vmem:[%s21767_s9 + $0xa8] sm:$0xff] }
 0x94c   :  { %v14164_v26 = vld [vmem:[%s21767_s9 + $0xd0] sm:$0xff] }
 0x94d   :  { %v13875_v2 = vsel %vm13859_vm1, %v15218_v1, %v15318_v30  ;;  %v13891_v62 = vsel %vm13859_vm1, %v15213_v0, %v15317_v31  ;;  %15334 = vxpose.xlu0.b32.cont [8/16] (narrow) %v15333_v18, 8  ;;  %v14186_v18 = vld [vmem:[%s21767_s9 + $0x180] sm:$0xff]  ;;  %v14165_v0 = vld [vmem:[%s21767_s9 + $0xd8] sm:$0xff]  ;;  %v14160_v31 = vld [vmem:[%s21767_s9 + $0xb0] sm:$0xff] }
 0x94e   :  { %v13908_v49 = vsel %vm13892_vm4, %v13875_v2, 0.0  ;;  %v13924_v3 = vsel %vm13892_vm4, %v13891_v62, 0.0  ;;  %v12415_v37 = vpop.permute.xlu1 %12414  ;;  %v14161_v1 = vld [vmem:[%s21767_s9 + $0xb8] sm:$0xff]  ;;  %v14158_v30 = vld [vmem:[%s21767_s9 + $0xa0] sm:$0xff] }
 0x94f   :  { %v12441_v59 = vsel %vm6300_vm0, %v20847_v40, %v12415_v37  ;;  %v15349_v17 = vpack.i.bf16 %v13908_v49, %v13924_v3  ;;  %v14157_v2 = vld [vmem:[%s21767_s9 + $0x98] sm:$0xff]  ;;  %v14154_v62 = vld [vmem:[%s21767_s9 + $0x80] sm:$0xff]  ;;  %v14156_v49 = vld [vmem:[%s21767_s9 + $0x90] sm:$0xff] }
 0x950   :  { %15040 = vmatprep.subr.mxu1 %v12441_v59  ;;  %v14151_v3 = vld [vmem:[%s21767_s9 + $0x68] sm:$0xff]  ;;  %v14153_v37 = vld [vmem:[%s21767_s9 + $0x78] sm:$0xff] }
 0x951   :  { %15041 = vmatpush3.msra.mxu1 %v12441_v59  ;;  %15336 = vxpose.xlu0.b32.cont [9/16] (narrow) %v15335_v29, 8  ;;  %v14199_v29 = vld [vmem:[%s21767_s9 + $0x1e8] sm:$0xff]  ;;  %v14150_v59 = vld [vmem:[%s21767_s9 + $0x60] sm:$0xff] }
 0x952   :  { %v12387_v46 = vpop.permute.xlu1 %12386 }
 0x953   :  { %v12428_v60 = vsel %vm6300_vm0, %v20859_v55, %v12387_v46  ;;  %v21322_v55 = vld [vmem:[#allocation5 + $0x28] sm:$0xff] }
 0x954   :  { %15042 = vmatprep.subr.mxu1 %v12428_v60  ;;  %v14147_v46 = vld [vmem:[%s21767_s9 + $0x48] sm:$0xff] }
 0x955   :  { %15043 = vmatpush3.msra.mxu1 %v12428_v60  ;;  %15338 = vxpose.xlu0.b32.cont [10/16] (narrow) %v15337_v14, 8  ;;  %v14175_v14 = vld [vmem:[%s21767_s9 + $0x128] sm:$0xff]  ;;  %v14149_v60 = vld [vmem:[%s21767_s9 + $0x58] sm:$0xff] }
 0x956   :  { %15045 = vmatmul.mubr.msk.f32.vlgmr.msra.gmra.mxu1 %vm5020_vm14, %v20875_v39  ;;  %v13188_v51 = vpop.permute.xlu1 %13187  ;;  %14288 = vmatprep.subr.mxu1 %v14199_v29  ;;  %v14144_v29 = vld [vmem:[%s21767_s9 + $0x30] sm:$0xff] }
 0x957   :  { %14289 = vmatpush1.msra.mxu1 %v14198_v53  ;;  %v14146_v51 = vld [vmem:[%s21767_s9 + $0x40] sm:$0xff]  ;;  %v14141_v53 = vld [vmem:[%s21767_s9 + $0x18] sm:$0xff] }
 0x958   :  { %14290 = vmatprep.subr.mxu1 %v14195_v57  ;;  %v14140_v57 = vld [vmem:[%s21767_s9 + $0x10] sm:$0xff] }
 0x959   :  { %15340 = vxpose.xlu0.b32.cont [11/16] (narrow) %v15339_v61, 8  ;;  %v14200_v61 = vld [vmem:[%s21767_s9 + $0x1f0] sm:$0xff] }
 0x95a   :  { %v13190_v40 = vpop.permute.xlu1 %13189 }
 0x95b   :  { %v14148_v40 = vld [vmem:[%s21767_s9 + $0x50] sm:$0xff] }
 0x95d   :  { %15342 = vxpose.xlu0.b32.cont [12/16] (narrow) %v15341_v41, 8  ;;  %v14166_v41 = vld [vmem:[%s21767_s9 + $0xe0] sm:$0xff] }
 0x961   :  { %15344 = vxpose.xlu0.b32.cont [13/16] (narrow) %v15343_v34, 8  ;;  %v14194_v34 = vld [vmem:[%s21767_s9 + $0x1c0] sm:$0xff] }
 0x962   :  { %14291 = vmatpush1.msra.mxu1 %v14194_v34  ;;  %v14265_v34 = vld [vmem:[%s21767_s9 + $0x3f8] sm:$0xff] }
 0x963   :  { %14292 = vmatprep.subr.mxu1 %v14191_v12  ;;  %v14264_v12 = vld [vmem:[%s21767_s9 + $0x3f0] sm:$0xff] }
 0x964   :  { %14293 = vmatpush1.msra.mxu1 %v14190_v56  ;;  %v14261_v56 = vld [vmem:[%s21767_s9 + $0x3d8] sm:$0xff] }
 0x965   :  { %15346 = vxpose.xlu0.b32.cont [14/16] (narrow) %v15345_v9, 8  ;;  %14294 = vmatprep.subr.mxu1 %v14187_v35  ;;  %v14155_v9 = vld [vmem:[%s21767_s9 + $0x88] sm:$0xff]  ;;  %v14260_v35 = vld [vmem:[%s21767_s9 + $0x3d0] sm:$0xff] }
 0x966   :  { %14295 = vmatpush1.msra.mxu1 %v14186_v18  ;;  %v14257_v18 = vld [vmem:[%s21767_s9 + $0x3b8] sm:$0xff] }
 0x967   :  { %14296 = vmatprep.subr.mxu1 %v14183_v5  ;;  %v14256_v5 = vld [vmem:[%s21767_s9 + $0x3b0] sm:$0xff] }
 0x968   :  { %14297 = vmatpush1.msra.mxu1 %v14182_v6  ;;  %v14253_v6 = vld [vmem:[%s21767_s9 + $0x398] sm:$0xff] }
 0x969   :  { %15348 = vxpose.xlu0.b32.cont [15/16] (narrow) %v15347_v16, 8  ;;  %v14193_v16 = vld [vmem:[%s21767_s9 + $0x1b8] sm:$0xff]  ;;  %14298 = vmatprep.subr.mxu1 %v14179_v25  ;;  %v14252_v25 = vld [vmem:[%s21767_s9 + $0x390] sm:$0xff] }
 0x96a   :  { %14299 = vmatpush1.msra.mxu1 %v14178_v10  ;;  %v14249_v10 = vld [vmem:[%s21767_s9 + $0x378] sm:$0xff] }
 0x96b   :  { %14300 = vmatprep.subr.mxu1 %v14175_v14  ;;  %v14248_v14 = vld [vmem:[%s21767_s9 + $0x370] sm:$0xff] }
 0x96c   :  { %14301 = vmatpush1.msra.mxu1 %v14174_v11  ;;  %v14245_v11 = vld [vmem:[%s21767_s9 + $0x358] sm:$0xff] }
 0x96d   :  { %15350 = vxpose.xlu0.b32.end [16/16] (narrow) %v15349_v17, 8  ;;  %14302 = vmatprep.subr.mxu1 %v14171_v43  ;;  %v14152_v17 = vld [vmem:[%s21767_s9 + $0x70] sm:$0xff] }
 0x96e   :  { %14303 = vmatpush1.msra.mxu1 %v14170_v28  ;;  %v14244_v43 = vld [vmem:[%s21767_s9 + $0x350] sm:$0xff]  ;;  %v14241_v28 = vld [vmem:[%s21767_s9 + $0x338] sm:$0xff] }
 0x96f   :  { %14304 = vmatprep.subr.mxu1 %v14167_v36  ;;  %v14240_v36 = vld [vmem:[%s21767_s9 + $0x330] sm:$0xff] }
 0x970   :  { %14305 = vmatpush1.msra.mxu1 %v14166_v41  ;;  %v14237_v41 = vld [vmem:[%s21767_s9 + $0x318] sm:$0xff] }
 0x971   :  { %14306 = vmatprep.subr.mxu1 %v14163_v24  ;;  %v14236_v24 = vld [vmem:[%s21767_s9 + $0x310] sm:$0xff] }
 0x972   :  { %14307 = vmatpush1.msra.mxu1 %v14162_v19  ;;  %v14233_v19 = vld [vmem:[%s21767_s9 + $0x2f8] sm:$0xff] }
 0x973   :  { %14308 = vmatprep.subr.mxu1 %v14159_v50  ;;  %v14232_v50 = vld [vmem:[%s21767_s9 + $0x2f0] sm:$0xff] }
 0x974   :  { %14309 = vmatpush1.msra.mxu1 %v14158_v30  ;;  %v14229_v30 = vld [vmem:[%s21767_s9 + $0x2d8] sm:$0xff] }
 0x975   :  { %14310 = vmatprep.subr.mxu1 %v14155_v9  ;;  %v14228_v9 = vld [vmem:[%s21767_s9 + $0x2d0] sm:$0xff] }
 0x976   :  { %14311 = vmatpush1.msra.mxu1 %v14154_v62  ;;  %v14225_v62 = vld [vmem:[%s21767_s9 + $0x2b8] sm:$0xff] }
 0x977   :  { %14312 = vmatprep.subr.mxu1 %v14151_v3  ;;  %v14224_v3 = vld [vmem:[%s21767_s9 + $0x2b0] sm:$0xff] }
 0x978   :  { %14313 = vmatpush1.msra.mxu1 %v14150_v59  ;;  %v14221_v59 = vld [vmem:[%s21767_s9 + $0x298] sm:$0xff] }
 0x979   :  { %14314 = vmatprep.subr.mxu1 %v14147_v46  ;;  %v14220_v46 = vld [vmem:[%s21767_s9 + $0x290] sm:$0xff] }
 0x97a   :  { %14315 = vmatpush1.msra.mxu1 %v14146_v51  ;;  %v14217_v51 = vld [vmem:[%s21767_s9 + $0x278] sm:$0xff] }
 0x996   :  { %13445 = vrot.lane.b32.xlu0 %v21322_v55, %s15429_s26 }
 0x9ad   :  { %v15351_v39 = vpop.trf.xlu0 }
 0x9ae   :  { %v15355_v38 = vunpack.i.h.bf16 %v15351_v39  ;;  %v15352_v44 = vunpack.i.l.bf16 %v15351_v39  ;;  %v14143_v39 = vld [vmem:[%s21767_s9 + $0x28] sm:$0xff] }
 0x9af   :  { %14316 = vmatprep.subr.mxu1 %v14143_v39  ;;  %v14216_v39 = vld [vmem:[%s21767_s9 + $0x270] sm:$0xff] }
 0x9b0   :  { %14129 = vmatprep.mubr.f32.mxu0 %v15352_v44  ;;  %v14142_v44 = vld [vmem:[%s21767_s9 + $0x20] sm:$0xff] }
 0x9b1   :  { %14130 = vmatmul.mubr.f32.vlgmr.msra.gmra.mxu0 %v15355_v38  ;;  %v14145_v38 = vld [vmem:[%s21767_s9 + $0x38] sm:$0xff]  ;;  %14317 = vmatpush1.msra.mxu1 %v14142_v44 }
 0x9b2   :  { %14360 = vmatpush1.msra.mxu0 %v14200_v61  ;;  %v14138_v61 = vld [vmem:[%s21767_s9] sm:$0xff]  ;;  %14318 = vmatprep.subr.mxu1 %v14139_v63  ;;  %v14213_v44 = vld [vmem:[%s21767_s9 + $0x258] sm:$0xff]  ;;  %v14212_v63 = vld [vmem:[%s21767_s9 + $0x250] sm:$0xff] }
 0x9b3   :  { %14361 = vmatprep.subr.mxu0 %v14197_v27  ;;  %v14263_v27 = vld [vmem:[%s21767_s9 + $0x3e8] sm:$0xff]  ;;  %14319 = vmatpush1.msra.mxu1 %v14138_v61  ;;  %v14209_v61 = vld [vmem:[%s21767_s9 + $0x238] sm:$0xff] }
 0x9b4   :  { %14362 = vmatpush1.msra.mxu0 %v14196_v52  ;;  %v14262_v52 = vld [vmem:[%s21767_s9 + $0x3e0] sm:$0xff]  ;;  %14320 = vmatprep.subr.mxu1 %v14263_v27  ;;  %v14208_v27 = vld [vmem:[%s21767_s9 + $0x230] sm:$0xff] }
 0x9b5   :  { %14363 = vmatprep.subr.mxu0 %v14193_v16  ;;  %14321 = vmatpush2.msra.mxu1 %v14262_v52  ;;  %v14259_v16 = vld [vmem:[%s21767_s9 + $0x3c8] sm:$0xff]  ;;  %v14205_v52 = vld [vmem:[%s21767_s9 + $0x218] sm:$0xff] }
 0x9b6   :  { %14364 = vmatpush1.msra.mxu0 %v14192_v45  ;;  %v14258_v45 = vld [vmem:[%s21767_s9 + $0x3c0] sm:$0xff]  ;;  %14322 = vmatprep.subr.mxu1 %v14259_v16  ;;  %v14204_v16 = vld [vmem:[%s21767_s9 + $0x210] sm:$0xff] }
 0x9b7   :  { %14365 = vmatprep.subr.mxu0 %v14189_v13  ;;  %v14255_v13 = vld [vmem:[%s21767_s9 + $0x3a8] sm:$0xff]  ;;  %14323 = vmatpush2.msra.mxu1 %v14258_v45 }
 0x9b8   :  { %14366 = vmatpush1.msra.mxu0 %v14188_v15  ;;  %v14254_v15 = vld [vmem:[%s21767_s9 + $0x3a0] sm:$0xff]  ;;  %14324 = vmatprep.subr.mxu1 %v14255_v13 }
 0x9b9   :  { %14367 = vmatprep.subr.mxu0 %v14185_v23  ;;  %14325 = vmatpush2.msra.mxu1 %v14254_v15  ;;  %v14251_v23 = vld [vmem:[%s21767_s9 + $0x388] sm:$0xff] }
 0x9ba   :  { %14368 = vmatpush1.msra.mxu0 %v14184_v20  ;;  %v14250_v20 = vld [vmem:[%s21767_s9 + $0x380] sm:$0xff]  ;;  %14326 = vmatprep.subr.mxu1 %v14251_v23 }
 0x9bb   :  { %14369 = vmatprep.subr.mxu0 %v14181_v22  ;;  %v14247_v22 = vld [vmem:[%s21767_s9 + $0x368] sm:$0xff]  ;;  %14327 = vmatpush2.msra.mxu1 %v14250_v20  ;;  %v13144_v20 = vld [vmem:[#allocation5 + $0x90] sm:$0xff] }
 0x9bc   :  { %14370 = vmatpush1.msra.mxu0 %v14180_v8  ;;  %v14246_v8 = vld [vmem:[%s21767_s9 + $0x360] sm:$0xff]  ;;  %14328 = vmatprep.subr.mxu1 %v14247_v22  ;;  %v15393_v22 = vld [vmem:[#allocation5 + $0x50] sm:$0xff] }
 0x9bd   :  { %14371 = vmatprep.subr.mxu0 %v14177_v4  ;;  %14329 = vmatpush2.msra.mxu1 %v14246_v8  ;;  %v14243_v4 = vld [vmem:[%s21767_s9 + $0x348] sm:$0xff] }
 0x9be   :  { %14372 = vmatpush1.msra.mxu0 %v14176_v32  ;;  %v14242_v32 = vld [vmem:[%s21767_s9 + $0x340] sm:$0xff]  ;;  %14330 = vmatprep.subr.mxu1 %v14243_v4  ;;  %v22141_v8 = vld [vmem:[#allocation14_spill] sm:$0xff]  ;;  %v22142_v4 = vld [vmem:[#allocation12_spill] sm:$0xff] }
 0x9bf   :  { %14373 = vmatprep.subr.mxu0 %v14173_v42  ;;  %v14239_v42 = vld [vmem:[%s21767_s9 + $0x328] sm:$0xff]  ;;  %14331 = vmatpush2.msra.mxu1 %v14242_v32 }
 0x9c0   :  { %14374 = vmatpush1.msra.mxu0 %v14172_v47  ;;  %v14238_v47 = vld [vmem:[%s21767_s9 + $0x320] sm:$0xff]  ;;  %14332 = vmatprep.subr.mxu1 %v14239_v42 }
 0x9c1   :  { %14375 = vmatprep.subr.mxu0 %v14169_v48  ;;  %14333 = vmatpush2.msra.mxu1 %v14238_v47  ;;  %v14235_v48 = vld [vmem:[%s21767_s9 + $0x308] sm:$0xff] }
 0x9c2   :  { %14376 = vmatpush1.msra.mxu0 %v14168_v33  ;;  %v14234_v33 = vld [vmem:[%s21767_s9 + $0x300] sm:$0xff]  ;;  %14334 = vmatprep.subr.mxu1 %v14235_v48  ;;  %v13200_v48 = vpop.permute.xlu1 %13199 }
 0x9c3   :  { %14377 = vmatprep.subr.mxu0 %v14165_v0  ;;  %v14231_v0 = vld [vmem:[%s21767_s9 + $0x2e8] sm:$0xff]  ;;  %14335 = vmatpush2.msra.mxu1 %v14234_v33 }
 0x9c4   :  { %14378 = vmatpush1.msra.mxu0 %v14164_v26  ;;  %v14230_v26 = vld [vmem:[%s21767_s9 + $0x2e0] sm:$0xff]  ;;  %14336 = vmatprep.subr.mxu1 %v14231_v0 }
 0x9c5   :  { %14379 = vmatprep.subr.mxu0 %v14161_v1  ;;  %14337 = vmatpush2.msra.mxu1 %v14230_v26  ;;  %v14227_v1 = vld [vmem:[%s21767_s9 + $0x2c8] sm:$0xff] }
 0x9c6   :  { %14380 = vmatpush1.msra.mxu0 %v14160_v31  ;;  %v14226_v31 = vld [vmem:[%s21767_s9 + $0x2c0] sm:$0xff]  ;;  %14338 = vmatprep.subr.mxu1 %v14227_v1 }
 0x9c7   :  { %14381 = vmatprep.subr.mxu0 %v14157_v2  ;;  %v14223_v2 = vld [vmem:[%s21767_s9 + $0x2a8] sm:$0xff]  ;;  %14339 = vmatpush2.msra.mxu1 %v14226_v31 }
 0x9c8   :  { %14382 = vmatpush1.msra.mxu0 %v14156_v49  ;;  %v14222_v49 = vld [vmem:[%s21767_s9 + $0x2a0] sm:$0xff]  ;;  %14340 = vmatprep.subr.mxu1 %v14223_v2 }
 0x9c9   :  { %14383 = vmatprep.subr.mxu0 %v14153_v37  ;;  %14341 = vmatpush2.msra.mxu1 %v14222_v49  ;;  %v14219_v37 = vld [vmem:[%s21767_s9 + $0x288] sm:$0xff] }
 0x9ca   :  { %14384 = vmatpush1.msra.mxu0 %v14152_v17  ;;  %v14218_v17 = vld [vmem:[%s21767_s9 + $0x280] sm:$0xff]  ;;  %14342 = vmatprep.subr.mxu1 %v14219_v37 }
 0x9cb   :  { %14385 = vmatprep.subr.mxu0 %v14149_v60  ;;  %14343 = vmatpush2.msra.mxu1 %v14218_v17  ;;  %v14215_v60 = vld [vmem:[%s21767_s9 + $0x268] sm:$0xff] }
 0x9cc   :  { %14386 = vmatpush1.msra.mxu0 %v14148_v40  ;;  %14344 = vmatprep.subr.mxu1 %v14215_v60  ;;  %v14214_v40 = vld [vmem:[%s21767_s9 + $0x260] sm:$0xff] }
 0x9cd   :  { %14387 = vmatprep.subr.mxu0 %v14145_v38  ;;  %14345 = vmatpush2.msra.mxu1 %v14214_v40  ;;  %v14211_v38 = vld [vmem:[%s21767_s9 + $0x248] sm:$0xff] }
 0x9ce   :  { %14388 = vmatpush1.msra.mxu0 %v14144_v29  ;;  %14346 = vmatprep.subr.mxu1 %v14211_v38  ;;  %v14210_v29 = vld [vmem:[%s21767_s9 + $0x240] sm:$0xff] }
 0x9cf   :  { %14389 = vmatprep.subr.mxu0 %v14141_v53  ;;  %14347 = vmatpush2.msra.mxu1 %v14210_v29  ;;  %v14207_v53 = vld [vmem:[%s21767_s9 + $0x228] sm:$0xff] }
 0x9d0   :  { %14390 = vmatpush1.msra.mxu0 %v14140_v57  ;;  %14348 = vmatprep.subr.mxu1 %v14207_v53  ;;  %v14206_v57 = vld [vmem:[%s21767_s9 + $0x220] sm:$0xff]  ;;  %v15449_v53 = vmov 1983009808  }
 0x9d1   :  { %14391 = vmatprep.subr.mxu0 %v14265_v34  ;;  %14349 = vmatpush2.msra.mxu1 %v14206_v57  ;;  %v14203_v34 = vld [vmem:[%s21767_s9 + $0x208] sm:$0xff]  ;;  %v14266_v57 = vld [vmem:[%s21768_s10] sm:$0xf]  ;;  %s15450_s10 = smov [#allocation7]  }
 0x9d2   :  { %14392 = vmatpush2.msra.mxu0 %v14264_v12  ;;  %v14202_v12 = vld [vmem:[%s21767_s9 + $0x200] sm:$0xff]  ;;  %14350 = vmatprep.subr.mxu1 %v14203_v34  ;;  %v14271_v34 = vrot.slane %v14266_v57, %v22141_v8 }
 0x9d3   :  { %14393 = vmatprep.subr.mxu0 %v14261_v56  ;;  %14351 = vmatpush2.msra.mxu1 %v14202_v12 }
 0x9d4   :  { %14394 = vmatpush2.msra.mxu0 %v14260_v35 }
 0x9d5   :  { %14395 = vmatprep.subr.mxu0 %v14257_v18 }
 0x9d6   :  { %14396 = vmatpush2.msra.mxu0 %v14256_v5 }
 0x9d7   :  { %14397 = vmatprep.subr.mxu0 %v14253_v6 }
 0x9d8   :  { %14398 = vmatpush2.msra.mxu0 %v14252_v25  ;;  %v15392_v25 = vld [vmem:[#allocation5 + $0x20] sm:$0xff] }
 0x9d9   :  { %14399 = vmatprep.subr.mxu0 %v14249_v10  ;;  %v15394_v10 = vld [vmem:[#allocation5 + $0x58] sm:$0xff] }
 0x9da   :  { %14400 = vmatpush2.msra.mxu0 %v14248_v14 }
 0x9db   :  { %14401 = vmatprep.subr.mxu0 %v14245_v11 }
 0x9dc   :  { %14402 = vmatpush2.msra.mxu0 %v14244_v43 }
 0x9dd   :  { %14403 = vmatprep.subr.mxu0 %v14241_v28 }
 0x9de   :  { %14404 = vmatpush2.msra.mxu0 %v14240_v36 }
 0x9df   :  { %14405 = vmatprep.subr.mxu0 %v14237_v41  ;;  %v13202_v41 = vpop.permute.xlu1 %13201 }
 0x9e0   :  { %14406 = vmatpush2.msra.mxu0 %v14236_v24 }
 0x9e1   :  { %14407 = vmatprep.subr.mxu0 %v14233_v19 }
 0x9e2   :  { %14408 = vmatpush2.msra.mxu0 %v14232_v50 }
 0x9e3   :  { %14409 = vmatprep.subr.mxu0 %v14229_v30 }
 0x9e4   :  { %14410 = vmatpush2.msra.mxu0 %v14228_v9 }
 0x9e5   :  { %14411 = vmatprep.subr.mxu0 %v14225_v62 }
 0x9e6   :  { %14412 = vmatpush2.msra.mxu0 %v14224_v3 }
 0x9e7   :  { %14413 = vmatprep.subr.mxu0 %v14221_v59 }
 0x9e8   :  { %14414 = vmatpush2.msra.mxu0 %v14220_v46 }
 0x9e9   :  { %14415 = vmatprep.subr.mxu0 %v14217_v51 }
 0x9ea   :  { %14416 = vmatpush2.msra.mxu0 %v14216_v39 }
 0x9eb   :  { %14417 = vmatprep.subr.mxu0 %v14213_v44 }
 0x9ec   :  { %14418 = vmatpush2.msra.mxu0 %v14212_v63 }
 0x9ed   :  { %14419 = vmatprep.subr.mxu0 %v14209_v61  ;;  %v14437_v61 = vunpack.c.l.s4 %v15449_v53 }
 0x9ee   :  { %14420 = vmatpush2.msra.mxu0 %v14208_v27 }
 0x9ef   :  { %14421 = vmatprep.subr.mxu0 %v14205_v52  ;;  %v14438_v27 = vunpack.c.0.s8 %v14437_v61  ;;  %v22143_v52 = vld [vmem:[#allocation11_spill] sm:$0xff] }
 0x9f0   :  { %14422 = vmatpush2.msra.mxu0 %v14204_v16  ;;  %v14279_v12 = vrot.slane %v14266_v57, %v22143_v52  ;;  %v14275_v16 = vrot.slane %v14266_v57, %v22142_v4 }
 0xa08   :  { %v13446_v30 = vpop.permute.xlu0 %13445 }
 0xa16   :  { %v15046_v56 = vpop.f32.mrf.mxu1 }
 0xa17   :  { %v13036_v45 = vadd.f32 %v15046_v56, %v20549_v21  ;;  %v13145_v21 = vld [vmem:[#allocation5 + $0x98] sm:$0xff]  ;;  %v22144_v56 = vld [vmem:[#allocation13_spill] sm:$0xff] }
 0xa18   :  { %v13002_v35 = vpop.f32.mrf.mxu1 }
 0xa19   :  { %v13074_v13 = vadd.f32 %v20554_v7, %v13036_v45  ;;  %v13023_v18 = vadd.f32 %v13002_v35, %v20564_v54  ;;  %v15390_v7 = vld [vmem:[#allocation5 + $0xc0] sm:$0xff]  ;;  %v15391_v54 = vld [vmem:[#allocation5 + $0xc8] sm:$0xff]  ;;  %v14283_v45 = vrot.slane %v14266_v57, %v22144_v56 }
 0xa1b   :  { %v13100_v15 = vmax.f32 %v13074_v13, 0.0  ;;  %v13061_v5 = vadd.f32 %v20530_v58, %v13023_v18 }
 0xa1d   :  { %13126 = vst.msk [vmem:[#allocation5 + $0xd0] sm:$0xff] %vm6985_vm3, %v13100_v15  ;;  %v13087_v23 = vmax.f32 %v13061_v5, 0.0  ;;  %v22145_v5 = vld [vmem:[#allocation10_spill] sm:$0xff] }
 0xa1f   :  { %13113 = vst.msk [vmem:[#allocation5 + $0x60] sm:$0xff] %vm6985_vm3, %v13087_v23  ;;  %v14441_v23 = vsub.s32 %v14438_v27, %v22145_v5 }
 0xa24   :  { %v13152_v58 = vld [vmem:[#allocation5 + $0xd0] sm:$0xff] }
 0xa26   :  { %v13139_v6 = vld [vmem:[#allocation5 + $0x60] sm:$0xff] }
 0xa27   :  { %13203 = vrot.lane.b32.xlu1 %v13139_v6, %s15423_s20 }
 0xa2b   :  { %13213 = vrot.lane.b32.xlu1 %v13144_v20, %s15423_s20 }
 0xa2f   :  { %13215 = vrot.lane.b32.xlu1 %v13145_v21, %s15423_s20 }
 0xa33   :  { %13225 = vrot.lane.b32.xlu1 %v15390_v7, %s15423_s20 }
 0xa37   :  { %13227 = vrot.lane.b32.xlu1 %v15391_v54, %s15423_s20 }
 0xa3b   :  { %13229 = vrot.lane.b32.xlu1 %v13152_v58, %s15423_s20 }
 0xa3f   :  { %13315 = vrot.lane.b32.xlu1 %v15392_v25, %s15427_s24 }
 0xa43   :  { %13317 = vrot.lane.b32.xlu1 %v21322_v55, %s15427_s24  ;;  %v14053_v55 = vld [vmem:[%s21766_s8] sm:$0x3] }
 0xa44   :  { %v14058_v14 = vrot.slane %v14053_v55, %v22141_v8  ;;  %v14062_v11 = vrot.slane %v14053_v55, %v22142_v4 }
 0xa47   :  { %13327 = vrot.lane.b32.xlu1 %v15393_v22, %s15427_s24 }
 0xa4b   :  { %13329 = vrot.lane.b32.xlu1 %v15394_v10, %s15427_s24 }
 0xa4f   :  { %13331 = vrot.lane.b32.xlu1 %v13139_v6, %s15427_s24 }
 0xa53   :  { %13341 = vrot.lane.b32.xlu1 %v13144_v20, %s15427_s24 }
 0xa57   :  { %13343 = vrot.lane.b32.xlu1 %v13145_v21, %s15427_s24 }
 0xa5b   :  { %13353 = vrot.lane.b32.xlu1 %v15390_v7, %s15427_s24 }
 0xa5f   :  { %13355 = vrot.lane.b32.xlu1 %v15391_v54, %s15427_s24 }
 0xa63   :  { %13357 = vrot.lane.b32.xlu1 %v13152_v58, %s15427_s24 }
 0xa67   :  { %13443 = vrot.lane.b32.xlu1 %v15392_v25, %s15429_s26 }
 0xa6b   :  { %13455 = vrot.lane.b32.xlu1 %v15393_v22, %s15429_s26 }
 0xa6f   :  { %13457 = vrot.lane.b32.xlu1 %v15394_v10, %s15429_s26 }
 0xa71   :  { %v14131_v32 = vpop.f32.mrf.mxu0 }
 0xa72   :  { %v14132_v43 = vadd.f32 %v14131_v32, %v14058_v14 }
 0xa73   :  { %13459 = vrot.lane.b32.xlu1 %v13139_v6, %s15429_s26  ;;  %v14133_v42 = vpop.f32.mrf.mxu0 }
 0xa74   :  { %v14134_v28 = vadd.f32 %v14133_v42, %v14062_v11  ;;  %v14136_v36 = vmax.f32 %v14132_v43, 0.0 }
 0xa76   :  { %v14137_v47 = vmax.f32 %v14134_v28, 0.0 }
 0xa77   :  { %13469 = vrot.lane.b32.xlu1 %v13144_v20, %s15429_s26 }
 0xa78   :  { %14352 = vmatprep.mubr.f32.mxu1 %v14137_v47  ;;  %14423 = vmatprep.mubr.f32.mxu0 %v14137_v47 }
 0xa79   :  { %14353 = vmatmul.mubr.f32.vlgmr.msra.gmra.mxu1 %v14136_v36  ;;  %14424 = vmatmul.mubr.f32.vlgmr.msra.gmra.mxu0 %v14136_v36 }
 0xa7b   :  { %13471 = vrot.lane.b32.xlu1 %v13145_v21, %s15429_s26 }
 0xa7f   :  { %13481 = vrot.lane.b32.xlu1 %v15390_v7, %s15429_s26 }
 0xa83   :  { %13483 = vrot.lane.b32.xlu1 %v15391_v54, %s15429_s26 }
 0xa87   :  { %13485 = vrot.lane.b32.xlu1 %v13152_v58, %s15429_s26  ;;  %s14459_s26 = sshll.u32 %s15450_s10, 4  ;;  %s14460_s26 = int_to_ptr.vmem [resolvable:$true] %s14459_s26 }
 0xa88   :  { %s15399_s0 = scalar_lea.vmem %s14460_s26, 128  ;;  %p15404_p1 = scmp.lt.s32.totalorder %s14460_s26, %s14460_s26 }
 0xa89   :  { %p15400_p0 = scmp.ne.s32.totalorder %s14460_s26, %s15399_s0  ;;  %p15405_p2 = scmp.lt.s32.totalorder %s15399_s0, %s15399_s0 }
 0xa8b   :  { %p15406_p3 = por %p15405_p2, %p15404_p1 }
 0xa8d   :  { %p15407_p4 = pnand %p15406_p3, %p15400_p0 }
 0xa99   :  { %v13204_v33 = vpop.permute.xlu1 %13203 }
 0xa9d   :  { %v13214_v24 = vpop.permute.xlu1 %13213 }
 0xaa1   :  { %v13216_v0 = vpop.permute.xlu1 %13215 }
 0xaa5   :  { %v13226_v19 = vpop.permute.xlu1 %13225 }
 0xaa9   :  { %v13228_v26 = vpop.permute.xlu1 %13227 }
 0xaad   :  { %v13230_v50 = vpop.permute.xlu1 %13229 }
 0xab1   :  { %v13316_v1 = vpop.permute.xlu1 %13315 }
 0xab5   :  { %v13318_v31 = vpop.permute.xlu1 %13317 }
 0xab9   :  { %v13328_v9 = vpop.permute.xlu1 %13327 }
 0xabd   :  { %v13330_v2 = vpop.permute.xlu1 %13329 }
 0xac1   :  { %v13332_v62 = vpop.permute.xlu1 %13331 }
 0xac5   :  { %v13342_v49 = vpop.permute.xlu1 %13341 }
 0xac9   :  { %v13344_v3 = vpop.permute.xlu1 %13343 }
 0xacd   :  { %v13354_v37 = vpop.permute.xlu1 %13353 }
 0xad1   :  { %v13356_v59 = vpop.permute.xlu1 %13355 }
 0xad5   :  { %v13358_v17 = vpop.permute.xlu1 %13357 }
 0xad9   :  { %v13444_v46 = vpop.permute.xlu1 %13443 }
 0xadd   :  { %v13456_v60 = vpop.permute.xlu1 %13455 }
 0xae1   :  { %v13458_v51 = vpop.permute.xlu1 %13457 }
 0xae5   :  { %v13460_v40 = vpop.permute.xlu1 %13459 }
 0xae9   :  { %v13470_v39 = vpop.permute.xlu1 %13469 }
 0xaed   :  { %v13472_v38 = vpop.permute.xlu1 %13471 }
 0xaf1   :  { %v13482_v44 = vpop.permute.xlu1 %13481 }
 0xaf5   :  { %v13484_v29 = vpop.permute.xlu1 %13483 }
 0xaf9   :  { %v13486_v63 = vpop.permute.xlu1 %13485 }
 0xb39   :  { %v14354_v35 = vpop.f32.mrf.mxu1  ;;  %v14425_v13 = vpop.f32.mrf.mxu0 }
 0xb3a   :  { %v14355_v6 = vadd.f32 %v14354_v35, %v14271_v34  ;;  %v14426_v20 = vadd.f32 %v14425_v13, %v14279_v12 }
 0xb3b   :  { %v14356_v18 = vpop.f32.mrf.mxu1  ;;  %v14427_v15 = vpop.f32.mrf.mxu0 }
 0xb3c   :  { %v14357_v21 = vadd.f32 %v14356_v18, %v14275_v16  ;;  %v14428_v7 = vadd.f32 %v14427_v15, %v14283_v45 }
 0xb3e   :  { %v14434_v54 = vcombine.low %v14355_v6, %v14357_v21  ;;  %v14435_v58 = vcombine.low %v14426_v20, %v14428_v7 }
 0xb40   :  { %v14442_v25 = vrot.slane %v14434_v54, %v14441_v23  ;;  %v14449_v22 = vrot.slane %v14435_v58, %v14441_v23 }
 0xb42   :  { %v14450_v10 = vcombine.low %v14442_v25, %v14449_v22 }
 0xb44   :  { %14452 = vst [vmem:[#allocation7] sm:$0xff] %v14450_v10 }
 0xb45   :  { %15410 = shalt.err (!%p15407_p4)
}
 0xb46   :  { %14462 = dma.vmem_to_hbm [thread:$0]  %s14460_s26, 128, %s21769_s11, [#allocation8]  }
 0xb47   :  { %15419 = dma.done.wait [#allocation8], 128  }
 0xb48   :  { %15420 = vsyncadd [#allocation8], 4294967168 }
 0xb49   :  { %14466 = vsyncpa [#allocation8], 1 }

</bundles_post_ra>
